<compile_context>
chip_gen: v7x
topology: tpu7x:2x2x1
jax: 0.10.0
libtpu: 0.0.40
codegen_flags: <defaults>
</compile_context>

<pallas_src>
import jax
import jax.numpy as jnp
from jax.experimental import pallas as pl
from jax.experimental.pallas import tpu as pltpu

_LANE = 128
_SUB = 8
# Point-tile target: big enough to amortize per-grid-step overhead on v5e/v6e,
# small enough that the ~6-10 MiB working set also fits v7x comfortably.
_TILE_POINTS = 1024
# Scoped-VMEM ceiling: well above the working set, below v7x's 64 MiB physical
# VMEM (v5e/v6e have 128 MiB), so the same value is safe on every generation.
_VMEM_LIMIT = 48 * 1024 * 1024


def _round_up(n, m):
    return ((n + m - 1) // m) * m


def _pad_points(x_bnc, target=_TILE_POINTS):
    """Choose a point-tile size (multiple of 8) and pad N by replicating the
    last point so the grid divides evenly.  Replicated points leave every
    max-over-points (the only thing consuming per-point activations) unchanged."""
    B, N, C = x_bnc.shape
    tn = min(target, _round_up(N, _SUB))
    n_pad = _round_up(N, tn)
    if n_pad != N:
        rep = jnp.broadcast_to(x_bnc[:, -1:, :], (B, n_pad - N, C))
        x_bnc = jnp.concatenate([x_bnc, rep], axis=1)
    return x_bnc, tn


def _w_spec(a):
    """Whole-array BlockSpec for weights / bias rows (constant block index)."""
    assert a.ndim == 2
    return pl.BlockSpec(a.shape, lambda b, n: (0, 0))


# ----------------------------- Pallas kernels -------------------------------

def _accum_max(acc_ref, h):
    """Running max of (tn, C) rows into an (8, C) VMEM scratch.

    Per tile this is pure VPU work (group-of-8 elementwise maxes); the
    cross-sublane 8->1 reduce is deferred to the final grid step."""
    tn, c = h.shape
    acc_ref[...] = jnp.maximum(
        acc_ref[...], jnp.max(h.reshape(tn // _SUB, _SUB, c), axis=0))


def _stn_conv_max_kernel(x_ref, w1_ref, b1_ref, w2_ref, b2_ref, w3_ref, b3_ref,
                         o_ref, acc_ref):
    """STN3d conv1/2/3 (BN folded, ReLU) + running max over points."""
    @pl.when(pl.program_id(1) == 0)
    def _():
        acc_ref[...] = jnp.full(acc_ref.shape, -jnp.inf, acc_ref.dtype)

    w1 = w1_ref[...]
    h = jnp.dot(x_ref[0].astype(w1.dtype), w1,
                preferred_element_type=jnp.float32) + b1_ref[...]
    h = jnp.maximum(h, 0.0)
    w2 = w2_ref[...]
    h = jnp.dot(h.astype(w2.dtype), w2,
                preferred_element_type=jnp.float32) + b2_ref[...]
    h = jnp.maximum(h, 0.0)
    w3 = w3_ref[...]
    h = jnp.dot(h.astype(w3.dtype), w3,
                preferred_element_type=jnp.float32) + b3_ref[...]
    h = jnp.maximum(h, 0.0)
    _accum_max(acc_ref, h)

    @pl.when(pl.program_id(1) == pl.num_programs(1) - 1)
    def _():
        o_ref[0] = jnp.max(acc_ref[...], axis=0, keepdims=True)


def _block0_fstn_max_kernel(x_ref, w0t_ref, b0_ref,
                            w1_ref, b1_ref, w2_ref, b2_ref, w3_ref, b3_ref,
                            o_ref, acc_ref):
    """block0 (input transform folded into conv0) fused with the STNkd conv
    chain + running max.  The (B, N, 64) intermediate stays in VMEM."""
    @pl.when(pl.program_id(1) == 0)
    def _():
        acc_ref[...] = jnp.full(acc_ref.shape, -jnp.inf, acc_ref.dtype)

    h = jnp.dot(x_ref[0], w0t_ref[0],
                preferred_element_type=jnp.float32) + b0_ref[...]
    h = jnp.maximum(h, 0.0)                                     # (tn, 64)

    w1 = w1_ref[...]
    g = jnp.dot(h.astype(w1.dtype), w1,
                preferred_element_type=jnp.float32) + b1_ref[...]
    g = jnp.maximum(g, 0.0)
    w2 = w2_ref[...]
    g = jnp.dot(g.astype(w2.dtype), w2,
                preferred_element_type=jnp.float32) + b2_ref[...]
    g = jnp.maximum(g, 0.0)
    w3 = w3_ref[...]
    g = jnp.dot(g.astype(w3.dtype), w3,
                preferred_element_type=jnp.float32) + b3_ref[...]
    g = jnp.maximum(g, 0.0)
    _accum_max(acc_ref, g)

    @pl.when(pl.program_id(1) == pl.num_programs(1) - 1)
    def _():
        o_ref[0] = jnp.max(acc_ref[...], axis=0, keepdims=True)


def _block1_max_kernel(x_ref, w0t_ref, b0_ref, w2t_ref, b2_ref,
                       w3_ref, b3_ref, o_ref, acc_ref):
    """block1: recompute the cheap block0 tile in VMEM, feature transform
    folded into conv2, conv(64->128)+BN+ReLU, conv(128->1024)+BN (no ReLU),
    running max over points."""
    @pl.when(pl.program_id(1) == 0)
    def _():
        acc_ref[...] = jnp.full(acc_ref.shape, -jnp.inf, acc_ref.dtype)

    h = jnp.dot(x_ref[0], w0t_ref[0],
                preferred_element_type=jnp.float32) + b0_ref[...]
    h = jnp.maximum(h, 0.0)                                     # (tn, 64)
    w2t = w2t_ref[0]                                            # trans_feat @ W2
    g = jnp.dot(h.astype(w2t.dtype), w2t,
                preferred_element_type=jnp.float32) + b2_ref[...]
    g = jnp.maximum(g, 0.0)
    w3 = w3_ref[...]
    g = jnp.dot(g.astype(w3.dtype), w3,
                preferred_element_type=jnp.float32) + b3_ref[...]   # no ReLU
    _accum_max(acc_ref, g)

    @pl.when(pl.program_id(1) == pl.num_programs(1) - 1)
    def _():
        o_ref[0] = jnp.max(acc_ref[...], axis=0, keepdims=True)


def _fc_head_kernel(x_ref, w1_ref, b1_ref, w2_ref, b2_ref, w3_ref, b3_ref,
                    o_ref):
    """fc1+BN+ReLU -> fc2+BN+ReLU -> fc3 (bias only), fused."""
    w1 = w1_ref[...]
    h = jnp.dot(x_ref[...].astype(w1.dtype), w1,
                preferred_element_type=jnp.float32) + b1_ref[...]
    h = jnp.maximum(h, 0.0)
    w2 = w2_ref[...]
    h = jnp.dot(h.astype(w2.dtype), w2,
                preferred_element_type=jnp.float32) + b2_ref[...]
    h = jnp.maximum(h, 0.0)
    w3 = w3_ref[...]
    y = jnp.dot(h.astype(w3.dtype), w3,
                preferred_element_type=jnp.float32) + b3_ref[...]
    o_ref[...] = y.astype(o_ref.dtype)


# ------------------------------- wrappers ------------------------------------

def _pooled_pallas_call(kernel, B, N, tn, c3, in_arrays, in_specs):
    out = pl.pallas_call(
        kernel,
        out_shape=jax.ShapeDtypeStruct((B, 1, c3), jnp.float32),
        grid=(B, N // tn),
        in_specs=in_specs,
        out_specs=pl.BlockSpec((1, 1, c3), lambda b, n: (b, 0, 0)),
        scratch_shapes=[pltpu.VMEM((_SUB, c3), jnp.float32)],
        compiler_params=pltpu.CompilerParams(
            dimension_semantics=("parallel", "arbitrary"),
            vmem_limit_bytes=_VMEM_LIMIT),
    )(*in_arrays)
    return out.reshape(B, c3)


def stn_conv_max(x_bnc, tn, w1, b1, w2, b2, w3, b3):
    """x: (B, N, Cin) -> max over points of the 3-conv chain: (B, 1024)."""
    B, N, Cin = x_bnc.shape
    c3 = w3.shape[1]
    in_specs = [pl.BlockSpec((1, tn, Cin), lambda b, n: (b, n, 0))]
    in_specs += [_w_spec(a) for a in (w1, b1, w2, b2, w3, b3)]
    return _pooled_pallas_call(_stn_conv_max_kernel, B, N, tn, c3,
                               (x_bnc, w1, b1, w2, b2, w3, b3), in_specs)


def block0_fstn_max(x_bnc, tn, w0t, b0, w1, b1, w2, b2, w3, b3):
    """x: (B,N,3), w0t: (B,3,64) per-batch (trans folded) -> pooled (B, 1024)."""
    B, N, Cin = x_bnc.shape
    c3 = w3.shape[1]
    in_specs = [pl.BlockSpec((1, tn, Cin), lambda b, n: (b, n, 0)),
                pl.BlockSpec((1,) + w0t.shape[1:], lambda b, n: (b, 0, 0))]
    in_specs += [_w_spec(a) for a in (b0, w1, b1, w2, b2, w3, b3)]
    return _pooled_pallas_call(_block0_fstn_max_kernel, B, N, tn, c3,
                               (x_bnc, w0t, b0, w1, b1, w2, b2, w3, b3),
                               in_specs)


def block1_max(x_bnc, tn, w0t, b0, w2t, b2, w3, b3):
    """x: (B,N,3), w0t: (B,3,64), w2t: (B,64,128) per-batch -> pooled (B,1024)."""
    B, N, Cin = x_bnc.shape
    c3 = w3.shape[1]
    in_specs = [pl.BlockSpec((1, tn, Cin), lambda b, n: (b, n, 0)),
                pl.BlockSpec((1,) + w0t.shape[1:], lambda b, n: (b, 0, 0)),
                _w_spec(b0),
                pl.BlockSpec((1,) + w2t.shape[1:], lambda b, n: (b, 0, 0)),
                _w_spec(b2), _w_spec(w3), _w_spec(b3)]
    return _pooled_pallas_call(_block1_max_kernel, B, N, tn, c3,
                               (x_bnc, w0t, b0, w2t, b2, w3, b3), in_specs)


def fc_head(x, w1, b1, w2, b2, w3, b3):
    """x: (B,K) -> fused fc1(BN,ReLU)/fc2(BN,ReLU)/fc3(bias) -> (B, Pout)."""
    B, K = x.shape
    pout = w3.shape[1]
    return pl.pallas_call(
        _fc_head_kernel,
        out_shape=jax.ShapeDtypeStruct((B, pout), jnp.float32),
        grid=(1,),
        in_specs=[
            pl.BlockSpec((B, K), lambda i: (0, 0)),
            pl.BlockSpec(w1.shape, lambda i: (0, 0)),
            pl.BlockSpec(b1.shape, lambda i: (0, 0)),
            pl.BlockSpec(w2.shape, lambda i: (0, 0)),
            pl.BlockSpec(b2.shape, lambda i: (0, 0)),
            pl.BlockSpec(w3.shape, lambda i: (0, 0)),
            pl.BlockSpec(b3.shape, lambda i: (0, 0)),
        ],
        out_specs=pl.BlockSpec((B, pout), lambda i: (0, 0)),
        compiler_params=pltpu.CompilerParams(
            dimension_semantics=("arbitrary",),
            vmem_limit_bytes=_VMEM_LIMIT),
    )(x, w1, b1, w2, b2, w3, b3)


# --------------------------- parameter construction -------------------------

def make_linear(key, cin, cout):
    kw, kb = jax.random.split(key)
    w = jax.random.normal(kw, (cin, cout), jnp.float32) * (1.0 / jnp.sqrt(float(cin)))
    b = jax.random.normal(kb, (cout,), jnp.float32) * 0.01
    return w, b


def make_bn(key, c):
    k1, k2, k3, k4 = jax.random.split(key, 4)
    gamma = 1.0 + 0.1 * jax.random.normal(k1, (c,), jnp.float32)
    beta = 0.05 * jax.random.normal(k2, (c,), jnp.float32)
    mean = 0.1 * jax.random.normal(k3, (c,), jnp.float32)
    var = 0.9 + 0.2 * jax.random.uniform(k4, (c,), jnp.float32)
    return gamma, beta, mean, var


def fold_conv_bn(w, b, bn, wdtype=jnp.bfloat16, eps=1e-5):
    """Fold eval-mode BatchNorm1d into the weight matrix / bias row-vector."""
    gamma, beta, mean, var = bn
    s = gamma / jnp.sqrt(var + eps)
    wf = (w * s[None, :]).astype(wdtype)
    bf = ((b - mean) * s + beta).reshape(1, -1)            # f32 epilogue
    return wf, bf


def pad_cols(w, b, multiple=_LANE):
    """Zero-pad output columns so narrow outputs store lane-dense; slice later."""
    n = w.shape[1]
    p = _round_up(n, multiple)
    if p == n:
        return w, b, n
    return (jnp.pad(w, ((0, 0), (0, p - n))),
            jnp.pad(b, ((0, 0), (0, p - n))), n)


def init_stn_params(key, cin, k):
    keys = jax.random.split(key, 11)
    p = {}
    p["conv1_w"], p["conv1_b"] = make_linear(keys[0], cin, 64)
    p["conv2_w"], p["conv2_b"] = make_linear(keys[1], 64, 128)
    p["conv3_w"], p["conv3_b"] = make_linear(keys[2], 128, 1024)
    p["fc1_w"], p["fc1_b"] = make_linear(keys[3], 1024, 512)
    p["fc2_w"], p["fc2_b"] = make_linear(keys[4], 512, 256)
    p["fc3_w"], p["fc3_b"] = make_linear(keys[5], 256, k * k)
    p["bn1"] = make_bn(keys[6], 64)
    p["bn2"] = make_bn(keys[7], 128)
    p["bn3"] = make_bn(keys[8], 1024)
    p["bn4"] = make_bn(keys[9], 512)
    p["bn5"] = make_bn(keys[10], 256)
    return p


def init_pointnet_params(key, channel=3, classes=40):
    keys = jax.random.split(key, 13)
    p = {}
    p["stn"] = init_stn_params(keys[0], channel, 3)      # STN3d
    p["fstn"] = init_stn_params(keys[1], 64, 64)         # STNkd (channel=64)
    p["b0_conv_w"], p["b0_conv_b"] = make_linear(keys[2], channel, 64)
    p["b0_bn"] = make_bn(keys[3], 64)
    p["b1_conv2_w"], p["b1_conv2_b"] = make_linear(keys[4], 64, 128)
    p["b1_bn2"] = make_bn(keys[5], 128)
    p["b1_conv3_w"], p["b1_conv3_b"] = make_linear(keys[6], 128, 1024)
    p["b1_bn3"] = make_bn(keys[7], 1024)
    p["b2_fc1_w"], p["b2_fc1_b"] = make_linear(keys[8], 1024, 512)
    p["b2_bn1"] = make_bn(keys[9], 512)
    p["b2_fc2_w"], p["b2_fc2_b"] = make_linear(keys[10], 512, 256)
    p["b2_bn2"] = make_bn(keys[11], 256)
    p["cls_w"], p["cls_b"] = make_linear(keys[12], 256, classes)
    return p


# ------------------------------ forward passes -------------------------------

def stn_fc_head(p, pooled, k):
    """Shared regression head of STN3d / STNkd: pooled (B,1024) -> (B,k,k)."""
    B = pooled.shape[0]
    f1w, f1b = fold_conv_bn(p["fc1_w"], p["fc1_b"], p["bn4"])
    f2w, f2b = fold_conv_bn(p["fc2_w"], p["fc2_b"], p["bn5"])
    f3w = p["fc3_w"].astype(jnp.bfloat16)
    f3b = p["fc3_b"].reshape(1, -1)
    f3w, f3b, kk = pad_cols(f3w, f3b)                          # lane-dense out
    y = fc_head(pooled, f1w, f1b, f2w, f2b, f3w, f3b)[:, :kk]  # (B, k*k)
    y = y + jnp.eye(k, dtype=jnp.float32).reshape(1, k * k)
    return y.reshape(B, k, k)


def pointnet_forward(p, x):
    """x: (B, D, N) in the PyTorch NCW Conv1d layout (D = 3, no normals)."""
    B, D, N = x.shape
    x_bnc = jnp.transpose(x, (0, 2, 1)).astype(jnp.float32)    # (B, N, 3)
    x_bnc, tn = _pad_points(x_bnc)

    # ---- STN3d conv chain + max (Kernel A), regression head (Kernel D) ----
    ps = p["stn"]
    w1, b1 = fold_conv_bn(ps["conv1_w"], ps["conv1_b"], ps["bn1"],
                          wdtype=jnp.float32)                  # tiny K=3 weight
    w2, b2 = fold_conv_bn(ps["conv2_w"], ps["conv2_b"], ps["bn2"])
    w3, b3 = fold_conv_bn(ps["conv3_w"], ps["conv3_b"], ps["bn3"])
    pooled_stn = stn_conv_max(x_bnc, tn, w1, b1, w2, b2, w3, b3)
    trans = stn_fc_head(ps, pooled_stn, 3)                     # (B, 3, 3)

    # ---- block0 fused with STNkd conv chain + max (Kernel B) ----
    w0, b0 = fold_conv_bn(p["b0_conv_w"], p["b0_conv_b"], p["b0_bn"],
                          wdtype=jnp.float32)
    w0t = jnp.einsum("bij,jk->bik", trans, w0)                 # fold x@trans into conv0
    pf = p["fstn"]
    fw1, fb1 = fold_conv_bn(pf["conv1_w"], pf["conv1_b"], pf["bn1"])
    fw2, fb2 = fold_conv_bn(pf["conv2_w"], pf["conv2_b"], pf["bn2"])
    fw3, fb3 = fold_conv_bn(pf["conv3_w"], pf["conv3_b"], pf["bn3"])
    pooled_fstn = block0_fstn_max(x_bnc, tn, w0t, b0,
                                  fw1, fb1, fw2, fb2, fw3, fb3)
    trans_feat = stn_fc_head(pf, pooled_fstn, 64)              # (B, 64, 64)

    # ---- block1: feature transform folded into conv2, chain + max (Kernel C)
    w2b, b2b = fold_conv_bn(p["b1_conv2_w"], p["b1_conv2_b"], p["b1_bn2"],
                            wdtype=jnp.float32)
    w2t = jnp.einsum("bij,jk->bik", trans_feat, w2b).astype(jnp.bfloat16)
    w3b, b3b = fold_conv_bn(p["b1_conv3_w"], p["b1_conv3_b"], p["b1_bn3"])
    pooled = block1_max(x_bnc, tn, w0t, b0, w2t, b2b, w3b, b3b)  # (B, 1024)

    # ---- block2 + classifier head fused (dropout is identity in eval) ----
    f1w, f1b = fold_conv_bn(p["b2_fc1_w"], p["b2_fc1_b"], p["b2_bn1"])
    f2w, f2b = fold_conv_bn(p["b2_fc2_w"], p["b2_fc2_b"], p["b2_bn2"])
    cw = p["cls_w"].astype(jnp.bfloat16)
    cb = p["cls_b"].reshape(1, -1)
    cw, cb, nc = pad_cols(cw, cb)
    logits = fc_head(pooled, f1w, f1b, f2w, f2b, cw, cb)[:, :nc]
    return logits, trans_feat


# ----------------------------------- main ------------------------------------

if __name__ == "__main__":
    key = jax.random.PRNGKey(0)
    kparam, kx = jax.random.split(key)

    B, D, N = 2, 3, 16          # small shapes: batch=2, xyz channels, 16 points
    classes = 40

    params = init_pointnet_params(kparam, channel=D, classes=classes)
    x = jax.random.normal(kx, (B, D, N), jnp.float32)

    logits, trans_feat = jax.jit(pointnet_forward)(params, x)
    jax.block_until_ready((logits, trans_feat))

    assert logits.shape == (B, classes)
    assert trans_feat.shape == (B, 64, 64)
    assert bool(jnp.all(jnp.isfinite(logits)))
    assert bool(jnp.all(jnp.isfinite(trans_feat)))
    print("KERNEL_OK")
</pallas_src>

<mosaic_0001>
module attributes {stable_mosaic.version = 11 : i64} {
  func.func @_stn_conv_max_kernel(%arg0: i32, %arg1: i32, %arg2: memref<1x16x3xf32, #tpu.memory_space<vmem>>, %arg3: memref<3x64xf32, #tpu.memory_space<vmem>>, %arg4: memref<1x64xf32, #tpu.memory_space<vmem>>, %arg5: memref<64x128xbf16, #tpu.memory_space<vmem>>, %arg6: memref<1x128xf32, #tpu.memory_space<vmem>>, %arg7: memref<128x1024xbf16, #tpu.memory_space<vmem>>, %arg8: memref<1x1024xf32, #tpu.memory_space<vmem>>, %arg9: memref<1x1x1024xf32, #tpu.memory_space<vmem>>, %arg10: memref<8x1024xf32, #tpu.memory_space<vmem>>) attributes {dimension_semantics = [#tpu.dimension_semantics<parallel>, #tpu.dimension_semantics<arbitrary>], iteration_bounds = array<i64: 2, 1>, scalar_prefetch = 0 : i64, scratch_operands = 1 : i64, tpu.core_type = #tpu.core_type<tc>, window_params = [{transform_indices = @transform_0, window_bounds = array<i64: 1, 16, 3>}, {pipeline_mode = #tpu.pipeline_mode<synchronous>, transform_indices = @transform_1, window_bounds = array<i64: 3, 64>}, {pipeline_mode = #tpu.pipeline_mode<synchronous>, transform_indices = @transform_2, window_bounds = array<i64: 1, 64>}, {pipeline_mode = #tpu.pipeline_mode<synchronous>, transform_indices = @transform_3, window_bounds = array<i64: 64, 128>}, {pipeline_mode = #tpu.pipeline_mode<synchronous>, transform_indices = @transform_4, window_bounds = array<i64: 1, 128>}, {pipeline_mode = #tpu.pipeline_mode<synchronous>, transform_indices = @transform_5, window_bounds = array<i64: 128, 1024>}, {pipeline_mode = #tpu.pipeline_mode<synchronous>, transform_indices = @transform_6, window_bounds = array<i64: 1, 1024>}, {transform_indices = @transform_7, window_bounds = array<i64: 1, 1, 1024>}]} {
    %c0_i32 = arith.constant 0 : i32
    %0 = arith.cmpi eq, %arg1, %c0_i32 : i32
    %1 = arith.extui %0 : i1 to i32
    %c0_i32_0 = arith.constant 0 : i32
    %2 = arith.cmpi ne, %1, %c0_i32_0 : i32
    scf.if %2 {
      %cst_27 = arith.constant 0xFF800000 : f32
      %36 = vector.broadcast %cst_27 : f32 to vector<8x1024xf32>
      %c0_28 = arith.constant 0 : index
      %c0_29 = arith.constant 0 : index
      %37 = vector.load %arg10[%c0_28, %c0_29] : memref<8x1024xf32, #tpu.memory_space<vmem>>, vector<8x1024xf32>
      tpu.vector_store %arg10[%c0_28, %c0_29], %36 {strides = array<i32>} : memref<8x1024xf32, #tpu.memory_space<vmem>>, vector<8x1024xf32>,
    } else {
    }
    %c0 = arith.constant 0 : index
    %c0_1 = arith.constant 0 : index
    %3 = vector.load %arg3[%c0, %c0_1] : memref<3x64xf32, #tpu.memory_space<vmem>>, vector<3x64xf32>
    %c0_2 = arith.constant 0 : index
    %c0_3 = arith.constant 0 : index
    %c0_4 = arith.constant 0 : index
    %4 = vector.load %arg2[%c0_2, %c0_3, %c0_4] : memref<1x16x3xf32, #tpu.memory_space<vmem>>, vector<1x16x3xf32>
    %5 = vector.shape_cast %4 : vector<1x16x3xf32> to vector<16x3xf32>
    %cst = arith.constant dense<0.000000e+00> : vector<16x64xf32>
    %6 = tpu.matmul %5, %3, %cst {dimension_numbers = #tpu.dot_dimension_numbers<[1], [0], [0], [1], [0, 0, 1, 1], [], []>} : vector<16x3xf32>, vector<3x64xf32>, vector<16x64xf32> -> vector<16x64xf32>
    %c0_5 = arith.constant 0 : index
    %c0_6 = arith.constant 0 : index
    %7 = vector.load %arg4[%c0_5, %c0_6] : memref<1x64xf32, #tpu.memory_space<vmem>>, vector<1x64xf32>
    %8 = vector.broadcast %7 : vector<1x64xf32> to vector<16x64xf32>
    %9 = arith.addf %6, %8 : vector<16x64xf32>
    %cst_7 = arith.constant 0.000000e+00 : f32
    %10 = vector.broadcast %cst_7 : f32 to vector<16x64xf32>
    %11 = arith.maximumf %9, %10 : vector<16x64xf32>
    %c0_8 = arith.constant 0 : index
    %c0_9 = arith.constant 0 : index
    %12 = vector.load %arg5[%c0_8, %c0_9] : memref<64x128xbf16, #tpu.memory_space<vmem>>, vector<64x128xbf16>
    %13 = arith.truncf %11 : vector<16x64xf32> to vector<16x64xbf16>
    %cst_10 = arith.constant dense<0.000000e+00> : vector<16x128xf32>
    %14 = tpu.matmul %13, %12, %cst_10 {dimension_numbers = #tpu.dot_dimension_numbers<[1], [0], [0], [1], [0, 0, 1, 1], [], []>} : vector<16x64xbf16>, vector<64x128xbf16>, vector<16x128xf32> -> vector<16x128xf32>
    %c0_11 = arith.constant 0 : index
    %c0_12 = arith.constant 0 : index
    %15 = vector.load %arg6[%c0_11, %c0_12] : memref<1x128xf32, #tpu.memory_space<vmem>>, vector<1x128xf32>
    %16 = vector.broadcast %15 : vector<1x128xf32> to vector<16x128xf32>
    %17 = arith.addf %14, %16 : vector<16x128xf32>
    %cst_13 = arith.constant 0.000000e+00 : f32
    %18 = vector.broadcast %cst_13 : f32 to vector<16x128xf32>
    %19 = arith.maximumf %17, %18 : vector<16x128xf32>
    %c0_14 = arith.constant 0 : index
    %c0_15 = arith.constant 0 : index
    %20 = vector.load %arg7[%c0_14, %c0_15] : memref<128x1024xbf16, #tpu.memory_space<vmem>>, vector<128x1024xbf16>
    %21 = arith.truncf %19 : vector<16x128xf32> to vector<16x128xbf16>
    %cst_16 = arith.constant dense<0.000000e+00> : vector<16x1024xf32>
    %22 = tpu.matmul %21, %20, %cst_16 {dimension_numbers = #tpu.dot_dimension_numbers<[1], [0], [0], [1], [0, 0, 1, 1], [], []>} : vector<16x128xbf16>, vector<128x1024xbf16>, vector<16x1024xf32> -> vector<16x1024xf32>
    %c0_17 = arith.constant 0 : index
    %c0_18 = arith.constant 0 : index
    %23 = vector.load %arg8[%c0_17, %c0_18] : memref<1x1024xf32, #tpu.memory_space<vmem>>, vector<1x1024xf32>
    %24 = vector.broadcast %23 : vector<1x1024xf32> to vector<16x1024xf32>
    %25 = arith.addf %22, %24 : vector<16x1024xf32>
    %cst_19 = arith.constant 0.000000e+00 : f32
    %26 = vector.broadcast %cst_19 : f32 to vector<16x1024xf32>
    %27 = arith.maximumf %25, %26 : vector<16x1024xf32>
    %c0_20 = arith.constant 0 : index
    %c0_21 = arith.constant 0 : index
    %28 = vector.load %arg10[%c0_20, %c0_21] : memref<8x1024xf32, #tpu.memory_space<vmem>>, vector<8x1024xf32>
    %29 = vector.shape_cast %27 : vector<16x1024xf32> to vector<2x8x1024xf32>
    %cst_22 = arith.constant dense<0xFF800000> : vector<8x1024xf32>
    %30 = vector.multi_reduction <maximumf>, %29, %cst_22 [0] : vector<2x8x1024xf32> to vector<8x1024xf32>
    %31 = arith.maximumf %28, %30 : vector<8x1024xf32>
    %c0_23 = arith.constant 0 : index
    %c0_24 = arith.constant 0 : index
    %32 = vector.load %arg10[%c0_23, %c0_24] : memref<8x1024xf32, #tpu.memory_space<vmem>>, vector<8x1024xf32>
    tpu.vector_store %arg10[%c0_23, %c0_24], %31 {strides = array<i32>} : memref<8x1024xf32, #tpu.memory_space<vmem>>, vector<8x1024xf32>,
    %c0_i32_25 = arith.constant 0 : i32
    %33 = arith.cmpi eq, %arg1, %c0_i32_25 : i32
    %34 = arith.extui %33 : i1 to i32
    %c0_i32_26 = arith.constant 0 : i32
    %35 = arith.cmpi ne, %34, %c0_i32_26 : i32
    scf.if %35 {
      %c0_27 = arith.constant 0 : index
      %c0_28 = arith.constant 0 : index
      %36 = vector.load %arg10[%c0_27, %c0_28] : memref<8x1024xf32, #tpu.memory_space<vmem>>, vector<8x1024xf32>
      %cst_29 = arith.constant dense<0xFF800000> : vector<1024xf32>
      %37 = vector.multi_reduction <maximumf>, %36, %cst_29 [0] : vector<8x1024xf32> to vector<1024xf32>
      %38 = vector.shape_cast %37 : vector<1024xf32> to vector<1x1024xf32>
      %c0_30 = arith.constant 0 : index
      %c0_31 = arith.constant 0 : index
      %c0_32 = arith.constant 0 : index
      %39 = vector.load %arg9[%c0_30, %c0_31, %c0_32] : memref<1x1x1024xf32, #tpu.memory_space<vmem>>, vector<1x1x1024xf32>
      %40 = vector.shape_cast %39 : vector<1x1x1024xf32> to vector<1x1024xf32>
      %41 = vector.shape_cast %38 : vector<1x1024xf32> to vector<1x1x1024xf32>
      tpu.vector_store %arg9[%c0_30, %c0_31, %c0_32], %41 {strides = array<i32>} : memref<1x1x1024xf32, #tpu.memory_space<vmem>>, vector<1x1x1024xf32>,
    } else {
    }
    return
  }
  func.func @transform_0(%arg0: i32, %arg1: i32) -> (i32, i32, i32) {
    %c0_i32 = arith.constant 0 : i32
    %c0_i32_0 = arith.constant 0 : i32
    return %arg0, %arg1, %c0_i32 : i32, i32, i32
  }
  func.func @transform_1(%arg0: i32, %arg1: i32) -> (i32, i32) {
    %c0_i32 = arith.constant 0 : i32
    %c0_i32_0 = arith.constant 0 : i32
    %c0_i32_1 = arith.constant 0 : i32
    return %c0_i32, %c0_i32_0 : i32, i32
  }
  func.func @transform_2(%arg0: i32, %arg1: i32) -> (i32, i32) {
    %c0_i32 = arith.constant 0 : i32
    %c0_i32_0 = arith.constant 0 : i32
    %c0_i32_1 = arith.constant 0 : i32
    return %c0_i32, %c0_i32_0 : i32, i32
  }
  func.func @transform_3(%arg0: i32, %arg1: i32) -> (i32, i32) {
    %c0_i32 = arith.constant 0 : i32
    %c0_i32_0 = arith.constant 0 : i32
    %c0_i32_1 = arith.constant 0 : i32
    return %c0_i32, %c0_i32_0 : i32, i32
  }
  func.func @transform_4(%arg0: i32, %arg1: i32) -> (i32, i32) {
    %c0_i32 = arith.constant 0 : i32
    %c0_i32_0 = arith.constant 0 : i32
    %c0_i32_1 = arith.constant 0 : i32
    return %c0_i32, %c0_i32_0 : i32, i32
  }
  func.func @transform_5(%arg0: i32, %arg1: i32) -> (i32, i32) {
    %c0_i32 = arith.constant 0 : i32
    %c0_i32_0 = arith.constant 0 : i32
    %c0_i32_1 = arith.constant 0 : i32
    return %c0_i32, %c0_i32_0 : i32, i32
  }
  func.func @transform_6(%arg0: i32, %arg1: i32) -> (i32, i32) {
    %c0_i32 = arith.constant 0 : i32
    %c0_i32_0 = arith.constant 0 : i32
    %c0_i32_1 = arith.constant 0 : i32
    return %c0_i32, %c0_i32_0 : i32, i32
  }
  func.func @transform_7(%arg0: i32, %arg1: i32) -> (i32, i32, i32) {
    %c0_i32 = arith.constant 0 : i32
    %c0_i32_0 = arith.constant 0 : i32
    %c0_i32_1 = arith.constant 0 : i32
    return %arg0, %c0_i32, %c0_i32_0 : i32, i32, i32
  }
}

module attributes {stable_mosaic.version = 11 : i64} {
  func.func @_fc_head_kernel(%arg0: i32, %arg1: memref<2x1024xf32, #tpu.memory_space<vmem>>, %arg2: memref<1024x512xbf16, #tpu.memory_space<vmem>>, %arg3: memref<1x512xf32, #tpu.memory_space<vmem>>, %arg4: memref<512x256xbf16, #tpu.memory_space<vmem>>, %arg5: memref<1x256xf32, #tpu.memory_space<vmem>>, %arg6: memref<256x128xbf16, #tpu.memory_space<vmem>>, %arg7: memref<1x128xf32, #tpu.memory_space<vmem>>, %arg8: memref<2x128xf32, #tpu.memory_space<vmem>>) attributes {dimension_semantics = [#tpu.dimension_semantics<arbitrary>], iteration_bounds = array<i64: 1>, scalar_prefetch = 0 : i64, scratch_operands = 0 : i64, tpu.core_type = #tpu.core_type<tc>, window_params = [{pipeline_mode = #tpu.pipeline_mode<synchronous>, transform_indices = @transform_0, window_bounds = array<i64: 2, 1024>}, {pipeline_mode = #tpu.pipeline_mode<synchronous>, transform_indices = @transform_1, window_bounds = array<i64: 1024, 512>}, {pipeline_mode = #tpu.pipeline_mode<synchronous>, transform_indices = @transform_2, window_bounds = array<i64: 1, 512>}, {pipeline_mode = #tpu.pipeline_mode<synchronous>, transform_indices = @transform_3, window_bounds = array<i64: 512, 256>}, {pipeline_mode = #tpu.pipeline_mode<synchronous>, transform_indices = @transform_4, window_bounds = array<i64: 1, 256>}, {pipeline_mode = #tpu.pipeline_mode<synchronous>, transform_indices = @transform_5, window_bounds = array<i64: 256, 128>}, {pipeline_mode = #tpu.pipeline_mode<synchronous>, transform_indices = @transform_6, window_bounds = array<i64: 1, 128>}, {pipeline_mode = #tpu.pipeline_mode<synchronous>, transform_indices = @transform_7, window_bounds = array<i64: 2, 128>}]} {
    %c0 = arith.constant 0 : index
    %c0_0 = arith.constant 0 : index
    %0 = vector.load %arg2[%c0, %c0_0] : memref<1024x512xbf16, #tpu.memory_space<vmem>>, vector<1024x512xbf16>
    %c0_1 = arith.constant 0 : index
    %c0_2 = arith.constant 0 : index
    %1 = vector.load %arg1[%c0_1, %c0_2] : memref<2x1024xf32, #tpu.memory_space<vmem>>, vector<2x1024xf32>
    %2 = arith.truncf %1 : vector<2x1024xf32> to vector<2x1024xbf16>
    %cst = arith.constant dense<0.000000e+00> : vector<2x512xf32>
    %3 = tpu.matmul %2, %0, %cst {dimension_numbers = #tpu.dot_dimension_numbers<[1], [0], [0], [1], [0, 0, 1, 1], [], []>} : vector<2x1024xbf16>, vector<1024x512xbf16>, vector<2x512xf32> -> vector<2x512xf32>
    %c0_3 = arith.constant 0 : index
    %c0_4 = arith.constant 0 : index
    %4 = vector.load %arg3[%c0_3, %c0_4] : memref<1x512xf32, #tpu.memory_space<vmem>>, vector<1x512xf32>
    %5 = vector.broadcast %4 : vector<1x512xf32> to vector<2x512xf32>
    %6 = arith.addf %3, %5 : vector<2x512xf32>
    %cst_5 = arith.constant 0.000000e+00 : f32
    %7 = vector.broadcast %cst_5 : f32 to vector<2x512xf32>
    %8 = arith.maximumf %6, %7 : vector<2x512xf32>
    %c0_6 = arith.constant 0 : index
    %c0_7 = arith.constant 0 : index
    %9 = vector.load %arg4[%c0_6, %c0_7] : memref<512x256xbf16, #tpu.memory_space<vmem>>, vector<512x256xbf16>
    %10 = arith.truncf %8 : vector<2x512xf32> to vector<2x512xbf16>
    %cst_8 = arith.constant dense<0.000000e+00> : vector<2x256xf32>
    %11 = tpu.matmul %10, %9, %cst_8 {dimension_numbers = #tpu.dot_dimension_numbers<[1], [0], [0], [1], [0, 0, 1, 1], [], []>} : vector<2x512xbf16>, vector<512x256xbf16>, vector<2x256xf32> -> vector<2x256xf32>
    %c0_9 = arith.constant 0 : index
    %c0_10 = arith.constant 0 : index
    %12 = vector.load %arg5[%c0_9, %c0_10] : memref<1x256xf32, #tpu.memory_space<vmem>>, vector<1x256xf32>
    %13 = vector.broadcast %12 : vector<1x256xf32> to vector<2x256xf32>
    %14 = arith.addf %11, %13 : vector<2x256xf32>
    %cst_11 = arith.constant 0.000000e+00 : f32
    %15 = vector.broadcast %cst_11 : f32 to vector<2x256xf32>
    %16 = arith.maximumf %14, %15 : vector<2x256xf32>
    %c0_12 = arith.constant 0 : index
    %c0_13 = arith.constant 0 : index
    %17 = vector.load %arg6[%c0_12, %c0_13] : memref<256x128xbf16, #tpu.memory_space<vmem>>, vector<256x128xbf16>
    %18 = arith.truncf %16 : vector<2x256xf32> to vector<2x256xbf16>
    %cst_14 = arith.constant dense<0.000000e+00> : vector<2x128xf32>
    %19 = tpu.matmul %18, %17, %cst_14 {dimension_numbers = #tpu.dot_dimension_numbers<[1], [0], [0], [1], [0, 0, 1, 1], [], []>} : vector<2x256xbf16>, vector<256x128xbf16>, vector<2x128xf32> -> vector<2x128xf32>
    %c0_15 = arith.constant 0 : index
    %c0_16 = arith.constant 0 : index
    %20 = vector.load %arg7[%c0_15, %c0_16] : memref<1x128xf32, #tpu.memory_space<vmem>>, vector<1x128xf32>
    %21 = vector.broadcast %20 : vector<1x128xf32> to vector<2x128xf32>
    %22 = arith.addf %19, %21 : vector<2x128xf32>
    %c0_17 = arith.constant 0 : index
    %c0_18 = arith.constant 0 : index
    %23 = vector.load %arg8[%c0_17, %c0_18] : memref<2x128xf32, #tpu.memory_space<vmem>>, vector<2x128xf32>
    tpu.vector_store %arg8[%c0_17, %c0_18], %22 {strides = array<i32>} : memref<2x128xf32, #tpu.memory_space<vmem>>, vector<2x128xf32>,
    return
  }
  func.func @transform_0(%arg0: i32) -> (i32, i32) {
    %c0_i32 = arith.constant 0 : i32
    %c0_i32_0 = arith.constant 0 : i32
    %c0_i32_1 = arith.constant 0 : i32
    return %c0_i32, %c0_i32_0 : i32, i32
  }
  func.func @transform_1(%arg0: i32) -> (i32, i32) {
    %c0_i32 = arith.constant 0 : i32
    %c0_i32_0 = arith.constant 0 : i32
    %c0_i32_1 = arith.constant 0 : i32
    return %c0_i32, %c0_i32_0 : i32, i32
  }
  func.func @transform_2(%arg0: i32) -> (i32, i32) {
    %c0_i32 = arith.constant 0 : i32
    %c0_i32_0 = arith.constant 0 : i32
    %c0_i32_1 = arith.constant 0 : i32
    return %c0_i32, %c0_i32_0 : i32, i32
  }
  func.func @transform_3(%arg0: i32) -> (i32, i32) {
    %c0_i32 = arith.constant 0 : i32
    %c0_i32_0 = arith.constant 0 : i32
    %c0_i32_1 = arith.constant 0 : i32
    return %c0_i32, %c0_i32_0 : i32, i32
  }
  func.func @transform_4(%arg0: i32) -> (i32, i32) {
    %c0_i32 = arith.constant 0 : i32
    %c0_i32_0 = arith.constant 0 : i32
    %c0_i32_1 = arith.constant 0 : i32
    return %c0_i32, %c0_i32_0 : i32, i32
  }
  func.func @transform_5(%arg0: i32) -> (i32, i32) {
    %c0_i32 = arith.constant 0 : i32
    %c0_i32_0 = arith.constant 0 : i32
    %c0_i32_1 = arith.constant 0 : i32
    return %c0_i32, %c0_i32_0 : i32, i32
  }
  func.func @transform_6(%arg0: i32) -> (i32, i32) {
    %c0_i32 = arith.constant 0 : i32
    %c0_i32_0 = arith.constant 0 : i32
    %c0_i32_1 = arith.constant 0 : i32
    return %c0_i32, %c0_i32_0 : i32, i32
  }
  func.func @transform_7(%arg0: i32) -> (i32, i32) {
    %c0_i32 = arith.constant 0 : i32
    %c0_i32_0 = arith.constant 0 : i32
    %c0_i32_1 = arith.constant 0 : i32
    return %c0_i32, %c0_i32_0 : i32, i32
  }
}

module attributes {stable_mosaic.version = 11 : i64} {
  func.func @_block0_fstn_max_kernel(%arg0: i32, %arg1: i32, %arg2: memref<1x16x3xf32, #tpu.memory_space<vmem>>, %arg3: memref<1x3x64xf32, #tpu.memory_space<vmem>>, %arg4: memref<1x64xf32, #tpu.memory_space<vmem>>, %arg5: memref<64x64xbf16, #tpu.memory_space<vmem>>, %arg6: memref<1x64xf32, #tpu.memory_space<vmem>>, %arg7: memref<64x128xbf16, #tpu.memory_space<vmem>>, %arg8: memref<1x128xf32, #tpu.memory_space<vmem>>, %arg9: memref<128x1024xbf16, #tpu.memory_space<vmem>>, %arg10: memref<1x1024xf32, #tpu.memory_space<vmem>>, %arg11: memref<1x1x1024xf32, #tpu.memory_space<vmem>>, %arg12: memref<8x1024xf32, #tpu.memory_space<vmem>>) attributes {dimension_semantics = [#tpu.dimension_semantics<parallel>, #tpu.dimension_semantics<arbitrary>], iteration_bounds = array<i64: 2, 1>, scalar_prefetch = 0 : i64, scratch_operands = 1 : i64, tpu.core_type = #tpu.core_type<tc>, window_params = [{transform_indices = @transform_0, window_bounds = array<i64: 1, 16, 3>}, {transform_indices = @transform_1, window_bounds = array<i64: 1, 3, 64>}, {pipeline_mode = #tpu.pipeline_mode<synchronous>, transform_indices = @transform_2, window_bounds = array<i64: 1, 64>}, {pipeline_mode = #tpu.pipeline_mode<synchronous>, transform_indices = @transform_3, window_bounds = array<i64: 64, 64>}, {pipeline_mode = #tpu.pipeline_mode<synchronous>, transform_indices = @transform_4, window_bounds = array<i64: 1, 64>}, {pipeline_mode = #tpu.pipeline_mode<synchronous>, transform_indices = @transform_5, window_bounds = array<i64: 64, 128>}, {pipeline_mode = #tpu.pipeline_mode<synchronous>, transform_indices = @transform_6, window_bounds = array<i64: 1, 128>}, {pipeline_mode = #tpu.pipeline_mode<synchronous>, transform_indices = @transform_7, window_bounds = array<i64: 128, 1024>}, {pipeline_mode = #tpu.pipeline_mode<synchronous>, transform_indices = @transform_8, window_bounds = array<i64: 1, 1024>}, {transform_indices = @transform_9, window_bounds = array<i64: 1, 1, 1024>}]} {
    %c0_i32 = arith.constant 0 : i32
    %0 = arith.cmpi eq, %arg1, %c0_i32 : i32
    %1 = arith.extui %0 : i1 to i32
    %c0_i32_0 = arith.constant 0 : i32
    %2 = arith.cmpi ne, %1, %c0_i32_0 : i32
    scf.if %2 {
      %cst_34 = arith.constant 0xFF800000 : f32
      %45 = vector.broadcast %cst_34 : f32 to vector<8x1024xf32>
      %c0_35 = arith.constant 0 : index
      %c0_36 = arith.constant 0 : index
      %46 = vector.load %arg12[%c0_35, %c0_36] : memref<8x1024xf32, #tpu.memory_space<vmem>>, vector<8x1024xf32>
      tpu.vector_store %arg12[%c0_35, %c0_36], %45 {strides = array<i32>} : memref<8x1024xf32, #tpu.memory_space<vmem>>, vector<8x1024xf32>,
    } else {
    }
    %c0 = arith.constant 0 : index
    %c0_1 = arith.constant 0 : index
    %c0_2 = arith.constant 0 : index
    %3 = vector.load %arg2[%c0, %c0_1, %c0_2] : memref<1x16x3xf32, #tpu.memory_space<vmem>>, vector<1x16x3xf32>
    %4 = vector.shape_cast %3 : vector<1x16x3xf32> to vector<16x3xf32>
    %c0_3 = arith.constant 0 : index
    %c0_4 = arith.constant 0 : index
    %c0_5 = arith.constant 0 : index
    %5 = vector.load %arg3[%c0_3, %c0_4, %c0_5] : memref<1x3x64xf32, #tpu.memory_space<vmem>>, vector<1x3x64xf32>
    %6 = vector.shape_cast %5 : vector<1x3x64xf32> to vector<3x64xf32>
    %cst = arith.constant dense<0.000000e+00> : vector<16x64xf32>
    %7 = tpu.matmul %4, %6, %cst {dimension_numbers = #tpu.dot_dimension_numbers<[1], [0], [0], [1], [0, 0, 1, 1], [], []>} : vector<16x3xf32>, vector<3x64xf32>, vector<16x64xf32> -> vector<16x64xf32>
    %c0_6 = arith.constant 0 : index
    %c0_7 = arith.constant 0 : index
    %8 = vector.load %arg4[%c0_6, %c0_7] : memref<1x64xf32, #tpu.memory_space<vmem>>, vector<1x64xf32>
    %9 = vector.broadcast %8 : vector<1x64xf32> to vector<16x64xf32>
    %10 = arith.addf %7, %9 : vector<16x64xf32>
    %cst_8 = arith.constant 0.000000e+00 : f32
    %11 = vector.broadcast %cst_8 : f32 to vector<16x64xf32>
    %12 = arith.maximumf %10, %11 : vector<16x64xf32>
    %c0_9 = arith.constant 0 : index
    %c0_10 = arith.constant 0 : index
    %13 = vector.load %arg5[%c0_9, %c0_10] : memref<64x64xbf16, #tpu.memory_space<vmem>>, vector<64x64xbf16>
    %14 = arith.truncf %12 : vector<16x64xf32> to vector<16x64xbf16>
    %cst_11 = arith.constant dense<0.000000e+00> : vector<16x64xf32>
    %15 = tpu.matmul %14, %13, %cst_11 {dimension_numbers = #tpu.dot_dimension_numbers<[1], [0], [0], [1], [0, 0, 1, 1], [], []>} : vector<16x64xbf16>, vector<64x64xbf16>, vector<16x64xf32> -> vector<16x64xf32>
    %c0_12 = arith.constant 0 : index
    %c0_13 = arith.constant 0 : index
    %16 = vector.load %arg6[%c0_12, %c0_13] : memref<1x64xf32, #tpu.memory_space<vmem>>, vector<1x64xf32>
    %17 = vector.broadcast %16 : vector<1x64xf32> to vector<16x64xf32>
    %18 = arith.addf %15, %17 : vector<16x64xf32>
    %cst_14 = arith.constant 0.000000e+00 : f32
    %19 = vector.broadcast %cst_14 : f32 to vector<16x64xf32>
    %20 = arith.maximumf %18, %19 : vector<16x64xf32>
    %c0_15 = arith.constant 0 : index
    %c0_16 = arith.constant 0 : index
    %21 = vector.load %arg7[%c0_15, %c0_16] : memref<64x128xbf16, #tpu.memory_space<vmem>>, vector<64x128xbf16>
    %22 = arith.truncf %20 : vector<16x64xf32> to vector<16x64xbf16>
    %cst_17 = arith.constant dense<0.000000e+00> : vector<16x128xf32>
    %23 = tpu.matmul %22, %21, %cst_17 {dimension_numbers = #tpu.dot_dimension_numbers<[1], [0], [0], [1], [0, 0, 1, 1], [], []>} : vector<16x64xbf16>, vector<64x128xbf16>, vector<16x128xf32> -> vector<16x128xf32>
    %c0_18 = arith.constant 0 : index
    %c0_19 = arith.constant 0 : index
    %24 = vector.load %arg8[%c0_18, %c0_19] : memref<1x128xf32, #tpu.memory_space<vmem>>, vector<1x128xf32>
    %25 = vector.broadcast %24 : vector<1x128xf32> to vector<16x128xf32>
    %26 = arith.addf %23, %25 : vector<16x128xf32>
    %cst_20 = arith.constant 0.000000e+00 : f32
    %27 = vector.broadcast %cst_20 : f32 to vector<16x128xf32>
    %28 = arith.maximumf %26, %27 : vector<16x128xf32>
    %c0_21 = arith.constant 0 : index
    %c0_22 = arith.constant 0 : index
    %29 = vector.load %arg9[%c0_21, %c0_22] : memref<128x1024xbf16, #tpu.memory_space<vmem>>, vector<128x1024xbf16>
    %30 = arith.truncf %28 : vector<16x128xf32> to vector<16x128xbf16>
    %cst_23 = arith.constant dense<0.000000e+00> : vector<16x1024xf32>
    %31 = tpu.matmul %30, %29, %cst_23 {dimension_numbers = #tpu.dot_dimension_numbers<[1], [0], [0], [1], [0, 0, 1, 1], [], []>} : vector<16x128xbf16>, vector<128x1024xbf16>, vector<16x1024xf32> -> vector<16x1024xf32>
    %c0_24 = arith.constant 0 : index
    %c0_25 = arith.constant 0 : index
    %32 = vector.load %arg10[%c0_24, %c0_25] : memref<1x1024xf32, #tpu.memory_space<vmem>>, vector<1x1024xf32>
    %33 = vector.broadcast %32 : vector<1x1024xf32> to vector<16x1024xf32>
    %34 = arith.addf %31, %33 : vector<16x1024xf32>
    %cst_26 = arith.constant 0.000000e+00 : f32
    %35 = vector.broadcast %cst_26 : f32 to vector<16x1024xf32>
    %36 = arith.maximumf %34, %35 : vector<16x1024xf32>
    %c0_27 = arith.constant 0 : index
    %c0_28 = arith.constant 0 : index
    %37 = vector.load %arg12[%c0_27, %c0_28] : memref<8x1024xf32, #tpu.memory_space<vmem>>, vector<8x1024xf32>
    %38 = vector.shape_cast %36 : vector<16x1024xf32> to vector<2x8x1024xf32>
    %cst_29 = arith.constant dense<0xFF800000> : vector<8x1024xf32>
    %39 = vector.multi_reduction <maximumf>, %38, %cst_29 [0] : vector<2x8x1024xf32> to vector<8x1024xf32>
    %40 = arith.maximumf %37, %39 : vector<8x1024xf32>
    %c0_30 = arith.constant 0 : index
    %c0_31 = arith.constant 0 : index
    %41 = vector.load %arg12[%c0_30, %c0_31] : memref<8x1024xf32, #tpu.memory_space<vmem>>, vector<8x1024xf32>
    tpu.vector_store %arg12[%c0_30, %c0_31], %40 {strides = array<i32>} : memref<8x1024xf32, #tpu.memory_space<vmem>>, vector<8x1024xf32>,
    %c0_i32_32 = arith.constant 0 : i32
    %42 = arith.cmpi eq, %arg1, %c0_i32_32 : i32
    %43 = arith.extui %42 : i1 to i32
    %c0_i32_33 = arith.constant 0 : i32
    %44 = arith.cmpi ne, %43, %c0_i32_33 : i32
    scf.if %44 {
      %c0_34 = arith.constant 0 : index
      %c0_35 = arith.constant 0 : index
      %45 = vector.load %arg12[%c0_34, %c0_35] : memref<8x1024xf32, #tpu.memory_space<vmem>>, vector<8x1024xf32>
      %cst_36 = arith.constant dense<0xFF800000> : vector<1024xf32>
      %46 = vector.multi_reduction <maximumf>, %45, %cst_36 [0] : vector<8x1024xf32> to vector<1024xf32>
      %47 = vector.shape_cast %46 : vector<1024xf32> to vector<1x1024xf32>
      %c0_37 = arith.constant 0 : index
      %c0_38 = arith.constant 0 : index
      %c0_39 = arith.constant 0 : index
      %48 = vector.load %arg11[%c0_37, %c0_38, %c0_39] : memref<1x1x1024xf32, #tpu.memory_space<vmem>>, vector<1x1x1024xf32>
      %49 = vector.shape_cast %48 : vector<1x1x1024xf32> to vector<1x1024xf32>
      %50 = vector.shape_cast %47 : vector<1x1024xf32> to vector<1x1x1024xf32>
      tpu.vector_store %arg11[%c0_37, %c0_38, %c0_39], %50 {strides = array<i32>} : memref<1x1x1024xf32, #tpu.memory_space<vmem>>, vector<1x1x1024xf32>,
    } else {
    }
    return
  }
  func.func @transform_0(%arg0: i32, %arg1: i32) -> (i32, i32, i32) {
    %c0_i32 = arith.constant 0 : i32
    %c0_i32_0 = arith.constant 0 : i32
    return %arg0, %arg1, %c0_i32 : i32, i32, i32
  }
  func.func @transform_1(%arg0: i32, %arg1: i32) -> (i32, i32, i32) {
    %c0_i32 = arith.constant 0 : i32
    %c0_i32_0 = arith.constant 0 : i32
    %c0_i32_1 = arith.constant 0 : i32
    return %arg0, %c0_i32, %c0_i32_0 : i32, i32, i32
  }
  func.func @transform_2(%arg0: i32, %arg1: i32) -> (i32, i32) {
    %c0_i32 = arith.constant 0 : i32
    %c0_i32_0 = arith.constant 0 : i32
    %c0_i32_1 = arith.constant 0 : i32
    return %c0_i32, %c0_i32_0 : i32, i32
  }
  func.func @transform_3(%arg0: i32, %arg1: i32) -> (i32, i32) {
    %c0_i32 = arith.constant 0 : i32
    %c0_i32_0 = arith.constant 0 : i32
    %c0_i32_1 = arith.constant 0 : i32
    return %c0_i32, %c0_i32_0 : i32, i32
  }
  func.func @transform_4(%arg0: i32, %arg1: i32) -> (i32, i32) {
    %c0_i32 = arith.constant 0 : i32
    %c0_i32_0 = arith.constant 0 : i32
    %c0_i32_1 = arith.constant 0 : i32
    return %c0_i32, %c0_i32_0 : i32, i32
  }
  func.func @transform_5(%arg0: i32, %arg1: i32) -> (i32, i32) {
    %c0_i32 = arith.constant 0 : i32
    %c0_i32_0 = arith.constant 0 : i32
    %c0_i32_1 = arith.constant 0 : i32
    return %c0_i32, %c0_i32_0 : i32, i32
  }
  func.func @transform_6(%arg0: i32, %arg1: i32) -> (i32, i32) {
    %c0_i32 = arith.constant 0 : i32
    %c0_i32_0 = arith.constant 0 : i32
    %c0_i32_1 = arith.constant 0 : i32
    return %c0_i32, %c0_i32_0 : i32, i32
  }
  func.func @transform_7(%arg0: i32, %arg1: i32) -> (i32, i32) {
    %c0_i32 = arith.constant 0 : i32
    %c0_i32_0 = arith.constant 0 : i32
    %c0_i32_1 = arith.constant 0 : i32
    return %c0_i32, %c0_i32_0 : i32, i32
  }
  func.func @transform_8(%arg0: i32, %arg1: i32) -> (i32, i32) {
    %c0_i32 = arith.constant 0 : i32
    %c0_i32_0 = arith.constant 0 : i32
    %c0_i32_1 = arith.constant 0 : i32
    return %c0_i32, %c0_i32_0 : i32, i32
  }
  func.func @transform_9(%arg0: i32, %arg1: i32) -> (i32, i32, i32) {
    %c0_i32 = arith.constant 0 : i32
    %c0_i32_0 = arith.constant 0 : i32
    %c0_i32_1 = arith.constant 0 : i32
    return %arg0, %c0_i32, %c0_i32_0 : i32, i32, i32
  }
}

module attributes {stable_mosaic.version = 11 : i64} {
  func.func @_fc_head_kernel(%arg0: i32, %arg1: memref<2x1024xf32, #tpu.memory_space<vmem>>, %arg2: memref<1024x512xbf16, #tpu.memory_space<vmem>>, %arg3: memref<1x512xf32, #tpu.memory_space<vmem>>, %arg4: memref<512x256xbf16, #tpu.memory_space<vmem>>, %arg5: memref<1x256xf32, #tpu.memory_space<vmem>>, %arg6: memref<256x4096xbf16, #tpu.memory_space<vmem>>, %arg7: memref<1x4096xf32, #tpu.memory_space<vmem>>, %arg8: memref<2x4096xf32, #tpu.memory_space<vmem>>) attributes {dimension_semantics = [#tpu.dimension_semantics<arbitrary>], iteration_bounds = array<i64: 1>, scalar_prefetch = 0 : i64, scratch_operands = 0 : i64, tpu.core_type = #tpu.core_type<tc>, window_params = [{pipeline_mode = #tpu.pipeline_mode<synchronous>, transform_indices = @transform_0, window_bounds = array<i64: 2, 1024>}, {pipeline_mode = #tpu.pipeline_mode<synchronous>, transform_indices = @transform_1, window_bounds = array<i64: 1024, 512>}, {pipeline_mode = #tpu.pipeline_mode<synchronous>, transform_indices = @transform_2, window_bounds = array<i64: 1, 512>}, {pipeline_mode = #tpu.pipeline_mode<synchronous>, transform_indices = @transform_3, window_bounds = array<i64: 512, 256>}, {pipeline_mode = #tpu.pipeline_mode<synchronous>, transform_indices = @transform_4, window_bounds = array<i64: 1, 256>}, {pipeline_mode = #tpu.pipeline_mode<synchronous>, transform_indices = @transform_5, window_bounds = array<i64: 256, 4096>}, {pipeline_mode = #tpu.pipeline_mode<synchronous>, transform_indices = @transform_6, window_bounds = array<i64: 1, 4096>}, {pipeline_mode = #tpu.pipeline_mode<synchronous>, transform_indices = @transform_7, window_bounds = array<i64: 2, 4096>}]} {
    %c0 = arith.constant 0 : index
    %c0_0 = arith.constant 0 : index
    %0 = vector.load %arg2[%c0, %c0_0] : memref<1024x512xbf16, #tpu.memory_space<vmem>>, vector<1024x512xbf16>
    %c0_1 = arith.constant 0 : index
    %c0_2 = arith.constant 0 : index
    %1 = vector.load %arg1[%c0_1, %c0_2] : memref<2x1024xf32, #tpu.memory_space<vmem>>, vector<2x1024xf32>
    %2 = arith.truncf %1 : vector<2x1024xf32> to vector<2x1024xbf16>
    %cst = arith.constant dense<0.000000e+00> : vector<2x512xf32>
    %3 = tpu.matmul %2, %0, %cst {dimension_numbers = #tpu.dot_dimension_numbers<[1], [0], [0], [1], [0, 0, 1, 1], [], []>} : vector<2x1024xbf16>, vector<1024x512xbf16>, vector<2x512xf32> -> vector<2x512xf32>
    %c0_3 = arith.constant 0 : index
    %c0_4 = arith.constant 0 : index
    %4 = vector.load %arg3[%c0_3, %c0_4] : memref<1x512xf32, #tpu.memory_space<vmem>>, vector<1x512xf32>
    %5 = vector.broadcast %4 : vector<1x512xf32> to vector<2x512xf32>
    %6 = arith.addf %3, %5 : vector<2x512xf32>
    %cst_5 = arith.constant 0.000000e+00 : f32
    %7 = vector.broadcast %cst_5 : f32 to vector<2x512xf32>
    %8 = arith.maximumf %6, %7 : vector<2x512xf32>
    %c0_6 = arith.constant 0 : index
    %c0_7 = arith.constant 0 : index
    %9 = vector.load %arg4[%c0_6, %c0_7] : memref<512x256xbf16, #tpu.memory_space<vmem>>, vector<512x256xbf16>
    %10 = arith.truncf %8 : vector<2x512xf32> to vector<2x512xbf16>
    %cst_8 = arith.constant dense<0.000000e+00> : vector<2x256xf32>
    %11 = tpu.matmul %10, %9, %cst_8 {dimension_numbers = #tpu.dot_dimension_numbers<[1], [0], [0], [1], [0, 0, 1, 1], [], []>} : vector<2x512xbf16>, vector<512x256xbf16>, vector<2x256xf32> -> vector<2x256xf32>
    %c0_9 = arith.constant 0 : index
    %c0_10 = arith.constant 0 : index
    %12 = vector.load %arg5[%c0_9, %c0_10] : memref<1x256xf32, #tpu.memory_space<vmem>>, vector<1x256xf32>
    %13 = vector.broadcast %12 : vector<1x256xf32> to vector<2x256xf32>
    %14 = arith.addf %11, %13 : vector<2x256xf32>
    %cst_11 = arith.constant 0.000000e+00 : f32
    %15 = vector.broadcast %cst_11 : f32 to vector<2x256xf32>
    %16 = arith.maximumf %14, %15 : vector<2x256xf32>
    %c0_12 = arith.constant 0 : index
    %c0_13 = arith.constant 0 : index
    %17 = vector.load %arg6[%c0_12, %c0_13] : memref<256x4096xbf16, #tpu.memory_space<vmem>>, vector<256x4096xbf16>
    %18 = arith.truncf %16 : vector<2x256xf32> to vector<2x256xbf16>
    %cst_14 = arith.constant dense<0.000000e+00> : vector<2x4096xf32>
    %19 = tpu.matmul %18, %17, %cst_14 {dimension_numbers = #tpu.dot_dimension_numbers<[1], [0], [0], [1], [0, 0, 1, 1], [], []>} : vector<2x256xbf16>, vector<256x4096xbf16>, vector<2x4096xf32> -> vector<2x4096xf32>
    %c0_15 = arith.constant 0 : index
    %c0_16 = arith.constant 0 : index
    %20 = vector.load %arg7[%c0_15, %c0_16] : memref<1x4096xf32, #tpu.memory_space<vmem>>, vector<1x4096xf32>
    %21 = vector.broadcast %20 : vector<1x4096xf32> to vector<2x4096xf32>
    %22 = arith.addf %19, %21 : vector<2x4096xf32>
    %c0_17 = arith.constant 0 : index
    %c0_18 = arith.constant 0 : index
    %23 = vector.load %arg8[%c0_17, %c0_18] : memref<2x4096xf32, #tpu.memory_space<vmem>>, vector<2x4096xf32>
    tpu.vector_store %arg8[%c0_17, %c0_18], %22 {strides = array<i32>} : memref<2x4096xf32, #tpu.memory_space<vmem>>, vector<2x4096xf32>,
    return
  }
  func.func @transform_0(%arg0: i32) -> (i32, i32) {
    %c0_i32 = arith.constant 0 : i32
    %c0_i32_0 = arith.constant 0 : i32
    %c0_i32_1 = arith.constant 0 : i32
    return %c0_i32, %c0_i32_0 : i32, i32
  }
  func.func @transform_1(%arg0: i32) -> (i32, i32) {
    %c0_i32 = arith.constant 0 : i32
    %c0_i32_0 = arith.constant 0 : i32
    %c0_i32_1 = arith.constant 0 : i32
    return %c0_i32, %c0_i32_0 : i32, i32
  }
  func.func @transform_2(%arg0: i32) -> (i32, i32) {
    %c0_i32 = arith.constant 0 : i32
    %c0_i32_0 = arith.constant 0 : i32
    %c0_i32_1 = arith.constant 0 : i32
    return %c0_i32, %c0_i32_0 : i32, i32
  }
  func.func @transform_3(%arg0: i32) -> (i32, i32) {
    %c0_i32 = arith.constant 0 : i32
    %c0_i32_0 = arith.constant 0 : i32
    %c0_i32_1 = arith.constant 0 : i32
    return %c0_i32, %c0_i32_0 : i32, i32
  }
  func.func @transform_4(%arg0: i32) -> (i32, i32) {
    %c0_i32 = arith.constant 0 : i32
    %c0_i32_0 = arith.constant 0 : i32
    %c0_i32_1 = arith.constant 0 : i32
    return %c0_i32, %c0_i32_0 : i32, i32
  }
  func.func @transform_5(%arg0: i32) -> (i32, i32) {
    %c0_i32 = arith.constant 0 : i32
    %c0_i32_0 = arith.constant 0 : i32
    %c0_i32_1 = arith.constant 0 : i32
    return %c0_i32, %c0_i32_0 : i32, i32
  }
  func.func @transform_6(%arg0: i32) -> (i32, i32) {
    %c0_i32 = arith.constant 0 : i32
    %c0_i32_0 = arith.constant 0 : i32
    %c0_i32_1 = arith.constant 0 : i32
    return %c0_i32, %c0_i32_0 : i32, i32
  }
  func.func @transform_7(%arg0: i32) -> (i32, i32) {
    %c0_i32 = arith.constant 0 : i32
    %c0_i32_0 = arith.constant 0 : i32
    %c0_i32_1 = arith.constant 0 : i32
    return %c0_i32, %c0_i32_0 : i32, i32
  }
}

module attributes {stable_mosaic.version = 11 : i64} {
  func.func @_block1_max_kernel(%arg0: i32, %arg1: i32, %arg2: memref<1x16x3xf32, #tpu.memory_space<vmem>>, %arg3: memref<1x3x64xf32, #tpu.memory_space<vmem>>, %arg4: memref<1x64xf32, #tpu.memory_space<vmem>>, %arg5: memref<1x64x128xbf16, #tpu.memory_space<vmem>>, %arg6: memref<1x128xf32, #tpu.memory_space<vmem>>, %arg7: memref<128x1024xbf16, #tpu.memory_space<vmem>>, %arg8: memref<1x1024xf32, #tpu.memory_space<vmem>>, %arg9: memref<1x1x1024xf32, #tpu.memory_space<vmem>>, %arg10: memref<8x1024xf32, #tpu.memory_space<vmem>>) attributes {dimension_semantics = [#tpu.dimension_semantics<parallel>, #tpu.dimension_semantics<arbitrary>], iteration_bounds = array<i64: 2, 1>, scalar_prefetch = 0 : i64, scratch_operands = 1 : i64, tpu.core_type = #tpu.core_type<tc>, window_params = [{transform_indices = @transform_0, window_bounds = array<i64: 1, 16, 3>}, {transform_indices = @transform_1, window_bounds = array<i64: 1, 3, 64>}, {pipeline_mode = #tpu.pipeline_mode<synchronous>, transform_indices = @transform_2, window_bounds = array<i64: 1, 64>}, {transform_indices = @transform_3, window_bounds = array<i64: 1, 64, 128>}, {pipeline_mode = #tpu.pipeline_mode<synchronous>, transform_indices = @transform_4, window_bounds = array<i64: 1, 128>}, {pipeline_mode = #tpu.pipeline_mode<synchronous>, transform_indices = @transform_5, window_bounds = array<i64: 128, 1024>}, {pipeline_mode = #tpu.pipeline_mode<synchronous>, transform_indices = @transform_6, window_bounds = array<i64: 1, 1024>}, {transform_indices = @transform_7, window_bounds = array<i64: 1, 1, 1024>}]} {
    %c0_i32 = arith.constant 0 : i32
    %0 = arith.cmpi eq, %arg1, %c0_i32 : i32
    %1 = arith.extui %0 : i1 to i32
    %c0_i32_0 = arith.constant 0 : i32
    %2 = arith.cmpi ne, %1, %c0_i32_0 : i32
    scf.if %2 {
      %cst_28 = arith.constant 0xFF800000 : f32
      %36 = vector.broadcast %cst_28 : f32 to vector<8x1024xf32>
      %c0_29 = arith.constant 0 : index
      %c0_30 = arith.constant 0 : index
      %37 = vector.load %arg10[%c0_29, %c0_30] : memref<8x1024xf32, #tpu.memory_space<vmem>>, vector<8x1024xf32>
      tpu.vector_store %arg10[%c0_29, %c0_30], %36 {strides = array<i32>} : memref<8x1024xf32, #tpu.memory_space<vmem>>, vector<8x1024xf32>,
    } else {
    }
    %c0 = arith.constant 0 : index
    %c0_1 = arith.constant 0 : index
    %c0_2 = arith.constant 0 : index
    %3 = vector.load %arg2[%c0, %c0_1, %c0_2] : memref<1x16x3xf32, #tpu.memory_space<vmem>>, vector<1x16x3xf32>
    %4 = vector.shape_cast %3 : vector<1x16x3xf32> to vector<16x3xf32>
    %c0_3 = arith.constant 0 : index
    %c0_4 = arith.constant 0 : index
    %c0_5 = arith.constant 0 : index
    %5 = vector.load %arg3[%c0_3, %c0_4, %c0_5] : memref<1x3x64xf32, #tpu.memory_space<vmem>>, vector<1x3x64xf32>
    %6 = vector.shape_cast %5 : vector<1x3x64xf32> to vector<3x64xf32>
    %cst = arith.constant dense<0.000000e+00> : vector<16x64xf32>
    %7 = tpu.matmul %4, %6, %cst {dimension_numbers = #tpu.dot_dimension_numbers<[1], [0], [0], [1], [0, 0, 1, 1], [], []>} : vector<16x3xf32>, vector<3x64xf32>, vector<16x64xf32> -> vector<16x64xf32>
    %c0_6 = arith.constant 0 : index
    %c0_7 = arith.constant 0 : index
    %8 = vector.load %arg4[%c0_6, %c0_7] : memref<1x64xf32, #tpu.memory_space<vmem>>, vector<1x64xf32>
    %9 = vector.broadcast %8 : vector<1x64xf32> to vector<16x64xf32>
    %10 = arith.addf %7, %9 : vector<16x64xf32>
    %cst_8 = arith.constant 0.000000e+00 : f32
    %11 = vector.broadcast %cst_8 : f32 to vector<16x64xf32>
    %12 = arith.maximumf %10, %11 : vector<16x64xf32>
    %c0_9 = arith.constant 0 : index
    %c0_10 = arith.constant 0 : index
    %c0_11 = arith.constant 0 : index
    %13 = vector.load %arg5[%c0_9, %c0_10, %c0_11] : memref<1x64x128xbf16, #tpu.memory_space<vmem>>, vector<1x64x128xbf16>
    %14 = vector.shape_cast %13 : vector<1x64x128xbf16> to vector<64x128xbf16>
    %15 = arith.truncf %12 : vector<16x64xf32> to vector<16x64xbf16>
    %cst_12 = arith.constant dense<0.000000e+00> : vector<16x128xf32>
    %16 = tpu.matmul %15, %14, %cst_12 {dimension_numbers = #tpu.dot_dimension_numbers<[1], [0], [0], [1], [0, 0, 1, 1], [], []>} : vector<16x64xbf16>, vector<64x128xbf16>, vector<16x128xf32> -> vector<16x128xf32>
    %c0_13 = arith.constant 0 : index
    %c0_14 = arith.constant 0 : index
    %17 = vector.load %arg6[%c0_13, %c0_14] : memref<1x128xf32, #tpu.memory_space<vmem>>, vector<1x128xf32>
    %18 = vector.broadcast %17 : vector<1x128xf32> to vector<16x128xf32>
    %19 = arith.addf %16, %18 : vector<16x128xf32>
    %cst_15 = arith.constant 0.000000e+00 : f32
    %20 = vector.broadcast %cst_15 : f32 to vector<16x128xf32>
    %21 = arith.maximumf %19, %20 : vector<16x128xf32>
    %c0_16 = arith.constant 0 : index
    %c0_17 = arith.constant 0 : index
    %22 = vector.load %arg7[%c0_16, %c0_17] : memref<128x1024xbf16, #tpu.memory_space<vmem>>, vector<128x1024xbf16>
    %23 = arith.truncf %21 : vector<16x128xf32> to vector<16x128xbf16>
    %cst_18 = arith.constant dense<0.000000e+00> : vector<16x1024xf32>
    %24 = tpu.matmul %23, %22, %cst_18 {dimension_numbers = #tpu.dot_dimension_numbers<[1], [0], [0], [1], [0, 0, 1, 1], [], []>} : vector<16x128xbf16>, vector<128x1024xbf16>, vector<16x1024xf32> -> vector<16x1024xf32>
    %c0_19 = arith.constant 0 : index
    %c0_20 = arith.constant 0 : index
    %25 = vector.load %arg8[%c0_19, %c0_20] : memref<1x1024xf32, #tpu.memory_space<vmem>>, vector<1x1024xf32>
    %26 = vector.broadcast %25 : vector<1x1024xf32> to vector<16x1024xf32>
    %27 = arith.addf %24, %26 : vector<16x1024xf32>
    %c0_21 = arith.constant 0 : index
    %c0_22 = arith.constant 0 : index
    %28 = vector.load %arg10[%c0_21, %c0_22] : memref<8x1024xf32, #tpu.memory_space<vmem>>, vector<8x1024xf32>
    %29 = vector.shape_cast %27 : vector<16x1024xf32> to vector<2x8x1024xf32>
    %cst_23 = arith.constant dense<0xFF800000> : vector<8x1024xf32>
    %30 = vector.multi_reduction <maximumf>, %29, %cst_23 [0] : vector<2x8x1024xf32> to vector<8x1024xf32>
    %31 = arith.maximumf %28, %30 : vector<8x1024xf32>
    %c0_24 = arith.constant 0 : index
    %c0_25 = arith.constant 0 : index
    %32 = vector.load %arg10[%c0_24, %c0_25] : memref<8x1024xf32, #tpu.memory_space<vmem>>, vector<8x1024xf32>
    tpu.vector_store %arg10[%c0_24, %c0_25], %31 {strides = array<i32>} : memref<8x1024xf32, #tpu.memory_space<vmem>>, vector<8x1024xf32>,
    %c0_i32_26 = arith.constant 0 : i32
    %33 = arith.cmpi eq, %arg1, %c0_i32_26 : i32
    %34 = arith.extui %33 : i1 to i32
    %c0_i32_27 = arith.constant 0 : i32
    %35 = arith.cmpi ne, %34, %c0_i32_27 : i32
    scf.if %35 {
      %c0_28 = arith.constant 0 : index
      %c0_29 = arith.constant 0 : index
      %36 = vector.load %arg10[%c0_28, %c0_29] : memref<8x1024xf32, #tpu.memory_space<vmem>>, vector<8x1024xf32>
      %cst_30 = arith.constant dense<0xFF800000> : vector<1024xf32>
      %37 = vector.multi_reduction <maximumf>, %36, %cst_30 [0] : vector<8x1024xf32> to vector<1024xf32>
      %38 = vector.shape_cast %37 : vector<1024xf32> to vector<1x1024xf32>
      %c0_31 = arith.constant 0 : index
      %c0_32 = arith.constant 0 : index
      %c0_33 = arith.constant 0 : index
      %39 = vector.load %arg9[%c0_31, %c0_32, %c0_33] : memref<1x1x1024xf32, #tpu.memory_space<vmem>>, vector<1x1x1024xf32>
      %40 = vector.shape_cast %39 : vector<1x1x1024xf32> to vector<1x1024xf32>
      %41 = vector.shape_cast %38 : vector<1x1024xf32> to vector<1x1x1024xf32>
      tpu.vector_store %arg9[%c0_31, %c0_32, %c0_33], %41 {strides = array<i32>} : memref<1x1x1024xf32, #tpu.memory_space<vmem>>, vector<1x1x1024xf32>,
    } else {
    }
    return
  }
  func.func @transform_0(%arg0: i32, %arg1: i32) -> (i32, i32, i32) {
    %c0_i32 = arith.constant 0 : i32
    %c0_i32_0 = arith.constant 0 : i32
    return %arg0, %arg1, %c0_i32 : i32, i32, i32
  }
  func.func @transform_1(%arg0: i32, %arg1: i32) -> (i32, i32, i32) {
    %c0_i32 = arith.constant 0 : i32
    %c0_i32_0 = arith.constant 0 : i32
    %c0_i32_1 = arith.constant 0 : i32
    return %arg0, %c0_i32, %c0_i32_0 : i32, i32, i32
  }
  func.func @transform_2(%arg0: i32, %arg1: i32) -> (i32, i32) {
    %c0_i32 = arith.constant 0 : i32
    %c0_i32_0 = arith.constant 0 : i32
    %c0_i32_1 = arith.constant 0 : i32
    return %c0_i32, %c0_i32_0 : i32, i32
  }
  func.func @transform_3(%arg0: i32, %arg1: i32) -> (i32, i32, i32) {
    %c0_i32 = arith.constant 0 : i32
    %c0_i32_0 = arith.constant 0 : i32
    %c0_i32_1 = arith.constant 0 : i32
    return %arg0, %c0_i32, %c0_i32_0 : i32, i32, i32
  }
  func.func @transform_4(%arg0: i32, %arg1: i32) -> (i32, i32) {
    %c0_i32 = arith.constant 0 : i32
    %c0_i32_0 = arith.constant 0 : i32
    %c0_i32_1 = arith.constant 0 : i32
    return %c0_i32, %c0_i32_0 : i32, i32
  }
  func.func @transform_5(%arg0: i32, %arg1: i32) -> (i32, i32) {
    %c0_i32 = arith.constant 0 : i32
    %c0_i32_0 = arith.constant 0 : i32
    %c0_i32_1 = arith.constant 0 : i32
    return %c0_i32, %c0_i32_0 : i32, i32
  }
  func.func @transform_6(%arg0: i32, %arg1: i32) -> (i32, i32) {
    %c0_i32 = arith.constant 0 : i32
    %c0_i32_0 = arith.constant 0 : i32
    %c0_i32_1 = arith.constant 0 : i32
    return %c0_i32, %c0_i32_0 : i32, i32
  }
  func.func @transform_7(%arg0: i32, %arg1: i32) -> (i32, i32, i32) {
    %c0_i32 = arith.constant 0 : i32
    %c0_i32_0 = arith.constant 0 : i32
    %c0_i32_1 = arith.constant 0 : i32
    return %arg0, %c0_i32, %c0_i32_0 : i32, i32, i32
  }
}

module attributes {stable_mosaic.version = 11 : i64} {
  func.func @_fc_head_kernel(%arg0: i32, %arg1: memref<2x1024xf32, #tpu.memory_space<vmem>>, %arg2: memref<1024x512xbf16, #tpu.memory_space<vmem>>, %arg3: memref<1x512xf32, #tpu.memory_space<vmem>>, %arg4: memref<512x256xbf16, #tpu.memory_space<vmem>>, %arg5: memref<1x256xf32, #tpu.memory_space<vmem>>, %arg6: memref<256x128xbf16, #tpu.memory_space<vmem>>, %arg7: memref<1x128xf32, #tpu.memory_space<vmem>>, %arg8: memref<2x128xf32, #tpu.memory_space<vmem>>) attributes {dimension_semantics = [#tpu.dimension_semantics<arbitrary>], iteration_bounds = array<i64: 1>, scalar_prefetch = 0 : i64, scratch_operands = 0 : i64, tpu.core_type = #tpu.core_type<tc>, window_params = [{pipeline_mode = #tpu.pipeline_mode<synchronous>, transform_indices = @transform_0, window_bounds = array<i64: 2, 1024>}, {pipeline_mode = #tpu.pipeline_mode<synchronous>, transform_indices = @transform_1, window_bounds = array<i64: 1024, 512>}, {pipeline_mode = #tpu.pipeline_mode<synchronous>, transform_indices = @transform_2, window_bounds = array<i64: 1, 512>}, {pipeline_mode = #tpu.pipeline_mode<synchronous>, transform_indices = @transform_3, window_bounds = array<i64: 512, 256>}, {pipeline_mode = #tpu.pipeline_mode<synchronous>, transform_indices = @transform_4, window_bounds = array<i64: 1, 256>}, {pipeline_mode = #tpu.pipeline_mode<synchronous>, transform_indices = @transform_5, window_bounds = array<i64: 256, 128>}, {pipeline_mode = #tpu.pipeline_mode<synchronous>, transform_indices = @transform_6, window_bounds = array<i64: 1, 128>}, {pipeline_mode = #tpu.pipeline_mode<synchronous>, transform_indices = @transform_7, window_bounds = array<i64: 2, 128>}]} {
    %c0 = arith.constant 0 : index
    %c0_0 = arith.constant 0 : index
    %0 = vector.load %arg2[%c0, %c0_0] : memref<1024x512xbf16, #tpu.memory_space<vmem>>, vector<1024x512xbf16>
    %c0_1 = arith.constant 0 : index
    %c0_2 = arith.constant 0 : index
    %1 = vector.load %arg1[%c0_1, %c0_2] : memref<2x1024xf32, #tpu.memory_space<vmem>>, vector<2x1024xf32>
    %2 = arith.truncf %1 : vector<2x1024xf32> to vector<2x1024xbf16>
    %cst = arith.constant dense<0.000000e+00> : vector<2x512xf32>
    %3 = tpu.matmul %2, %0, %cst {dimension_numbers = #tpu.dot_dimension_numbers<[1], [0], [0], [1], [0, 0, 1, 1], [], []>} : vector<2x1024xbf16>, vector<1024x512xbf16>, vector<2x512xf32> -> vector<2x512xf32>
    %c0_3 = arith.constant 0 : index
    %c0_4 = arith.constant 0 : index
    %4 = vector.load %arg3[%c0_3, %c0_4] : memref<1x512xf32, #tpu.memory_space<vmem>>, vector<1x512xf32>
    %5 = vector.broadcast %4 : vector<1x512xf32> to vector<2x512xf32>
    %6 = arith.addf %3, %5 : vector<2x512xf32>
    %cst_5 = arith.constant 0.000000e+00 : f32
    %7 = vector.broadcast %cst_5 : f32 to vector<2x512xf32>
    %8 = arith.maximumf %6, %7 : vector<2x512xf32>
    %c0_6 = arith.constant 0 : index
    %c0_7 = arith.constant 0 : index
    %9 = vector.load %arg4[%c0_6, %c0_7] : memref<512x256xbf16, #tpu.memory_space<vmem>>, vector<512x256xbf16>
    %10 = arith.truncf %8 : vector<2x512xf32> to vector<2x512xbf16>
    %cst_8 = arith.constant dense<0.000000e+00> : vector<2x256xf32>
    %11 = tpu.matmul %10, %9, %cst_8 {dimension_numbers = #tpu.dot_dimension_numbers<[1], [0], [0], [1], [0, 0, 1, 1], [], []>} : vector<2x512xbf16>, vector<512x256xbf16>, vector<2x256xf32> -> vector<2x256xf32>
    %c0_9 = arith.constant 0 : index
    %c0_10 = arith.constant 0 : index
    %12 = vector.load %arg5[%c0_9, %c0_10] : memref<1x256xf32, #tpu.memory_space<vmem>>, vector<1x256xf32>
    %13 = vector.broadcast %12 : vector<1x256xf32> to vector<2x256xf32>
    %14 = arith.addf %11, %13 : vector<2x256xf32>
    %cst_11 = arith.constant 0.000000e+00 : f32
    %15 = vector.broadcast %cst_11 : f32 to vector<2x256xf32>
    %16 = arith.maximumf %14, %15 : vector<2x256xf32>
    %c0_12 = arith.constant 0 : index
    %c0_13 = arith.constant 0 : index
    %17 = vector.load %arg6[%c0_12, %c0_13] : memref<256x128xbf16, #tpu.memory_space<vmem>>, vector<256x128xbf16>
    %18 = arith.truncf %16 : vector<2x256xf32> to vector<2x256xbf16>
    %cst_14 = arith.constant dense<0.000000e+00> : vector<2x128xf32>
    %19 = tpu.matmul %18, %17, %cst_14 {dimension_numbers = #tpu.dot_dimension_numbers<[1], [0], [0], [1], [0, 0, 1, 1], [], []>} : vector<2x256xbf16>, vector<256x128xbf16>, vector<2x128xf32> -> vector<2x128xf32>
    %c0_15 = arith.constant 0 : index
    %c0_16 = arith.constant 0 : index
    %20 = vector.load %arg7[%c0_15, %c0_16] : memref<1x128xf32, #tpu.memory_space<vmem>>, vector<1x128xf32>
    %21 = vector.broadcast %20 : vector<1x128xf32> to vector<2x128xf32>
    %22 = arith.addf %19, %21 : vector<2x128xf32>
    %c0_17 = arith.constant 0 : index
    %c0_18 = arith.constant 0 : index
    %23 = vector.load %arg8[%c0_17, %c0_18] : memref<2x128xf32, #tpu.memory_space<vmem>>, vector<2x128xf32>
    tpu.vector_store %arg8[%c0_17, %c0_18], %22 {strides = array<i32>} : memref<2x128xf32, #tpu.memory_space<vmem>>, vector<2x128xf32>,
    return
  }
  func.func @transform_0(%arg0: i32) -> (i32, i32) {
    %c0_i32 = arith.constant 0 : i32
    %c0_i32_0 = arith.constant 0 : i32
    %c0_i32_1 = arith.constant 0 : i32
    return %c0_i32, %c0_i32_0 : i32, i32
  }
  func.func @transform_1(%arg0: i32) -> (i32, i32) {
    %c0_i32 = arith.constant 0 : i32
    %c0_i32_0 = arith.constant 0 : i32
    %c0_i32_1 = arith.constant 0 : i32
    return %c0_i32, %c0_i32_0 : i32, i32
  }
  func.func @transform_2(%arg0: i32) -> (i32, i32) {
    %c0_i32 = arith.constant 0 : i32
    %c0_i32_0 = arith.constant 0 : i32
    %c0_i32_1 = arith.constant 0 : i32
    return %c0_i32, %c0_i32_0 : i32, i32
  }
  func.func @transform_3(%arg0: i32) -> (i32, i32) {
    %c0_i32 = arith.constant 0 : i32
    %c0_i32_0 = arith.constant 0 : i32
    %c0_i32_1 = arith.constant 0 : i32
    return %c0_i32, %c0_i32_0 : i32, i32
  }
  func.func @transform_4(%arg0: i32) -> (i32, i32) {
    %c0_i32 = arith.constant 0 : i32
    %c0_i32_0 = arith.constant 0 : i32
    %c0_i32_1 = arith.constant 0 : i32
    return %c0_i32, %c0_i32_0 : i32, i32
  }
  func.func @transform_5(%arg0: i32) -> (i32, i32) {
    %c0_i32 = arith.constant 0 : i32
    %c0_i32_0 = arith.constant 0 : i32
    %c0_i32_1 = arith.constant 0 : i32
    return %c0_i32, %c0_i32_0 : i32, i32
  }
  func.func @transform_6(%arg0: i32) -> (i32, i32) {
    %c0_i32 = arith.constant 0 : i32
    %c0_i32_0 = arith.constant 0 : i32
    %c0_i32_1 = arith.constant 0 : i32
    return %c0_i32, %c0_i32_0 : i32, i32
  }
  func.func @transform_7(%arg0: i32) -> (i32, i32) {
    %c0_i32 = arith.constant 0 : i32
    %c0_i32_0 = arith.constant 0 : i32
    %c0_i32_1 = arith.constant 0 : i32
    return %c0_i32, %c0_i32_0 : i32, i32
  }
}

</mosaic_0001>

<bundles_post_ra>
// kernel: pointnet_forward.6
= control target key start
LH: loop header
LB: loop body
LE: loop exit
PB: predicated region body
PF: predicated region fallthrough
CT: control target
= control target key end

     0   :  { %s1545_s24 = smov 0   ;;  %s1547_s25 = smov 0   ;;  %s1842_s0 = inlined_call_operand.vmem [shape: f32[2,16,3], index: 0, kind: input, shape index: {}]   ;;  %s1843_s1 = inlined_call_operand.vmem [shape: f32[3,64], index: 1, kind: input, shape index: {}]   ;;  %s1844_s2 = inlined_call_operand.vmem [shape: f32[1,64], index: 2, kind: input, shape index: {}]   ;;  %s1845_s3 = inlined_call_operand.vmem [shape: bf16[64,128], index: 3, kind: input, shape index: {}]   ;;  %s1846_s4 = inlined_call_operand.vmem [shape: f32[1,128], index: 4, kind: input, shape index: {}]   ;;  %s1847_s5 = inlined_call_operand.vmem [shape: bf16[128,1024], index: 5, kind: input, shape index: {}]   ;;  %s1848_s6 = inlined_call_operand.vmem [shape: f32[1,1024], index: 6, kind: input, shape index: {}]   ;;  %s1849_s7 = inlined_call_operand.vmem [shape: f32[2,1,1024], index: 7, kind: output, shape index: {}]  }
   0x1   :  { %s1549_s26 = smov 0  }
   0x2 LB: > { %s29_s27 = sadd.s32 1, %s1495_s25  ;;  %p1339_p0 = scmp.ge.s32.totalorder %s1499_s26, 1  ;;  %s1499_s26 = sphi %s1549_s26, %s17_s26   ;;  %s1495_s25 = sphi %s1547_s25, %s1851_s25   ;;  %s1491_s24 = sphi %s1545_s24, %s1850_s24  }
   0x3   : > { %p31_p1 = scmp.ge.s32.totalorder %s29_s27, 2  ;;  %p256_p2 = scmp.lt.s32.totalorder %s1499_s26, 3 }
   0x5   : > { %s1853_s27 = smov (%p31_p1, %s29_s27), 0  ;;  %p257_p3 = pnand %p1339_p0, %p256_p2 }
   0x6   : > { %v318_v0 = vld [vmem:[%s1843_s1] sm:$0x7] (!%p257_p3)  ;;  %vm335_vm0 = vcmask (!%p257_p3), 1042432   ;;  %p292_p4 = scmp.lt.s32.totalorder (!%p257_p3), %s1491_s24, 1  ;;  %v1501_v1 = vmov (!%p257_p3), 0.0   ;;  %v1474_v3 = vld [vmem:[%s1845_s3 + $0x8] sm:$0xff] (!%p257_p3)  }
   0x7   : > { %260 = sbr.rel (%p257_p3) target bundleno = 734 (0x2de), region = 48  ;;  %1428 = vmatprep.subr.msk.mxu0 (!%p257_p3), %vm335_vm0, %v318_v0  ;;  %1433 = vmatprep.subr.bf16.mxu1 (!%p257_p3), %v1501_v1  ;;  %v1473_v2 = vld [vmem:[%s1845_s3] sm:$0xff] (!%p257_p3)   ;;  %vm328_vm1 = vcmask (!%p257_p3), 23552   ;;  %v1475_v6 = vld [vmem:[%s1845_s3 + $0x10] sm:$0xff] (!%p257_p3)   ;;  %v1476_v7 = vld [vmem:[%s1845_s3 + $0x18] sm:$0xff] (!%p257_p3)   ;;  %vm1502_vm2 = vmmov (!%p257_p3), 0  }
   0x8   : > { %1429 = vmatpush3.msk.msra.mxu0 (!%p257_p3), %vm335_vm0, %v318_v0  ;;  %1434 = vmatpush3.bf16.msra.mxu1 (!%p257_p3), %v1473_v2  ;;  %v503_v8 = vld [vmem:[%s1847_s5] sm:$0xff] (!%p257_p3)  ;;  %v504_v10 = vld [vmem:[%s1847_s5 + $0x8] sm:$0xff] (!%p257_p3)  ;;  %vm456_vm3 = vcmask (!%p257_p3), 523264  }
   0x9   : > { %1435 = vmatprep.subr.bf16.mxu1 (!%p257_p3), %v1501_v1  ;;  %1441 = vmatprep.mubr.msk.bf16.mxu1 (!%p257_p3), %vm1502_vm2, %v1501_v1  ;;  %v507_v9 = vld [vmem:[%s1847_s5 + $0x20] sm:$0xff] (!%p257_p3)  ;;  %v508_v13 = vld [vmem:[%s1847_s5 + $0x28] sm:$0xff] (!%p257_p3) }
   0xa   : > { %v1353_v11 = vcombine.low (!%p257_p3), %v503_v8, %v507_v9  ;;  %v1354_v12 = vcombine.high (!%p257_p3), %v503_v8, %v507_v9  ;;  %v511_v14 = vld [vmem:[%s1847_s5 + $0x40] sm:$0xff] (!%p257_p3)  ;;  %v1355_v16 = vcombine.low (!%p257_p3), %v504_v10, %v508_v13  ;;  %v1356_v17 = vcombine.high (!%p257_p3), %v504_v10, %v508_v13  ;;  %v512_v42 = vld [vmem:[%s1847_s5 + $0x48] sm:$0xff] (!%p257_p3) }
   0xb   : > { %v515_v15 = vld [vmem:[%s1847_s5 + $0x60] sm:$0xff] (!%p257_p3)  ;;  %v516_v43 = vld [vmem:[%s1847_s5 + $0x68] sm:$0xff] (!%p257_p3) }
   0xc   : > { %1436 = vmatpush3.bf16.msra.mxu1 (!%p257_p3), %v1474_v3  ;;  %v1362_v18 = vcombine.high (!%p257_p3), %v511_v14, %v515_v15  ;;  %930 = vmatprep.subr.bf16.mxu0 (!%p257_p3), %v1354_v12  ;;  %v1361_v19 = vcombine.low (!%p257_p3), %v511_v14, %v515_v15  ;;  %v519_v20 = vld [vmem:[%s1847_s5 + $0x80] sm:$0xff] (!%p257_p3)  ;;  %v1364_v46 = vcombine.high (!%p257_p3), %v512_v42, %v516_v43  ;;  %v520_v47 = vld [vmem:[%s1847_s5 + $0x88] sm:$0xff] (!%p257_p3) }
   0xd   : > { %1437 = vmatprep.subr.bf16.mxu1 (!%p257_p3), %v1501_v1  ;;  %v523_v21 = vld [vmem:[%s1847_s5 + $0xa0] sm:$0xff] (!%p257_p3)  ;;  %v524_v48 = vld [vmem:[%s1847_s5 + $0xa8] sm:$0xff] (!%p257_p3)  ;;  %v1363_v49 = vcombine.low (!%p257_p3), %v512_v42, %v516_v43  ;;  %v525_v42 = vld [vmem:[%s1847_s5 + $0xb0] sm:$0xff] (!%p257_p3) }
   0xe   : > { %s1855_s24 = smov (!%p292_p4, %s1491_s24), 1  ;;  %v1370_v22 = vcombine.high %v519_v20, %v523_v21  ;;  %v1369_v23 = vcombine.low %v519_v20, %v523_v21  ;;  %v527_v24 = vld [vmem:[%s1847_s5 + $0xc0] sm:$0xff]  ;;  %v1372_v50 = vcombine.high %v520_v47, %v524_v48  ;;  %v528_v51 = vld [vmem:[%s1847_s5 + $0xc8] sm:$0xff]  ;;  %v1371_v53 = vcombine.low %v520_v47, %v524_v48  ;;  %v510_v20 = vld [vmem:[%s1847_s5 + $0x38] sm:$0xff] }
   0xf   : > { %s1419_s11 = sshll.u32 %s1855_s24, 4  ;;  %v531_v25 = vld [vmem:[%s1847_s5 + $0xe0] sm:$0xff]  ;;  %v532_v52 = vld [vmem:[%s1847_s5 + $0xe8] sm:$0xff]  ;;  %v522_v43 = vld [vmem:[%s1847_s5 + $0x98] sm:$0xff]  ;;  %s1342_s20 = sshll.u32 %s1855_s24, 3 }
  0x10   : > { %s299_s14 = scalar_lea.vmem %s1842_s0, %s1419_s11  ;;  %1438 = vmatpush3.bf16.msra.mxu1 %v1475_v6  ;;  %v1378_v26 = vcombine.high %v527_v24, %v531_v25  ;;  %v1377_v27 = vcombine.low %v527_v24, %v531_v25  ;;  %v535_v28 = vld [vmem:[%s1847_s5 + $0x100] sm:$0xff]  ;;  %v1380_v54 = vcombine.high %v528_v51, %v532_v52  ;;  %v536_v55 = vld [vmem:[%s1847_s5 + $0x108] sm:$0xff]  ;;  %v1379_v57 = vcombine.low %v528_v51, %v532_v52  ;;  %v530_v51 = vld [vmem:[%s1847_s5 + $0xd8] sm:$0xff]  ;;  %s304_s23 = scalar_lea.vmem %s1849_s7, %s1342_s20 }
  0x11   : > { %v319_v4 = vld [vmem:[%s299_s14] sm:$0xff]  ;;  %v320_v5 = vld [vmem:[%s299_s14 + $0x8] sm:$0xff]  ;;  %1439 = vmatprep.subr.bf16.mxu1 %v1501_v1  ;;  %v1503_v24 = vmov 0   ;;  %v534_v52 = vld [vmem:[%s1847_s5 + $0xf8] sm:$0xff] }
  0x12   : > { %1430 = vmatprep.mubr.msk.f32.mxu0 %vm328_vm1, %v319_v4  ;;  %v539_v29 = vld [vmem:[%s1847_s5 + $0x120] sm:$0xff]  ;;  %v540_v56 = vld [vmem:[%s1847_s5 + $0x128] sm:$0xff] }
  0x13   : > { %1431 = vmatmul.mubr.msk.f32.vlgmr.msra.gmra.mrb[0].mxu0 %vm328_vm1, %v320_v5  ;;  %v1386_v30 = vcombine.high %v535_v28, %v539_v29  ;;  %v1385_v31 = vcombine.low %v535_v28, %v539_v29  ;;  %v543_v32 = vld [vmem:[%s1847_s5 + $0x140] sm:$0xff]  ;;  %v1388_v58 = vcombine.high %v536_v55, %v540_v56  ;;  %v544_v59 = vld [vmem:[%s1847_s5 + $0x148] sm:$0xff]  ;;  %v1387_v61 = vcombine.low %v536_v55, %v540_v56 }
  0x14   : > { %1440 = vmatpush3.bf16.msra.mxu1 %v1476_v7  ;;  %931 = vmatpush1.bf16.msra.mxu0 %v1353_v11  ;;  %v547_v33 = vld [vmem:[%s1847_s5 + $0x160] sm:$0xff]  ;;  %v548_v60 = vld [vmem:[%s1847_s5 + $0x168] sm:$0xff]  ;;  %v1384_v56 = vcombine.high %v530_v51, %v534_v52 }
  0x15   : > { %973 = vmatprep.subr.bf16.mxu1 %v1356_v17  ;;  %932 = vmatprep.subr.bf16.mxu0 %v1362_v18  ;;  %v1394_v34 = vcombine.high %v543_v32, %v547_v33  ;;  %v1393_v35 = vcombine.low %v543_v32, %v547_v33  ;;  %v1343_v36 = vld [vmem:[%s1844_s2] ss:$0 sm:$0xff]  ;;  %v1396_v62 = vcombine.high %v544_v59, %v548_v60  ;;  %v552_v2 = vld [vmem:[%s1847_s5 + $0x188] sm:$0xff]  ;;  %v509_v17 = vld [vmem:[%s1847_s5 + $0x30] sm:$0xff] }
  0x16   : > { %v1395_v63 = vcombine.low %v544_v59, %v548_v60  ;;  %v551_v0 = vld [vmem:[%s1847_s5 + $0x180] sm:$0xff]  ;;  %v556_v4 = vld [vmem:[%s1847_s5 + $0x1a8] sm:$0xff]  ;;  %v506_v18 = vld [vmem:[%s1847_s5 + $0x18] sm:$0xff]  ;;  %962 = vmatprep.mubr.bf16.mxu0 %v1503_v24 }
  0x17   : > { %v555_v1 = vld [vmem:[%s1847_s5 + $0x1a0] sm:$0xff]  ;;  %v1403_v6 = vcombine.low %v552_v2, %v556_v4  ;;  %v1404_v7 = vcombine.high %v552_v2, %v556_v4  ;;  %v560_v10 = vld [vmem:[%s1847_s5 + $0x1c8] sm:$0xff]  ;;  %v513_v32 = vld [vmem:[%s1847_s5 + $0x50] sm:$0xff] }
  0x18   : > { %933 = vmatpush1.bf16.msra.mxu0 %v1361_v19  ;;  %v1402_v3 = vcombine.high %v551_v0, %v555_v1  ;;  %v1401_v5 = vcombine.low %v551_v0, %v555_v1  ;;  %v559_v8 = vld [vmem:[%s1847_s5 + $0x1c0] sm:$0xff]  ;;  %v564_v12 = vld [vmem:[%s1847_s5 + $0x1e8] sm:$0xff]  ;;  %v517_v33 = vld [vmem:[%s1847_s5 + $0x70] sm:$0xff] }
  0x19   : > { %934 = vmatprep.subr.bf16.mxu0 %v1370_v22  ;;  %v563_v9 = vld [vmem:[%s1847_s5 + $0x1e0] sm:$0xff]  ;;  %v1411_v14 = vcombine.low %v560_v10, %v564_v12  ;;  %v1412_v15 = vcombine.high %v560_v10, %v564_v12  ;;  %v1359_v22 = vcombine.low %v506_v18, %v510_v20  ;;  %v538_v59 = vld [vmem:[%s1847_s5 + $0x118] sm:$0xff]  ;;  %v545_v1 = vld [vmem:[%s1847_s5 + $0x150] sm:$0xff] }
  0x1a   : > { %v1410_v11 = vcombine.high %v559_v8, %v563_v9  ;;  %v1409_v13 = vcombine.low %v559_v8, %v563_v9  ;;  %v1347_v25 = vld [vmem:[%s1846_s4] ss:$0 sm:$0xff]  ;;  %v542_v60 = vld [vmem:[%s1847_s5 + $0x138] sm:$0xff]  ;;  %v549_v2 = vld [vmem:[%s1847_s5 + $0x170] sm:$0xff] }
  0x1b   : > { %v1392_v0 = vcombine.high %v538_v59, %v542_v60  ;;  %v550_v4 = vld [vmem:[%s1847_s5 + $0x178] sm:$0xff]  ;;  %v553_v9 = vld [vmem:[%s1847_s5 + $0x190] sm:$0xff] }
  0x1c   : > { %935 = vmatpush1.bf16.msra.mxu0 %v1369_v23  ;;  %v1360_v23 = vcombine.high %v506_v18, %v510_v20  ;;  %v557_v10 = vld [vmem:[%s1847_s5 + $0x1b0] sm:$0xff]  ;;  %v558_v12 = vld [vmem:[%s1847_s5 + $0x1b8] sm:$0xff] }
  0x1d   : > { %936 = vmatprep.subr.bf16.mxu0 %v1378_v26  ;;  %v565_v18 = vld [vmem:[%s1847_s5 + $0x1f0] sm:$0xff]  ;;  %v566_v20 = vld [vmem:[%s1847_s5 + $0x1f8] sm:$0xff] }
  0x20   : > { %937 = vmatpush1.bf16.msra.mxu0 %v1377_v27 }
  0x21   : > { %938 = vmatprep.subr.bf16.mxu0 %v1386_v30 }
  0x24   : > { %939 = vmatpush1.bf16.msra.mxu0 %v1385_v31 }
  0x25   : > { %940 = vmatprep.subr.bf16.mxu0 %v1394_v34  ;;  %v514_v34 = vld [vmem:[%s1847_s5 + $0x58] sm:$0xff] }
  0x28   : > { %941 = vmatpush1.bf16.msra.mxu0 %v1393_v35  ;;  %v518_v35 = vld [vmem:[%s1847_s5 + $0x78] sm:$0xff] }
  0x29   : > { %942 = vmatprep.subr.bf16.mxu0 %v1402_v3  ;;  %v546_v3 = vld [vmem:[%s1847_s5 + $0x158] sm:$0xff] }
  0x2a   : > { %v1400_v8 = vcombine.high %v546_v3, %v550_v4 }
  0x2c   : > { %943 = vmatpush1.bf16.msra.mxu0 %v1401_v5 }
  0x2d   : > { %944 = vmatprep.subr.bf16.mxu0 %v1410_v11  ;;  %v554_v11 = vld [vmem:[%s1847_s5 + $0x198] sm:$0xff] }
  0x30   : > { %945 = vmatpush1.bf16.msra.mxu0 %v1409_v13  ;;  %v1397_v13 = vcombine.low %v545_v1, %v549_v2 }
  0xe6   : > { %v1432_v37 = vpop.f32.mrb[0].mxu0 }
  0xe7   : > { %v411_v38 = vadd.f32 %v1432_v37, %v1343_v36  ;;  %v405_v39 = vpop.f32.mrb[1].mxu0 }
  0xe8   : > { %v406_v40 = vadd.f32 %v1343_v36, %v405_v39  ;;  %v1366_v39 = vcombine.high %v513_v32, %v517_v33 }
  0xe9   : > { %v415_v41 = vmax.f32 %v411_v38, 0.0 }
  0xea   : > { %v414_v44 = vmax.f32 %v406_v40, 0.0  ;;  %v1368_v40 = vcombine.high %v514_v34, %v518_v35 }
  0xec   : > { %v424_v45 = vpack.c.bf16 %v415_v41, %v414_v44  ;;  %v521_v41 = vld [vmem:[%s1847_s5 + $0x90] sm:$0xff]  ;;  %v526_v44 = vld [vmem:[%s1847_s5 + $0xb8] sm:$0xff] }
  0xed   : > { %v1374_v47 = vcombine.high %v521_v41, %v525_v42  ;;  %v1376_v48 = vcombine.high %v522_v43, %v526_v44 }
  0xee   : > { %1442 = vmatmul.mubr.msk.bf16.vlgmr.msra.gmra.mrb[0].mxu1 %vm456_vm3, %v424_v45  ;;  %v1365_v45 = vcombine.low %v513_v32, %v517_v33 }
  0xef   : > { %974 = vmatpush1.bf16.msra.mxu1 %v1355_v16  ;;  %v505_v16 = vld [vmem:[%s1847_s5 + $0x10] sm:$0xff]  ;;  %1005 = vmatprep.mubr.bf16.mxu1 %v1503_v24 }
  0xf0   : > { %975 = vmatprep.subr.bf16.mxu1 %v1364_v46  ;;  %v1358_v19 = vcombine.high %v505_v16, %v509_v17  ;;  %v1357_v21 = vcombine.low %v505_v16, %v509_v17  ;;  %v1367_v46 = vcombine.low %v514_v34, %v518_v35  ;;  %v1408_v16 = vcombine.high %v554_v11, %v558_v12  ;;  %v561_v17 = vld [vmem:[%s1847_s5 + $0x1d0] sm:$0xff] }
  0xf2   : > { %1016 = vmatprep.subr.bf16.mxu0 %v1358_v19  ;;  %v562_v19 = vld [vmem:[%s1847_s5 + $0x1d8] sm:$0xff] }
  0xf3   : > { %976 = vmatpush1.bf16.msra.mxu1 %v1363_v49  ;;  %v529_v49 = vld [vmem:[%s1847_s5 + $0xd0] sm:$0xff] }
  0xf4   : > { %977 = vmatprep.subr.bf16.mxu1 %v1372_v50  ;;  %v533_v50 = vld [vmem:[%s1847_s5 + $0xf0] sm:$0xff] }
  0xf5   : > { %v1382_v55 = vcombine.high %v529_v49, %v533_v50 }
  0xf7   : > { %978 = vmatpush1.bf16.msra.mxu1 %v1371_v53  ;;  %v1373_v53 = vcombine.low %v521_v41, %v525_v42 }
  0xf8   : > { %979 = vmatprep.subr.bf16.mxu1 %v1380_v54  ;;  %v1375_v54 = vcombine.low %v522_v43, %v526_v44 }
  0xfb   : > { %980 = vmatpush1.bf16.msra.mxu1 %v1379_v57  ;;  %v537_v57 = vld [vmem:[%s1847_s5 + $0x110] sm:$0xff] }
  0xfc   : > { %981 = vmatprep.subr.bf16.mxu1 %v1388_v58  ;;  %v541_v58 = vld [vmem:[%s1847_s5 + $0x130] sm:$0xff] }
  0xfd   : > { %v1389_v5 = vcombine.low %v537_v57, %v541_v58 }
  0xff   : > { %982 = vmatpush1.bf16.msra.mxu1 %v1387_v61  ;;  %v1381_v61 = vcombine.low %v529_v49, %v533_v50 }
 0x100   : > { %983 = vmatprep.subr.bf16.mxu1 %v1396_v62  ;;  %v1383_v62 = vcombine.low %v530_v51, %v534_v52 }
 0x103   : > { %984 = vmatpush1.bf16.msra.mxu1 %v1395_v63  ;;  %v1390_v63 = vcombine.high %v537_v57, %v541_v58 }
 0x104   : > { %985 = vmatprep.subr.bf16.mxu1 %v1404_v7  ;;  %v1398_v7 = vcombine.high %v545_v1, %v549_v2 }
 0x107   : > { %986 = vmatpush1.bf16.msra.mxu1 %v1403_v6  ;;  %v1391_v6 = vcombine.low %v538_v59, %v542_v60 }
 0x108   : > { %987 = vmatprep.subr.bf16.mxu1 %v1412_v15  ;;  %v1406_v15 = vcombine.high %v553_v9, %v557_v10 }
 0x10b   : > { %988 = vmatpush1.bf16.msra.mxu1 %v1411_v14  ;;  %v1399_v14 = vcombine.low %v546_v3, %v550_v4 }
 0x10c   : > { %1059 = vmatprep.subr.bf16.mxu1 %v1360_v23  ;;  %v1414_v23 = vcombine.high %v561_v17, %v565_v18 }
 0x1c1   : > { %v494_v26 = vpop.f32.mrb[0].mxu1 }
 0x1c2   : > { %v495_v27 = vadd.f32 %v1347_v25, %v494_v26  ;;  %v1443_v28 = vpop.f32.mrb[1].mxu1  ;;  %v1415_v26 = vcombine.low %v562_v19, %v566_v20 }
 0x1c3   : > { %v497_v29 = vpop.f32.mrb[2].mxu1 }
 0x1c4   : > { %v498_v30 = vadd.f32 %v1347_v25, %v497_v29  ;;  %v1444_v31 = vpop.f32.mrb[3].mxu1  ;;  %v501_v36 = vmax.f32 %v495_v27, 0.0  ;;  %v1413_v25 = vcombine.low %v561_v17, %v565_v18  ;;  %v570_v27 = vlaneseq }
 0x1c5   : > { %v1795_v31 = vld [vmem:[%s1848_s6] sm:$0xff] }
 0x1c6   : > { %v502_v37 = vmax.f32 %v498_v30, 0.0  ;;  %v1788_v28 = vshrl.u32 %v570_v27, 7 }
 0x1c8   : > { %v1710_v38 = vpack.c.bf16 %v502_v37, %v501_v36  ;;  %v572_v29 = vsub.s32 0, %v1788_v28  ;;  %v580_v30 = vsub.s32 2, %v1788_v28  ;;  %v576_v32 = vsub.s32 1, %v1788_v28 }
 0x1c9   : > { %v584_v33 = vsub.s32 3, %v1788_v28 }
 0x1ca   : > { %963 = vmatmul.mubr.bf16.vlgmr.msra.gmra.mrb[4].mxu0 %v1710_v38  ;;  %1006 = vmatmul.mubr.bf16.vlgmr.msra.gmra.mrb[4].mxu1 %v1710_v38  ;;  %v573_v34 = vrot.slane %v1795_v31, %v572_v29  ;;  %v581_v35 = vrot.slane %v1795_v31, %v580_v30  ;;  %v577_v36 = vrot.slane %v1795_v31, %v576_v32 }
 0x1cb   : > { %1017 = vmatpush1.bf16.msra.mxu0 %v1357_v21  ;;  %1060 = vmatpush1.bf16.msra.mxu1 %v1359_v22  ;;  %v1405_v21 = vcombine.low %v553_v9, %v557_v10  ;;  %v1407_v22 = vcombine.low %v554_v11, %v558_v12  ;;  %v585_v37 = vrot.slane %v1795_v31, %v584_v33  ;;  %v1504_v9 = vmov 1966171168  }
 0x1cc   : > { %1018 = vmatprep.subr.bf16.mxu0 %v1366_v39  ;;  %1061 = vmatprep.subr.bf16.mxu1 %v1368_v40  ;;  %v1222_v10 = vunpack.c.l.s4 %v1504_v9 }
 0x1cd   : > { %1048 = vmatprep.mubr.bf16.mxu0 %v1503_v24  ;;  %1091 = vmatprep.mubr.bf16.mxu1 %v1503_v24  ;;  %v1416_v24 = vcombine.high %v562_v19, %v566_v20 }
 0x1ce   : > { %v1223_v19 = vunpack.c.0.s8 %v1222_v10 }
 0x1cf   : > { %1019 = vmatpush1.bf16.msra.mxu0 %v1365_v45  ;;  %1062 = vmatpush1.bf16.msra.mxu1 %v1367_v46 }
 0x1d0   : > { %1020 = vmatprep.subr.bf16.mxu0 %v1374_v47  ;;  %1063 = vmatprep.subr.bf16.mxu1 %v1376_v48  ;;  %v1804_v29 = vsub.s32 %v1223_v19, %v1788_v28 }
 0x1d3   : > { %1021 = vmatpush1.bf16.msra.mxu0 %v1373_v53  ;;  %1064 = vmatpush1.bf16.msra.mxu1 %v1375_v54 }
 0x1d4   : > { %1022 = vmatprep.subr.bf16.mxu0 %v1382_v55  ;;  %1065 = vmatprep.subr.bf16.mxu1 %v1384_v56 }
 0x1d7   : > { %1023 = vmatpush1.bf16.msra.mxu0 %v1381_v61  ;;  %1066 = vmatpush1.bf16.msra.mxu1 %v1383_v62 }
 0x1d8   : > { %1024 = vmatprep.subr.bf16.mxu0 %v1390_v63  ;;  %1067 = vmatprep.subr.bf16.mxu1 %v1392_v0 }
 0x1db   : > { %1025 = vmatpush1.bf16.msra.mxu0 %v1389_v5  ;;  %1068 = vmatpush1.bf16.msra.mxu1 %v1391_v6 }
 0x1dc   : > { %1026 = vmatprep.subr.bf16.mxu0 %v1398_v7  ;;  %1069 = vmatprep.subr.bf16.mxu1 %v1400_v8 }
 0x1df   : > { %1027 = vmatpush1.bf16.msra.mxu0 %v1397_v13  ;;  %1070 = vmatpush1.bf16.msra.mxu1 %v1399_v14 }
 0x1e0   : > { %1028 = vmatprep.subr.bf16.mxu0 %v1406_v15  ;;  %1071 = vmatprep.subr.bf16.mxu1 %v1408_v16 }
 0x1e3   : > { %1029 = vmatpush1.bf16.msra.mxu0 %v1405_v21  ;;  %1072 = vmatpush1.bf16.msra.mxu1 %v1407_v22 }
 0x1e4   : > { %1030 = vmatprep.subr.bf16.mxu0 %v1414_v23  ;;  %1073 = vmatprep.subr.bf16.mxu1 %v1416_v24 }
 0x1e7   : > { %1031 = vmatpush1.bf16.msra.mxu0 %v1413_v25  ;;  %1074 = vmatpush1.bf16.msra.mxu1 %v1415_v26 }
 0x1ea   : > { %1049 = vmatmul.mubr.bf16.vlgmr.msra.gmra.mrb[8].mxu0 %v1710_v38  ;;  %1092 = vmatmul.mubr.bf16.vlgmr.msra.gmra.mrb[8].mxu1 %v1710_v38 }
 0x29d   : > { %v964_v38 = vpop.f32.mrb[4].mxu0  ;;  %v1007_v39 = vpop.f32.mrb[4].mxu1 }
 0x29e   : > { %v965_v40 = vadd.f32 %v964_v38, %v573_v34  ;;  %v1008_v41 = vadd.f32 %v1007_v39, %v581_v35  ;;  %v966_v42 = vpop.f32.mrb[5].mxu0  ;;  %v1009_v43 = vpop.f32.mrb[5].mxu1  ;;  %v592_v39 = vsub.s32 5, %v1788_v28 }
 0x29f   : > { %v967_v44 = vadd.f32 %v966_v42, %v577_v36  ;;  %v1010_v45 = vadd.f32 %v1009_v43, %v585_v37  ;;  %v968_v46 = vpop.f32.mrb[6].mxu0  ;;  %v1011_v47 = vpop.f32.mrb[6].mxu1 }
 0x2a0   : > { %v969_v48 = vadd.f32 %v968_v46, %v573_v34  ;;  %v1012_v49 = vadd.f32 %v1011_v47, %v581_v35  ;;  %v970_v50 = vpop.f32.mrb[7].mxu0  ;;  %v1013_v51 = vpop.f32.mrb[7].mxu1  ;;  %v1102_v54 = vmax.f32 %v965_v40, 0.0  ;;  %v1104_v55 = vmax.f32 %v1008_v41, 0.0 }
 0x2a1   : > { %v971_v52 = vadd.f32 %v970_v50, %v577_v36  ;;  %v1014_v53 = vadd.f32 %v1013_v51, %v585_v37  ;;  %v1103_v58 = vmax.f32 %v967_v44, 0.0  ;;  %v1105_v59 = vmax.f32 %v1010_v45, 0.0 }
 0x2a2   : > { %v1110_v56 = vmax.f32 %v969_v48, 0.0  ;;  %v1112_v57 = vmax.f32 %v1012_v49, 0.0  ;;  %v588_v36 = vsub.s32 4, %v1788_v28  ;;  %v596_v37 = vsub.s32 6, %v1788_v28 }
 0x2a3   : > { %v1111_v60 = vmax.f32 %v971_v52, 0.0  ;;  %v1113_v61 = vmax.f32 %v1014_v53, 0.0  ;;  %v600_v40 = vsub.s32 7, %v1788_v28  ;;  %v593_v43 = vrot.slane %v1795_v31, %v592_v39 }
 0x2a4   : > { %v1126_v62 = vmax.f32 %v1102_v54, %v1110_v56  ;;  %v1128_v63 = vmax.f32 %v1104_v55, %v1112_v57  ;;  %v589_v41 = vrot.slane %v1795_v31, %v588_v36  ;;  %v597_v42 = vrot.slane %v1795_v31, %v596_v37 }
 0x2a5   : > { %v1127_v0 = vmax.f32 %v1103_v58, %v1111_v60  ;;  %v1129_v1 = vmax.f32 %v1105_v59, %v1113_v61  ;;  %v601_v44 = vrot.slane %v1795_v31, %v600_v40 }
 0x2a6   : > { %v1161_v2 = vrot.slane %v1126_v62, 4  ;;  %v1173_v3 = vrot.slane %v1128_v63, 4 }
 0x2a7   : > { %v1167_v4 = vrot.slane %v1127_v0, 4  ;;  %v1179_v5 = vrot.slane %v1129_v1, 4 }
 0x2a8   : > { %v1162_v6 = vmax.f32 %v1126_v62, %v1161_v2  ;;  %v1174_v7 = vmax.f32 %v1128_v63, %v1173_v3 }
 0x2a9   : > { %v1168_v8 = vmax.f32 %v1127_v0, %v1167_v4  ;;  %v1180_v11 = vmax.f32 %v1129_v1, %v1179_v5 }
 0x2aa   : > { %v1163_v12 = vrot.slane %v1162_v6, 2  ;;  %v1175_v13 = vrot.slane %v1174_v7, 2 }
 0x2ab   : > { %v1169_v14 = vrot.slane %v1168_v8, 2  ;;  %v1181_v15 = vrot.slane %v1180_v11, 2 }
 0x2ac   : > { %v1164_v16 = vmax.f32 %v1162_v6, %v1163_v12  ;;  %v1176_v17 = vmax.f32 %v1174_v7, %v1175_v13 }
 0x2ad   : > { %v1170_v18 = vmax.f32 %v1168_v8, %v1169_v14  ;;  %v1182_v20 = vmax.f32 %v1180_v11, %v1181_v15 }
 0x2ae   : > { %v1165_v21 = vrot.slane %v1164_v16, 1  ;;  %v1177_v22 = vrot.slane %v1176_v17, 1 }
 0x2af   : > { %v1171_v23 = vrot.slane %v1170_v18, 1  ;;  %v1183_v24 = vrot.slane %v1182_v20, 1 }
 0x2b0   : > { %v1166_v25 = vmax.f32 %v1164_v16, %v1165_v21  ;;  %v1178_v26 = vmax.f32 %v1176_v17, %v1177_v22 }
 0x2b1   : > { %v1172_v27 = vmax.f32 %v1170_v18, %v1171_v23  ;;  %v1184_v30 = vmax.f32 %v1182_v20, %v1183_v24 }
 0x2b3   : > { %v1217_v32 = vcombine.low %v1166_v25, %v1172_v27  ;;  %v1218_v33 = vcombine.low %v1178_v26, %v1184_v30 }
 0x2b5   : > { %v1807_v34 = vrot.slane %v1217_v32, %v1804_v29  ;;  %v1810_v35 = vrot.slane %v1218_v33, %v1804_v29 }
 0x2b7   : > { %v1249_v38 = vcombine.low %v1807_v34, %v1810_v35 }
 0x2bd   : > { %v1050_v45 = vpop.f32.mrb[8].mxu0  ;;  %v1093_v46 = vpop.f32.mrb[8].mxu1 }
 0x2be   : > { %v1051_v47 = vadd.f32 %v1050_v45, %v589_v41  ;;  %v1094_v48 = vadd.f32 %v1093_v46, %v597_v42  ;;  %v1052_v49 = vpop.f32.mrb[9].mxu0  ;;  %v1095_v50 = vpop.f32.mrb[9].mxu1 }
 0x2bf   : > { %v1053_v51 = vadd.f32 %v1052_v49, %v593_v43  ;;  %v1096_v52 = vadd.f32 %v1095_v50, %v601_v44  ;;  %v1054_v53 = vpop.f32.mrb[10].mxu0  ;;  %v1097_v54 = vpop.f32.mrb[10].mxu1 }
 0x2c0   : > { %v1055_v55 = vadd.f32 %v1054_v53, %v589_v41  ;;  %v1098_v28 = vadd.f32 %v1097_v54, %v597_v42  ;;  %v1056_v56 = vpop.f32.mrb[11].mxu0  ;;  %v1099_v57 = vpop.f32.mrb[11].mxu1  ;;  %v1106_v60 = vmax.f32 %v1051_v47, 0.0  ;;  %v1108_v61 = vmax.f32 %v1094_v48, 0.0 }
 0x2c1   : > { %v1057_v58 = vadd.f32 %v1056_v56, %v593_v43  ;;  %v1100_v59 = vadd.f32 %v1099_v57, %v601_v44  ;;  %v1107_v63 = vmax.f32 %v1053_v51, 0.0  ;;  %v1109_v0 = vmax.f32 %v1096_v52, 0.0 }
 0x2c2   : > { %v1114_v62 = vmax.f32 %v1055_v55, 0.0  ;;  %v1116_v31 = vmax.f32 %v1098_v28, 0.0  ;;  %v1257_v42 = vrot.slane %v1249_v38, %v1804_v29 }
 0x2c3   : > { %v1115_v1 = vmax.f32 %v1057_v58, 0.0  ;;  %v1117_v2 = vmax.f32 %v1100_v59, 0.0 }
 0x2c4   : > { %v1130_v3 = vmax.f32 %v1106_v60, %v1114_v62  ;;  %v1132_v4 = vmax.f32 %v1108_v61, %v1116_v31 }
 0x2c5   : > { %v1131_v5 = vmax.f32 %v1107_v63, %v1115_v1  ;;  %v1133_v6 = vmax.f32 %v1109_v0, %v1117_v2 }
 0x2c6   : > { %v1185_v7 = vrot.slane %v1130_v3, 4  ;;  %v1197_v8 = vrot.slane %v1132_v4, 4 }
 0x2c7   : > { %v1191_v9 = vrot.slane %v1131_v5, 4  ;;  %v1203_v10 = vrot.slane %v1133_v6, 4 }
 0x2c8   : > { %v1186_v11 = vmax.f32 %v1130_v3, %v1185_v7  ;;  %v1198_v12 = vmax.f32 %v1132_v4, %v1197_v8 }
 0x2c9   : > { %v1192_v13 = vmax.f32 %v1131_v5, %v1191_v9  ;;  %v1204_v14 = vmax.f32 %v1133_v6, %v1203_v10 }
 0x2ca   : > { %v1187_v15 = vrot.slane %v1186_v11, 2  ;;  %v1199_v16 = vrot.slane %v1198_v12, 2 }
 0x2cb   : > { %v1193_v17 = vrot.slane %v1192_v13, 2  ;;  %v1205_v18 = vrot.slane %v1204_v14, 2 }
 0x2cc   : > { %v1188_v19 = vmax.f32 %v1186_v11, %v1187_v15  ;;  %v1200_v20 = vmax.f32 %v1198_v12, %v1199_v16 }
 0x2cd   : > { %v1194_v21 = vmax.f32 %v1192_v13, %v1193_v17  ;;  %v1206_v22 = vmax.f32 %v1204_v14, %v1205_v18 }
 0x2ce   : > { %v1189_v23 = vrot.slane %v1188_v19, 1  ;;  %v1201_v24 = vrot.slane %v1200_v20, 1 }
 0x2cf   : > { %v1195_v25 = vrot.slane %v1194_v21, 1  ;;  %v1207_v26 = vrot.slane %v1206_v22, 1 }
 0x2d0   : > { %v1190_v27 = vmax.f32 %v1188_v19, %v1189_v23  ;;  %v1202_v30 = vmax.f32 %v1200_v20, %v1201_v24 }
 0x2d1   : > { %v1196_v32 = vmax.f32 %v1194_v21, %v1195_v25  ;;  %v1208_v33 = vmax.f32 %v1206_v22, %v1207_v26 }
 0x2d3   : > { %v1219_v36 = vcombine.low %v1190_v27, %v1196_v32  ;;  %v1220_v37 = vcombine.low %v1202_v30, %v1208_v33 }
 0x2d5   : > { %v1241_v39 = vrot.slane %v1219_v36, %v1804_v29  ;;  %v1248_v40 = vrot.slane %v1220_v37, %v1804_v29 }
 0x2d7   : > { %v1250_v41 = vcombine.low %v1241_v39, %v1248_v40 }
 0x2d9   : > { %v1264_v43 = vrot.slane %v1250_v41, %v1804_v29 }
 0x2db   : > { %v1265_v44 = vcombine.low %v1257_v42, %v1264_v43 }
 0x2dd   : > { %1267 = vst [vmem:[%s304_s23] sm:$0xff] %v1265_v44 }
 0x2de PF: > { %s17_s26 = sadd.s32 1, %s1499_s26   ;;  %s1850_s24 = smov %s1495_s25 }
 0x2df   : > { %p14_p5 = scmp.ge.s32.totalorder %s17_s26, 4   ;;  %s1851_s25 = smov %s1853_s27 }
 0x2e1   :  { %16 = sbr.rel (!%p14_p5) target bundleno = 2 (0x2), region = 86 }

// kernel: pointnet_forward.7
= control target key start
LH: loop header
LB: loop body
LE: loop exit
PB: predicated region body
PF: predicated region fallthrough
CT: control target
= control target key end

     0   :  { %v3527_v36 = vmov 1983009808   ;;  %v291_v38 = vlaneseq  ;;  %s4666_s1 = inlined_call_operand.vmem [shape: bf16[1024,512], index: 1, kind: input, shape index: {}]   ;;  %s4667_s0 = inlined_call_operand.vmem [shape: f32[2,1024], index: 0, kind: input, shape index: {}]   ;;  %s4668_s3 = inlined_call_operand.vmem [shape: bf16[512,256], index: 3, kind: input, shape index: {}]   ;;  %s4669_s2 = inlined_call_operand.vmem [shape: f32[1,512], index: 2, kind: input, shape index: {}]   ;;  %s4670_s5 = inlined_call_operand.vmem [shape: bf16[256,128], index: 5, kind: input, shape index: {}]   ;;  %s4671_s4 = inlined_call_operand.vmem [shape: f32[1,256], index: 4, kind: input, shape index: {}]   ;;  %s4672_s6 = inlined_call_operand.vmem [shape: f32[1,128], index: 6, kind: input, shape index: {}]   ;;  %s4673_s7 = inlined_call_operand.vmem [shape: f32[2,128], index: 7, kind: output, shape index: {}]  }
   0x1   :  { %v3029_v0 = vld [vmem:[%s4666_s1 + $0x4] ss:$16 sps:$4 sm:$0xff]   ;;  %v3033_v2 = vld [vmem:[%s4666_s1] ss:$16 sps:$4 sm:$0xff]   ;;  %v289_v37 = vunpack.c.l.s4 %v3527_v36 }
   0x2   :  { %v3031_v1 = vld [vmem:[%s4666_s1 + $0x204] ss:$16 sps:$4 sm:$0xff]   ;;  %1639 = vmatprep.subr.bf16.mxu1 %v3029_v0  ;;  %v3034_v3 = vld [vmem:[%s4666_s1 + $0x200] ss:$16 sps:$4 sm:$0xff]   ;;  %v3685_v43 = vshrl.u32 %v291_v38, 7 }
   0x3   :  { %1680 = vmatprep.subr.bf16.mxu0 %v3031_v1  ;;  %v3035_v4 = vld [vmem:[%s4666_s1 + $0x24] ss:$16 sps:$4 sm:$0xff]   ;;  %1640 = vmatpush1.bf16.msra.mxu1 %v3033_v2  ;;  %v3039_v6 = vld [vmem:[%s4666_s1 + $0x20] ss:$16 sps:$4 sm:$0xff]   ;;  %v290_v42 = vunpack.c.0.s8 %v289_v37  ;;  %v3156_v37 = vld [vmem:[%s4666_s1 + $0x8c] ss:$16 sps:$4 sm:$0xff]  }
   0x4   :  { %1681 = vmatpush1.bf16.msra.mxu0 %v3034_v3  ;;  %v3037_v5 = vld [vmem:[%s4666_s1 + $0x224] ss:$16 sps:$4 sm:$0xff]   ;;  %1641 = vmatprep.subr.bf16.mxu1 %v3035_v4  ;;  %v3040_v7 = vld [vmem:[%s4666_s1 + $0x220] ss:$16 sps:$4 sm:$0xff]  }
   0x5   :  { %1682 = vmatprep.subr.bf16.mxu0 %v3037_v5  ;;  %v3041_v8 = vld [vmem:[%s4666_s1 + $0x44] ss:$16 sps:$4 sm:$0xff]   ;;  %v3045_v10 = vld [vmem:[%s4666_s1 + $0x40] ss:$16 sps:$4 sm:$0xff]   ;;  %v3703_v49 = vsub.s32 %v290_v42, %v3685_v43 }
   0x6   :  { %v3043_v9 = vld [vmem:[%s4666_s1 + $0x244] ss:$16 sps:$4 sm:$0xff]   ;;  %v3046_v11 = vld [vmem:[%s4666_s1 + $0x240] ss:$16 sps:$4 sm:$0xff]  }
   0x7   :  { %1642 = vmatpush1.bf16.msra.mxu1 %v3039_v6  ;;  %v3047_v12 = vld [vmem:[%s4666_s1 + $0x64] ss:$16 sps:$4 sm:$0xff]   ;;  %v3051_v14 = vld [vmem:[%s4666_s1 + $0x60] ss:$16 sps:$4 sm:$0xff]  }
   0x8   :  { %1683 = vmatpush1.bf16.msra.mxu0 %v3040_v7  ;;  %1643 = vmatprep.subr.bf16.mxu1 %v3041_v8  ;;  %v3049_v13 = vld [vmem:[%s4666_s1 + $0x264] ss:$16 sps:$4 sm:$0xff]   ;;  %v3052_v15 = vld [vmem:[%s4666_s1 + $0x260] ss:$16 sps:$4 sm:$0xff]   ;;  %v3758_v8 = vld [vmem:[%s4667_s0 + $0x8] sm:$0xff] }
   0x9   :  { %1684 = vmatprep.subr.bf16.mxu0 %v3043_v9  ;;  %v3053_v16 = vld [vmem:[%s4666_s1 + $0x84] ss:$16 sps:$4 sm:$0xff]   ;;  %v3057_v18 = vld [vmem:[%s4666_s1 + $0x80] ss:$16 sps:$4 sm:$0xff]  }
   0xa   :  { %v3055_v17 = vld [vmem:[%s4666_s1 + $0x284] ss:$16 sps:$4 sm:$0xff]   ;;  %v3058_v19 = vld [vmem:[%s4666_s1 + $0x280] ss:$16 sps:$4 sm:$0xff]  }
   0xb   :  { %1644 = vmatpush1.bf16.msra.mxu1 %v3045_v10  ;;  %v3059_v20 = vld [vmem:[%s4666_s1 + $0xa4] ss:$16 sps:$4 sm:$0xff]   ;;  %v3063_v22 = vld [vmem:[%s4666_s1 + $0xa0] ss:$16 sps:$4 sm:$0xff]  }
   0xc   :  { %1685 = vmatpush1.bf16.msra.mxu0 %v3046_v11  ;;  %1645 = vmatprep.subr.bf16.mxu1 %v3047_v12  ;;  %v3061_v21 = vld [vmem:[%s4666_s1 + $0x2a4] ss:$16 sps:$4 sm:$0xff]   ;;  %v3064_v23 = vld [vmem:[%s4666_s1 + $0x2a0] ss:$16 sps:$4 sm:$0xff]  }
   0xd   :  { %1686 = vmatprep.subr.bf16.mxu0 %v3049_v13  ;;  %v3065_v24 = vld [vmem:[%s4666_s1 + $0xc4] ss:$16 sps:$4 sm:$0xff]   ;;  %v3069_v26 = vld [vmem:[%s4666_s1 + $0xc0] ss:$16 sps:$4 sm:$0xff]   ;;  %v3774_v13 = vrot.slane %v3758_v8, %v3703_v49 }
   0xe   :  { %v3067_v25 = vld [vmem:[%s4666_s1 + $0x2c4] ss:$16 sps:$4 sm:$0xff]   ;;  %v3070_v27 = vld [vmem:[%s4666_s1 + $0x2c0] ss:$16 sps:$4 sm:$0xff]  }
   0xf   :  { %1646 = vmatpush1.bf16.msra.mxu1 %v3051_v14  ;;  %v3071_v28 = vld [vmem:[%s4666_s1 + $0xe4] ss:$16 sps:$4 sm:$0xff]   ;;  %v3075_v30 = vld [vmem:[%s4666_s1 + $0xe0] ss:$16 sps:$4 sm:$0xff]  }
  0x10   :  { %1687 = vmatpush1.bf16.msra.mxu0 %v3052_v15  ;;  %1647 = vmatprep.subr.bf16.mxu1 %v3053_v16  ;;  %v3073_v29 = vld [vmem:[%s4666_s1 + $0x2e4] ss:$16 sps:$4 sm:$0xff]   ;;  %v3076_v31 = vld [vmem:[%s4666_s1 + $0x2e0] ss:$16 sps:$4 sm:$0xff]  }
  0x11   :  { %1688 = vmatprep.subr.bf16.mxu0 %v3055_v17  ;;  %v3077_v32 = vld [vmem:[%s4666_s1 + $0x104] ss:$16 sps:$4 sm:$0xff]   ;;  %v3081_v34 = vld [vmem:[%s4666_s1 + $0x100] ss:$16 sps:$4 sm:$0xff]   ;;  %v3132_v17 = vld [vmem:[%s4666_s1 + $0xc] ss:$16 sps:$4 sm:$0xff]  }
  0x12   :  { %v3079_v33 = vld [vmem:[%s4666_s1 + $0x304] ss:$16 sps:$4 sm:$0xff]   ;;  %v3082_v35 = vld [vmem:[%s4666_s1 + $0x300] ss:$16 sps:$4 sm:$0xff]  }
  0x13   :  { %1648 = vmatpush1.bf16.msra.mxu1 %v3057_v18  ;;  %v3083_v39 = vld [vmem:[%s4666_s1 + $0x124] ss:$16 sps:$4 sm:$0xff]   ;;  %v3087_v41 = vld [vmem:[%s4666_s1 + $0x120] ss:$16 sps:$4 sm:$0xff]   ;;  %v319_v18 = vcombine.high %v3774_v13, %v3774_v13 }
  0x14   :  { %1689 = vmatpush1.bf16.msra.mxu0 %v3058_v19  ;;  %1649 = vmatprep.subr.bf16.mxu1 %v3059_v20  ;;  %v3085_v40 = vld [vmem:[%s4666_s1 + $0x324] ss:$16 sps:$4 sm:$0xff]   ;;  %v3088_v44 = vld [vmem:[%s4666_s1 + $0x320] ss:$16 sps:$4 sm:$0xff]  }
  0x15   :  { %1690 = vmatprep.subr.bf16.mxu0 %v3061_v21  ;;  %v3089_v45 = vld [vmem:[%s4666_s1 + $0x144] ss:$16 sps:$4 sm:$0xff]   ;;  %v3093_v47 = vld [vmem:[%s4666_s1 + $0x140] ss:$16 sps:$4 sm:$0xff]  }
  0x16   :  { %v3091_v46 = vld [vmem:[%s4666_s1 + $0x344] ss:$16 sps:$4 sm:$0xff]   ;;  %v3094_v48 = vld [vmem:[%s4666_s1 + $0x340] ss:$16 sps:$4 sm:$0xff]  }
  0x17   :  { %1650 = vmatpush1.bf16.msra.mxu1 %v3063_v22  ;;  %v3095_v50 = vld [vmem:[%s4666_s1 + $0x164] ss:$16 sps:$4 sm:$0xff]   ;;  %v3099_v55 = vld [vmem:[%s4666_s1 + $0x160] ss:$16 sps:$4 sm:$0xff]   ;;  %v3130_v22 = vld [vmem:[%s4666_s1 + $0x8] ss:$16 sps:$4 sm:$0xff]  }
  0x18   :  { %1691 = vmatpush1.bf16.msra.mxu0 %v3064_v23  ;;  %1651 = vmatprep.subr.bf16.mxu1 %v3065_v24  ;;  %v3097_v51 = vld [vmem:[%s4666_s1 + $0x364] ss:$16 sps:$4 sm:$0xff]   ;;  %v3100_v56 = vld [vmem:[%s4666_s1 + $0x360] ss:$16 sps:$4 sm:$0xff]   ;;  %v3138_v24 = vld [vmem:[%s4666_s1 + $0x2c] ss:$16 sps:$4 sm:$0xff]  }
  0x19   :  { %1692 = vmatprep.subr.bf16.mxu0 %v3067_v25  ;;  %v283_v52 = vld [vmem:[%s4667_s0] sm:$0xff]  ;;  %v3806_v25 = vpack.c.bf16 %v319_v18, %v319_v18  ;;  %v3216_v18 = vld [vmem:[%s4666_s1 + $0x1cc] ss:$16 sps:$4 sm:$0xff]  }
  0x1a   :  { %v294_v53 = vrot.slane %v283_v52, %v3703_v49  ;;  %v287_v54 = vcombine.high %v283_v52, %v283_v52  ;;  %v3101_v57 = vld [vmem:[%s4666_s1 + $0x184] ss:$16 sps:$4 sm:$0xff]   ;;  %v3105_v63 = vld [vmem:[%s4666_s1 + $0x180] ss:$16 sps:$4 sm:$0xff]  }
  0x1b   :  { %1652 = vmatpush1.bf16.msra.mxu1 %v3069_v26  ;;  %v3103_v58 = vld [vmem:[%s4666_s1 + $0x384] ss:$16 sps:$4 sm:$0xff]   ;;  %v3106_v0 = vld [vmem:[%s4666_s1 + $0x380] ss:$16 sps:$4 sm:$0xff]  }
  0x1c   :  { %1693 = vmatpush1.bf16.msra.mxu0 %v3070_v27  ;;  %1653 = vmatprep.subr.bf16.mxu1 %v3071_v28  ;;  %v302_v59 = vcombine.high %v294_v53, %v294_v53  ;;  %v301_v60 = vrot.slane %v287_v54, %v3703_v49  ;;  %v3107_v1 = vld [vmem:[%s4666_s1 + $0x1a4] ss:$16 sps:$4 sm:$0xff]   ;;  %v3111_v4 = vld [vmem:[%s4666_s1 + $0x1a0] ss:$16 sps:$4 sm:$0xff]   ;;  %v3790_v19 = vpack.c.bf16 %v294_v53, %v294_v53  ;;  %v3136_v27 = vld [vmem:[%s4666_s1 + $0x28] ss:$16 sps:$4 sm:$0xff]  }
  0x1d   :  { %1694 = vmatprep.subr.bf16.mxu0 %v3073_v29  ;;  %v3109_v2 = vld [vmem:[%s4666_s1 + $0x3a4] ss:$16 sps:$4 sm:$0xff]   ;;  %v3112_v5 = vld [vmem:[%s4666_s1 + $0x3a0] ss:$16 sps:$4 sm:$0xff]   ;;  %v3144_v29 = vld [vmem:[%s4666_s1 + $0x4c] ss:$16 sps:$4 sm:$0xff]  }
  0x1e   :  { %v330_v61 = vpack.c.bf16 %v302_v59, %v302_v59  ;;  %v303_v62 = vcombine.high %v301_v60, %v301_v60  ;;  %v3113_v6 = vld [vmem:[%s4666_s1 + $0x1c4] ss:$16 sps:$4 sm:$0xff]   ;;  %v3117_v9 = vld [vmem:[%s4666_s1 + $0x1c0] ss:$16 sps:$4 sm:$0xff]   ;;  %v3792_v20 = vpack.c.bf16 %v301_v60, %v301_v60  ;;  %v3172_v53 = vld [vmem:[%s4666_s1 + $0xe8] ss:$16 sps:$4 sm:$0xff]  }
  0x1f   :  { %1654 = vmatpush1.bf16.msra.mxu1 %v3075_v30  ;;  %v3115_v7 = vld [vmem:[%s4666_s1 + $0x3c4] ss:$16 sps:$4 sm:$0xff]   ;;  %v3118_v10 = vld [vmem:[%s4666_s1 + $0x3c0] ss:$16 sps:$4 sm:$0xff]   ;;  %v3186_v59 = vld [vmem:[%s4666_s1 + $0x12c] ss:$16 sps:$4 sm:$0xff]  }
  0x20   :  { %1695 = vmatpush1.bf16.msra.mxu0 %v3076_v31  ;;  %1655 = vmatprep.subr.bf16.mxu1 %v3077_v32  ;;  %v3740_v3 = vpack.c.bf16 %v303_v62, %v303_v62  ;;  %v3119_v11 = vld [vmem:[%s4666_s1 + $0x1e4] ss:$16 sps:$4 sm:$0xff]   ;;  %v3123_v14 = vld [vmem:[%s4666_s1 + $0x1e0] ss:$16 sps:$4 sm:$0xff]   ;;  %v3142_v31 = vld [vmem:[%s4666_s1 + $0x48] ss:$16 sps:$4 sm:$0xff]  }
  0x21   :  { %1696 = vmatprep.subr.bf16.mxu0 %v3079_v33  ;;  %1671 = vmatprep.mubr.bf16.mxu1 %v330_v61  ;;  %v3121_v12 = vld [vmem:[%s4666_s1 + $0x3e4] ss:$16 sps:$4 sm:$0xff]   ;;  %v3124_v15 = vld [vmem:[%s4666_s1 + $0x3e0] ss:$16 sps:$4 sm:$0xff]   ;;  %v3150_v33 = vld [vmem:[%s4666_s1 + $0x6c] ss:$16 sps:$4 sm:$0xff]  }
  0x22   :  { %1712 = vmatprep.mubr.bf16.mxu0 %v3740_v3  ;;  %v3129_v16 = vld [vmem:[%s4666_s1 + $0x404] ss:$16 sps:$4 sm:$0xff]   ;;  %v3127_v21 = vld [vmem:[%s4666_s1 + $0x400] ss:$16 sps:$4 sm:$0xff]  }
  0x23   :  { %1656 = vmatpush1.bf16.msra.mxu1 %v3081_v34  ;;  %v3135_v23 = vld [vmem:[%s4666_s1 + $0x424] ss:$16 sps:$4 sm:$0xff]   ;;  %v3133_v26 = vld [vmem:[%s4666_s1 + $0x420] ss:$16 sps:$4 sm:$0xff]  }
  0x24   :  { %1697 = vmatpush1.bf16.msra.mxu0 %v3082_v35  ;;  %1657 = vmatprep.subr.bf16.mxu1 %v3083_v39  ;;  %v3141_v28 = vld [vmem:[%s4666_s1 + $0x444] ss:$16 sps:$4 sm:$0xff]   ;;  %v3139_v30 = vld [vmem:[%s4666_s1 + $0x440] ss:$16 sps:$4 sm:$0xff]   ;;  %v3148_v35 = vld [vmem:[%s4666_s1 + $0x68] ss:$16 sps:$4 sm:$0xff]  }
  0x25   :  { %1698 = vmatprep.subr.bf16.mxu0 %v3085_v40  ;;  %v3147_v32 = vld [vmem:[%s4666_s1 + $0x464] ss:$16 sps:$4 sm:$0xff]   ;;  %v3145_v34 = vld [vmem:[%s4666_s1 + $0x460] ss:$16 sps:$4 sm:$0xff]   ;;  %v3154_v39 = vld [vmem:[%s4666_s1 + $0x88] ss:$16 sps:$4 sm:$0xff]  }
  0x26   :  { %v3153_v36 = vld [vmem:[%s4666_s1 + $0x484] ss:$16 sps:$4 sm:$0xff]   ;;  %v3151_v38 = vld [vmem:[%s4666_s1 + $0x480] ss:$16 sps:$4 sm:$0xff]  }
  0x27   :  { %1658 = vmatpush1.bf16.msra.mxu1 %v3087_v41  ;;  %v3159_v40 = vld [vmem:[%s4666_s1 + $0x4a4] ss:$16 sps:$4 sm:$0xff]   ;;  %v3162_v41 = vld [vmem:[%s4666_s1 + $0xac] ss:$16 sps:$4 sm:$0xff]   ;;  %v3157_v42 = vld [vmem:[%s4666_s1 + $0x4a0] ss:$16 sps:$4 sm:$0xff]  }
  0x28   :  { %1699 = vmatpush1.bf16.msra.mxu0 %v3088_v44  ;;  %1659 = vmatprep.subr.bf16.mxu1 %v3089_v45  ;;  %v3160_v44 = vld [vmem:[%s4666_s1 + $0xa8] ss:$16 sps:$4 sm:$0xff]   ;;  %v3165_v45 = vld [vmem:[%s4666_s1 + $0x4c4] ss:$16 sps:$4 sm:$0xff]   ;;  %v3169_v52 = vld [vmem:[%s4666_s1 + $0x4e0] ss:$16 sps:$4 sm:$0xff]  }
  0x29   :  { %1700 = vmatprep.subr.bf16.mxu0 %v3091_v46  ;;  %v3168_v46 = vld [vmem:[%s4666_s1 + $0xcc] ss:$16 sps:$4 sm:$0xff]   ;;  %v3177_v54 = vld [vmem:[%s4666_s1 + $0x504] ss:$16 sps:$4 sm:$0xff]   ;;  %v3181_v60 = vld [vmem:[%s4666_s1 + $0x520] ss:$16 sps:$4 sm:$0xff]  }
  0x2a   :  { %v3189_v62 = vld [vmem:[%s4666_s1 + $0x544] ss:$16 sps:$4 sm:$0xff]  }
  0x2b   :  { %1660 = vmatpush1.bf16.msra.mxu1 %v3093_v47  ;;  %v3163_v47 = vld [vmem:[%s4666_s1 + $0x4c0] ss:$16 sps:$4 sm:$0xff]  }
  0x2c   :  { %1701 = vmatpush1.bf16.msra.mxu0 %v3094_v48  ;;  %1661 = vmatprep.subr.bf16.mxu1 %v3095_v50  ;;  %v3166_v48 = vld [vmem:[%s4666_s1 + $0xc8] ss:$16 sps:$4 sm:$0xff]   ;;  %v3171_v50 = vld [vmem:[%s4666_s1 + $0x4e4] ss:$16 sps:$4 sm:$0xff]  }
  0x2d   :  { %1702 = vmatprep.subr.bf16.mxu0 %v3097_v51  ;;  %v3174_v51 = vld [vmem:[%s4666_s1 + $0xec] ss:$16 sps:$4 sm:$0xff]  }
  0x2f   :  { %1662 = vmatpush1.bf16.msra.mxu1 %v3099_v55  ;;  %v3180_v55 = vld [vmem:[%s4666_s1 + $0x10c] ss:$16 sps:$4 sm:$0xff]  }
  0x30   :  { %1703 = vmatpush1.bf16.msra.mxu0 %v3100_v56  ;;  %1663 = vmatprep.subr.bf16.mxu1 %v3101_v57  ;;  %v3175_v56 = vld [vmem:[%s4666_s1 + $0x500] ss:$16 sps:$4 sm:$0xff]   ;;  %v3178_v57 = vld [vmem:[%s4666_s1 + $0x108] ss:$16 sps:$4 sm:$0xff]  }
  0x31   :  { %1704 = vmatprep.subr.bf16.mxu0 %v3103_v58  ;;  %v3183_v58 = vld [vmem:[%s4666_s1 + $0x524] ss:$16 sps:$4 sm:$0xff]  }
  0x33   :  { %1664 = vmatpush1.bf16.msra.mxu1 %v3105_v63  ;;  %v3192_v63 = vld [vmem:[%s4666_s1 + $0x14c] ss:$16 sps:$4 sm:$0xff]  }
  0x34   :  { %1705 = vmatpush1.bf16.msra.mxu0 %v3106_v0  ;;  %1665 = vmatprep.subr.bf16.mxu1 %v3107_v1  ;;  %v3187_v0 = vld [vmem:[%s4666_s1 + $0x540] ss:$16 sps:$4 sm:$0xff]   ;;  %v3190_v1 = vld [vmem:[%s4666_s1 + $0x148] ss:$16 sps:$4 sm:$0xff]  }
  0x35   :  { %1706 = vmatprep.subr.bf16.mxu0 %v3109_v2  ;;  %v3195_v2 = vld [vmem:[%s4666_s1 + $0x564] ss:$16 sps:$4 sm:$0xff]  }
  0x37   :  { %1666 = vmatpush1.bf16.msra.mxu1 %v3111_v4  ;;  %v3198_v4 = vld [vmem:[%s4666_s1 + $0x16c] ss:$16 sps:$4 sm:$0xff]  }
  0x38   :  { %1707 = vmatpush1.bf16.msra.mxu0 %v3112_v5  ;;  %1667 = vmatprep.subr.bf16.mxu1 %v3113_v6  ;;  %v3193_v5 = vld [vmem:[%s4666_s1 + $0x560] ss:$16 sps:$4 sm:$0xff]   ;;  %v3196_v6 = vld [vmem:[%s4666_s1 + $0x168] ss:$16 sps:$4 sm:$0xff]  }
  0x39   :  { %1708 = vmatprep.subr.bf16.mxu0 %v3115_v7  ;;  %v3201_v7 = vld [vmem:[%s4666_s1 + $0x584] ss:$16 sps:$4 sm:$0xff]  }
  0x3b   :  { %1668 = vmatpush1.bf16.msra.mxu1 %v3117_v9  ;;  %v3204_v9 = vld [vmem:[%s4666_s1 + $0x18c] ss:$16 sps:$4 sm:$0xff]  }
  0x3c   :  { %1709 = vmatpush1.bf16.msra.mxu0 %v3118_v10  ;;  %1669 = vmatprep.subr.bf16.mxu1 %v3119_v11  ;;  %v3199_v10 = vld [vmem:[%s4666_s1 + $0x580] ss:$16 sps:$4 sm:$0xff]   ;;  %v3202_v11 = vld [vmem:[%s4666_s1 + $0x188] ss:$16 sps:$4 sm:$0xff]  }
  0x3d   :  { %1710 = vmatprep.subr.bf16.mxu0 %v3121_v12  ;;  %v3207_v12 = vld [vmem:[%s4666_s1 + $0x5a4] ss:$16 sps:$4 sm:$0xff]  }
  0x3f   :  { %1670 = vmatpush1.bf16.msra.mxu1 %v3123_v14  ;;  %v3210_v14 = vld [vmem:[%s4666_s1 + $0x1ac] ss:$16 sps:$4 sm:$0xff]  }
  0x40   :  { %1711 = vmatpush1.bf16.msra.mxu0 %v3124_v15  ;;  %1803 = vmatprep.subr.bf16.mxu1 %v3132_v17  ;;  %v3205_v15 = vld [vmem:[%s4666_s1 + $0x5a0] ss:$16 sps:$4 sm:$0xff]   ;;  %v3213_v17 = vld [vmem:[%s4666_s1 + $0x5c4] ss:$16 sps:$4 sm:$0xff]  }
  0x41   :  { %1721 = vmatprep.subr.bf16.mxu0 %v3129_v16  ;;  %v3208_v16 = vld [vmem:[%s4666_s1 + $0x1a8] ss:$16 sps:$4 sm:$0xff]  }
  0x42   :  { %1672 = vmatmul.mubr.bf16.vlgmr.msra.gmra.mrb[0].mxu1 %v3790_v19 }
  0x43   :  { %1713 = vmatmul.mubr.bf16.vlgmr.msra.gmra.mrb[0].mxu0 %v3792_v20  ;;  %1804 = vmatpush1.bf16.msra.mxu1 %v3130_v22  ;;  %v3211_v22 = vld [vmem:[%s4666_s1 + $0x5c0] ss:$16 sps:$4 sm:$0xff]  }
  0x44   :  { %1722 = vmatpush1.bf16.msra.mxu0 %v3127_v21  ;;  %1805 = vmatprep.subr.bf16.mxu1 %v3138_v24  ;;  %v304_v21 = vcombine.high %v3758_v8, %v3758_v8  ;;  %v3219_v24 = vld [vmem:[%s4666_s1 + $0x5e4] ss:$16 sps:$4 sm:$0xff]   ;;  %v3222_v8 = vld [vmem:[%s4666_s1 + $0x1ec] ss:$16 sps:$4 sm:$0xff]  }
  0x45   :  { %1723 = vmatprep.subr.bf16.mxu0 %v3135_v23  ;;  %1753 = vmatprep.mubr.bf16.mxu0 %v3806_v25  ;;  %v3214_v23 = vld [vmem:[%s4666_s1 + $0x1c8] ss:$16 sps:$4 sm:$0xff]  }
  0x46   :  { %1835 = vmatprep.mubr.bf16.mxu1 %v330_v61  ;;  %v3184_v61 = vld [vmem:[%s4666_s1 + $0x128] ss:$16 sps:$4 sm:$0xff]  }
  0x47   :  { %1806 = vmatpush1.bf16.msra.mxu1 %v3136_v27  ;;  %v3217_v27 = vld [vmem:[%s4666_s1 + $0x5e0] ss:$16 sps:$4 sm:$0xff]  }
  0x48   :  { %1724 = vmatpush1.bf16.msra.mxu0 %v3133_v26  ;;  %1807 = vmatprep.subr.bf16.mxu1 %v3144_v29  ;;  %v3982_v26 = vrot.slane %v304_v21, %v3703_v49  ;;  %v3225_v29 = vld [vmem:[%s4666_s1 + $0x604] ss:$16 sps:$4 sm:$0xff]   ;;  %v3228_v49 = vld [vmem:[%s4666_s1 + $0x20c] ss:$16 sps:$4 sm:$0xff]   ;;  %v3295_v21 = vld [vmem:[%s4666_s1 + $0x780] ss:$16 sps:$4 sm:$0xff]  }
  0x49   :  { %1725 = vmatprep.subr.bf16.mxu0 %v3141_v28  ;;  %v3220_v28 = vld [vmem:[%s4666_s1 + $0x1e8] ss:$16 sps:$4 sm:$0xff]  }
  0x4b   :  { %1808 = vmatpush1.bf16.msra.mxu1 %v3142_v31  ;;  %v4000_v31 = vpack.c.bf16 %v3774_v13, %v3774_v13  ;;  %v3234_v13 = vld [vmem:[%s4666_s1 + $0x22c] ss:$16 sps:$4 sm:$0xff]  }
  0x4c   :  { %1726 = vmatpush1.bf16.msra.mxu0 %v3139_v30  ;;  %1809 = vmatprep.subr.bf16.mxu1 %v3150_v33  ;;  %v320_v30 = vcombine.high %v3982_v26, %v3982_v26  ;;  %v3226_v33 = vld [vmem:[%s4666_s1 + $0x208] ss:$16 sps:$4 sm:$0xff]  }
  0x4d   :  { %1727 = vmatprep.subr.bf16.mxu0 %v3147_v32  ;;  %v3223_v32 = vld [vmem:[%s4666_s1 + $0x600] ss:$16 sps:$4 sm:$0xff]  }
  0x4f   :  { %1810 = vmatpush1.bf16.msra.mxu1 %v3148_v35  ;;  %v4014_v35 = vpack.c.bf16 %v320_v30, %v320_v30  ;;  %v3310_v30 = vld [vmem:[%s4666_s1 + $0x3c8] ss:$16 sps:$4 sm:$0xff]  }
  0x50   :  { %1728 = vmatpush1.bf16.msra.mxu0 %v3145_v34  ;;  %1811 = vmatprep.subr.bf16.mxu1 %v3156_v37  ;;  %v3231_v34 = vld [vmem:[%s4666_s1 + $0x624] ss:$16 sps:$4 sm:$0xff]   ;;  %v3232_v37 = vld [vmem:[%s4666_s1 + $0x228] ss:$16 sps:$4 sm:$0xff]  }
  0x51   :  { %1729 = vmatprep.subr.bf16.mxu0 %v3153_v36  ;;  %v3229_v36 = vld [vmem:[%s4666_s1 + $0x620] ss:$16 sps:$4 sm:$0xff]  }
  0x53   :  { %1812 = vmatpush1.bf16.msra.mxu1 %v3154_v39  ;;  %v3235_v39 = vld [vmem:[%s4666_s1 + $0x640] ss:$16 sps:$4 sm:$0xff]  }
  0x54   :  { %1730 = vmatpush1.bf16.msra.mxu0 %v3151_v38  ;;  %1813 = vmatprep.subr.bf16.mxu1 %v3162_v41  ;;  %v3237_v38 = vld [vmem:[%s4666_s1 + $0x644] ss:$16 sps:$4 sm:$0xff]  }
  0x55   :  { %1731 = vmatprep.subr.bf16.mxu0 %v3159_v40  ;;  %v3238_v40 = vld [vmem:[%s4666_s1 + $0x248] ss:$16 sps:$4 sm:$0xff]   ;;  %v3243_v41 = vld [vmem:[%s4666_s1 + $0x664] ss:$16 sps:$4 sm:$0xff]  }
  0x57   :  { %1814 = vmatpush1.bf16.msra.mxu1 %v3160_v44  ;;  %v3244_v44 = vld [vmem:[%s4666_s1 + $0x268] ss:$16 sps:$4 sm:$0xff]  }
  0x58   :  { %1732 = vmatpush1.bf16.msra.mxu0 %v3157_v42  ;;  %1815 = vmatprep.subr.bf16.mxu1 %v3168_v46  ;;  %v3241_v42 = vld [vmem:[%s4666_s1 + $0x660] ss:$16 sps:$4 sm:$0xff]   ;;  %v3252_v46 = vld [vmem:[%s4666_s1 + $0x28c] ss:$16 sps:$4 sm:$0xff]  }
  0x59   :  { %1733 = vmatprep.subr.bf16.mxu0 %v3165_v45  ;;  %v3249_v45 = vld [vmem:[%s4666_s1 + $0x684] ss:$16 sps:$4 sm:$0xff]  }
  0x5b   :  { %1816 = vmatpush1.bf16.msra.mxu1 %v3166_v48  ;;  %v3250_v48 = vld [vmem:[%s4666_s1 + $0x288] ss:$16 sps:$4 sm:$0xff]  }
  0x5c   :  { %1734 = vmatpush1.bf16.msra.mxu0 %v3163_v47  ;;  %1817 = vmatprep.subr.bf16.mxu1 %v3174_v51  ;;  %v3247_v47 = vld [vmem:[%s4666_s1 + $0x680] ss:$16 sps:$4 sm:$0xff]   ;;  %v3258_v51 = vld [vmem:[%s4666_s1 + $0x2ac] ss:$16 sps:$4 sm:$0xff]  }
  0x5d   :  { %1735 = vmatprep.subr.bf16.mxu0 %v3171_v50  ;;  %v3255_v50 = vld [vmem:[%s4666_s1 + $0x6a4] ss:$16 sps:$4 sm:$0xff]  }
  0x5f   :  { %1818 = vmatpush1.bf16.msra.mxu1 %v3172_v53  ;;  %v3256_v53 = vld [vmem:[%s4666_s1 + $0x2a8] ss:$16 sps:$4 sm:$0xff]  }
  0x60   :  { %1736 = vmatpush1.bf16.msra.mxu0 %v3169_v52  ;;  %1819 = vmatprep.subr.bf16.mxu1 %v3180_v55  ;;  %v3253_v52 = vld [vmem:[%s4666_s1 + $0x6a0] ss:$16 sps:$4 sm:$0xff]   ;;  %v3264_v55 = vld [vmem:[%s4666_s1 + $0x2cc] ss:$16 sps:$4 sm:$0xff]  }
  0x61   :  { %1737 = vmatprep.subr.bf16.mxu0 %v3177_v54  ;;  %v3261_v54 = vld [vmem:[%s4666_s1 + $0x6c4] ss:$16 sps:$4 sm:$0xff]  }
  0x63   :  { %1820 = vmatpush1.bf16.msra.mxu1 %v3178_v57  ;;  %v3262_v57 = vld [vmem:[%s4666_s1 + $0x2c8] ss:$16 sps:$4 sm:$0xff]  }
  0x64   :  { %1738 = vmatpush1.bf16.msra.mxu0 %v3175_v56  ;;  %1821 = vmatprep.subr.bf16.mxu1 %v3186_v59  ;;  %v3259_v56 = vld [vmem:[%s4666_s1 + $0x6c0] ss:$16 sps:$4 sm:$0xff]   ;;  %v3270_v59 = vld [vmem:[%s4666_s1 + $0x2ec] ss:$16 sps:$4 sm:$0xff]  }
  0x65   :  { %1739 = vmatprep.subr.bf16.mxu0 %v3183_v58  ;;  %v3267_v58 = vld [vmem:[%s4666_s1 + $0x6e4] ss:$16 sps:$4 sm:$0xff]  }
  0x67   :  { %1822 = vmatpush1.bf16.msra.mxu1 %v3184_v61  ;;  %v3268_v61 = vld [vmem:[%s4666_s1 + $0x2e8] ss:$16 sps:$4 sm:$0xff]  }
  0x68   :  { %1740 = vmatpush1.bf16.msra.mxu0 %v3181_v60  ;;  %1823 = vmatprep.subr.bf16.mxu1 %v3192_v63  ;;  %v3265_v60 = vld [vmem:[%s4666_s1 + $0x6e0] ss:$16 sps:$4 sm:$0xff]   ;;  %v3276_v63 = vld [vmem:[%s4666_s1 + $0x30c] ss:$16 sps:$4 sm:$0xff]  }
  0x69   :  { %1741 = vmatprep.subr.bf16.mxu0 %v3189_v62  ;;  %v3273_v62 = vld [vmem:[%s4666_s1 + $0x704] ss:$16 sps:$4 sm:$0xff]  }
  0x6b   :  { %1824 = vmatpush1.bf16.msra.mxu1 %v3190_v1  ;;  %v3274_v1 = vld [vmem:[%s4666_s1 + $0x308] ss:$16 sps:$4 sm:$0xff]  }
  0x6c   :  { %1742 = vmatpush1.bf16.msra.mxu0 %v3187_v0  ;;  %1825 = vmatprep.subr.bf16.mxu1 %v3198_v4  ;;  %v3271_v0 = vld [vmem:[%s4666_s1 + $0x700] ss:$16 sps:$4 sm:$0xff]   ;;  %v3282_v4 = vld [vmem:[%s4666_s1 + $0x32c] ss:$16 sps:$4 sm:$0xff]  }
  0x6d   :  { %1743 = vmatprep.subr.bf16.mxu0 %v3195_v2  ;;  %v3279_v2 = vld [vmem:[%s4666_s1 + $0x724] ss:$16 sps:$4 sm:$0xff]  }
  0x6f   :  { %1826 = vmatpush1.bf16.msra.mxu1 %v3196_v6  ;;  %v3280_v6 = vld [vmem:[%s4666_s1 + $0x328] ss:$16 sps:$4 sm:$0xff]  }
  0x70   :  { %1744 = vmatpush1.bf16.msra.mxu0 %v3193_v5  ;;  %1827 = vmatprep.subr.bf16.mxu1 %v3204_v9  ;;  %v3277_v5 = vld [vmem:[%s4666_s1 + $0x720] ss:$16 sps:$4 sm:$0xff]   ;;  %v3288_v9 = vld [vmem:[%s4666_s1 + $0x34c] ss:$16 sps:$4 sm:$0xff]  }
  0x71   :  { %1745 = vmatprep.subr.bf16.mxu0 %v3201_v7  ;;  %v3285_v7 = vld [vmem:[%s4666_s1 + $0x744] ss:$16 sps:$4 sm:$0xff]  }
  0x73   :  { %1828 = vmatpush1.bf16.msra.mxu1 %v3202_v11  ;;  %v3286_v11 = vld [vmem:[%s4666_s1 + $0x348] ss:$16 sps:$4 sm:$0xff]  }
  0x74   :  { %1746 = vmatpush1.bf16.msra.mxu0 %v3199_v10  ;;  %1829 = vmatprep.subr.bf16.mxu1 %v3210_v14  ;;  %v3283_v10 = vld [vmem:[%s4666_s1 + $0x740] ss:$16 sps:$4 sm:$0xff]   ;;  %v3294_v14 = vld [vmem:[%s4666_s1 + $0x36c] ss:$16 sps:$4 sm:$0xff]  }
  0x75   :  { %1747 = vmatprep.subr.bf16.mxu0 %v3207_v12  ;;  %v3291_v12 = vld [vmem:[%s4666_s1 + $0x764] ss:$16 sps:$4 sm:$0xff]  }
  0x77   :  { %1830 = vmatpush1.bf16.msra.mxu1 %v3208_v16  ;;  %v3292_v16 = vld [vmem:[%s4666_s1 + $0x368] ss:$16 sps:$4 sm:$0xff]  }
  0x78   :  { %1748 = vmatpush1.bf16.msra.mxu0 %v3205_v15  ;;  %1831 = vmatprep.subr.bf16.mxu1 %v3216_v18  ;;  %v3289_v15 = vld [vmem:[%s4666_s1 + $0x760] ss:$16 sps:$4 sm:$0xff]   ;;  %v3300_v18 = vld [vmem:[%s4666_s1 + $0x38c] ss:$16 sps:$4 sm:$0xff]  }
  0x79   :  { %1749 = vmatprep.subr.bf16.mxu0 %v3213_v17  ;;  %v3297_v17 = vld [vmem:[%s4666_s1 + $0x784] ss:$16 sps:$4 sm:$0xff]  }
  0x7b   :  { %1832 = vmatpush1.bf16.msra.mxu1 %v3214_v23  ;;  %v3303_v23 = vld [vmem:[%s4666_s1 + $0x7a4] ss:$16 sps:$4 sm:$0xff]  }
  0x7c   :  { %1750 = vmatpush1.bf16.msra.mxu0 %v3211_v22  ;;  %1833 = vmatprep.subr.bf16.mxu1 %v3222_v8  ;;  %v3298_v22 = vld [vmem:[%s4666_s1 + $0x388] ss:$16 sps:$4 sm:$0xff]   ;;  %v3301_v8 = vld [vmem:[%s4666_s1 + $0x7a0] ss:$16 sps:$4 sm:$0xff]  }
  0x7d   :  { %1751 = vmatprep.subr.bf16.mxu0 %v3219_v24  ;;  %v3306_v24 = vld [vmem:[%s4666_s1 + $0x3ac] ss:$16 sps:$4 sm:$0xff]  }
  0x7f   :  { %1834 = vmatpush1.bf16.msra.mxu1 %v3220_v28  ;;  %v3309_v28 = vld [vmem:[%s4666_s1 + $0x7c4] ss:$16 sps:$4 sm:$0xff]  }
  0x80   :  { %1752 = vmatpush1.bf16.msra.mxu0 %v3217_v27  ;;  %1844 = vmatprep.subr.bf16.mxu1 %v3228_v49  ;;  %v3304_v27 = vld [vmem:[%s4666_s1 + $0x3a8] ss:$16 sps:$4 sm:$0xff]   ;;  %v3307_v49 = vld [vmem:[%s4666_s1 + $0x7c0] ss:$16 sps:$4 sm:$0xff]  }
  0x81   :  { %1762 = vmatprep.subr.bf16.mxu0 %v3225_v29  ;;  %v3312_v29 = vld [vmem:[%s4666_s1 + $0x3cc] ss:$16 sps:$4 sm:$0xff]  }
  0x82   :  { %1836 = vmatmul.mubr.bf16.vlgmr.msra.gmra.mrb[4].mxu1 %v3790_v19  ;;  %v3240_v19 = vld [vmem:[%s4666_s1 + $0x24c] ss:$16 sps:$4 sm:$0xff]  }
  0x83   :  { %1754 = vmatmul.mubr.bf16.vlgmr.msra.gmra.mrb[0].mxu0 %v4000_v31  ;;  %1845 = vmatpush1.bf16.msra.mxu1 %v3226_v33  ;;  %v3318_v33 = vld [vmem:[%s4666_s1 + $0x3ec] ss:$16 sps:$4 sm:$0xff]  }
  0x84   :  { %1763 = vmatpush1.bf16.msra.mxu0 %v3223_v32  ;;  %1846 = vmatprep.subr.bf16.mxu1 %v3234_v13  ;;  %v3315_v32 = vld [vmem:[%s4666_s1 + $0x7e4] ss:$16 sps:$4 sm:$0xff]   ;;  %v3316_v13 = vld [vmem:[%s4666_s1 + $0x3e8] ss:$16 sps:$4 sm:$0xff]  }
  0x85   :  { %1764 = vmatprep.subr.bf16.mxu0 %v3231_v34  ;;  %1794 = vmatprep.mubr.bf16.mxu0 %v4014_v35  ;;  %v3313_v34 = vld [vmem:[%s4666_s1 + $0x7e0] ss:$16 sps:$4 sm:$0xff]  }
  0x86   :  { %1876 = vmatprep.mubr.bf16.mxu1 %v3740_v3  ;;  %v3246_v3 = vld [vmem:[%s4666_s1 + $0x26c] ss:$16 sps:$4 sm:$0xff]  }
  0x87   :  { %1847 = vmatpush1.bf16.msra.mxu1 %v3232_v37  ;;  %v4199_v37 = vpack.c.bf16 %v3982_v26, %v3982_v26  ;;  %v3322_v26 = vld [vmem:[%s4666_s1 + $0x428] ss:$16 sps:$4 sm:$0xff]  }
  0x88   :  { %1765 = vmatpush1.bf16.msra.mxu0 %v3229_v36  ;;  %1848 = vmatprep.subr.bf16.mxu1 %v3240_v19  ;;  %v3321_v36 = vld [vmem:[%s4666_s1 + $0x40c] ss:$16 sps:$4 sm:$0xff]  }
  0x89   :  { %1766 = vmatprep.subr.bf16.mxu0 %v3237_v38  ;;  %v3319_v38 = vld [vmem:[%s4666_s1 + $0x408] ss:$16 sps:$4 sm:$0xff]   ;;  %v3324_v19 = vld [vmem:[%s4666_s1 + $0x42c] ss:$16 sps:$4 sm:$0xff]  }
  0x8b   :  { %1849 = vmatpush1.bf16.msra.mxu1 %v3238_v40  ;;  %v3415_v40 = vld [vmem:[%s4668_s3] ss:$8 sps:$4 sm:$0xff]  }
  0x8c   :  { %1767 = vmatpush1.bf16.msra.mxu0 %v3235_v39  ;;  %1850 = vmatprep.subr.bf16.mxu1 %v3246_v3  ;;  %v3327_v39 = vld [vmem:[%s4666_s1 + $0x44c] ss:$16 sps:$4 sm:$0xff]   ;;  %v3325_v3 = vld [vmem:[%s4666_s1 + $0x448] ss:$16 sps:$4 sm:$0xff]  }
  0x8d   :  { %1768 = vmatprep.subr.bf16.mxu0 %v3243_v41  ;;  %v3420_v41 = vld [vmem:[%s4668_s3 + $0x14] ss:$8 sps:$4 sm:$0xff]  }
  0x8f   :  { %1851 = vmatpush1.bf16.msra.mxu1 %v3244_v44  ;;  %v3423_v44 = vld [vmem:[%s4668_s3 + $0x24] ss:$8 sps:$4 sm:$0xff]  }
  0x90   :  { %1769 = vmatpush1.bf16.msra.mxu0 %v3241_v42  ;;  %1852 = vmatprep.subr.bf16.mxu1 %v3252_v46  ;;  %v3418_v42 = vld [vmem:[%s4668_s3 + $0x10] ss:$8 sps:$4 sm:$0xff]   ;;  %v3333_v46 = vld [vmem:[%s4666_s1 + $0x48c] ss:$16 sps:$4 sm:$0xff]  }
  0x91   :  { %1770 = vmatprep.subr.bf16.mxu0 %v3249_v45  ;;  %v3328_v45 = vld [vmem:[%s4666_s1 + $0x468] ss:$16 sps:$4 sm:$0xff]  }
  0x93   :  { %1853 = vmatpush1.bf16.msra.mxu1 %v3250_v48  ;;  %v3426_v48 = vld [vmem:[%s4668_s3 + $0x34] ss:$8 sps:$4 sm:$0xff]  }
  0x94   :  { %1771 = vmatpush1.bf16.msra.mxu0 %v3247_v47  ;;  %1854 = vmatprep.subr.bf16.mxu1 %v3258_v51  ;;  %v3421_v47 = vld [vmem:[%s4668_s3 + $0x20] ss:$8 sps:$4 sm:$0xff]   ;;  %v3336_v51 = vld [vmem:[%s4666_s1 + $0x4ac] ss:$16 sps:$4 sm:$0xff]  }
  0x95   :  { %1772 = vmatprep.subr.bf16.mxu0 %v3255_v50  ;;  %v3331_v50 = vld [vmem:[%s4666_s1 + $0x488] ss:$16 sps:$4 sm:$0xff]  }
  0x97   :  { %1855 = vmatpush1.bf16.msra.mxu1 %v3256_v53  ;;  %v3429_v53 = vld [vmem:[%s4668_s3 + $0x44] ss:$8 sps:$4 sm:$0xff]  }
  0x98   :  { %1773 = vmatpush1.bf16.msra.mxu0 %v3253_v52  ;;  %1856 = vmatprep.subr.bf16.mxu1 %v3264_v55  ;;  %v3424_v52 = vld [vmem:[%s4668_s3 + $0x30] ss:$8 sps:$4 sm:$0xff]   ;;  %v3339_v55 = vld [vmem:[%s4666_s1 + $0x4cc] ss:$16 sps:$4 sm:$0xff]  }
  0x99   :  { %1774 = vmatprep.subr.bf16.mxu0 %v3261_v54  ;;  %v3334_v54 = vld [vmem:[%s4666_s1 + $0x4a8] ss:$16 sps:$4 sm:$0xff]  }
  0x9b   :  { %1857 = vmatpush1.bf16.msra.mxu1 %v3262_v57  ;;  %v3432_v57 = vld [vmem:[%s4668_s3 + $0x54] ss:$8 sps:$4 sm:$0xff]  }
  0x9c   :  { %1775 = vmatpush1.bf16.msra.mxu0 %v3259_v56  ;;  %1858 = vmatprep.subr.bf16.mxu1 %v3270_v59  ;;  %v3427_v56 = vld [vmem:[%s4668_s3 + $0x40] ss:$8 sps:$4 sm:$0xff]   ;;  %v3430_v59 = vld [vmem:[%s4668_s3 + $0x50] ss:$8 sps:$4 sm:$0xff]  }
  0x9d   :  { %1776 = vmatprep.subr.bf16.mxu0 %v3267_v58  ;;  %v3337_v58 = vld [vmem:[%s4666_s1 + $0x4c8] ss:$16 sps:$4 sm:$0xff]  }
  0x9f   :  { %1859 = vmatpush1.bf16.msra.mxu1 %v3268_v61  ;;  %v3435_v61 = vld [vmem:[%s4668_s3 + $0x64] ss:$8 sps:$4 sm:$0xff]  }
  0xa0   :  { %1777 = vmatpush1.bf16.msra.mxu0 %v3265_v60  ;;  %1860 = vmatprep.subr.bf16.mxu1 %v3276_v63  ;;  %v3342_v60 = vld [vmem:[%s4666_s1 + $0x4ec] ss:$16 sps:$4 sm:$0xff]   ;;  %v3433_v63 = vld [vmem:[%s4668_s3 + $0x60] ss:$8 sps:$4 sm:$0xff]  }
  0xa1   :  { %1778 = vmatprep.subr.bf16.mxu0 %v3273_v62  ;;  %v3340_v62 = vld [vmem:[%s4666_s1 + $0x4e8] ss:$16 sps:$4 sm:$0xff]  }
  0xa3   :  { %1861 = vmatpush1.bf16.msra.mxu1 %v3274_v1  ;;  %v3438_v1 = vld [vmem:[%s4668_s3 + $0x74] ss:$8 sps:$4 sm:$0xff]  }
  0xa4   :  { %1779 = vmatpush1.bf16.msra.mxu0 %v3271_v0  ;;  %1862 = vmatprep.subr.bf16.mxu1 %v3282_v4  ;;  %v3345_v0 = vld [vmem:[%s4666_s1 + $0x50c] ss:$16 sps:$4 sm:$0xff]   ;;  %v3436_v4 = vld [vmem:[%s4668_s3 + $0x70] ss:$8 sps:$4 sm:$0xff]  }
  0xa5   :  { %1780 = vmatprep.subr.bf16.mxu0 %v3279_v2  ;;  %v3343_v2 = vld [vmem:[%s4666_s1 + $0x508] ss:$16 sps:$4 sm:$0xff]  }
  0xa7   :  { %1863 = vmatpush1.bf16.msra.mxu1 %v3280_v6  ;;  %v3441_v6 = vld [vmem:[%s4668_s3 + $0x84] ss:$8 sps:$4 sm:$0xff]  }
  0xa8   :  { %1781 = vmatpush1.bf16.msra.mxu0 %v3277_v5  ;;  %1864 = vmatprep.subr.bf16.mxu1 %v3288_v9  ;;  %v3348_v5 = vld [vmem:[%s4666_s1 + $0x52c] ss:$16 sps:$4 sm:$0xff]   ;;  %v3439_v9 = vld [vmem:[%s4668_s3 + $0x80] ss:$8 sps:$4 sm:$0xff]  }
  0xa9   :  { %1782 = vmatprep.subr.bf16.mxu0 %v3285_v7  ;;  %v3346_v7 = vld [vmem:[%s4666_s1 + $0x528] ss:$16 sps:$4 sm:$0xff]  }
  0xab   :  { %1865 = vmatpush1.bf16.msra.mxu1 %v3286_v11  ;;  %v3444_v11 = vld [vmem:[%s4668_s3 + $0x94] ss:$8 sps:$4 sm:$0xff]  }
  0xac   :  { %1783 = vmatpush1.bf16.msra.mxu0 %v3283_v10  ;;  %1866 = vmatprep.subr.bf16.mxu1 %v3294_v14  ;;  %v3351_v10 = vld [vmem:[%s4666_s1 + $0x54c] ss:$16 sps:$4 sm:$0xff]   ;;  %v3442_v14 = vld [vmem:[%s4668_s3 + $0x90] ss:$8 sps:$4 sm:$0xff]  }
  0xad   :  { %1784 = vmatprep.subr.bf16.mxu0 %v3291_v12  ;;  %v3349_v12 = vld [vmem:[%s4666_s1 + $0x548] ss:$16 sps:$4 sm:$0xff]  }
  0xaf   :  { %1867 = vmatpush1.bf16.msra.mxu1 %v3292_v16  ;;  %v3447_v16 = vld [vmem:[%s4668_s3 + $0xa4] ss:$8 sps:$4 sm:$0xff]  }
  0xb0   :  { %1785 = vmatpush1.bf16.msra.mxu0 %v3289_v15  ;;  %1868 = vmatprep.subr.bf16.mxu1 %v3300_v18  ;;  %v3354_v15 = vld [vmem:[%s4666_s1 + $0x56c] ss:$16 sps:$4 sm:$0xff]   ;;  %v3445_v18 = vld [vmem:[%s4668_s3 + $0xa0] ss:$8 sps:$4 sm:$0xff]  }
  0xb1   :  { %1786 = vmatprep.subr.bf16.mxu0 %v3297_v17  ;;  %v3352_v17 = vld [vmem:[%s4666_s1 + $0x568] ss:$16 sps:$4 sm:$0xff]  }
  0xb3   :  { %1869 = vmatpush1.bf16.msra.mxu1 %v3298_v22  ;;  %v3450_v22 = vld [vmem:[%s4668_s3 + $0xb4] ss:$8 sps:$4 sm:$0xff]  }
  0xb4   :  { %1787 = vmatpush1.bf16.msra.mxu0 %v3295_v21  ;;  %1870 = vmatprep.subr.bf16.mxu1 %v3306_v24  ;;  %v3357_v21 = vld [vmem:[%s4666_s1 + $0x58c] ss:$16 sps:$4 sm:$0xff]   ;;  %v3448_v24 = vld [vmem:[%s4668_s3 + $0xb0] ss:$8 sps:$4 sm:$0xff]  }
  0xb5   :  { %1788 = vmatprep.subr.bf16.mxu0 %v3303_v23  ;;  %v3355_v23 = vld [vmem:[%s4666_s1 + $0x588] ss:$16 sps:$4 sm:$0xff]  }
  0xb7   :  { %1871 = vmatpush1.bf16.msra.mxu1 %v3304_v27  ;;  %v3453_v27 = vld [vmem:[%s4668_s3 + $0xc4] ss:$8 sps:$4 sm:$0xff]  }
  0xb8   :  { %1789 = vmatpush1.bf16.msra.mxu0 %v3301_v8  ;;  %1872 = vmatprep.subr.bf16.mxu1 %v3312_v29  ;;  %v3360_v8 = vld [vmem:[%s4666_s1 + $0x5ac] ss:$16 sps:$4 sm:$0xff]   ;;  %v3451_v29 = vld [vmem:[%s4668_s3 + $0xc0] ss:$8 sps:$4 sm:$0xff]  }
  0xb9   :  { %1790 = vmatprep.subr.bf16.mxu0 %v3309_v28  ;;  %v3358_v28 = vld [vmem:[%s4666_s1 + $0x5a8] ss:$16 sps:$4 sm:$0xff]  }
  0xbb   :  { %1873 = vmatpush1.bf16.msra.mxu1 %v3310_v30  ;;  %v3456_v30 = vld [vmem:[%s4668_s3 + $0xd4] ss:$8 sps:$4 sm:$0xff]  }
  0xbc   :  { %1791 = vmatpush1.bf16.msra.mxu0 %v3307_v49  ;;  %1874 = vmatprep.subr.bf16.mxu1 %v3318_v33  ;;  %v3363_v49 = vld [vmem:[%s4666_s1 + $0x5cc] ss:$16 sps:$4 sm:$0xff]   ;;  %v3454_v33 = vld [vmem:[%s4668_s3 + $0xd0] ss:$8 sps:$4 sm:$0xff]  }
  0xbd   :  { %1792 = vmatprep.subr.bf16.mxu0 %v3315_v32  ;;  %v3361_v32 = vld [vmem:[%s4666_s1 + $0x5c8] ss:$16 sps:$4 sm:$0xff]  }
  0xbf   :  { %1875 = vmatpush1.bf16.msra.mxu1 %v3316_v13  ;;  %v3364_v13 = vld [vmem:[%s4666_s1 + $0x5e8] ss:$16 sps:$4 sm:$0xff]  }
  0xc0   :  { %1793 = vmatpush1.bf16.msra.mxu0 %v3313_v34  ;;  %1885 = vmatprep.subr.bf16.mxu1 %v3321_v36  ;;  %v3366_v34 = vld [vmem:[%s4666_s1 + $0x5ec] ss:$16 sps:$4 sm:$0xff]  }
  0xc1   :  { %v3369_v36 = vld [vmem:[%s4666_s1 + $0x60c] ss:$16 sps:$4 sm:$0xff]  }
  0xc2   :  { %1877 = vmatmul.mubr.bf16.vlgmr.msra.gmra.mrb[4].mxu1 %v3792_v20  ;;  %v3417_v20 = vld [vmem:[%s4668_s3 + $0x4] ss:$8 sps:$4 sm:$0xff]  }
  0xc3   :  { %1795 = vmatmul.mubr.bf16.vlgmr.msra.gmra.mrb[0].mxu0 %v4199_v37  ;;  %1886 = vmatpush1.bf16.msra.mxu1 %v3319_v38  ;;  %v3367_v38 = vld [vmem:[%s4666_s1 + $0x608] ss:$16 sps:$4 sm:$0xff]  }
  0xc4   :  { %1917 = vmatprep.mubr.bf16.mxu1 %v3806_v25  ;;  %1887 = vmatprep.subr.bf16.mxu1 %v3324_v19  ;;  %v3330_v25 = vld [vmem:[%s4666_s1 + $0x46c] ss:$16 sps:$4 sm:$0xff]  }
  0xc5   :  { %2371 = vmatprep.subr.bf16.mxu0 %v3417_v20  ;;  %v3372_v19 = vld [vmem:[%s4666_s1 + $0x62c] ss:$16 sps:$4 sm:$0xff]  }
  0xc6   :  { %2372 = vmatpush1.bf16.msra.mxu0 %v3415_v40  ;;  %v3373_v40 = vld [vmem:[%s4666_s1 + $0x648] ss:$16 sps:$4 sm:$0xff]   ;;  %v3381_v20 = vld [vmem:[%s4666_s1 + $0x68c] ss:$16 sps:$4 sm:$0xff]  }
  0xc7   :  { %1888 = vmatpush1.bf16.msra.mxu1 %v3322_v26  ;;  %2373 = vmatprep.subr.bf16.mxu0 %v3420_v41  ;;  %v3370_v26 = vld [vmem:[%s4666_s1 + $0x628] ss:$16 sps:$4 sm:$0xff]  }
  0xc8   :  { %1889 = vmatprep.subr.bf16.mxu1 %v3327_v39  ;;  %v3375_v39 = vld [vmem:[%s4666_s1 + $0x64c] ss:$16 sps:$4 sm:$0xff]   ;;  %v3379_v41 = vld [vmem:[%s4666_s1 + $0x688] ss:$16 sps:$4 sm:$0xff]  }
  0xca   :  { %2374 = vmatpush1.bf16.msra.mxu0 %v3418_v42  ;;  %v3387_v42 = vld [vmem:[%s4666_s1 + $0x6cc] ss:$16 sps:$4 sm:$0xff]  }
  0xcb   :  { %1890 = vmatpush1.bf16.msra.mxu1 %v3325_v3  ;;  %2375 = vmatprep.subr.bf16.mxu0 %v3423_v44  ;;  %v3384_v3 = vld [vmem:[%s4666_s1 + $0x6ac] ss:$16 sps:$4 sm:$0xff]  }
  0xcc   :  { %1891 = vmatprep.subr.bf16.mxu1 %v3330_v25  ;;  %v3382_v25 = vld [vmem:[%s4666_s1 + $0x6a8] ss:$16 sps:$4 sm:$0xff]   ;;  %v3459_v44 = vld [vmem:[%s4668_s3 + $0xe4] ss:$8 sps:$4 sm:$0xff]  }
  0xce   :  { %2376 = vmatpush1.bf16.msra.mxu0 %v3421_v47 }
  0xcf   :  { %1892 = vmatpush1.bf16.msra.mxu1 %v3328_v45  ;;  %2377 = vmatprep.subr.bf16.mxu0 %v3426_v48 }
  0xd0   :  { %1893 = vmatprep.subr.bf16.mxu1 %v3333_v46  ;;  %v3457_v46 = vld [vmem:[%s4668_s3 + $0xe0] ss:$8 sps:$4 sm:$0xff]  }
  0xd2   :  { %2378 = vmatpush1.bf16.msra.mxu0 %v3424_v52  ;;  %v3390_v52 = vld [vmem:[%s4666_s1 + $0x6ec] ss:$16 sps:$4 sm:$0xff]  }
  0xd3   :  { %1894 = vmatpush1.bf16.msra.mxu1 %v3331_v50  ;;  %2379 = vmatprep.subr.bf16.mxu0 %v3429_v53  ;;  %v3385_v50 = vld [vmem:[%s4666_s1 + $0x6c8] ss:$16 sps:$4 sm:$0xff]   ;;  %v3462_v53 = vld [vmem:[%s4668_s3 + $0xf4] ss:$8 sps:$4 sm:$0xff]  }
  0xd4   :  { %1895 = vmatprep.subr.bf16.mxu1 %v3336_v51 }
  0xd6   :  { %2380 = vmatpush1.bf16.msra.mxu0 %v3427_v56  ;;  %v3393_v56 = vld [vmem:[%s4666_s1 + $0x70c] ss:$16 sps:$4 sm:$0xff]  }
  0xd7   :  { %1896 = vmatpush1.bf16.msra.mxu1 %v3334_v54  ;;  %2381 = vmatprep.subr.bf16.mxu0 %v3432_v57  ;;  %v3460_v54 = vld [vmem:[%s4668_s3 + $0xf0] ss:$8 sps:$4 sm:$0xff]   ;;  %v3465_v57 = vld [vmem:[%s4668_s3 + $0x104] ss:$8 sps:$4 sm:$0xff]  }
  0xd8   :  { %1897 = vmatprep.subr.bf16.mxu1 %v3339_v55  ;;  %v3388_v55 = vld [vmem:[%s4666_s1 + $0x6e8] ss:$16 sps:$4 sm:$0xff]  }
  0xda   :  { %2382 = vmatpush1.bf16.msra.mxu0 %v3430_v59  ;;  %v3396_v59 = vld [vmem:[%s4666_s1 + $0x72c] ss:$16 sps:$4 sm:$0xff]  }
  0xdb   :  { %1898 = vmatpush1.bf16.msra.mxu1 %v3337_v58  ;;  %2383 = vmatprep.subr.bf16.mxu0 %v3435_v61  ;;  %v3391_v58 = vld [vmem:[%s4666_s1 + $0x708] ss:$16 sps:$4 sm:$0xff]   ;;  %v3399_v61 = vld [vmem:[%s4666_s1 + $0x74c] ss:$16 sps:$4 sm:$0xff]  }
  0xdc   :  { %1899 = vmatprep.subr.bf16.mxu1 %v3342_v60  ;;  %v3394_v60 = vld [vmem:[%s4666_s1 + $0x728] ss:$16 sps:$4 sm:$0xff]  }
  0xde   :  { %2384 = vmatpush1.bf16.msra.mxu0 %v3433_v63  ;;  %v3402_v63 = vld [vmem:[%s4666_s1 + $0x76c] ss:$16 sps:$4 sm:$0xff]  }
  0xdf   :  { %1900 = vmatpush1.bf16.msra.mxu1 %v3340_v62  ;;  %2385 = vmatprep.subr.bf16.mxu0 %v3438_v1  ;;  %v3397_v62 = vld [vmem:[%s4666_s1 + $0x748] ss:$16 sps:$4 sm:$0xff]   ;;  %v3405_v1 = vld [vmem:[%s4666_s1 + $0x78c] ss:$16 sps:$4 sm:$0xff]  }
  0xe0   :  { %1901 = vmatprep.subr.bf16.mxu1 %v3345_v0  ;;  %v3400_v0 = vld [vmem:[%s4666_s1 + $0x768] ss:$16 sps:$4 sm:$0xff]  }
  0xe2   :  { %2386 = vmatpush1.bf16.msra.mxu0 %v3436_v4  ;;  %v3408_v4 = vld [vmem:[%s4666_s1 + $0x7ac] ss:$16 sps:$4 sm:$0xff]  }
  0xe3   :  { %1902 = vmatpush1.bf16.msra.mxu1 %v3343_v2  ;;  %2387 = vmatprep.subr.bf16.mxu0 %v3441_v6  ;;  %v3403_v2 = vld [vmem:[%s4666_s1 + $0x788] ss:$16 sps:$4 sm:$0xff]   ;;  %v3411_v6 = vld [vmem:[%s4666_s1 + $0x7cc] ss:$16 sps:$4 sm:$0xff]  }
  0xe4   :  { %1903 = vmatprep.subr.bf16.mxu1 %v3348_v5  ;;  %v3406_v5 = vld [vmem:[%s4666_s1 + $0x7a8] ss:$16 sps:$4 sm:$0xff]  }
  0xe6   :  { %2388 = vmatpush1.bf16.msra.mxu0 %v3439_v9  ;;  %v3414_v9 = vld [vmem:[%s4666_s1 + $0x7ec] ss:$16 sps:$4 sm:$0xff]  }
  0xe7   :  { %1904 = vmatpush1.bf16.msra.mxu1 %v3346_v7  ;;  %2389 = vmatprep.subr.bf16.mxu0 %v3444_v11  ;;  %v3409_v7 = vld [vmem:[%s4666_s1 + $0x7c8] ss:$16 sps:$4 sm:$0xff]   ;;  %v341_v11 = vsub.s32 0, %v3685_v43 }
  0xe8   :  { %1905 = vmatprep.subr.bf16.mxu1 %v3351_v10  ;;  %v3412_v10 = vld [vmem:[%s4666_s1 + $0x7e8] ss:$16 sps:$4 sm:$0xff]  }
  0xea   :  { %2390 = vmatpush1.bf16.msra.mxu0 %v3442_v14  ;;  %v345_v14 = vsub.s32 1, %v3685_v43 }
  0xeb   :  { %1906 = vmatpush1.bf16.msra.mxu1 %v3349_v12  ;;  %2391 = vmatprep.subr.bf16.mxu0 %v3447_v16  ;;  %v4499_v12 = vld [vmem:[%s4669_s2] sm:$0xf] }
  0xec   :  { %1907 = vmatprep.subr.bf16.mxu1 %v3354_v15  ;;  %v342_v15 = vrot.slane %v4499_v12, %v341_v11  ;;  %v346_v16 = vrot.slane %v4499_v12, %v345_v14 }
  0xee   :  { %2392 = vmatpush1.bf16.msra.mxu0 %v3445_v18 }
  0xef   :  { %1908 = vmatpush1.bf16.msra.mxu1 %v3352_v17  ;;  %2393 = vmatprep.subr.bf16.mxu0 %v3450_v22 }
  0xf0   :  { %1909 = vmatprep.subr.bf16.mxu1 %v3357_v21 }
  0xf2   :  { %2394 = vmatpush1.bf16.msra.mxu0 %v3448_v24 }
  0xf3   :  { %1910 = vmatpush1.bf16.msra.mxu1 %v3355_v23  ;;  %2395 = vmatprep.subr.bf16.mxu0 %v3453_v27 }
  0xf4   :  { %1911 = vmatprep.subr.bf16.mxu1 %v3360_v8 }
  0xf6   :  { %2396 = vmatpush1.bf16.msra.mxu0 %v3451_v29 }
  0xf7   :  { %1912 = vmatpush1.bf16.msra.mxu1 %v3358_v28  ;;  %2397 = vmatprep.subr.bf16.mxu0 %v3456_v30 }
  0xf8   :  { %1913 = vmatprep.subr.bf16.mxu1 %v3363_v49  ;;  %v3463_v49 = vld [vmem:[%s4668_s3 + $0x100] ss:$8 sps:$4 sm:$0xff]  }
  0xfa   :  { %2398 = vmatpush1.bf16.msra.mxu0 %v3454_v33  ;;  %v3466_v33 = vld [vmem:[%s4668_s3 + $0x110] ss:$8 sps:$4 sm:$0xff]  }
  0xfb   :  { %1914 = vmatpush1.bf16.msra.mxu1 %v3361_v32  ;;  %2399 = vmatprep.subr.bf16.mxu0 %v3459_v44  ;;  %v3468_v32 = vld [vmem:[%s4668_s3 + $0x114] ss:$8 sps:$4 sm:$0xff]   ;;  %v3519_v44 = vld [vmem:[%s4670_s5 + $0x60] sm:$0xff]  }
  0xfc   :  { %1915 = vmatprep.subr.bf16.mxu1 %v3366_v34  ;;  %v3471_v34 = vld [vmem:[%s4668_s3 + $0x124] ss:$8 sps:$4 sm:$0xff]  }
  0xfe   :  { %2400 = vmatpush1.bf16.msra.mxu0 %v3457_v46  ;;  %v3478_v46 = vld [vmem:[%s4668_s3 + $0x150] ss:$8 sps:$4 sm:$0xff]  }
  0xff   :  { %1916 = vmatpush1.bf16.msra.mxu1 %v3364_v13  ;;  %2401 = vmatprep.subr.bf16.mxu0 %v3462_v53  ;;  %v3511_v13 = vld [vmem:[%s4670_s5 + $0x40] sm:$0xff]   ;;  %v3484_v53 = vld [vmem:[%s4668_s3 + $0x170] ss:$8 sps:$4 sm:$0xff]  }
 0x100   :  { %1926 = vmatprep.subr.bf16.mxu1 %v3369_v36  ;;  %v3512_v36 = vld [vmem:[%s4670_s5] sm:$0xff]  }
 0x102   :  { %1918 = vmatmul.mubr.bf16.vlgmr.msra.gmra.mrb[4].mxu1 %v4000_v31  ;;  %v3378_v31 = vld [vmem:[%s4666_s1 + $0x66c] ss:$16 sps:$4 sm:$0xff]   ;;  %2402 = vmatpush1.bf16.msra.mxu0 %v3460_v54 }
 0x103   :  { %1927 = vmatpush1.bf16.msra.mxu1 %v3367_v38  ;;  %1958 = vmatprep.mubr.bf16.mxu1 %v4014_v35  ;;  %v3376_v35 = vld [vmem:[%s4666_s1 + $0x668] ss:$16 sps:$4 sm:$0xff]   ;;  %v3489_v54 = vld [vmem:[%s4668_s3 + $0x184] ss:$8 sps:$4 sm:$0xff]  }
 0x104   :  { %1928 = vmatprep.subr.bf16.mxu1 %v3372_v19  ;;  %2412 = vmatprep.subr.bf16.mxu0 %v3465_v57  ;;  %v3469_v38 = vld [vmem:[%s4668_s3 + $0x120] ss:$8 sps:$4 sm:$0xff]   ;;  %v3490_v57 = vld [vmem:[%s4668_s3 + $0x190] ss:$8 sps:$4 sm:$0xff]  }
 0x105   :  { %v3513_v19 = vld [vmem:[%s4670_s5 + $0x48] sm:$0xff]  }
 0x107   :  { %1929 = vmatpush1.bf16.msra.mxu1 %v3370_v26  ;;  %v3514_v26 = vld [vmem:[%s4670_s5 + $0x8] sm:$0xff]  }
 0x108   :  { %1930 = vmatprep.subr.bf16.mxu1 %v3375_v39  ;;  %v3515_v39 = vld [vmem:[%s4670_s5 + $0x50] sm:$0xff]  }
 0x10b   :  { %1931 = vmatpush1.bf16.msra.mxu1 %v3373_v40  ;;  %v3474_v40 = vld [vmem:[%s4668_s3 + $0x134] ss:$8 sps:$4 sm:$0xff]  }
 0x10c   :  { %1932 = vmatprep.subr.bf16.mxu1 %v3378_v31  ;;  %v3472_v31 = vld [vmem:[%s4668_s3 + $0x130] ss:$8 sps:$4 sm:$0xff]  }
 0x10f   :  { %1933 = vmatpush1.bf16.msra.mxu1 %v3376_v35  ;;  %v3516_v35 = vld [vmem:[%s4670_s5 + $0x10] sm:$0xff]  }
 0x110   :  { %1934 = vmatprep.subr.bf16.mxu1 %v3381_v20  ;;  %v3517_v20 = vld [vmem:[%s4670_s5 + $0x58] sm:$0xff]  }
 0x113   :  { %1935 = vmatpush1.bf16.msra.mxu1 %v3379_v41  ;;  %v3477_v41 = vld [vmem:[%s4668_s3 + $0x144] ss:$8 sps:$4 sm:$0xff]  }
 0x114   :  { %1936 = vmatprep.subr.bf16.mxu1 %v3384_v3  ;;  %v3475_v3 = vld [vmem:[%s4668_s3 + $0x140] ss:$8 sps:$4 sm:$0xff]  }
 0x115   :  { %v1673_v45 = vpop.f32.mrb[0].mxu1 }
 0x116   :  { %v1675_v47 = vpop.f32.mrb[1].mxu1  ;;  %v1674_v17 = vadd.f32 %v1673_v45, %v342_v15  ;;  %v3520_v45 = vld [vmem:[%s4670_s5 + $0x20] sm:$0xff]  }
 0x117   :  { %v1677_v48 = vpop.f32.mrb[2].mxu1  ;;  %1937 = vmatpush1.bf16.msra.mxu1 %v3382_v25  ;;  %v1676_v18 = vadd.f32 %v1675_v47, %v346_v16  ;;  %v3480_v25 = vld [vmem:[%s4668_s3 + $0x154] ss:$8 sps:$4 sm:$0xff]   ;;  %v3521_v47 = vld [vmem:[%s4670_s5 + $0x68] sm:$0xff]  }
 0x118   :  { %v1678_v51 = vpop.f32.mrb[3].mxu1  ;;  %1938 = vmatprep.subr.bf16.mxu1 %v3387_v42  ;;  %v3518_v42 = vld [vmem:[%s4670_s5 + $0x18] sm:$0xff]   ;;  %v3483_v48 = vld [vmem:[%s4668_s3 + $0x164] ss:$8 sps:$4 sm:$0xff]  }
 0x119   :  { %v3481_v51 = vld [vmem:[%s4668_s3 + $0x160] ss:$8 sps:$4 sm:$0xff]  }
 0x11b   :  { %1939 = vmatpush1.bf16.msra.mxu1 %v3385_v50  ;;  %v3522_v50 = vld [vmem:[%s4670_s5 + $0x28] sm:$0xff]  }
 0x11c   :  { %1940 = vmatprep.subr.bf16.mxu1 %v3390_v52  ;;  %v3486_v52 = vld [vmem:[%s4668_s3 + $0x174] ss:$8 sps:$4 sm:$0xff]  }
 0x11f   :  { %1941 = vmatpush1.bf16.msra.mxu1 %v3388_v55  ;;  %v3487_v55 = vld [vmem:[%s4668_s3 + $0x180] ss:$8 sps:$4 sm:$0xff]  }
 0x120   :  { %1942 = vmatprep.subr.bf16.mxu1 %v3393_v56  ;;  %v3492_v56 = vld [vmem:[%s4668_s3 + $0x194] ss:$8 sps:$4 sm:$0xff]  }
 0x123   :  { %1943 = vmatpush1.bf16.msra.mxu1 %v3391_v58  ;;  %v3495_v58 = vld [vmem:[%s4668_s3 + $0x1a4] ss:$8 sps:$4 sm:$0xff]  }
 0x124   :  { %1944 = vmatprep.subr.bf16.mxu1 %v3396_v59  ;;  %v3493_v59 = vld [vmem:[%s4668_s3 + $0x1a0] ss:$8 sps:$4 sm:$0xff]  }
 0x127   :  { %1945 = vmatpush1.bf16.msra.mxu1 %v3394_v60  ;;  %v3498_v60 = vld [vmem:[%s4668_s3 + $0x1b4] ss:$8 sps:$4 sm:$0xff]  }
 0x128   :  { %1946 = vmatprep.subr.bf16.mxu1 %v3399_v61  ;;  %v3496_v61 = vld [vmem:[%s4668_s3 + $0x1b0] ss:$8 sps:$4 sm:$0xff]  }
 0x12b   :  { %1947 = vmatpush1.bf16.msra.mxu1 %v3397_v62  ;;  %v3501_v62 = vld [vmem:[%s4668_s3 + $0x1c4] ss:$8 sps:$4 sm:$0xff]  }
 0x12c   :  { %1948 = vmatprep.subr.bf16.mxu1 %v3402_v63  ;;  %v3499_v63 = vld [vmem:[%s4668_s3 + $0x1c0] ss:$8 sps:$4 sm:$0xff]  }
 0x12f   :  { %1949 = vmatpush1.bf16.msra.mxu1 %v3400_v0  ;;  %v3504_v0 = vld [vmem:[%s4668_s3 + $0x1d4] ss:$8 sps:$4 sm:$0xff]  }
 0x130   :  { %1950 = vmatprep.subr.bf16.mxu1 %v3405_v1  ;;  %v3502_v1 = vld [vmem:[%s4668_s3 + $0x1d0] ss:$8 sps:$4 sm:$0xff]  }
 0x133   :  { %1951 = vmatpush1.bf16.msra.mxu1 %v3403_v2  ;;  %v3507_v2 = vld [vmem:[%s4668_s3 + $0x1e4] ss:$8 sps:$4 sm:$0xff]  }
 0x134   :  { %1952 = vmatprep.subr.bf16.mxu1 %v3408_v4  ;;  %v3505_v4 = vld [vmem:[%s4668_s3 + $0x1e0] ss:$8 sps:$4 sm:$0xff]  }
 0x137   :  { %1953 = vmatpush1.bf16.msra.mxu1 %v3406_v5  ;;  %v3510_v5 = vld [vmem:[%s4668_s3 + $0x1f4] ss:$8 sps:$4 sm:$0xff]  }
 0x138   :  { %1954 = vmatprep.subr.bf16.mxu1 %v3411_v6  ;;  %v3508_v6 = vld [vmem:[%s4668_s3 + $0x1f0] ss:$8 sps:$4 sm:$0xff]  }
 0x13b   :  { %1955 = vmatpush1.bf16.msra.mxu1 %v3409_v7  ;;  %v349_v7 = vsub.s32 2, %v3685_v43 }
 0x13c   :  { %1956 = vmatprep.subr.bf16.mxu1 %v3414_v9  ;;  %v353_v9 = vsub.s32 3, %v3685_v43 }
 0x13e   :  { %v354_v15 = vrot.slane %v4499_v12, %v353_v9 }
 0x13f   :  { %1957 = vmatpush1.bf16.msra.mxu1 %v3412_v10  ;;  %v350_v10 = vrot.slane %v4499_v12, %v349_v7  ;;  %v3524_v12 = vld [vmem:[%s4670_s5 + $0x30] sm:$0xff]  }
 0x140   :  { %2974 = vmatprep.subr.bf16.mxu1 %v3511_v13 }
 0x142   :  { %1959 = vmatmul.mubr.bf16.vlgmr.msra.gmra.mrb[4].mxu1 %v4199_v37 }
 0x143   :  { %2975 = vmatpush3.bf16.msra.mxu1 %v3512_v36 }
 0x144   :  { %2976 = vmatprep.subr.bf16.mxu1 %v3513_v19 }
 0x147   :  { %2977 = vmatpush3.bf16.msra.mxu1 %v3514_v26 }
 0x148   :  { %2978 = vmatprep.subr.bf16.mxu1 %v3515_v39 }
 0x14b   :  { %2979 = vmatpush3.bf16.msra.mxu1 %v3516_v35 }
 0x14c   :  { %2980 = vmatprep.subr.bf16.mxu1 %v3517_v20 }
 0x14f   :  { %2981 = vmatpush3.bf16.msra.mxu1 %v3518_v42 }
 0x150   :  { %2982 = vmatprep.subr.bf16.mxu1 %v3519_v44 }
 0x153   :  { %2983 = vmatpush3.bf16.msra.mxu1 %v3520_v45 }
 0x154   :  { %2984 = vmatprep.subr.bf16.mxu1 %v3521_v47 }
 0x157   :  { %2985 = vmatpush3.bf16.msra.mxu1 %v3522_v50 }
 0x196   :  { %v1796_v37 = vpop.f32.mrb[0].mxu0 }
 0x197   :  { %v2997_v21 = vadd.f32 %v1796_v37, %v1674_v17  ;;  %v1798_v22 = vpop.f32.mrb[1].mxu0 }
 0x198   :  { %v2999_v23 = vadd.f32 %v1798_v22, %v1676_v18  ;;  %v1800_v24 = vpop.f32.mrb[2].mxu0 }
 0x199   :  { %v1967_v8 = vmax.f32 %v2997_v21, 0.0  ;;  %v1801_v27 = vpop.f32.mrb[3].mxu0 }
 0x19a   :  { %v1968_v28 = vmax.f32 %v2999_v23, 0.0 }
 0x19b   :  { %v2035_v30 = vpack.c.bf16 %v1967_v8, %v1967_v8 }
 0x19c   :  { %v2036_v29 = vpack.c.bf16 %v1968_v28, %v1968_v28  ;;  %v3523_v28 = vld [vmem:[%s4670_s5 + $0x70] sm:$0xff]  }
 0x19d   :  { %2986 = vmatprep.subr.bf16.mxu1 %v3523_v28 }
 0x19e   :  { %2403 = vmatprep.mubr.bf16.mxu0 %v2036_v29  ;;  %2987 = vmatpush3.bf16.msra.mxu1 %v3524_v12  ;;  %v3525_v29 = vld [vmem:[%s4670_s5 + $0x78] sm:$0xff]  }
 0x19f   :  { %2404 = vmatmul.mubr.bf16.vlgmr.msra.gmra.mrb[4].mxu0 %v2035_v30  ;;  %2988 = vmatprep.subr.bf16.mxu1 %v3525_v29  ;;  %v2039_v30 = vld [vmem:[%s4671_s4] sm:$0x3] }
 0x1a0   :  { %2413 = vmatpush1.bf16.msra.mxu0 %v3463_v49  ;;  %v3526_v49 = vld [vmem:[%s4670_s5 + $0x38] sm:$0xff]  }
 0x1a1   :  { %2414 = vmatprep.subr.bf16.mxu0 %v3468_v32  ;;  %v2044_v32 = vrot.slane %v2039_v30, %v341_v11  ;;  %v2957_v11 = vld [vmem:[%s4672_s6] ss:$0 sm:$0xff] }
 0x1a2   :  { %2989 = vmatpush3.bf16.msra.mxu1 %v3526_v49 }
 0x1a4   :  { %2415 = vmatpush1.bf16.msra.mxu0 %v3466_v33  ;;  %v2048_v33 = vrot.slane %v2039_v30, %v345_v14 }
 0x1a5   :  { %2416 = vmatprep.subr.bf16.mxu0 %v3471_v34 }
 0x1a8   :  { %2417 = vmatpush1.bf16.msra.mxu0 %v3469_v38 }
 0x1a9   :  { %2418 = vmatprep.subr.bf16.mxu0 %v3474_v40 }
 0x1ac   :  { %2419 = vmatpush1.bf16.msra.mxu0 %v3472_v31 }
 0x1ad   :  { %2420 = vmatprep.subr.bf16.mxu0 %v3477_v41 }
 0x1b0   :  { %2421 = vmatpush1.bf16.msra.mxu0 %v3475_v3 }
 0x1b1   :  { %2422 = vmatprep.subr.bf16.mxu0 %v3480_v25 }
 0x1b4   :  { %2423 = vmatpush1.bf16.msra.mxu0 %v3478_v46 }
 0x1b5   :  { %2424 = vmatprep.subr.bf16.mxu0 %v3483_v48 }
 0x1b8   :  { %2425 = vmatpush1.bf16.msra.mxu0 %v3481_v51 }
 0x1b9   :  { %2426 = vmatprep.subr.bf16.mxu0 %v3486_v52 }
 0x1bc   :  { %2427 = vmatpush1.bf16.msra.mxu0 %v3484_v53 }
 0x1bd   :  { %2428 = vmatprep.subr.bf16.mxu0 %v3489_v54 }
 0x1c0   :  { %2429 = vmatpush1.bf16.msra.mxu0 %v3487_v55 }
 0x1c1   :  { %2430 = vmatprep.subr.bf16.mxu0 %v3492_v56 }
 0x1c4   :  { %2431 = vmatpush1.bf16.msra.mxu0 %v3490_v57 }
 0x1c5   :  { %2432 = vmatprep.subr.bf16.mxu0 %v3495_v58 }
 0x1c8   :  { %2433 = vmatpush1.bf16.msra.mxu0 %v3493_v59 }
 0x1c9   :  { %2434 = vmatprep.subr.bf16.mxu0 %v3498_v60 }
 0x1cc   :  { %2435 = vmatpush1.bf16.msra.mxu0 %v3496_v61 }
 0x1cd   :  { %2436 = vmatprep.subr.bf16.mxu0 %v3501_v62 }
 0x1d0   :  { %2437 = vmatpush1.bf16.msra.mxu0 %v3499_v63 }
 0x1d1   :  { %2438 = vmatprep.subr.bf16.mxu0 %v3504_v0 }
 0x1d4   :  { %2439 = vmatpush1.bf16.msra.mxu0 %v3502_v1 }
 0x1d5   :  { %2440 = vmatprep.subr.bf16.mxu0 %v3507_v2 }
 0x1d8   :  { %2441 = vmatpush1.bf16.msra.mxu0 %v3505_v4 }
 0x1d9   :  { %2442 = vmatprep.subr.bf16.mxu0 %v3510_v5 }
 0x1dc   :  { %2443 = vmatpush1.bf16.msra.mxu0 %v3508_v6 }
 0x215   :  { %v1960_v16 = vpop.f32.mrb[4].mxu1 }
 0x216   :  { %v3000_v17 = vadd.f32 %v1960_v16, %v350_v10  ;;  %v1962_v18 = vpop.f32.mrb[5].mxu1 }
 0x217   :  { %v3001_v37 = vadd.f32 %v1962_v18, %v354_v15  ;;  %v1964_v21 = vpop.f32.mrb[6].mxu1 }
 0x218   :  { %v1969_v22 = vmax.f32 %v3000_v17, 0.0  ;;  %v1965_v23 = vpop.f32.mrb[7].mxu1 }
 0x219   :  { %v1970_v24 = vmax.f32 %v3001_v37, 0.0 }
 0x21a   :  { %v2037_v27 = vpack.c.bf16 %v1969_v22, %v1969_v22 }
 0x21b   :  { %v2038_v8 = vpack.c.bf16 %v1970_v24, %v1970_v24 }
 0x21d   :  { %2444 = vmatprep.mubr.bf16.mxu0 %v2038_v8 }
 0x21e   :  { %2445 = vmatmul.mubr.bf16.vlgmr.msra.gmra.mrb[4].mxu0 %v2037_v27 }
 0x2f1   :  { %v2446_v34 = vpop.f32.mrb[4].mxu0 }
 0x2f2   :  { %v3002_v13 = vadd.f32 %v2446_v34, %v2044_v32  ;;  %v2448_v36 = vpop.f32.mrb[5].mxu0 }
 0x2f3   :  { %v3003_v38 = vadd.f32 %v2448_v36, %v2048_v33  ;;  %v2450_v19 = vpop.f32.mrb[6].mxu0 }
 0x2f4   :  { %v2453_v26 = vmax.f32 %v3002_v13, 0.0  ;;  %v2451_v39 = vpop.f32.mrb[7].mxu0 }
 0x2f5   :  { %v2454_v40 = vmax.f32 %v3003_v38, 0.0 }
 0x2f6   :  { %v2487_v35 = vpack.c.bf16 %v2453_v26, %v2453_v26 }
 0x2f7   :  { %v2488_v31 = vpack.c.bf16 %v2454_v40, %v2454_v40 }
 0x2f9   :  { %2624 = vmatprep.mubr.bf16.mxu1 %v2488_v31 }
 0x2fa   :  { %2625 = vmatmul.mubr.bf16.vlgmr.msra.gmra.mrb[8].mxu1 %v2487_v35 }
 0x3cd   :  { %v2990_v20 = vpop.f32.mrb[8].mxu1 }
 0x3ce   :  { %v2991_v41 = vpop.f32.mrb[9].mxu1 }
 0x3cf   :  { %v2992_v43 = vadd.f32 %v2991_v41, %v2990_v20  ;;  %v2993_v14 = vpop.f32.mrb[10].mxu1 }
 0x3d0   :  { %v2994_v3 = vpop.f32.mrb[11].mxu1 }
 0x3d1   :  { %v2627_v25 = vadd.f32 %v2992_v43, %v2957_v11 }
 0x3d3   :  { %2632 = vst [vmem:[%s4673_s7] sm:$0x3] %v2627_v25 }

// kernel: pointnet_forward.8
= control target key start
LH: loop header
LB: loop body
LE: loop exit
PB: predicated region body
PF: predicated region fallthrough
CT: control target
= control target key end

     0   :  { %s1752_s30 = smov 0   ;;  %s1754_s10 = smov 0   ;;  %s2067_s0 = inlined_call_operand.vmem [shape: f32[2,16,3], index: 0, kind: input, shape index: {}]   ;;  %s2068_s1 = inlined_call_operand.vmem [shape: f32[2,3,64], index: 1, kind: input, shape index: {}]   ;;  %s2069_s2 = inlined_call_operand.vmem [shape: f32[1,64], index: 2, kind: input, shape index: {}]   ;;  %s2070_s3 = inlined_call_operand.vmem [shape: bf16[64,64], index: 3, kind: input, shape index: {}]   ;;  %s2071_s4 = inlined_call_operand.vmem [shape: f32[1,64], index: 4, kind: input, shape index: {}]   ;;  %s2072_s5 = inlined_call_operand.vmem [shape: bf16[64,128], index: 5, kind: input, shape index: {}]   ;;  %s2073_s6 = inlined_call_operand.vmem [shape: f32[1,128], index: 6, kind: input, shape index: {}]   ;;  %s2074_s7 = inlined_call_operand.vmem [shape: bf16[128,1024], index: 7, kind: input, shape index: {}]   ;;  %s2075_s8 = inlined_call_operand.vmem [shape: f32[1,1024], index: 8, kind: input, shape index: {}]   ;;  %s2076_s9 = inlined_call_operand.vmem [shape: f32[2,1,1024], index: 9, kind: output, shape index: {}]  }
   0x1   :  { %s1756_s11 = smov 0  }
   0x2 LB: > { %s31_s12 = sadd.s32 1, %s1692_s10  ;;  %p1508_p0 = scmp.ge.s32.totalorder %s1696_s11, 1  ;;  %s1696_s11 = sphi %s1756_s11, %s19_s11   ;;  %s1692_s10 = sphi %s1754_s10, %s2078_s10   ;;  %s1688_s30 = sphi %s1752_s30, %s2077_s30  }
   0x3   : > { %p33_p1 = scmp.ge.s32.totalorder %s31_s12, 2  ;;  %p315_p2 = scmp.lt.s32.totalorder %s1696_s11, 3 }
   0x5   : > { %s2080_s12 = smov (%p33_p1, %s31_s12), 0  ;;  %p316_p3 = pnand %p1508_p0, %p315_p2 }
   0x6   : > { %p359_p4 = scmp.lt.s32.totalorder (!%p316_p3), %s1688_s30, 1  ;;  %v1698_v0 = vmov (!%p316_p3), 0.0   ;;  %v1666_v1 = vld [vmem:[%s2070_s3] sm:$0xff] (!%p316_p3)   ;;  %v1667_v2 = vld [vmem:[%s2070_s3 + $0x8] sm:$0xff] (!%p316_p3)   ;;  %vm406_vm0 = vcmask (!%p316_p3), 1042432   ;;  %vm399_vm1 = vcmask (!%p316_p3), 23552  }
   0x7   : > { %319 = sbr.rel (%p316_p3) target bundleno = 955 (0x3bb), region = 56  ;;  %1614 = vmatprep.subr.bf16.mxu1 (!%p316_p3), %v1698_v0  ;;  %v1668_v6 = vld [vmem:[%s2070_s3 + $0x10] sm:$0xff] (!%p316_p3)   ;;  %v1669_v7 = vld [vmem:[%s2070_s3 + $0x18] sm:$0xff] (!%p316_p3)   ;;  %vm1699_vm2 = vmmov (!%p316_p3), 0   ;;  %v1670_v8 = vld [vmem:[%s2072_s5] sm:$0xff] (!%p316_p3)   ;;  %vm527_vm3 = vcmask (!%p316_p3), 523264  }
   0x8   : > { %1615 = vmatpush3.bf16.msra.mxu1 (!%p316_p3), %v1666_v1  ;;  %1622 = vmatprep.mubr.msk.bf16.mxu1 (!%p316_p3), %vm1699_vm2, %v1698_v0  ;;  %v1671_v9 = vld [vmem:[%s2072_s5 + $0x8] sm:$0xff] (!%p316_p3)   ;;  %v1513_v10 = vld [vmem:[%s2069_s2] ss:$0 sm:$0xff] (!%p316_p3)  ;;  %v1672_v18 = vld [vmem:[%s2072_s5 + $0x10] sm:$0xff] (!%p316_p3)  }
   0x9   : > { %1616 = vmatprep.subr.bf16.mxu1 (!%p316_p3), %v1698_v0  ;;  %v1673_v19 = vld [vmem:[%s2072_s5 + $0x18] sm:$0xff] (!%p316_p3)   ;;  %v660_v20 = vld [vmem:[%s2074_s7] sm:$0xff] (!%p316_p3)  ;;  %v661_v22 = vld [vmem:[%s2074_s7 + $0x8] sm:$0xff] (!%p316_p3) }
   0xa   : > { %v664_v21 = vld [vmem:[%s2074_s7 + $0x20] sm:$0xff] (!%p316_p3)  ;;  %v665_v25 = vld [vmem:[%s2074_s7 + $0x28] sm:$0xff] (!%p316_p3) }
   0xb   : > { %v1529_v23 = vcombine.low (!%p316_p3), %v660_v20, %v664_v21  ;;  %v1530_v24 = vcombine.high (!%p316_p3), %v660_v20, %v664_v21  ;;  %v668_v26 = vld [vmem:[%s2074_s7 + $0x40] sm:$0xff] (!%p316_p3)  ;;  %v1531_v28 = vcombine.low (!%p316_p3), %v661_v22, %v665_v25  ;;  %v1532_v29 = vcombine.high (!%p316_p3), %v661_v22, %v665_v25  ;;  %v669_v55 = vld [vmem:[%s2074_s7 + $0x48] sm:$0xff] (!%p316_p3) }
   0xc   : > { %1617 = vmatpush3.bf16.msra.mxu1 (!%p316_p3), %v1667_v2  ;;  %v672_v27 = vld [vmem:[%s2074_s7 + $0x60] sm:$0xff] (!%p316_p3)  ;;  %v673_v56 = vld [vmem:[%s2074_s7 + $0x68] sm:$0xff] (!%p316_p3) }
   0xd   : > { %1618 = vmatprep.subr.bf16.mxu1 (!%p316_p3), %v1698_v0  ;;  %v1538_v30 = vcombine.high (!%p316_p3), %v668_v26, %v672_v27  ;;  %v1537_v31 = vcombine.low (!%p316_p3), %v668_v26, %v672_v27  ;;  %v676_v32 = vld [vmem:[%s2074_s7 + $0x80] sm:$0xff] (!%p316_p3)  ;;  %v1540_v60 = vcombine.high (!%p316_p3), %v669_v55, %v673_v56  ;;  %v677_v61 = vld [vmem:[%s2074_s7 + $0x88] sm:$0xff] (!%p316_p3)  ;;  %v1539_v63 = vcombine.low (!%p316_p3), %v669_v55, %v673_v56  ;;  %v678_v55 = vld [vmem:[%s2074_s7 + $0x90] sm:$0xff] (!%p316_p3) }
   0xe   : > { %s2082_s30 = smov (!%p359_p4, %s1688_s30), 1  ;;  %v680_v33 = vld [vmem:[%s2074_s7 + $0xa0] sm:$0xff]  ;;  %v681_v62 = vld [vmem:[%s2074_s7 + $0xa8] sm:$0xff]  ;;  %v682_v56 = vld [vmem:[%s2074_s7 + $0xb0] sm:$0xff] }
   0xf   : > { %s1511_s17 = sshll.u32 %s2082_s30, 2  ;;  %s1595_s21 = sshll.u32 %s2082_s30, 4  ;;  %v1546_v34 = vcombine.high %v676_v32, %v680_v33  ;;  %v1545_v35 = vcombine.low %v676_v32, %v680_v33  ;;  %v684_v36 = vld [vmem:[%s2074_s7 + $0xc0] sm:$0xff]  ;;  %v685_v1 = vld [vmem:[%s2074_s7 + $0xc8] sm:$0xff]  ;;  %v663_v32 = vld [vmem:[%s2074_s7 + $0x18] sm:$0xff] }
  0x10   : > { %s371_s20 = scalar_lea.vmem %s2068_s1, %s1511_s17  ;;  %s366_s24 = scalar_lea.vmem %s2067_s0, %s1595_s21  ;;  %1619 = vmatpush3.bf16.msra.mxu1 %v1668_v6  ;;  %v688_v37 = vld [vmem:[%s2074_s7 + $0xe0] sm:$0xff]  ;;  %v689_v2 = vld [vmem:[%s2074_s7 + $0xe8] sm:$0xff] }
  0x11   : > { %v391_v3 = vld [vmem:[%s371_s20] sm:$0x7]  ;;  %v390_v5 = vld [vmem:[%s366_s24 + $0x8] sm:$0xff]  ;;  %1620 = vmatprep.subr.bf16.mxu1 %v1698_v0  ;;  %v1554_v38 = vcombine.high %v684_v36, %v688_v37  ;;  %v1553_v39 = vcombine.low %v684_v36, %v688_v37  ;;  %s1512_s20 = sshll.u32 %s2082_s30, 3 }
  0x12   : > { %1609 = vmatprep.subr.msk.mxu0 %vm406_vm0, %v391_v3  ;;  %v389_v4 = vld [vmem:[%s366_s24] sm:$0xff]  ;;  %v697_v6 = vld [vmem:[%s2074_s7 + $0x128] sm:$0xff]  ;;  %s375_s23 = scalar_lea.vmem %s2076_s9, %s1512_s20 }
  0x13   : > { %1610 = vmatpush3.msk.msra.mxu0 %vm406_vm0, %v391_v3  ;;  %1611 = vmatprep.mubr.msk.f32.mxu0 %vm399_vm1, %v389_v4  ;;  %v692_v40 = vld [vmem:[%s2074_s7 + $0x100] sm:$0xff]  ;;  %v1547_v3 = vcombine.low %v677_v61, %v681_v62  ;;  %v1556_v4 = vcombine.high %v685_v1, %v689_v2  ;;  %v721_v26 = vld [vmem:[%s2074_s7 + $0x1e8] sm:$0xff] }
  0x14   : > { %1626 = vmatprep.subr.bf16.mxu0 %v1698_v0  ;;  %1612 = vmatmul.mubr.msk.f32.vlgmr.msra.gmra.mrb[0].mxu0 %vm399_vm1, %v390_v5  ;;  %v696_v41 = vld [vmem:[%s2074_s7 + $0x120] sm:$0xff]  ;;  %v693_v5 = vld [vmem:[%s2074_s7 + $0x108] sm:$0xff] }
  0x15   : > { %1621 = vmatpush3.bf16.msra.mxu1 %v1669_v7  ;;  %1634 = vmatprep.mubr.msk.bf16.mxu0 %vm1699_vm2, %v1698_v0  ;;  %v1562_v42 = vcombine.high %v692_v40, %v696_v41  ;;  %v1561_v43 = vcombine.low %v692_v40, %v696_v41  ;;  %v700_v44 = vld [vmem:[%s2074_s7 + $0x140] sm:$0xff]  ;;  %v1555_v7 = vcombine.low %v685_v1, %v689_v2  ;;  %v687_v1 = vld [vmem:[%s2074_s7 + $0xd8] sm:$0xff] }
  0x16   : > { %1627 = vmatpush3.bf16.msra.mxu0 %v1670_v8  ;;  %1087 = vmatprep.subr.bf16.mxu1 %v1530_v24  ;;  %v704_v45 = vld [vmem:[%s2074_s7 + $0x160] sm:$0xff]  ;;  %v1564_v8 = vcombine.high %v693_v5, %v697_v6  ;;  %v717_v24 = vld [vmem:[%s2074_s7 + $0x1c8] sm:$0xff]  ;;  %v691_v2 = vld [vmem:[%s2074_s7 + $0xf8] sm:$0xff] }
  0x17   : > { %1628 = vmatprep.subr.bf16.mxu0 %v1698_v0  ;;  %v1570_v46 = vcombine.high %v700_v44, %v704_v45  ;;  %v1569_v47 = vcombine.low %v700_v44, %v704_v45  ;;  %v1517_v48 = vld [vmem:[%s2071_s4] ss:$0 sm:$0xff] }
  0x18   : > { %v716_v22 = vld [vmem:[%s2074_s7 + $0x1c0] sm:$0xff] }
  0x1a   : > { %1629 = vmatpush3.bf16.msra.mxu0 %v1671_v9  ;;  %v701_v9 = vld [vmem:[%s2074_s7 + $0x148] sm:$0xff] }
  0x1b   : > { %1630 = vmatprep.subr.bf16.mxu0 %v1698_v0 }
  0x1e   : > { %1631 = vmatpush3.bf16.msra.mxu0 %v1672_v18  ;;  %v713_v18 = vld [vmem:[%s2074_s7 + $0x1a8] sm:$0xff] }
  0x1f   : > { %1632 = vmatprep.subr.bf16.mxu0 %v1698_v0  ;;  %v1548_v0 = vcombine.high %v677_v61, %v681_v62  ;;  %v1550_v61 = vcombine.high %v678_v55, %v682_v56 }
  0x22   : > { %1633 = vmatpush3.bf16.msra.mxu0 %v1673_v19 }
  0x23   : > { %1130 = vmatprep.subr.bf16.mxu0 %v1532_v29  ;;  %v1588_v29 = vcombine.high %v717_v24, %v721_v26 }
  0xe7   : > { %v1613_v11 = vpop.f32.mrb[0].mxu0 }
  0xe8   : > { %v482_v12 = vadd.f32 %v1613_v11, %v1513_v10  ;;  %v476_v13 = vpop.f32.mrb[1].mxu0  ;;  %v1563_v11 = vcombine.low %v693_v5, %v697_v6  ;;  %v1560_v6 = vcombine.high %v687_v1, %v691_v2 }
  0xe9   : > { %v477_v14 = vadd.f32 %v1513_v10, %v476_v13  ;;  %v705_v10 = vld [vmem:[%s2074_s7 + $0x168] sm:$0xff] }
  0xea   : > { %v486_v15 = vmax.f32 %v482_v12, 0.0  ;;  %v1572_v12 = vcombine.high %v701_v9, %v705_v10  ;;  %v1571_v13 = vcombine.low %v701_v9, %v705_v10  ;;  %v695_v9 = vld [vmem:[%s2074_s7 + $0x118] sm:$0xff] }
  0xeb   : > { %v485_v16 = vmax.f32 %v477_v14, 0.0  ;;  %v708_v14 = vld [vmem:[%s2074_s7 + $0x180] sm:$0xff]  ;;  %v699_v10 = vld [vmem:[%s2074_s7 + $0x138] sm:$0xff] }
  0xed   : > { %v495_v17 = vpack.c.bf16 %v486_v15, %v485_v16  ;;  %v712_v15 = vld [vmem:[%s2074_s7 + $0x1a0] sm:$0xff]  ;;  %v709_v16 = vld [vmem:[%s2074_s7 + $0x188] sm:$0xff] }
  0xee   : > { %v1577_v19 = vcombine.low %v708_v14, %v712_v15  ;;  %v1579_v20 = vcombine.low %v709_v16, %v713_v18  ;;  %v1580_v21 = vcombine.high %v709_v16, %v713_v18  ;;  %v706_v16 = vld [vmem:[%s2074_s7 + $0x170] sm:$0xff]  ;;  %v707_v18 = vld [vmem:[%s2074_s7 + $0x178] sm:$0xff] }
  0xef   : > { %1623 = vmatmul.mubr.msk.bf16.vlgmr.msra.gmra.mrb[0].mxu1 %vm527_vm3, %v495_v17  ;;  %v1578_v17 = vcombine.high %v708_v14, %v712_v15  ;;  %v1568_v14 = vcombine.high %v695_v9, %v699_v10  ;;  %v702_v15 = vld [vmem:[%s2074_s7 + $0x150] sm:$0xff] }
  0xf0   : > { %1088 = vmatpush1.bf16.msra.mxu1 %v1529_v23  ;;  %v720_v23 = vld [vmem:[%s2074_s7 + $0x1e0] sm:$0xff] }
  0xf1   : > { %1089 = vmatprep.subr.bf16.mxu1 %v1538_v30  ;;  %v1586_v25 = vcombine.high %v716_v22, %v720_v23  ;;  %v1585_v27 = vcombine.low %v716_v22, %v720_v23  ;;  %v662_v30 = vld [vmem:[%s2074_s7 + $0x10] sm:$0xff] }
  0xf2   : > { %v710_v23 = vld [vmem:[%s2074_s7 + $0x190] sm:$0xff] }
  0xf4   : > { %1090 = vmatpush1.bf16.msra.mxu1 %v1537_v31  ;;  %v666_v31 = vld [vmem:[%s2074_s7 + $0x30] sm:$0xff] }
  0xf5   : > { %1091 = vmatprep.subr.bf16.mxu1 %v1546_v34  ;;  %v1534_v33 = vcombine.high %v662_v30, %v666_v31  ;;  %v667_v34 = vld [vmem:[%s2074_s7 + $0x38] sm:$0xff] }
  0xf6   : > { %v1535_v36 = vcombine.low %v663_v32, %v667_v34  ;;  %v1536_v37 = vcombine.high %v663_v32, %v667_v34  ;;  %v722_v32 = vld [vmem:[%s2074_s7 + $0x1f0] sm:$0xff]  ;;  %v723_v34 = vld [vmem:[%s2074_s7 + $0x1f8] sm:$0xff] }
  0xf8   : > { %1092 = vmatpush1.bf16.msra.mxu1 %v1545_v35  ;;  %v1533_v35 = vcombine.low %v662_v30, %v666_v31  ;;  %v718_v31 = vld [vmem:[%s2074_s7 + $0x1d0] sm:$0xff] }
  0xf9   : > { %1093 = vmatprep.subr.bf16.mxu1 %v1554_v38  ;;  %v1700_v38 = vmov 0  }
  0xfa   : > { %1119 = vmatprep.mubr.bf16.mxu1 %v1700_v38 }
  0xfc   : > { %1094 = vmatpush1.bf16.msra.mxu1 %v1553_v39  ;;  %v1523_v39 = vld [vmem:[%s2073_s6] ss:$0 sm:$0xff] }
  0xfd   : > { %1095 = vmatprep.subr.bf16.mxu1 %v1562_v42 }
 0x100   : > { %1096 = vmatpush1.bf16.msra.mxu1 %v1561_v43 }
 0x101   : > { %1097 = vmatprep.subr.bf16.mxu1 %v1570_v46  ;;  %v670_v46 = vld [vmem:[%s2074_s7 + $0x50] sm:$0xff] }
 0x104   : > { %1098 = vmatpush1.bf16.msra.mxu1 %v1569_v47  ;;  %v674_v47 = vld [vmem:[%s2074_s7 + $0x70] sm:$0xff] }
 0x105   : > { %1099 = vmatprep.subr.bf16.mxu1 %v1578_v17  ;;  %v703_v17 = vld [vmem:[%s2074_s7 + $0x158] sm:$0xff] }
 0x106   : > { %v1576_v22 = vcombine.high %v703_v17, %v707_v18 }
 0x108   : > { %1100 = vmatpush1.bf16.msra.mxu1 %v1577_v19 }
 0x109   : > { %1101 = vmatprep.subr.bf16.mxu1 %v1586_v25  ;;  %v711_v25 = vld [vmem:[%s2074_s7 + $0x198] sm:$0xff] }
 0x10c   : > { %1102 = vmatpush1.bf16.msra.mxu1 %v1585_v27  ;;  %v1573_v27 = vcombine.low %v702_v15, %v706_v16 }
 0x10d   : > { %1173 = vmatprep.subr.bf16.mxu1 %v1534_v33  ;;  %v719_v33 = vld [vmem:[%s2074_s7 + $0x1d8] sm:$0xff] }
 0x1c2   : > { %v565_v49 = vpop.f32.mrb[0].mxu1 }
 0x1c3   : > { %v566_v50 = vadd.f32 %v1517_v48, %v565_v49  ;;  %v1624_v51 = vpop.f32.mrb[1].mxu1  ;;  %v675_v49 = vld [vmem:[%s2074_s7 + $0x78] sm:$0xff] }
 0x1c4   : > { %v568_v52 = vpop.f32.mrb[2].mxu1 }
 0x1c5   : > { %v569_v53 = vadd.f32 %v1517_v48, %v568_v52  ;;  %v1625_v54 = vpop.f32.mrb[3].mxu1  ;;  %v572_v57 = vmax.f32 %v566_v50, 0.0  ;;  %v671_v48 = vld [vmem:[%s2074_s7 + $0x58] sm:$0xff] }
 0x1c6   : > { %v1544_v54 = vcombine.high %v671_v48, %v675_v49 }
 0x1c7   : > { %v573_v58 = vmax.f32 %v569_v53, 0.0  ;;  %v1542_v53 = vcombine.high %v670_v46, %v674_v47 }
 0x1c9   : > { %v582_v59 = vpack.c.bf16 %v573_v58, %v572_v57  ;;  %v679_v57 = vld [vmem:[%s2074_s7 + $0x98] sm:$0xff] }
 0x1ca   : > { %v683_v58 = vld [vmem:[%s2074_s7 + $0xb8] sm:$0xff] }
 0x1cb   : > { %1635 = vmatmul.mubr.msk.bf16.vlgmr.msra.gmra.mrb[4].mxu0 %vm527_vm3, %v582_v59  ;;  %v1541_v59 = vcombine.low %v670_v46, %v674_v47  ;;  %v1552_v62 = vcombine.high %v679_v57, %v683_v58 }
 0x1cc   : > { %1131 = vmatpush1.bf16.msra.mxu0 %v1531_v28  ;;  %v1587_v28 = vcombine.low %v717_v24, %v721_v26  ;;  %1162 = vmatprep.mubr.bf16.mxu0 %v1700_v38  ;;  %v714_v24 = vld [vmem:[%s2074_s7 + $0x1b0] sm:$0xff]  ;;  %v715_v26 = vld [vmem:[%s2074_s7 + $0x1b8] sm:$0xff] }
 0x1cd   : > { %1132 = vmatprep.subr.bf16.mxu0 %v1540_v60  ;;  %v1543_v60 = vcombine.low %v671_v48, %v675_v49  ;;  %v1584_v30 = vcombine.high %v711_v25, %v715_v26 }
 0x1d0   : > { %1133 = vmatpush1.bf16.msra.mxu0 %v1539_v63  ;;  %v686_v63 = vld [vmem:[%s2074_s7 + $0xd0] sm:$0xff] }
 0x1d1   : > { %1134 = vmatprep.subr.bf16.mxu0 %v1548_v0  ;;  %v690_v0 = vld [vmem:[%s2074_s7 + $0xf0] sm:$0xff] }
 0x1d2   : > { %v1558_v5 = vcombine.high %v686_v63, %v690_v0 }
 0x1d4   : > { %1135 = vmatpush1.bf16.msra.mxu0 %v1547_v3  ;;  %v1549_v3 = vcombine.low %v678_v55, %v682_v56 }
 0x1d5   : > { %1136 = vmatprep.subr.bf16.mxu0 %v1556_v4  ;;  %v1551_v4 = vcombine.low %v679_v57, %v683_v58 }
 0x1d8   : > { %1137 = vmatpush1.bf16.msra.mxu0 %v1555_v7  ;;  %v694_v7 = vld [vmem:[%s2074_s7 + $0x110] sm:$0xff] }
 0x1d9   : > { %1138 = vmatprep.subr.bf16.mxu0 %v1564_v8  ;;  %v698_v8 = vld [vmem:[%s2074_s7 + $0x130] sm:$0xff] }
 0x1da   : > { %v1565_v19 = vcombine.low %v694_v7, %v698_v8 }
 0x1dc   : > { %1139 = vmatpush1.bf16.msra.mxu0 %v1563_v11  ;;  %v1557_v11 = vcombine.low %v686_v63, %v690_v0 }
 0x1dd   : > { %1140 = vmatprep.subr.bf16.mxu0 %v1572_v12  ;;  %v1559_v12 = vcombine.low %v687_v1, %v691_v2 }
 0x1e0   : > { %1141 = vmatpush1.bf16.msra.mxu0 %v1571_v13  ;;  %v1566_v13 = vcombine.high %v694_v7, %v698_v8 }
 0x1e1   : > { %1142 = vmatprep.subr.bf16.mxu0 %v1580_v21  ;;  %v1574_v21 = vcombine.high %v702_v15, %v706_v16 }
 0x1e4   : > { %1143 = vmatpush1.bf16.msra.mxu0 %v1579_v20  ;;  %v1567_v20 = vcombine.low %v695_v9, %v699_v10 }
 0x1e5   : > { %1144 = vmatprep.subr.bf16.mxu0 %v1588_v29  ;;  %v1582_v29 = vcombine.high %v710_v23, %v714_v24 }
 0x1e8   : > { %1145 = vmatpush1.bf16.msra.mxu0 %v1587_v28  ;;  %v1575_v28 = vcombine.low %v703_v17, %v707_v18 }
 0x1e9   : > { %1216 = vmatprep.subr.bf16.mxu0 %v1536_v37  ;;  %v1590_v37 = vcombine.high %v718_v31, %v722_v32 }
 0x29e   : > { %v651_v40 = vpop.f32.mrb[4].mxu0 }
 0x29f   : > { %v652_v41 = vadd.f32 %v1523_v39, %v651_v40  ;;  %v1636_v42 = vpop.f32.mrb[5].mxu0  ;;  %v1591_v40 = vcombine.low %v719_v33, %v723_v34 }
 0x2a0   : > { %v654_v43 = vpop.f32.mrb[6].mxu0 }
 0x2a1   : > { %v655_v44 = vadd.f32 %v1523_v39, %v654_v43  ;;  %v1637_v45 = vpop.f32.mrb[7].mxu0  ;;  %v658_v50 = vmax.f32 %v652_v41, 0.0  ;;  %v1589_v39 = vcombine.low %v718_v31, %v722_v32  ;;  %v727_v41 = vlaneseq }
 0x2a2   : > { %v2020_v45 = vld [vmem:[%s2075_s8] sm:$0xff] }
 0x2a3   : > { %v659_v51 = vmax.f32 %v655_v44, 0.0  ;;  %v2013_v42 = vshrl.u32 %v727_v41, 7 }
 0x2a5   : > { %v1935_v52 = vpack.c.bf16 %v659_v51, %v658_v50  ;;  %v729_v43 = vsub.s32 0, %v2013_v42  ;;  %v737_v44 = vsub.s32 2, %v2013_v42  ;;  %v733_v46 = vsub.s32 1, %v2013_v42 }
 0x2a6   : > { %v741_v47 = vsub.s32 3, %v2013_v42 }
 0x2a7   : > { %1120 = vmatmul.mubr.bf16.vlgmr.msra.gmra.mrb[4].mxu1 %v1935_v52  ;;  %1163 = vmatmul.mubr.bf16.vlgmr.msra.gmra.mrb[8].mxu0 %v1935_v52  ;;  %v730_v48 = vrot.slane %v2020_v45, %v729_v43  ;;  %v738_v49 = vrot.slane %v2020_v45, %v737_v44  ;;  %v734_v50 = vrot.slane %v2020_v45, %v733_v46 }
 0x2a8   : > { %1174 = vmatpush1.bf16.msra.mxu1 %v1533_v35  ;;  %1217 = vmatpush1.bf16.msra.mxu0 %v1535_v36  ;;  %v1581_v35 = vcombine.low %v710_v23, %v714_v24  ;;  %v1583_v36 = vcombine.low %v711_v25, %v715_v26  ;;  %v742_v51 = vrot.slane %v2020_v45, %v741_v47  ;;  %v1701_v23 = vmov 1966171168  }
 0x2a9   : > { %1175 = vmatprep.subr.bf16.mxu1 %v1542_v53  ;;  %1218 = vmatprep.subr.bf16.mxu0 %v1544_v54  ;;  %v1379_v24 = vunpack.c.l.s4 %v1701_v23 }
 0x2aa   : > { %1205 = vmatprep.mubr.bf16.mxu1 %v1700_v38  ;;  %1248 = vmatprep.mubr.bf16.mxu0 %v1700_v38  ;;  %v1592_v38 = vcombine.high %v719_v33, %v723_v34 }
 0x2ab   : > { %v1380_v33 = vunpack.c.0.s8 %v1379_v24 }
 0x2ac   : > { %1176 = vmatpush1.bf16.msra.mxu1 %v1541_v59  ;;  %1219 = vmatpush1.bf16.msra.mxu0 %v1543_v60 }
 0x2ad   : > { %1177 = vmatprep.subr.bf16.mxu1 %v1550_v61  ;;  %1220 = vmatprep.subr.bf16.mxu0 %v1552_v62  ;;  %v2029_v43 = vsub.s32 %v1380_v33, %v2013_v42 }
 0x2b0   : > { %1178 = vmatpush1.bf16.msra.mxu1 %v1549_v3  ;;  %1221 = vmatpush1.bf16.msra.mxu0 %v1551_v4 }
 0x2b1   : > { %1179 = vmatprep.subr.bf16.mxu1 %v1558_v5  ;;  %1222 = vmatprep.subr.bf16.mxu0 %v1560_v6 }
 0x2b4   : > { %1180 = vmatpush1.bf16.msra.mxu1 %v1557_v11  ;;  %1223 = vmatpush1.bf16.msra.mxu0 %v1559_v12 }
 0x2b5   : > { %1181 = vmatprep.subr.bf16.mxu1 %v1566_v13  ;;  %1224 = vmatprep.subr.bf16.mxu0 %v1568_v14 }
 0x2b8   : > { %1182 = vmatpush1.bf16.msra.mxu1 %v1565_v19  ;;  %1225 = vmatpush1.bf16.msra.mxu0 %v1567_v20 }
 0x2b9   : > { %1183 = vmatprep.subr.bf16.mxu1 %v1574_v21  ;;  %1226 = vmatprep.subr.bf16.mxu0 %v1576_v22 }
 0x2bc   : > { %1184 = vmatpush1.bf16.msra.mxu1 %v1573_v27  ;;  %1227 = vmatpush1.bf16.msra.mxu0 %v1575_v28 }
 0x2bd   : > { %1185 = vmatprep.subr.bf16.mxu1 %v1582_v29  ;;  %1228 = vmatprep.subr.bf16.mxu0 %v1584_v30 }
 0x2c0   : > { %1186 = vmatpush1.bf16.msra.mxu1 %v1581_v35  ;;  %1229 = vmatpush1.bf16.msra.mxu0 %v1583_v36 }
 0x2c1   : > { %1187 = vmatprep.subr.bf16.mxu1 %v1590_v37  ;;  %1230 = vmatprep.subr.bf16.mxu0 %v1592_v38 }
 0x2c4   : > { %1188 = vmatpush1.bf16.msra.mxu1 %v1589_v39  ;;  %1231 = vmatpush1.bf16.msra.mxu0 %v1591_v40 }
 0x2c7   : > { %1206 = vmatmul.mubr.bf16.vlgmr.msra.gmra.mrb[8].mxu1 %v1935_v52  ;;  %1249 = vmatmul.mubr.bf16.vlgmr.msra.gmra.mrb[12].mxu0 %v1935_v52 }
 0x37a   : > { %v1121_v52 = vpop.f32.mrb[4].mxu1  ;;  %v1164_v53 = vpop.f32.mrb[8].mxu0 }
 0x37b   : > { %v1122_v54 = vadd.f32 %v1121_v52, %v730_v48  ;;  %v1165_v55 = vadd.f32 %v1164_v53, %v738_v49  ;;  %v1123_v56 = vpop.f32.mrb[5].mxu1  ;;  %v1166_v57 = vpop.f32.mrb[9].mxu0  ;;  %v749_v53 = vsub.s32 5, %v2013_v42 }
 0x37c   : > { %v1124_v58 = vadd.f32 %v1123_v56, %v734_v50  ;;  %v1167_v59 = vadd.f32 %v1166_v57, %v742_v51  ;;  %v1125_v60 = vpop.f32.mrb[6].mxu1  ;;  %v1168_v61 = vpop.f32.mrb[10].mxu0 }
 0x37d   : > { %v1126_v62 = vadd.f32 %v1125_v60, %v730_v48  ;;  %v1169_v63 = vadd.f32 %v1168_v61, %v738_v49  ;;  %v1127_v0 = vpop.f32.mrb[7].mxu1  ;;  %v1170_v1 = vpop.f32.mrb[11].mxu0  ;;  %v1259_v4 = vmax.f32 %v1122_v54, 0.0  ;;  %v1261_v5 = vmax.f32 %v1165_v55, 0.0 }
 0x37e   : > { %v1128_v2 = vadd.f32 %v1127_v0, %v734_v50  ;;  %v1171_v3 = vadd.f32 %v1170_v1, %v742_v51  ;;  %v1260_v8 = vmax.f32 %v1124_v58, 0.0  ;;  %v1262_v9 = vmax.f32 %v1167_v59, 0.0 }
 0x37f   : > { %v1267_v6 = vmax.f32 %v1126_v62, 0.0  ;;  %v1269_v7 = vmax.f32 %v1169_v63, 0.0  ;;  %v745_v50 = vsub.s32 4, %v2013_v42  ;;  %v753_v51 = vsub.s32 6, %v2013_v42 }
 0x380   : > { %v1268_v10 = vmax.f32 %v1128_v2, 0.0  ;;  %v1270_v11 = vmax.f32 %v1171_v3, 0.0  ;;  %v757_v54 = vsub.s32 7, %v2013_v42  ;;  %v750_v57 = vrot.slane %v2020_v45, %v749_v53 }
 0x381   : > { %v1283_v12 = vmax.f32 %v1259_v4, %v1267_v6  ;;  %v1285_v13 = vmax.f32 %v1261_v5, %v1269_v7  ;;  %v746_v55 = vrot.slane %v2020_v45, %v745_v50  ;;  %v754_v56 = vrot.slane %v2020_v45, %v753_v51 }
 0x382   : > { %v1284_v14 = vmax.f32 %v1260_v8, %v1268_v10  ;;  %v1286_v15 = vmax.f32 %v1262_v9, %v1270_v11  ;;  %v758_v58 = vrot.slane %v2020_v45, %v757_v54 }
 0x383   : > { %v1318_v16 = vrot.slane %v1283_v12, 4  ;;  %v1330_v17 = vrot.slane %v1285_v13, 4 }
 0x384   : > { %v1324_v18 = vrot.slane %v1284_v14, 4  ;;  %v1336_v19 = vrot.slane %v1286_v15, 4 }
 0x385   : > { %v1319_v20 = vmax.f32 %v1283_v12, %v1318_v16  ;;  %v1331_v21 = vmax.f32 %v1285_v13, %v1330_v17 }
 0x386   : > { %v1325_v22 = vmax.f32 %v1284_v14, %v1324_v18  ;;  %v1337_v25 = vmax.f32 %v1286_v15, %v1336_v19 }
 0x387   : > { %v1320_v26 = vrot.slane %v1319_v20, 2  ;;  %v1332_v27 = vrot.slane %v1331_v21, 2 }
 0x388   : > { %v1326_v28 = vrot.slane %v1325_v22, 2  ;;  %v1338_v29 = vrot.slane %v1337_v25, 2 }
 0x389   : > { %v1321_v30 = vmax.f32 %v1319_v20, %v1320_v26  ;;  %v1333_v31 = vmax.f32 %v1331_v21, %v1332_v27 }
 0x38a   : > { %v1327_v32 = vmax.f32 %v1325_v22, %v1326_v28  ;;  %v1339_v34 = vmax.f32 %v1337_v25, %v1338_v29 }
 0x38b   : > { %v1322_v35 = vrot.slane %v1321_v30, 1  ;;  %v1334_v36 = vrot.slane %v1333_v31, 1 }
 0x38c   : > { %v1328_v37 = vrot.slane %v1327_v32, 1  ;;  %v1340_v38 = vrot.slane %v1339_v34, 1 }
 0x38d   : > { %v1323_v39 = vmax.f32 %v1321_v30, %v1322_v35  ;;  %v1335_v40 = vmax.f32 %v1333_v31, %v1334_v36 }
 0x38e   : > { %v1329_v41 = vmax.f32 %v1327_v32, %v1328_v37  ;;  %v1341_v44 = vmax.f32 %v1339_v34, %v1340_v38 }
 0x390   : > { %v1374_v46 = vcombine.low %v1323_v39, %v1329_v41  ;;  %v1375_v47 = vcombine.low %v1335_v40, %v1341_v44 }
 0x392   : > { %v2032_v48 = vrot.slane %v1374_v46, %v2029_v43  ;;  %v2035_v49 = vrot.slane %v1375_v47, %v2029_v43 }
 0x394   : > { %v1406_v52 = vcombine.low %v2032_v48, %v2035_v49 }
 0x39a   : > { %v1207_v59 = vpop.f32.mrb[8].mxu1  ;;  %v1250_v60 = vpop.f32.mrb[12].mxu0 }
 0x39b   : > { %v1208_v61 = vadd.f32 %v1207_v59, %v746_v55  ;;  %v1251_v62 = vadd.f32 %v1250_v60, %v754_v56  ;;  %v1209_v63 = vpop.f32.mrb[9].mxu1  ;;  %v1252_v0 = vpop.f32.mrb[13].mxu0 }
 0x39c   : > { %v1210_v1 = vadd.f32 %v1209_v63, %v750_v57  ;;  %v1253_v2 = vadd.f32 %v1252_v0, %v758_v58  ;;  %v1211_v3 = vpop.f32.mrb[10].mxu1  ;;  %v1254_v4 = vpop.f32.mrb[14].mxu0 }
 0x39d   : > { %v1212_v5 = vadd.f32 %v1211_v3, %v746_v55  ;;  %v1255_v42 = vadd.f32 %v1254_v4, %v754_v56  ;;  %v1213_v6 = vpop.f32.mrb[11].mxu1  ;;  %v1256_v7 = vpop.f32.mrb[15].mxu0  ;;  %v1263_v10 = vmax.f32 %v1208_v61, 0.0  ;;  %v1265_v11 = vmax.f32 %v1251_v62, 0.0 }
 0x39e   : > { %v1214_v8 = vadd.f32 %v1213_v6, %v750_v57  ;;  %v1257_v9 = vadd.f32 %v1256_v7, %v758_v58  ;;  %v1264_v13 = vmax.f32 %v1210_v1, 0.0  ;;  %v1266_v14 = vmax.f32 %v1253_v2, 0.0 }
 0x39f   : > { %v1271_v12 = vmax.f32 %v1212_v5, 0.0  ;;  %v1273_v45 = vmax.f32 %v1255_v42, 0.0  ;;  %v1414_v56 = vrot.slane %v1406_v52, %v2029_v43 }
 0x3a0   : > { %v1272_v15 = vmax.f32 %v1214_v8, 0.0  ;;  %v1274_v16 = vmax.f32 %v1257_v9, 0.0 }
 0x3a1   : > { %v1287_v17 = vmax.f32 %v1263_v10, %v1271_v12  ;;  %v1289_v18 = vmax.f32 %v1265_v11, %v1273_v45 }
 0x3a2   : > { %v1288_v19 = vmax.f32 %v1264_v13, %v1272_v15  ;;  %v1290_v20 = vmax.f32 %v1266_v14, %v1274_v16 }
 0x3a3   : > { %v1342_v21 = vrot.slane %v1287_v17, 4  ;;  %v1354_v22 = vrot.slane %v1289_v18, 4 }
 0x3a4   : > { %v1348_v23 = vrot.slane %v1288_v19, 4  ;;  %v1360_v24 = vrot.slane %v1290_v20, 4 }
 0x3a5   : > { %v1343_v25 = vmax.f32 %v1287_v17, %v1342_v21  ;;  %v1355_v26 = vmax.f32 %v1289_v18, %v1354_v22 }
 0x3a6   : > { %v1349_v27 = vmax.f32 %v1288_v19, %v1348_v23  ;;  %v1361_v28 = vmax.f32 %v1290_v20, %v1360_v24 }
 0x3a7   : > { %v1344_v29 = vrot.slane %v1343_v25, 2  ;;  %v1356_v30 = vrot.slane %v1355_v26, 2 }
 0x3a8   : > { %v1350_v31 = vrot.slane %v1349_v27, 2  ;;  %v1362_v32 = vrot.slane %v1361_v28, 2 }
 0x3a9   : > { %v1345_v33 = vmax.f32 %v1343_v25, %v1344_v29  ;;  %v1357_v34 = vmax.f32 %v1355_v26, %v1356_v30 }
 0x3aa   : > { %v1351_v35 = vmax.f32 %v1349_v27, %v1350_v31  ;;  %v1363_v36 = vmax.f32 %v1361_v28, %v1362_v32 }
 0x3ab   : > { %v1346_v37 = vrot.slane %v1345_v33, 1  ;;  %v1358_v38 = vrot.slane %v1357_v34, 1 }
 0x3ac   : > { %v1352_v39 = vrot.slane %v1351_v35, 1  ;;  %v1364_v40 = vrot.slane %v1363_v36, 1 }
 0x3ad   : > { %v1347_v41 = vmax.f32 %v1345_v33, %v1346_v37  ;;  %v1359_v44 = vmax.f32 %v1357_v34, %v1358_v38 }
 0x3ae   : > { %v1353_v46 = vmax.f32 %v1351_v35, %v1352_v39  ;;  %v1365_v47 = vmax.f32 %v1363_v36, %v1364_v40 }
 0x3b0   : > { %v1376_v50 = vcombine.low %v1347_v41, %v1353_v46  ;;  %v1377_v51 = vcombine.low %v1359_v44, %v1365_v47 }
 0x3b2   : > { %v1398_v53 = vrot.slane %v1376_v50, %v2029_v43  ;;  %v1405_v54 = vrot.slane %v1377_v51, %v2029_v43 }
 0x3b4   : > { %v1407_v55 = vcombine.low %v1398_v53, %v1405_v54 }
 0x3b6   : > { %v1421_v57 = vrot.slane %v1407_v55, %v2029_v43 }
 0x3b8   : > { %v1422_v58 = vcombine.low %v1414_v56, %v1421_v57 }
 0x3ba   : > { %1424 = vst [vmem:[%s375_s23] sm:$0xff] %v1422_v58 }
 0x3bb PF: > { %s19_s11 = sadd.s32 1, %s1696_s11   ;;  %s2077_s30 = smov %s1692_s10 }
 0x3bc   : > { %p16_p5 = scmp.ge.s32.totalorder %s19_s11, 4   ;;  %s2078_s10 = smov %s2080_s12 }
 0x3be   :  { %18 = sbr.rel (!%p16_p5) target bundleno = 2 (0x2), region = 97 }

// kernel: pointnet_forward.10
= control target key start
LH: loop header
LB: loop body
LE: loop exit
PB: predicated region body
PF: predicated region fallthrough
CT: control target
= control target key end

     0   :  { %s1594_s24 = smov 0   ;;  %s1596_s25 = smov 0   ;;  %s1875_s0 = inlined_call_operand.vmem [shape: f32[2,16,3], index: 0, kind: input, shape index: {}]   ;;  %s1876_s1 = inlined_call_operand.vmem [shape: f32[2,3,64], index: 1, kind: input, shape index: {}]   ;;  %s1877_s2 = inlined_call_operand.vmem [shape: f32[1,64], index: 2, kind: input, shape index: {}]   ;;  %s1878_s3 = inlined_call_operand.vmem [shape: bf16[2,64,128], index: 3, kind: input, shape index: {}]   ;;  %s1879_s4 = inlined_call_operand.vmem [shape: f32[1,128], index: 4, kind: input, shape index: {}]   ;;  %s1880_s5 = inlined_call_operand.vmem [shape: bf16[128,1024], index: 5, kind: input, shape index: {}]   ;;  %s1881_s6 = inlined_call_operand.vmem [shape: f32[1,1024], index: 6, kind: input, shape index: {}]   ;;  %s1882_s7 = inlined_call_operand.vmem [shape: f32[2,1,1024], index: 7, kind: output, shape index: {}]  }
   0x1   :  { %s1598_s26 = smov 0  }
   0x2 LB: > { %s29_s27 = sadd.s32 1, %s1544_s25  ;;  %p1384_p0 = scmp.ge.s32.totalorder %s1548_s26, 1  ;;  %s1548_s26 = sphi %s1598_s26, %s17_s26   ;;  %s1544_s25 = sphi %s1596_s25, %s1884_s25   ;;  %s1540_s24 = sphi %s1594_s24, %s1883_s24  }
   0x3   : > { %p31_p1 = scmp.ge.s32.totalorder %s29_s27, 2  ;;  %p275_p2 = scmp.lt.s32.totalorder %s1548_s26, 3 }
   0x5   : > { %s1886_s27 = smov (%p31_p1, %s29_s27), 0  ;;  %p276_p3 = pnand %p1384_p0, %p275_p2 }
   0x6   : > { %p320_p4 = scmp.lt.s32.totalorder (!%p276_p3), %s1540_s24, 1  ;;  %v1550_v0 = vmov (!%p276_p3), 0.0   ;;  %vm372_vm0 = vcmask (!%p276_p3), 1042432   ;;  %vm365_vm1 = vcmask (!%p276_p3), 23552   ;;  %vm1551_vm2 = vmmov (!%p276_p3), 0   ;;  %v540_v8 = vld [vmem:[%s1880_s5] sm:$0xff] (!%p276_p3) }
   0x7   : > { %279 = sbr.rel (%p276_p3) target bundleno = 734 (0x2de), region = 48  ;;  %1482 = vmatprep.subr.bf16.mxu1 (!%p276_p3), %v1550_v0  ;;  %1490 = vmatprep.mubr.msk.bf16.mxu1 (!%p276_p3), %vm1551_vm2, %v1550_v0  ;;  %v544_v9 = vld [vmem:[%s1880_s5 + $0x20] sm:$0xff] (!%p276_p3)  ;;  %v541_v10 = vld [vmem:[%s1880_s5 + $0x8] sm:$0xff] (!%p276_p3)  ;;  %vm493_vm3 = vcmask (!%p276_p3), 523264  }
   0x8   : > { %v1401_v11 = vcombine.low (!%p276_p3), %v540_v8, %v544_v9  ;;  %v1402_v12 = vcombine.high (!%p276_p3), %v540_v8, %v544_v9  ;;  %v545_v13 = vld [vmem:[%s1880_s5 + $0x28] sm:$0xff] (!%p276_p3)  ;;  %v548_v14 = vld [vmem:[%s1880_s5 + $0x40] sm:$0xff] (!%p276_p3) }
   0x9   : > { %v552_v15 = vld [vmem:[%s1880_s5 + $0x60] sm:$0xff] (!%p276_p3)  ;;  %v1403_v16 = vcombine.low (!%p276_p3), %v541_v10, %v545_v13  ;;  %v1404_v17 = vcombine.high (!%p276_p3), %v541_v10, %v545_v13  ;;  %v549_v42 = vld [vmem:[%s1880_s5 + $0x48] sm:$0xff] (!%p276_p3) }
   0xa   : > { %v1410_v18 = vcombine.high (!%p276_p3), %v548_v14, %v552_v15  ;;  %v1409_v19 = vcombine.low (!%p276_p3), %v548_v14, %v552_v15  ;;  %v556_v20 = vld [vmem:[%s1880_s5 + $0x80] sm:$0xff] (!%p276_p3)  ;;  %v553_v43 = vld [vmem:[%s1880_s5 + $0x68] sm:$0xff] (!%p276_p3) }
   0xb   : > { %v560_v21 = vld [vmem:[%s1880_s5 + $0xa0] sm:$0xff] (!%p276_p3)  ;;  %v1412_v46 = vcombine.high (!%p276_p3), %v549_v42, %v553_v43  ;;  %v557_v47 = vld [vmem:[%s1880_s5 + $0x88] sm:$0xff] (!%p276_p3)  ;;  %v1411_v49 = vcombine.low (!%p276_p3), %v549_v42, %v553_v43  ;;  %v562_v42 = vld [vmem:[%s1880_s5 + $0xb0] sm:$0xff] (!%p276_p3) }
   0xc   : > { %v1418_v22 = vcombine.high (!%p276_p3), %v556_v20, %v560_v21  ;;  %v1417_v23 = vcombine.low (!%p276_p3), %v556_v20, %v560_v21  ;;  %v564_v24 = vld [vmem:[%s1880_s5 + $0xc0] sm:$0xff] (!%p276_p3)  ;;  %v561_v48 = vld [vmem:[%s1880_s5 + $0xa8] sm:$0xff] (!%p276_p3)  ;;  %v547_v20 = vld [vmem:[%s1880_s5 + $0x38] sm:$0xff] (!%p276_p3) }
   0xd   : > { %v568_v25 = vld [vmem:[%s1880_s5 + $0xe0] sm:$0xff] (!%p276_p3)  ;;  %v1420_v50 = vcombine.high (!%p276_p3), %v557_v47, %v561_v48  ;;  %v565_v51 = vld [vmem:[%s1880_s5 + $0xc8] sm:$0xff] (!%p276_p3)  ;;  %v1419_v53 = vcombine.low (!%p276_p3), %v557_v47, %v561_v48  ;;  %v559_v43 = vld [vmem:[%s1880_s5 + $0x98] sm:$0xff] (!%p276_p3) }
   0xe   : > { %s1888_s24 = smov (!%p320_p4, %s1540_s24), 1  ;;  %v1426_v26 = vcombine.high %v564_v24, %v568_v25  ;;  %v1425_v27 = vcombine.low %v564_v24, %v568_v25  ;;  %v572_v28 = vld [vmem:[%s1880_s5 + $0x100] sm:$0xff]  ;;  %v569_v52 = vld [vmem:[%s1880_s5 + $0xe8] sm:$0xff]  ;;  %v1552_v24 = vmov 0  }
   0xf   : > { %s1387_s28 = sshll.u32 %s1888_s24, 2  ;;  %s1468_s29 = sshll.u32 %s1888_s24, 5  ;;  %v576_v29 = vld [vmem:[%s1880_s5 + $0x120] sm:$0xff]  ;;  %v1428_v54 = vcombine.high %v565_v51, %v569_v52  ;;  %v573_v55 = vld [vmem:[%s1880_s5 + $0x108] sm:$0xff]  ;;  %v1427_v57 = vcombine.low %v565_v51, %v569_v52  ;;  %v567_v51 = vld [vmem:[%s1880_s5 + $0xd8] sm:$0xff] }
  0x10   : > { %s332_s9 = scalar_lea.vmem %s1876_s1, %s1387_s28  ;;  %s337_s12 = scalar_lea.vmem %s1878_s3, %s1468_s29  ;;  %v1434_v30 = vcombine.high %v572_v28, %v576_v29  ;;  %v1433_v31 = vcombine.low %v572_v28, %v576_v29  ;;  %v580_v32 = vld [vmem:[%s1880_s5 + $0x140] sm:$0xff]  ;;  %v577_v56 = vld [vmem:[%s1880_s5 + $0x128] sm:$0xff]  ;;  %v571_v52 = vld [vmem:[%s1880_s5 + $0xf8] sm:$0xff] }
  0x11   : > { %v357_v1 = vld [vmem:[%s332_s9] sm:$0x7]  ;;  %s1467_s13 = sshll.u32 %s1888_s24, 4  ;;  %v1523_v5 = vld [vmem:[%s337_s12 + $0x8] sm:$0xff]   ;;  %v1524_v6 = vld [vmem:[%s337_s12 + $0x10] sm:$0xff]   ;;  %v1436_v58 = vcombine.high %v573_v55, %v577_v56  ;;  %v1435_v61 = vcombine.low %v573_v55, %v577_v56  ;;  %v1432_v56 = vcombine.high %v567_v51, %v571_v52  ;;  %s1390_s18 = sshll.u32 %s1888_s24, 3 }
  0x12   : > { %1477 = vmatprep.subr.msk.mxu0 %vm372_vm0, %v357_v1  ;;  %s327_s16 = scalar_lea.vmem %s1875_s0, %s1467_s13  ;;  %v1522_v2 = vld [vmem:[%s337_s12] sm:$0xff]   ;;  %v1525_v7 = vld [vmem:[%s337_s12 + $0x18] sm:$0xff]   ;;  %v581_v59 = vld [vmem:[%s1880_s5 + $0x148] sm:$0xff]  ;;  %s341_s21 = scalar_lea.vmem %s1882_s7, %s1390_s18 }
  0x13   : > { %1478 = vmatpush3.msk.msra.mxu0 %vm372_vm0, %v357_v1  ;;  %v355_v3 = vld [vmem:[%s327_s16] sm:$0xff]  ;;  %v356_v4 = vld [vmem:[%s327_s16 + $0x8] sm:$0xff]  ;;  %1483 = vmatpush3.bf16.msra.mxu1 %v1522_v2 }
  0x14   : > { %1479 = vmatprep.mubr.msk.f32.mxu0 %vm365_vm1, %v355_v3  ;;  %1484 = vmatprep.subr.bf16.mxu1 %v1550_v0  ;;  %v584_v33 = vld [vmem:[%s1880_s5 + $0x160] sm:$0xff]  ;;  %v585_v60 = vld [vmem:[%s1880_s5 + $0x168] sm:$0xff] }
  0x15   : > { %1480 = vmatmul.mubr.msk.f32.vlgmr.msra.gmra.mrb[0].mxu0 %vm365_vm1, %v356_v4  ;;  %967 = vmatprep.subr.bf16.mxu0 %v1402_v12  ;;  %v1442_v34 = vcombine.high %v580_v32, %v584_v33  ;;  %v1441_v35 = vcombine.low %v580_v32, %v584_v33  ;;  %v1391_v36 = vld [vmem:[%s1877_s2] ss:$0 sm:$0xff]  ;;  %v1444_v62 = vcombine.high %v581_v59, %v585_v60  ;;  %v589_v2 = vld [vmem:[%s1880_s5 + $0x188] sm:$0xff]  ;;  %v550_v32 = vld [vmem:[%s1880_s5 + $0x50] sm:$0xff] }
  0x16   : > { %968 = vmatpush1.bf16.msra.mxu0 %v1401_v11  ;;  %v1443_v63 = vcombine.low %v581_v59, %v585_v60  ;;  %v592_v1 = vld [vmem:[%s1880_s5 + $0x1a0] sm:$0xff]  ;;  %v593_v4 = vld [vmem:[%s1880_s5 + $0x1a8] sm:$0xff]  ;;  %999 = vmatprep.mubr.bf16.mxu0 %v1552_v24  ;;  %v554_v33 = vld [vmem:[%s1880_s5 + $0x70] sm:$0xff] }
  0x17   : > { %1485 = vmatpush3.bf16.msra.mxu1 %v1523_v5  ;;  %969 = vmatprep.subr.bf16.mxu0 %v1410_v18  ;;  %v596_v8 = vld [vmem:[%s1880_s5 + $0x1c0] sm:$0xff]  ;;  %v597_v10 = vld [vmem:[%s1880_s5 + $0x1c8] sm:$0xff]  ;;  %v543_v18 = vld [vmem:[%s1880_s5 + $0x18] sm:$0xff] }
  0x18   : > { %1486 = vmatprep.subr.bf16.mxu1 %v1550_v0  ;;  %v600_v9 = vld [vmem:[%s1880_s5 + $0x1e0] sm:$0xff]  ;;  %v601_v12 = vld [vmem:[%s1880_s5 + $0x1e8] sm:$0xff]  ;;  %v575_v59 = vld [vmem:[%s1880_s5 + $0x118] sm:$0xff] }
  0x19   : > { %v1458_v11 = vcombine.high %v596_v8, %v600_v9  ;;  %v1457_v13 = vcombine.low %v596_v8, %v600_v9  ;;  %v1459_v14 = vcombine.low %v597_v10, %v601_v12  ;;  %v1460_v15 = vcombine.high %v597_v10, %v601_v12  ;;  %v1395_v25 = vld [vmem:[%s1879_s4] ss:$0 sm:$0xff]  ;;  %v579_v60 = vld [vmem:[%s1880_s5 + $0x138] sm:$0xff]  ;;  %v590_v9 = vld [vmem:[%s1880_s5 + $0x190] sm:$0xff] }
  0x1a   : > { %970 = vmatpush1.bf16.msra.mxu0 %v1409_v19  ;;  %v594_v10 = vld [vmem:[%s1880_s5 + $0x1b0] sm:$0xff]  ;;  %v595_v12 = vld [vmem:[%s1880_s5 + $0x1b8] sm:$0xff] }
  0x1b   : > { %1487 = vmatpush3.bf16.msra.mxu1 %v1524_v6  ;;  %971 = vmatprep.subr.bf16.mxu0 %v1418_v22  ;;  %v1451_v6 = vcombine.low %v589_v2, %v593_v4  ;;  %v1407_v22 = vcombine.low %v543_v18, %v547_v20 }
  0x1c   : > { %1488 = vmatprep.subr.bf16.mxu1 %v1550_v0  ;;  %v588_v0 = vld [vmem:[%s1880_s5 + $0x180] sm:$0xff] }
  0x1d   : > { %v1450_v3 = vcombine.high %v588_v0, %v592_v1  ;;  %v1449_v5 = vcombine.low %v588_v0, %v592_v1  ;;  %v1440_v0 = vcombine.high %v575_v59, %v579_v60  ;;  %v582_v1 = vld [vmem:[%s1880_s5 + $0x150] sm:$0xff] }
  0x1e   : > { %972 = vmatpush1.bf16.msra.mxu0 %v1417_v23  ;;  %v1408_v23 = vcombine.high %v543_v18, %v547_v20  ;;  %v602_v18 = vld [vmem:[%s1880_s5 + $0x1f0] sm:$0xff]  ;;  %v603_v20 = vld [vmem:[%s1880_s5 + $0x1f8] sm:$0xff] }
  0x1f   : > { %1489 = vmatpush3.bf16.msra.mxu1 %v1525_v7  ;;  %973 = vmatprep.subr.bf16.mxu0 %v1426_v26  ;;  %v1452_v7 = vcombine.high %v589_v2, %v593_v4  ;;  %v586_v2 = vld [vmem:[%s1880_s5 + $0x170] sm:$0xff]  ;;  %v587_v4 = vld [vmem:[%s1880_s5 + $0x178] sm:$0xff] }
  0x20   : > { %1010 = vmatprep.subr.bf16.mxu1 %v1404_v17  ;;  %v546_v17 = vld [vmem:[%s1880_s5 + $0x30] sm:$0xff] }
  0x22   : > { %974 = vmatpush1.bf16.msra.mxu0 %v1425_v27 }
  0x23   : > { %975 = vmatprep.subr.bf16.mxu0 %v1434_v30 }
  0x26   : > { %976 = vmatpush1.bf16.msra.mxu0 %v1433_v31 }
  0x27   : > { %977 = vmatprep.subr.bf16.mxu0 %v1442_v34  ;;  %v551_v34 = vld [vmem:[%s1880_s5 + $0x58] sm:$0xff] }
  0x2a   : > { %978 = vmatpush1.bf16.msra.mxu0 %v1441_v35  ;;  %v555_v35 = vld [vmem:[%s1880_s5 + $0x78] sm:$0xff] }
  0x2b   : > { %979 = vmatprep.subr.bf16.mxu0 %v1450_v3  ;;  %v583_v3 = vld [vmem:[%s1880_s5 + $0x158] sm:$0xff] }
  0x2c   : > { %v1448_v8 = vcombine.high %v583_v3, %v587_v4 }
  0x2e   : > { %980 = vmatpush1.bf16.msra.mxu0 %v1449_v5 }
  0x2f   : > { %981 = vmatprep.subr.bf16.mxu0 %v1458_v11  ;;  %v591_v11 = vld [vmem:[%s1880_s5 + $0x198] sm:$0xff] }
  0x32   : > { %982 = vmatpush1.bf16.msra.mxu0 %v1457_v13  ;;  %v1445_v13 = vcombine.low %v582_v1, %v586_v2 }
  0xe8   : > { %v1481_v37 = vpop.f32.mrb[0].mxu0 }
  0xe9   : > { %v448_v38 = vadd.f32 %v1481_v37, %v1391_v36  ;;  %v442_v39 = vpop.f32.mrb[1].mxu0 }
  0xea   : > { %v443_v40 = vadd.f32 %v1391_v36, %v442_v39  ;;  %v1414_v39 = vcombine.high %v550_v32, %v554_v33 }
  0xeb   : > { %v452_v41 = vmax.f32 %v448_v38, 0.0 }
  0xec   : > { %v451_v44 = vmax.f32 %v443_v40, 0.0  ;;  %v1416_v40 = vcombine.high %v551_v34, %v555_v35 }
  0xee   : > { %v461_v45 = vpack.c.bf16 %v452_v41, %v451_v44  ;;  %v558_v41 = vld [vmem:[%s1880_s5 + $0x90] sm:$0xff]  ;;  %v563_v44 = vld [vmem:[%s1880_s5 + $0xb8] sm:$0xff] }
  0xef   : > { %v1422_v47 = vcombine.high %v558_v41, %v562_v42  ;;  %v1424_v48 = vcombine.high %v559_v43, %v563_v44 }
  0xf0   : > { %1491 = vmatmul.mubr.msk.bf16.vlgmr.msra.gmra.mrb[0].mxu1 %vm493_vm3, %v461_v45  ;;  %v1413_v45 = vcombine.low %v550_v32, %v554_v33 }
  0xf1   : > { %1011 = vmatpush1.bf16.msra.mxu1 %v1403_v16  ;;  %v542_v16 = vld [vmem:[%s1880_s5 + $0x10] sm:$0xff]  ;;  %1042 = vmatprep.mubr.bf16.mxu1 %v1552_v24 }
  0xf2   : > { %1012 = vmatprep.subr.bf16.mxu1 %v1412_v46  ;;  %v1406_v19 = vcombine.high %v542_v16, %v546_v17  ;;  %v1405_v21 = vcombine.low %v542_v16, %v546_v17  ;;  %v1415_v46 = vcombine.low %v551_v34, %v555_v35  ;;  %v1456_v16 = vcombine.high %v591_v11, %v595_v12  ;;  %v598_v17 = vld [vmem:[%s1880_s5 + $0x1d0] sm:$0xff] }
  0xf4   : > { %1053 = vmatprep.subr.bf16.mxu0 %v1406_v19  ;;  %v599_v19 = vld [vmem:[%s1880_s5 + $0x1d8] sm:$0xff] }
  0xf5   : > { %1013 = vmatpush1.bf16.msra.mxu1 %v1411_v49  ;;  %v566_v49 = vld [vmem:[%s1880_s5 + $0xd0] sm:$0xff] }
  0xf6   : > { %1014 = vmatprep.subr.bf16.mxu1 %v1420_v50  ;;  %v570_v50 = vld [vmem:[%s1880_s5 + $0xf0] sm:$0xff] }
  0xf7   : > { %v1430_v55 = vcombine.high %v566_v49, %v570_v50 }
  0xf9   : > { %1015 = vmatpush1.bf16.msra.mxu1 %v1419_v53  ;;  %v1421_v53 = vcombine.low %v558_v41, %v562_v42 }
  0xfa   : > { %1016 = vmatprep.subr.bf16.mxu1 %v1428_v54  ;;  %v1423_v54 = vcombine.low %v559_v43, %v563_v44 }
  0xfd   : > { %1017 = vmatpush1.bf16.msra.mxu1 %v1427_v57  ;;  %v574_v57 = vld [vmem:[%s1880_s5 + $0x110] sm:$0xff] }
  0xfe   : > { %1018 = vmatprep.subr.bf16.mxu1 %v1436_v58  ;;  %v578_v58 = vld [vmem:[%s1880_s5 + $0x130] sm:$0xff] }
  0xff   : > { %v1437_v5 = vcombine.low %v574_v57, %v578_v58 }
 0x101   : > { %1019 = vmatpush1.bf16.msra.mxu1 %v1435_v61  ;;  %v1429_v61 = vcombine.low %v566_v49, %v570_v50 }
 0x102   : > { %1020 = vmatprep.subr.bf16.mxu1 %v1444_v62  ;;  %v1431_v62 = vcombine.low %v567_v51, %v571_v52 }
 0x105   : > { %1021 = vmatpush1.bf16.msra.mxu1 %v1443_v63  ;;  %v1438_v63 = vcombine.high %v574_v57, %v578_v58 }
 0x106   : > { %1022 = vmatprep.subr.bf16.mxu1 %v1452_v7  ;;  %v1446_v7 = vcombine.high %v582_v1, %v586_v2  ;;  %v1553_v1 = vmov 1966171168  }
 0x107   : > { %v1243_v2 = vunpack.c.l.s4 %v1553_v1 }
 0x109   : > { %1023 = vmatpush1.bf16.msra.mxu1 %v1451_v6  ;;  %v1439_v6 = vcombine.low %v575_v59, %v579_v60 }
 0x10a   : > { %1024 = vmatprep.subr.bf16.mxu1 %v1460_v15  ;;  %v1454_v15 = vcombine.high %v590_v9, %v594_v10 }
 0x10d   : > { %1025 = vmatpush1.bf16.msra.mxu1 %v1459_v14  ;;  %v1447_v14 = vcombine.low %v583_v3, %v587_v4 }
 0x10e   : > { %1096 = vmatprep.subr.bf16.mxu1 %v1408_v23  ;;  %v1462_v23 = vcombine.high %v598_v17, %v602_v18 }
 0x1c3   : > { %v531_v26 = vpop.f32.mrb[0].mxu1 }
 0x1c4   : > { %v532_v27 = vadd.f32 %v1395_v25, %v531_v26  ;;  %v1492_v28 = vpop.f32.mrb[1].mxu1  ;;  %v1463_v26 = vcombine.low %v599_v19, %v603_v20 }
 0x1c5   : > { %v534_v29 = vpop.f32.mrb[2].mxu1 }
 0x1c6   : > { %v535_v30 = vadd.f32 %v1395_v25, %v534_v29  ;;  %v1493_v31 = vpop.f32.mrb[3].mxu1  ;;  %v538_v36 = vmax.f32 %v532_v27, 0.0  ;;  %v1461_v25 = vcombine.low %v598_v17, %v602_v18  ;;  %v607_v27 = vlaneseq }
 0x1c7   : > { %v1837_v31 = vld [vmem:[%s1881_s6] sm:$0xff] }
 0x1c8   : > { %v539_v37 = vmax.f32 %v535_v30, 0.0  ;;  %v1830_v28 = vshrl.u32 %v607_v27, 7 }
 0x1ca   : > { %v1752_v38 = vpack.c.bf16 %v539_v37, %v538_v36  ;;  %v609_v29 = vsub.s32 0, %v1830_v28  ;;  %v617_v30 = vsub.s32 2, %v1830_v28  ;;  %v613_v32 = vsub.s32 1, %v1830_v28 }
 0x1cb   : > { %v621_v33 = vsub.s32 3, %v1830_v28  ;;  %v625_v27 = vsub.s32 4, %v1830_v28 }
 0x1cc   : > { %1000 = vmatmul.mubr.bf16.vlgmr.msra.gmra.mrb[4].mxu0 %v1752_v38  ;;  %1043 = vmatmul.mubr.bf16.vlgmr.msra.gmra.mrb[4].mxu1 %v1752_v38  ;;  %v610_v34 = vrot.slane %v1837_v31, %v609_v29  ;;  %v618_v35 = vrot.slane %v1837_v31, %v617_v30  ;;  %v633_v29 = vsub.s32 6, %v1830_v28  ;;  %v629_v30 = vsub.s32 5, %v1830_v28 }
 0x1cd   : > { %1054 = vmatpush1.bf16.msra.mxu0 %v1405_v21  ;;  %1097 = vmatpush1.bf16.msra.mxu1 %v1407_v22  ;;  %v1453_v21 = vcombine.low %v590_v9, %v594_v10  ;;  %v1455_v22 = vcombine.low %v591_v11, %v595_v12  ;;  %v1244_v11 = vunpack.c.0.s8 %v1243_v2 }
 0x1ce   : > { %1055 = vmatprep.subr.bf16.mxu0 %v1414_v39  ;;  %1098 = vmatprep.subr.bf16.mxu1 %v1416_v40  ;;  %v622_v39 = vrot.slane %v1837_v31, %v621_v33  ;;  %v626_v33 = vrot.slane %v1837_v31, %v625_v27 }
 0x1cf   : > { %1085 = vmatprep.mubr.bf16.mxu0 %v1552_v24  ;;  %1128 = vmatprep.mubr.bf16.mxu1 %v1552_v24  ;;  %v1464_v24 = vcombine.high %v599_v19, %v603_v20  ;;  %v1846_v20 = vsub.s32 %v1244_v11, %v1830_v28 }
 0x1d1   : > { %1056 = vmatpush1.bf16.msra.mxu0 %v1413_v45  ;;  %1099 = vmatpush1.bf16.msra.mxu1 %v1415_v46 }
 0x1d2   : > { %1057 = vmatprep.subr.bf16.mxu0 %v1422_v47  ;;  %1100 = vmatprep.subr.bf16.mxu1 %v1424_v48 }
 0x1d5   : > { %1058 = vmatpush1.bf16.msra.mxu0 %v1421_v53  ;;  %1101 = vmatpush1.bf16.msra.mxu1 %v1423_v54 }
 0x1d6   : > { %1059 = vmatprep.subr.bf16.mxu0 %v1430_v55  ;;  %1102 = vmatprep.subr.bf16.mxu1 %v1432_v56 }
 0x1d9   : > { %1060 = vmatpush1.bf16.msra.mxu0 %v1429_v61  ;;  %1103 = vmatpush1.bf16.msra.mxu1 %v1431_v62 }
 0x1da   : > { %1061 = vmatprep.subr.bf16.mxu0 %v1438_v63  ;;  %1104 = vmatprep.subr.bf16.mxu1 %v1440_v0 }
 0x1dd   : > { %1062 = vmatpush1.bf16.msra.mxu0 %v1437_v5  ;;  %1105 = vmatpush1.bf16.msra.mxu1 %v1439_v6 }
 0x1de   : > { %1063 = vmatprep.subr.bf16.mxu0 %v1446_v7  ;;  %1106 = vmatprep.subr.bf16.mxu1 %v1448_v8 }
 0x1e1   : > { %1064 = vmatpush1.bf16.msra.mxu0 %v1445_v13  ;;  %1107 = vmatpush1.bf16.msra.mxu1 %v1447_v14 }
 0x1e2   : > { %1065 = vmatprep.subr.bf16.mxu0 %v1454_v15  ;;  %1108 = vmatprep.subr.bf16.mxu1 %v1456_v16 }
 0x1e5   : > { %1066 = vmatpush1.bf16.msra.mxu0 %v1453_v21  ;;  %1109 = vmatpush1.bf16.msra.mxu1 %v1455_v22 }
 0x1e6   : > { %1067 = vmatprep.subr.bf16.mxu0 %v1462_v23  ;;  %1110 = vmatprep.subr.bf16.mxu1 %v1464_v24 }
 0x1e9   : > { %1068 = vmatpush1.bf16.msra.mxu0 %v1461_v25  ;;  %1111 = vmatpush1.bf16.msra.mxu1 %v1463_v26 }
 0x1ec   : > { %1086 = vmatmul.mubr.bf16.vlgmr.msra.gmra.mrb[8].mxu0 %v1752_v38  ;;  %1129 = vmatmul.mubr.bf16.vlgmr.msra.gmra.mrb[8].mxu1 %v1752_v38  ;;  %v614_v38 = vrot.slane %v1837_v31, %v613_v32  ;;  %v637_v32 = vsub.s32 7, %v1830_v28 }
 0x29f   : > { %v1001_v36 = vpop.f32.mrb[4].mxu0  ;;  %v1044_v37 = vpop.f32.mrb[4].mxu1 }
 0x2a0   : > { %v1003_v40 = vpop.f32.mrb[5].mxu0  ;;  %v1046_v41 = vpop.f32.mrb[5].mxu1  ;;  %v1002_v44 = vadd.f32 %v1001_v36, %v610_v34  ;;  %v1045_v45 = vadd.f32 %v1044_v37, %v618_v35  ;;  %v630_v37 = vrot.slane %v1837_v31, %v629_v30 }
 0x2a1   : > { %v1005_v42 = vpop.f32.mrb[6].mxu0  ;;  %v1048_v43 = vpop.f32.mrb[6].mxu1  ;;  %v1004_v50 = vadd.f32 %v1003_v40, %v614_v38  ;;  %v1047_v51 = vadd.f32 %v1046_v41, %v622_v39 }
 0x2a2   : > { %v1006_v46 = vadd.f32 %v1005_v42, %v610_v34  ;;  %v1049_v47 = vadd.f32 %v1048_v43, %v618_v35  ;;  %v1007_v48 = vpop.f32.mrb[7].mxu0  ;;  %v1050_v49 = vpop.f32.mrb[7].mxu1  ;;  %v634_v34 = vrot.slane %v1837_v31, %v633_v29 }
 0x2a3   : > { %v1008_v52 = vadd.f32 %v1007_v48, %v614_v38  ;;  %v1051_v53 = vadd.f32 %v1050_v49, %v622_v39  ;;  %v638_v38 = vrot.slane %v1837_v31, %v637_v32 }
 0x2a4   : > { %v1147_v54 = vmax.f32 %v1002_v44, %v1006_v46  ;;  %v1149_v55 = vmax.f32 %v1045_v45, %v1049_v47 }
 0x2a5   : > { %v1148_v56 = vmax.f32 %v1004_v50, %v1008_v52  ;;  %v1150_v57 = vmax.f32 %v1047_v51, %v1051_v53 }
 0x2a6   : > { %v1182_v58 = vrot.slane %v1147_v54, 4  ;;  %v1194_v59 = vrot.slane %v1149_v55, 4 }
 0x2a7   : > { %v1188_v60 = vrot.slane %v1148_v56, 4  ;;  %v1200_v61 = vrot.slane %v1150_v57, 4 }
 0x2a8   : > { %v1183_v62 = vmax.f32 %v1147_v54, %v1182_v58  ;;  %v1195_v63 = vmax.f32 %v1149_v55, %v1194_v59 }
 0x2a9   : > { %v1189_v0 = vmax.f32 %v1148_v56, %v1188_v60  ;;  %v1201_v3 = vmax.f32 %v1150_v57, %v1200_v61 }
 0x2aa   : > { %v1184_v4 = vrot.slane %v1183_v62, 2  ;;  %v1196_v5 = vrot.slane %v1195_v63, 2 }
 0x2ab   : > { %v1190_v6 = vrot.slane %v1189_v0, 2  ;;  %v1202_v7 = vrot.slane %v1201_v3, 2 }
 0x2ac   : > { %v1185_v8 = vmax.f32 %v1183_v62, %v1184_v4  ;;  %v1197_v9 = vmax.f32 %v1195_v63, %v1196_v5 }
 0x2ad   : > { %v1191_v10 = vmax.f32 %v1189_v0, %v1190_v6  ;;  %v1203_v12 = vmax.f32 %v1201_v3, %v1202_v7 }
 0x2ae   : > { %v1186_v13 = vrot.slane %v1185_v8, 1  ;;  %v1198_v14 = vrot.slane %v1197_v9, 1 }
 0x2af   : > { %v1192_v15 = vrot.slane %v1191_v10, 1  ;;  %v1204_v16 = vrot.slane %v1203_v12, 1 }
 0x2b0   : > { %v1187_v17 = vmax.f32 %v1185_v8, %v1186_v13  ;;  %v1199_v18 = vmax.f32 %v1197_v9, %v1198_v14 }
 0x2b1   : > { %v1193_v19 = vmax.f32 %v1191_v10, %v1192_v15  ;;  %v1205_v21 = vmax.f32 %v1203_v12, %v1204_v16 }
 0x2b3   : > { %v1238_v22 = vcombine.low %v1187_v17, %v1193_v19  ;;  %v1239_v23 = vcombine.low %v1199_v18, %v1205_v21 }
 0x2b5   : > { %v1248_v24 = vrot.slane %v1238_v22, %v1846_v20  ;;  %v1255_v25 = vrot.slane %v1239_v23, %v1846_v20 }
 0x2b7   : > { %v1270_v26 = vcombine.low %v1248_v24, %v1255_v25 }
 0x2b9   : > { %v1278_v21 = vrot.slane %v1270_v26, %v1846_v20 }
 0x2bf   : > { %v1087_v35 = vpop.f32.mrb[8].mxu0  ;;  %v1130_v36 = vpop.f32.mrb[8].mxu1 }
 0x2c0   : > { %v1089_v39 = vpop.f32.mrb[9].mxu0  ;;  %v1132_v40 = vpop.f32.mrb[9].mxu1  ;;  %v1088_v43 = vadd.f32 %v1087_v35, %v626_v33  ;;  %v1131_v44 = vadd.f32 %v1130_v36, %v634_v34 }
 0x2c1   : > { %v1091_v41 = vpop.f32.mrb[10].mxu0  ;;  %v1134_v42 = vpop.f32.mrb[10].mxu1  ;;  %v1090_v48 = vadd.f32 %v1089_v39, %v630_v37  ;;  %v1133_v49 = vadd.f32 %v1132_v40, %v638_v38 }
 0x2c2   : > { %v1092_v45 = vadd.f32 %v1091_v41, %v626_v33  ;;  %v1135_v46 = vadd.f32 %v1134_v42, %v634_v34  ;;  %v1093_v47 = vpop.f32.mrb[11].mxu0  ;;  %v1136_v28 = vpop.f32.mrb[11].mxu1 }
 0x2c3   : > { %v1094_v50 = vadd.f32 %v1093_v47, %v630_v37  ;;  %v1137_v51 = vadd.f32 %v1136_v28, %v638_v38 }
 0x2c4   : > { %v1151_v52 = vmax.f32 %v1088_v43, %v1092_v45  ;;  %v1153_v53 = vmax.f32 %v1131_v44, %v1135_v46 }
 0x2c5   : > { %v1152_v54 = vmax.f32 %v1090_v48, %v1094_v50  ;;  %v1154_v55 = vmax.f32 %v1133_v49, %v1137_v51 }
 0x2c6   : > { %v1206_v56 = vrot.slane %v1151_v52, 4  ;;  %v1218_v31 = vrot.slane %v1153_v53, 4 }
 0x2c7   : > { %v1212_v57 = vrot.slane %v1152_v54, 4  ;;  %v1224_v58 = vrot.slane %v1154_v55, 4 }
 0x2c8   : > { %v1207_v59 = vmax.f32 %v1151_v52, %v1206_v56  ;;  %v1219_v60 = vmax.f32 %v1153_v53, %v1218_v31 }
 0x2c9   : > { %v1213_v61 = vmax.f32 %v1152_v54, %v1212_v57  ;;  %v1225_v62 = vmax.f32 %v1154_v55, %v1224_v58 }
 0x2ca   : > { %v1208_v63 = vrot.slane %v1207_v59, 2  ;;  %v1220_v0 = vrot.slane %v1219_v60, 2 }
 0x2cb   : > { %v1214_v1 = vrot.slane %v1213_v61, 2  ;;  %v1226_v2 = vrot.slane %v1225_v62, 2 }
 0x2cc   : > { %v1209_v3 = vmax.f32 %v1207_v59, %v1208_v63  ;;  %v1221_v4 = vmax.f32 %v1219_v60, %v1220_v0 }
 0x2cd   : > { %v1215_v5 = vmax.f32 %v1213_v61, %v1214_v1  ;;  %v1227_v6 = vmax.f32 %v1225_v62, %v1226_v2 }
 0x2ce   : > { %v1210_v7 = vrot.slane %v1209_v3, 1  ;;  %v1222_v8 = vrot.slane %v1221_v4, 1 }
 0x2cf   : > { %v1216_v9 = vrot.slane %v1215_v5, 1  ;;  %v1228_v10 = vrot.slane %v1227_v6, 1 }
 0x2d0   : > { %v1211_v11 = vmax.f32 %v1209_v3, %v1210_v7  ;;  %v1223_v12 = vmax.f32 %v1221_v4, %v1222_v8 }
 0x2d1   : > { %v1217_v13 = vmax.f32 %v1215_v5, %v1216_v9  ;;  %v1229_v14 = vmax.f32 %v1227_v6, %v1228_v10 }
 0x2d3   : > { %v1240_v15 = vcombine.low %v1211_v11, %v1217_v13  ;;  %v1241_v16 = vcombine.low %v1223_v12, %v1229_v14 }
 0x2d5   : > { %v1262_v17 = vrot.slane %v1240_v15, %v1846_v20  ;;  %v1269_v18 = vrot.slane %v1241_v16, %v1846_v20 }
 0x2d7   : > { %v1271_v19 = vcombine.low %v1262_v17, %v1269_v18 }
 0x2d9   : > { %v1285_v22 = vrot.slane %v1271_v19, %v1846_v20 }
 0x2db   : > { %v1286_v23 = vcombine.low %v1278_v21, %v1285_v22 }
 0x2dd   : > { %1288 = vst [vmem:[%s341_s21] sm:$0xff] %v1286_v23 }
 0x2de PF: > { %s17_s26 = sadd.s32 1, %s1548_s26   ;;  %s1883_s24 = smov %s1544_s25 }
 0x2df   : > { %p14_p5 = scmp.ge.s32.totalorder %s17_s26, 4   ;;  %s1884_s25 = smov %s1886_s27 }
 0x2e1   :  { %16 = sbr.rel (!%p14_p5) target bundleno = 2 (0x2), region = 92 }

// kernel: pointnet_forward.9
= control target key start
LH: loop header
LB: loop body
LE: loop exit
PB: predicated region body
PF: predicated region fallthrough
CT: control target
= control target key end

     0   :  { %v7890_v36 = vmov 1983009808   ;;  %v290_v38 = vlaneseq  ;;  %s10725_s1 = inlined_call_operand.vmem [shape: bf16[1024,512], index: 1, kind: input, shape index: {}]   ;;  %s10726_s0 = inlined_call_operand.vmem [shape: f32[2,1024], index: 0, kind: input, shape index: {}]   ;;  %s10727_s3 = inlined_call_operand.vmem [shape: bf16[512,256], index: 3, kind: input, shape index: {}]   ;;  %s10728_s5 = inlined_call_operand.vmem [shape: bf16[256,4096], index: 5, kind: input, shape index: {}]   ;;  %s10729_s2 = inlined_call_operand.vmem [shape: f32[1,512], index: 2, kind: input, shape index: {}]   ;;  %s10730_s4 = inlined_call_operand.vmem [shape: f32[1,256], index: 4, kind: input, shape index: {}]   ;;  %s10731_s6 = inlined_call_operand.vmem [shape: f32[1,4096], index: 6, kind: input, shape index: {}]   ;;  %s10732_s7 = inlined_call_operand.vmem [shape: f32[2,4096], index: 7, kind: output, shape index: {}]  }
   0x1   :  { %v7407_v0 = vld [vmem:[%s10725_s1 + $0x4] ss:$16 sps:$4 sm:$0xff]   ;;  %v7409_v1 = vld [vmem:[%s10725_s1 + $0xc] ss:$16 sps:$4 sm:$0xff]   ;;  %v7411_v2 = vld [vmem:[%s10725_s1] ss:$16 sps:$4 sm:$0xff]   ;;  %v288_v37 = vunpack.c.l.s4 %v7890_v36 }
   0x2   :  { %1638 = vmatprep.subr.bf16.mxu0 %v7407_v0  ;;  %v7412_v3 = vld [vmem:[%s10725_s1 + $0x8] ss:$16 sps:$4 sm:$0xff]   ;;  %1802 = vmatprep.subr.bf16.mxu1 %v7409_v1  ;;  %v7413_v4 = vld [vmem:[%s10725_s1 + $0x24] ss:$16 sps:$4 sm:$0xff]   ;;  %v7415_v5 = vld [vmem:[%s10725_s1 + $0x2c] ss:$16 sps:$4 sm:$0xff]  }
   0x3   :  { %1639 = vmatpush1.bf16.msra.mxu0 %v7411_v2  ;;  %1803 = vmatpush1.bf16.msra.mxu1 %v7412_v3  ;;  %v7417_v6 = vld [vmem:[%s10725_s1 + $0x20] ss:$16 sps:$4 sm:$0xff]   ;;  %v7418_v7 = vld [vmem:[%s10725_s1 + $0x28] ss:$16 sps:$4 sm:$0xff]   ;;  %v7419_v8 = vld [vmem:[%s10725_s1 + $0x44] ss:$16 sps:$4 sm:$0xff]   ;;  %v289_v42 = vunpack.c.0.s8 %v288_v37 }
   0x4   :  { %1640 = vmatprep.subr.bf16.mxu0 %v7413_v4  ;;  %1804 = vmatprep.subr.bf16.mxu1 %v7415_v5  ;;  %v7421_v9 = vld [vmem:[%s10725_s1 + $0x4c] ss:$16 sps:$4 sm:$0xff]   ;;  %v7423_v10 = vld [vmem:[%s10725_s1 + $0x40] ss:$16 sps:$4 sm:$0xff]   ;;  %v7424_v11 = vld [vmem:[%s10725_s1 + $0x48] ss:$16 sps:$4 sm:$0xff]  }
   0x5   :  { %v7425_v12 = vld [vmem:[%s10725_s1 + $0x64] ss:$16 sps:$4 sm:$0xff]   ;;  %v7427_v13 = vld [vmem:[%s10725_s1 + $0x6c] ss:$16 sps:$4 sm:$0xff]   ;;  %v7429_v14 = vld [vmem:[%s10725_s1 + $0x60] ss:$16 sps:$4 sm:$0xff]  }
   0x6   :  { %v7430_v15 = vld [vmem:[%s10725_s1 + $0x68] ss:$16 sps:$4 sm:$0xff]   ;;  %v7431_v16 = vld [vmem:[%s10725_s1 + $0x84] ss:$16 sps:$4 sm:$0xff]   ;;  %v7433_v17 = vld [vmem:[%s10725_s1 + $0x8c] ss:$16 sps:$4 sm:$0xff]  }
   0x7   :  { %1641 = vmatpush1.bf16.msra.mxu0 %v7417_v6  ;;  %1805 = vmatpush1.bf16.msra.mxu1 %v7418_v7  ;;  %v7435_v18 = vld [vmem:[%s10725_s1 + $0x80] ss:$16 sps:$4 sm:$0xff]   ;;  %v7436_v19 = vld [vmem:[%s10725_s1 + $0x88] ss:$16 sps:$4 sm:$0xff]   ;;  %v7437_v20 = vld [vmem:[%s10725_s1 + $0xa4] ss:$16 sps:$4 sm:$0xff]  }
   0x8   :  { %1642 = vmatprep.subr.bf16.mxu0 %v7419_v8  ;;  %1806 = vmatprep.subr.bf16.mxu1 %v7421_v9  ;;  %v7439_v21 = vld [vmem:[%s10725_s1 + $0xac] ss:$16 sps:$4 sm:$0xff]   ;;  %v7441_v22 = vld [vmem:[%s10725_s1 + $0xa0] ss:$16 sps:$4 sm:$0xff]   ;;  %v7442_v23 = vld [vmem:[%s10725_s1 + $0xa8] ss:$16 sps:$4 sm:$0xff]  }
   0x9   :  { %v7443_v24 = vld [vmem:[%s10725_s1 + $0xc4] ss:$16 sps:$4 sm:$0xff]   ;;  %v7445_v25 = vld [vmem:[%s10725_s1 + $0xcc] ss:$16 sps:$4 sm:$0xff]   ;;  %v7447_v26 = vld [vmem:[%s10725_s1 + $0xc0] ss:$16 sps:$4 sm:$0xff]  }
   0xa   :  { %v7448_v27 = vld [vmem:[%s10725_s1 + $0xc8] ss:$16 sps:$4 sm:$0xff]   ;;  %v7449_v28 = vld [vmem:[%s10725_s1 + $0xe4] ss:$16 sps:$4 sm:$0xff]   ;;  %v7451_v29 = vld [vmem:[%s10725_s1 + $0xec] ss:$16 sps:$4 sm:$0xff]  }
   0xb   :  { %1643 = vmatpush1.bf16.msra.mxu0 %v7423_v10  ;;  %1807 = vmatpush1.bf16.msra.mxu1 %v7424_v11  ;;  %v7453_v30 = vld [vmem:[%s10725_s1 + $0xe0] ss:$16 sps:$4 sm:$0xff]   ;;  %v7454_v31 = vld [vmem:[%s10725_s1 + $0xe8] ss:$16 sps:$4 sm:$0xff]   ;;  %v7455_v32 = vld [vmem:[%s10725_s1 + $0x104] ss:$16 sps:$4 sm:$0xff]  }
   0xc   :  { %1644 = vmatprep.subr.bf16.mxu0 %v7425_v12  ;;  %1808 = vmatprep.subr.bf16.mxu1 %v7427_v13  ;;  %v7457_v33 = vld [vmem:[%s10725_s1 + $0x10c] ss:$16 sps:$4 sm:$0xff]   ;;  %v7459_v34 = vld [vmem:[%s10725_s1 + $0x100] ss:$16 sps:$4 sm:$0xff]   ;;  %v7460_v35 = vld [vmem:[%s10725_s1 + $0x108] ss:$16 sps:$4 sm:$0xff]  }
   0xd   :  { %v7461_v39 = vld [vmem:[%s10725_s1 + $0x124] ss:$16 sps:$4 sm:$0xff]   ;;  %v7463_v40 = vld [vmem:[%s10725_s1 + $0x12c] ss:$16 sps:$4 sm:$0xff]   ;;  %v7465_v41 = vld [vmem:[%s10725_s1 + $0x120] ss:$16 sps:$4 sm:$0xff]  }
   0xe   :  { %v8048_v43 = vshrl.u32 %v290_v38, 7  ;;  %v7466_v44 = vld [vmem:[%s10725_s1 + $0x128] ss:$16 sps:$4 sm:$0xff]   ;;  %v7467_v45 = vld [vmem:[%s10725_s1 + $0x144] ss:$16 sps:$4 sm:$0xff]  }
   0xf   :  { %1645 = vmatpush1.bf16.msra.mxu0 %v7429_v14  ;;  %1809 = vmatpush1.bf16.msra.mxu1 %v7430_v15  ;;  %v7469_v46 = vld [vmem:[%s10725_s1 + $0x14c] ss:$16 sps:$4 sm:$0xff]   ;;  %v7471_v47 = vld [vmem:[%s10725_s1 + $0x140] ss:$16 sps:$4 sm:$0xff]   ;;  %v7472_v48 = vld [vmem:[%s10725_s1 + $0x148] ss:$16 sps:$4 sm:$0xff]  }
  0x10   :  { %1646 = vmatprep.subr.bf16.mxu0 %v7431_v16  ;;  %1810 = vmatprep.subr.bf16.mxu1 %v7433_v17  ;;  %v8066_v49 = vsub.s32 %v289_v42, %v8048_v43  ;;  %v7473_v50 = vld [vmem:[%s10725_s1 + $0x164] ss:$16 sps:$4 sm:$0xff]   ;;  %v7475_v51 = vld [vmem:[%s10725_s1 + $0x16c] ss:$16 sps:$4 sm:$0xff]   ;;  %v7477_v54 = vld [vmem:[%s10725_s1 + $0x160] ss:$16 sps:$4 sm:$0xff]  }
  0x11   :  { %v282_v52 = vld [vmem:[%s10726_s0] sm:$0xff]  ;;  %v7478_v55 = vld [vmem:[%s10725_s1 + $0x168] ss:$16 sps:$4 sm:$0xff]   ;;  %v7481_v57 = vld [vmem:[%s10725_s1 + $0x18c] ss:$16 sps:$4 sm:$0xff]  }
  0x12   :  { %v293_v53 = vrot.slane %v282_v52, %v8066_v49  ;;  %v7479_v56 = vld [vmem:[%s10725_s1 + $0x184] ss:$16 sps:$4 sm:$0xff]   ;;  %v7483_v60 = vld [vmem:[%s10725_s1 + $0x180] ss:$16 sps:$4 sm:$0xff]   ;;  %v7484_v61 = vld [vmem:[%s10725_s1 + $0x188] ss:$16 sps:$4 sm:$0xff]   ;;  %v286_v4 = vcombine.high %v282_v52, %v282_v52 }
  0x13   :  { %1647 = vmatpush1.bf16.msra.mxu0 %v7435_v18  ;;  %1811 = vmatpush1.bf16.msra.mxu1 %v7436_v19  ;;  %v7485_v62 = vld [vmem:[%s10725_s1 + $0x1a4] ss:$16 sps:$4 sm:$0xff]   ;;  %v7487_v63 = vld [vmem:[%s10725_s1 + $0x1ac] ss:$16 sps:$4 sm:$0xff]   ;;  %v7489_v0 = vld [vmem:[%s10725_s1 + $0x1a0] ss:$16 sps:$4 sm:$0xff]  }
  0x14   :  { %1648 = vmatprep.subr.bf16.mxu0 %v7437_v20  ;;  %1812 = vmatprep.subr.bf16.mxu1 %v7439_v21  ;;  %v301_v58 = vcombine.high %v293_v53, %v293_v53  ;;  %v7490_v1 = vld [vmem:[%s10725_s1 + $0x1a8] ss:$16 sps:$4 sm:$0xff]   ;;  %v7491_v2 = vld [vmem:[%s10725_s1 + $0x1c4] ss:$16 sps:$4 sm:$0xff]   ;;  %v7493_v3 = vld [vmem:[%s10725_s1 + $0x1cc] ss:$16 sps:$4 sm:$0xff]   ;;  %v8127_v9 = vrot.slane %v286_v4, %v8066_v49  ;;  %v328_v15 = vpack.c.bf16 %v293_v53, %v293_v53 }
  0x15   :  { %v7495_v5 = vld [vmem:[%s10725_s1 + $0x1c0] ss:$16 sps:$4 sm:$0xff]   ;;  %v7496_v6 = vld [vmem:[%s10725_s1 + $0x1c8] ss:$16 sps:$4 sm:$0xff]   ;;  %v7497_v7 = vld [vmem:[%s10725_s1 + $0x1e4] ss:$16 sps:$4 sm:$0xff]  }
  0x16   :  { %v329_v59 = vpack.c.bf16 %v301_v58, %v301_v58  ;;  %v7499_v8 = vld [vmem:[%s10725_s1 + $0x1ec] ss:$16 sps:$4 sm:$0xff]   ;;  %v7501_v10 = vld [vmem:[%s10725_s1 + $0x1e0] ss:$16 sps:$4 sm:$0xff]   ;;  %v7502_v11 = vld [vmem:[%s10725_s1 + $0x1e8] ss:$16 sps:$4 sm:$0xff]   ;;  %v302_v14 = vcombine.high %v8127_v9, %v8127_v9 }
  0x17   :  { %1649 = vmatpush1.bf16.msra.mxu0 %v7441_v22  ;;  %1813 = vmatpush1.bf16.msra.mxu1 %v7442_v23  ;;  %v7507_v12 = vld [vmem:[%s10725_s1 + $0x204] ss:$16 sps:$4 sm:$0xff]   ;;  %v7510_v13 = vld [vmem:[%s10725_s1 + $0x20c] ss:$16 sps:$4 sm:$0xff]   ;;  %v7505_v16 = vld [vmem:[%s10725_s1 + $0x200] ss:$16 sps:$4 sm:$0xff]  }
  0x18   :  { %1650 = vmatprep.subr.bf16.mxu0 %v7443_v24  ;;  %1814 = vmatprep.subr.bf16.mxu1 %v7445_v25  ;;  %v7508_v17 = vld [vmem:[%s10725_s1 + $0x208] ss:$16 sps:$4 sm:$0xff]   ;;  %v7513_v18 = vld [vmem:[%s10725_s1 + $0x224] ss:$16 sps:$4 sm:$0xff]   ;;  %v7516_v19 = vld [vmem:[%s10725_s1 + $0x22c] ss:$16 sps:$4 sm:$0xff]   ;;  %v331_v20 = vpack.c.bf16 %v302_v14, %v302_v14 }
  0x19   :  { %1670 = vmatprep.mubr.bf16.mxu0 %v329_v59  ;;  %1834 = vmatprep.mubr.bf16.mxu1 %v329_v59  ;;  %v7511_v21 = vld [vmem:[%s10725_s1 + $0x220] ss:$16 sps:$4 sm:$0xff]   ;;  %v7514_v22 = vld [vmem:[%s10725_s1 + $0x228] ss:$16 sps:$4 sm:$0xff]   ;;  %v7519_v23 = vld [vmem:[%s10725_s1 + $0x244] ss:$16 sps:$4 sm:$0xff]  }
  0x1a   :  { %v7522_v24 = vld [vmem:[%s10725_s1 + $0x24c] ss:$16 sps:$4 sm:$0xff]   ;;  %v7517_v25 = vld [vmem:[%s10725_s1 + $0x240] ss:$16 sps:$4 sm:$0xff]   ;;  %v7538_v38 = vld [vmem:[%s10725_s1 + $0x2a8] ss:$16 sps:$4 sm:$0xff]  }
  0x1b   :  { %1651 = vmatpush1.bf16.msra.mxu0 %v7447_v26  ;;  %1815 = vmatpush1.bf16.msra.mxu1 %v7448_v27  ;;  %v7520_v26 = vld [vmem:[%s10725_s1 + $0x248] ss:$16 sps:$4 sm:$0xff]   ;;  %v7525_v27 = vld [vmem:[%s10725_s1 + $0x264] ss:$16 sps:$4 sm:$0xff]   ;;  %v7540_v36 = vld [vmem:[%s10725_s1 + $0x2ac] ss:$16 sps:$4 sm:$0xff]  }
  0x1c   :  { %1652 = vmatprep.subr.bf16.mxu0 %v7449_v28  ;;  %1816 = vmatprep.subr.bf16.mxu1 %v7451_v29  ;;  %v7528_v28 = vld [vmem:[%s10725_s1 + $0x26c] ss:$16 sps:$4 sm:$0xff]   ;;  %v7523_v29 = vld [vmem:[%s10725_s1 + $0x260] ss:$16 sps:$4 sm:$0xff]   ;;  %v7544_v42 = vld [vmem:[%s10725_s1 + $0x2c8] ss:$16 sps:$4 sm:$0xff]  }
  0x1d   :  { %v7535_v37 = vld [vmem:[%s10725_s1 + $0x2a0] ss:$16 sps:$4 sm:$0xff]   ;;  %v7556_v52 = vld [vmem:[%s10725_s1 + $0x308] ss:$16 sps:$4 sm:$0xff]   ;;  %v7561_v53 = vld [vmem:[%s10725_s1 + $0x324] ss:$16 sps:$4 sm:$0xff]  }
  0x1e   :  { %v7570_v58 = vld [vmem:[%s10725_s1 + $0x34c] ss:$16 sps:$4 sm:$0xff]   ;;  %v7565_v59 = vld [vmem:[%s10725_s1 + $0x340] ss:$16 sps:$4 sm:$0xff]   ;;  %v7580_v4 = vld [vmem:[%s10725_s1 + $0x388] ss:$16 sps:$4 sm:$0xff]  }
  0x1f   :  { %1653 = vmatpush1.bf16.msra.mxu0 %v7453_v30  ;;  %1817 = vmatpush1.bf16.msra.mxu1 %v7454_v31  ;;  %v7526_v30 = vld [vmem:[%s10725_s1 + $0x268] ss:$16 sps:$4 sm:$0xff]   ;;  %v7531_v31 = vld [vmem:[%s10725_s1 + $0x284] ss:$16 sps:$4 sm:$0xff]  }
  0x20   :  { %1654 = vmatprep.subr.bf16.mxu0 %v7455_v32  ;;  %1818 = vmatprep.subr.bf16.mxu1 %v7457_v33  ;;  %v7534_v32 = vld [vmem:[%s10725_s1 + $0x28c] ss:$16 sps:$4 sm:$0xff]   ;;  %v7529_v33 = vld [vmem:[%s10725_s1 + $0x280] ss:$16 sps:$4 sm:$0xff]   ;;  %v7592_v14 = vld [vmem:[%s10725_s1 + $0x3c8] ss:$16 sps:$4 sm:$0xff]  }
  0x23   :  { %1655 = vmatpush1.bf16.msra.mxu0 %v7459_v34  ;;  %1819 = vmatpush1.bf16.msra.mxu1 %v7460_v35  ;;  %v7532_v34 = vld [vmem:[%s10725_s1 + $0x288] ss:$16 sps:$4 sm:$0xff]   ;;  %v7537_v35 = vld [vmem:[%s10725_s1 + $0x2a4] ss:$16 sps:$4 sm:$0xff]  }
  0x24   :  { %1656 = vmatprep.subr.bf16.mxu0 %v7461_v39  ;;  %1820 = vmatprep.subr.bf16.mxu1 %v7463_v40  ;;  %v7543_v39 = vld [vmem:[%s10725_s1 + $0x2c4] ss:$16 sps:$4 sm:$0xff]   ;;  %v7546_v40 = vld [vmem:[%s10725_s1 + $0x2cc] ss:$16 sps:$4 sm:$0xff]  }
  0x27   :  { %1657 = vmatpush1.bf16.msra.mxu0 %v7465_v41  ;;  %1821 = vmatpush1.bf16.msra.mxu1 %v7466_v44  ;;  %v7541_v41 = vld [vmem:[%s10725_s1 + $0x2c0] ss:$16 sps:$4 sm:$0xff]   ;;  %v7549_v44 = vld [vmem:[%s10725_s1 + $0x2e4] ss:$16 sps:$4 sm:$0xff]  }
  0x28   :  { %1658 = vmatprep.subr.bf16.mxu0 %v7467_v45  ;;  %1822 = vmatprep.subr.bf16.mxu1 %v7469_v46  ;;  %v7552_v45 = vld [vmem:[%s10725_s1 + $0x2ec] ss:$16 sps:$4 sm:$0xff]   ;;  %v7547_v46 = vld [vmem:[%s10725_s1 + $0x2e0] ss:$16 sps:$4 sm:$0xff]  }
  0x2b   :  { %1659 = vmatpush1.bf16.msra.mxu0 %v7471_v47  ;;  %1823 = vmatpush1.bf16.msra.mxu1 %v7472_v48  ;;  %v7550_v47 = vld [vmem:[%s10725_s1 + $0x2e8] ss:$16 sps:$4 sm:$0xff]   ;;  %v7555_v48 = vld [vmem:[%s10725_s1 + $0x304] ss:$16 sps:$4 sm:$0xff]  }
  0x2c   :  { %1660 = vmatprep.subr.bf16.mxu0 %v7473_v50  ;;  %1824 = vmatprep.subr.bf16.mxu1 %v7475_v51  ;;  %v7558_v50 = vld [vmem:[%s10725_s1 + $0x30c] ss:$16 sps:$4 sm:$0xff]   ;;  %v7553_v51 = vld [vmem:[%s10725_s1 + $0x300] ss:$16 sps:$4 sm:$0xff]  }
  0x2f   :  { %1661 = vmatpush1.bf16.msra.mxu0 %v7477_v54  ;;  %1825 = vmatpush1.bf16.msra.mxu1 %v7478_v55  ;;  %v7564_v54 = vld [vmem:[%s10725_s1 + $0x32c] ss:$16 sps:$4 sm:$0xff]   ;;  %v7559_v55 = vld [vmem:[%s10725_s1 + $0x320] ss:$16 sps:$4 sm:$0xff]  }
  0x30   :  { %1662 = vmatprep.subr.bf16.mxu0 %v7479_v56  ;;  %1826 = vmatprep.subr.bf16.mxu1 %v7481_v57  ;;  %v7562_v56 = vld [vmem:[%s10725_s1 + $0x328] ss:$16 sps:$4 sm:$0xff]   ;;  %v7567_v57 = vld [vmem:[%s10725_s1 + $0x344] ss:$16 sps:$4 sm:$0xff]  }
  0x33   :  { %1663 = vmatpush1.bf16.msra.mxu0 %v7483_v60  ;;  %1827 = vmatpush1.bf16.msra.mxu1 %v7484_v61  ;;  %v7568_v60 = vld [vmem:[%s10725_s1 + $0x348] ss:$16 sps:$4 sm:$0xff]   ;;  %v7573_v61 = vld [vmem:[%s10725_s1 + $0x364] ss:$16 sps:$4 sm:$0xff]  }
  0x34   :  { %1664 = vmatprep.subr.bf16.mxu0 %v7485_v62  ;;  %1828 = vmatprep.subr.bf16.mxu1 %v7487_v63  ;;  %v7576_v62 = vld [vmem:[%s10725_s1 + $0x36c] ss:$16 sps:$4 sm:$0xff]   ;;  %v7571_v63 = vld [vmem:[%s10725_s1 + $0x360] ss:$16 sps:$4 sm:$0xff]  }
  0x37   :  { %1665 = vmatpush1.bf16.msra.mxu0 %v7489_v0  ;;  %1829 = vmatpush1.bf16.msra.mxu1 %v7490_v1  ;;  %v7574_v0 = vld [vmem:[%s10725_s1 + $0x368] ss:$16 sps:$4 sm:$0xff]   ;;  %v7579_v1 = vld [vmem:[%s10725_s1 + $0x384] ss:$16 sps:$4 sm:$0xff]  }
  0x38   :  { %1666 = vmatprep.subr.bf16.mxu0 %v7491_v2  ;;  %1830 = vmatprep.subr.bf16.mxu1 %v7493_v3  ;;  %v7582_v2 = vld [vmem:[%s10725_s1 + $0x38c] ss:$16 sps:$4 sm:$0xff]   ;;  %v7577_v3 = vld [vmem:[%s10725_s1 + $0x380] ss:$16 sps:$4 sm:$0xff]  }
  0x3b   :  { %1667 = vmatpush1.bf16.msra.mxu0 %v7495_v5  ;;  %1831 = vmatpush1.bf16.msra.mxu1 %v7496_v6  ;;  %v7585_v5 = vld [vmem:[%s10725_s1 + $0x3a4] ss:$16 sps:$4 sm:$0xff]   ;;  %v7588_v6 = vld [vmem:[%s10725_s1 + $0x3ac] ss:$16 sps:$4 sm:$0xff]  }
  0x3c   :  { %1668 = vmatprep.subr.bf16.mxu0 %v7497_v7  ;;  %1832 = vmatprep.subr.bf16.mxu1 %v7499_v8  ;;  %v7583_v7 = vld [vmem:[%s10725_s1 + $0x3a0] ss:$16 sps:$4 sm:$0xff]   ;;  %v7586_v8 = vld [vmem:[%s10725_s1 + $0x3a8] ss:$16 sps:$4 sm:$0xff]  }
  0x3f   :  { %1669 = vmatpush1.bf16.msra.mxu0 %v7501_v10  ;;  %1833 = vmatpush1.bf16.msra.mxu1 %v7502_v11  ;;  %v7591_v10 = vld [vmem:[%s10725_s1 + $0x3c4] ss:$16 sps:$4 sm:$0xff]   ;;  %v7594_v11 = vld [vmem:[%s10725_s1 + $0x3cc] ss:$16 sps:$4 sm:$0xff]  }
  0x40   :  { %1679 = vmatprep.subr.bf16.mxu0 %v7507_v12  ;;  %1843 = vmatprep.subr.bf16.mxu1 %v7510_v13  ;;  %v8314_v12 = vld [vmem:[%s10726_s0 + $0x8] sm:$0xff]  ;;  %v7589_v13 = vld [vmem:[%s10725_s1 + $0x3c0] ss:$16 sps:$4 sm:$0xff]  }
  0x42   :  { %1671 = vmatmul.mubr.bf16.vlgmr.msra.gmra.mrb[0].mxu0 %v328_v15  ;;  %1835 = vmatmul.mubr.bf16.vlgmr.msra.gmra.mrb[0].mxu1 %v328_v15  ;;  %v7597_v15 = vld [vmem:[%s10725_s1 + $0x3e4] ss:$16 sps:$4 sm:$0xff]  }
  0x43   :  { %1680 = vmatpush1.bf16.msra.mxu0 %v7505_v16  ;;  %1844 = vmatpush1.bf16.msra.mxu1 %v7508_v17  ;;  %v7600_v16 = vld [vmem:[%s10725_s1 + $0x3ec] ss:$16 sps:$4 sm:$0xff]   ;;  %v8330_v17 = vrot.slane %v8314_v12, %v8066_v49 }
  0x44   :  { %1681 = vmatprep.subr.bf16.mxu0 %v7513_v18  ;;  %1845 = vmatprep.subr.bf16.mxu1 %v7516_v19  ;;  %v7595_v18 = vld [vmem:[%s10725_s1 + $0x3e0] ss:$16 sps:$4 sm:$0xff]   ;;  %v7598_v19 = vld [vmem:[%s10725_s1 + $0x3e8] ss:$16 sps:$4 sm:$0xff]  }
  0x45   :  { %1711 = vmatprep.mubr.bf16.mxu0 %v331_v20  ;;  %1875 = vmatprep.mubr.bf16.mxu1 %v331_v20  ;;  %v7603_v20 = vld [vmem:[%s10725_s1 + $0x404] ss:$16 sps:$4 sm:$0xff]  }
  0x47   :  { %1682 = vmatpush1.bf16.msra.mxu0 %v7511_v21  ;;  %1846 = vmatpush1.bf16.msra.mxu1 %v7514_v22  ;;  %v7606_v21 = vld [vmem:[%s10725_s1 + $0x40c] ss:$16 sps:$4 sm:$0xff]   ;;  %v318_v22 = vcombine.high %v8330_v17, %v8330_v17 }
  0x48   :  { %1683 = vmatprep.subr.bf16.mxu0 %v7519_v23  ;;  %1847 = vmatprep.subr.bf16.mxu1 %v7522_v24  ;;  %v330_v23 = vpack.c.bf16 %v8127_v9, %v8127_v9  ;;  %v7601_v24 = vld [vmem:[%s10725_s1 + $0x400] ss:$16 sps:$4 sm:$0xff]   ;;  %v7612_v9 = vld [vmem:[%s10725_s1 + $0x42c] ss:$16 sps:$4 sm:$0xff]  }
  0x4b   :  { %1684 = vmatpush1.bf16.msra.mxu0 %v7517_v25  ;;  %1848 = vmatpush1.bf16.msra.mxu1 %v7520_v26  ;;  %v7604_v25 = vld [vmem:[%s10725_s1 + $0x408] ss:$16 sps:$4 sm:$0xff]   ;;  %v7609_v26 = vld [vmem:[%s10725_s1 + $0x424] ss:$16 sps:$4 sm:$0xff]  }
  0x4c   :  { %1685 = vmatprep.subr.bf16.mxu0 %v7525_v27  ;;  %1849 = vmatprep.subr.bf16.mxu1 %v7528_v28  ;;  %v333_v27 = vpack.c.bf16 %v318_v22, %v318_v22  ;;  %v7607_v28 = vld [vmem:[%s10725_s1 + $0x420] ss:$16 sps:$4 sm:$0xff]  }
  0x4d   :  { %v7685_v22 = vld [vmem:[%s10725_s1 + $0x5c0] ss:$16 sps:$4 sm:$0xff]  }
  0x4f   :  { %1686 = vmatpush1.bf16.msra.mxu0 %v7523_v29  ;;  %1850 = vmatpush1.bf16.msra.mxu1 %v7526_v30  ;;  %v7610_v29 = vld [vmem:[%s10725_s1 + $0x428] ss:$16 sps:$4 sm:$0xff]   ;;  %v7615_v30 = vld [vmem:[%s10725_s1 + $0x444] ss:$16 sps:$4 sm:$0xff]  }
  0x50   :  { %1687 = vmatprep.subr.bf16.mxu0 %v7531_v31  ;;  %1851 = vmatprep.subr.bf16.mxu1 %v7534_v32  ;;  %v7618_v31 = vld [vmem:[%s10725_s1 + $0x44c] ss:$16 sps:$4 sm:$0xff]   ;;  %v7613_v32 = vld [vmem:[%s10725_s1 + $0x440] ss:$16 sps:$4 sm:$0xff]  }
  0x53   :  { %1688 = vmatpush1.bf16.msra.mxu0 %v7529_v33  ;;  %1852 = vmatpush1.bf16.msra.mxu1 %v7532_v34  ;;  %v7616_v33 = vld [vmem:[%s10725_s1 + $0x448] ss:$16 sps:$4 sm:$0xff]   ;;  %v7621_v34 = vld [vmem:[%s10725_s1 + $0x464] ss:$16 sps:$4 sm:$0xff]  }
  0x54   :  { %1689 = vmatprep.subr.bf16.mxu0 %v7537_v35  ;;  %1853 = vmatprep.subr.bf16.mxu1 %v7540_v36  ;;  %v7624_v35 = vld [vmem:[%s10725_s1 + $0x46c] ss:$16 sps:$4 sm:$0xff]   ;;  %v7619_v36 = vld [vmem:[%s10725_s1 + $0x460] ss:$16 sps:$4 sm:$0xff]  }
  0x57   :  { %1690 = vmatpush1.bf16.msra.mxu0 %v7535_v37  ;;  %1854 = vmatpush1.bf16.msra.mxu1 %v7538_v38  ;;  %v7622_v37 = vld [vmem:[%s10725_s1 + $0x468] ss:$16 sps:$4 sm:$0xff]   ;;  %v7627_v38 = vld [vmem:[%s10725_s1 + $0x484] ss:$16 sps:$4 sm:$0xff]  }
  0x58   :  { %1691 = vmatprep.subr.bf16.mxu0 %v7543_v39  ;;  %1855 = vmatprep.subr.bf16.mxu1 %v7546_v40  ;;  %v7630_v39 = vld [vmem:[%s10725_s1 + $0x48c] ss:$16 sps:$4 sm:$0xff]   ;;  %v7625_v40 = vld [vmem:[%s10725_s1 + $0x480] ss:$16 sps:$4 sm:$0xff]  }
  0x5b   :  { %1692 = vmatpush1.bf16.msra.mxu0 %v7541_v41  ;;  %1856 = vmatpush1.bf16.msra.mxu1 %v7544_v42  ;;  %v7628_v41 = vld [vmem:[%s10725_s1 + $0x488] ss:$16 sps:$4 sm:$0xff]   ;;  %v7633_v42 = vld [vmem:[%s10725_s1 + $0x4a4] ss:$16 sps:$4 sm:$0xff]  }
  0x5c   :  { %1693 = vmatprep.subr.bf16.mxu0 %v7549_v44  ;;  %1857 = vmatprep.subr.bf16.mxu1 %v7552_v45  ;;  %v7636_v44 = vld [vmem:[%s10725_s1 + $0x4ac] ss:$16 sps:$4 sm:$0xff]   ;;  %v7631_v45 = vld [vmem:[%s10725_s1 + $0x4a0] ss:$16 sps:$4 sm:$0xff]  }
  0x5f   :  { %1694 = vmatpush1.bf16.msra.mxu0 %v7547_v46  ;;  %1858 = vmatpush1.bf16.msra.mxu1 %v7550_v47  ;;  %v7634_v46 = vld [vmem:[%s10725_s1 + $0x4a8] ss:$16 sps:$4 sm:$0xff]   ;;  %v7639_v47 = vld [vmem:[%s10725_s1 + $0x4c4] ss:$16 sps:$4 sm:$0xff]  }
  0x60   :  { %1695 = vmatprep.subr.bf16.mxu0 %v7555_v48  ;;  %1859 = vmatprep.subr.bf16.mxu1 %v7558_v50  ;;  %v7642_v48 = vld [vmem:[%s10725_s1 + $0x4cc] ss:$16 sps:$4 sm:$0xff]   ;;  %v7637_v50 = vld [vmem:[%s10725_s1 + $0x4c0] ss:$16 sps:$4 sm:$0xff]  }
  0x63   :  { %1696 = vmatpush1.bf16.msra.mxu0 %v7553_v51  ;;  %1860 = vmatpush1.bf16.msra.mxu1 %v7556_v52  ;;  %v7640_v51 = vld [vmem:[%s10725_s1 + $0x4c8] ss:$16 sps:$4 sm:$0xff]   ;;  %v7645_v52 = vld [vmem:[%s10725_s1 + $0x4e4] ss:$16 sps:$4 sm:$0xff]  }
  0x64   :  { %1697 = vmatprep.subr.bf16.mxu0 %v7561_v53  ;;  %1861 = vmatprep.subr.bf16.mxu1 %v7564_v54  ;;  %v7648_v53 = vld [vmem:[%s10725_s1 + $0x4ec] ss:$16 sps:$4 sm:$0xff]   ;;  %v7643_v54 = vld [vmem:[%s10725_s1 + $0x4e0] ss:$16 sps:$4 sm:$0xff]  }
  0x67   :  { %1698 = vmatpush1.bf16.msra.mxu0 %v7559_v55  ;;  %1862 = vmatpush1.bf16.msra.mxu1 %v7562_v56  ;;  %v7646_v55 = vld [vmem:[%s10725_s1 + $0x4e8] ss:$16 sps:$4 sm:$0xff]   ;;  %v7651_v56 = vld [vmem:[%s10725_s1 + $0x504] ss:$16 sps:$4 sm:$0xff]  }
  0x68   :  { %1699 = vmatprep.subr.bf16.mxu0 %v7567_v57  ;;  %1863 = vmatprep.subr.bf16.mxu1 %v7570_v58  ;;  %v7654_v57 = vld [vmem:[%s10725_s1 + $0x50c] ss:$16 sps:$4 sm:$0xff]   ;;  %v7649_v58 = vld [vmem:[%s10725_s1 + $0x500] ss:$16 sps:$4 sm:$0xff]  }
  0x6b   :  { %1700 = vmatpush1.bf16.msra.mxu0 %v7565_v59  ;;  %1864 = vmatpush1.bf16.msra.mxu1 %v7568_v60  ;;  %v7652_v59 = vld [vmem:[%s10725_s1 + $0x508] ss:$16 sps:$4 sm:$0xff]   ;;  %v7657_v60 = vld [vmem:[%s10725_s1 + $0x524] ss:$16 sps:$4 sm:$0xff]  }
  0x6c   :  { %1701 = vmatprep.subr.bf16.mxu0 %v7573_v61  ;;  %1865 = vmatprep.subr.bf16.mxu1 %v7576_v62  ;;  %v7660_v61 = vld [vmem:[%s10725_s1 + $0x52c] ss:$16 sps:$4 sm:$0xff]   ;;  %v7655_v62 = vld [vmem:[%s10725_s1 + $0x520] ss:$16 sps:$4 sm:$0xff]  }
  0x6f   :  { %1702 = vmatpush1.bf16.msra.mxu0 %v7571_v63  ;;  %1866 = vmatpush1.bf16.msra.mxu1 %v7574_v0  ;;  %v7658_v63 = vld [vmem:[%s10725_s1 + $0x528] ss:$16 sps:$4 sm:$0xff]   ;;  %v7663_v0 = vld [vmem:[%s10725_s1 + $0x544] ss:$16 sps:$4 sm:$0xff]  }
  0x70   :  { %1703 = vmatprep.subr.bf16.mxu0 %v7579_v1  ;;  %1867 = vmatprep.subr.bf16.mxu1 %v7582_v2  ;;  %v7666_v1 = vld [vmem:[%s10725_s1 + $0x54c] ss:$16 sps:$4 sm:$0xff]   ;;  %v7661_v2 = vld [vmem:[%s10725_s1 + $0x540] ss:$16 sps:$4 sm:$0xff]  }
  0x73   :  { %1704 = vmatpush1.bf16.msra.mxu0 %v7577_v3  ;;  %1868 = vmatpush1.bf16.msra.mxu1 %v7580_v4  ;;  %v7664_v3 = vld [vmem:[%s10725_s1 + $0x548] ss:$16 sps:$4 sm:$0xff]   ;;  %v7669_v4 = vld [vmem:[%s10725_s1 + $0x564] ss:$16 sps:$4 sm:$0xff]  }
  0x74   :  { %1705 = vmatprep.subr.bf16.mxu0 %v7585_v5  ;;  %1869 = vmatprep.subr.bf16.mxu1 %v7588_v6  ;;  %v7672_v5 = vld [vmem:[%s10725_s1 + $0x56c] ss:$16 sps:$4 sm:$0xff]   ;;  %v7667_v6 = vld [vmem:[%s10725_s1 + $0x560] ss:$16 sps:$4 sm:$0xff]  }
  0x77   :  { %1706 = vmatpush1.bf16.msra.mxu0 %v7583_v7  ;;  %1870 = vmatpush1.bf16.msra.mxu1 %v7586_v8  ;;  %v7670_v7 = vld [vmem:[%s10725_s1 + $0x568] ss:$16 sps:$4 sm:$0xff]   ;;  %v7675_v8 = vld [vmem:[%s10725_s1 + $0x584] ss:$16 sps:$4 sm:$0xff]  }
  0x78   :  { %1707 = vmatprep.subr.bf16.mxu0 %v7591_v10  ;;  %1871 = vmatprep.subr.bf16.mxu1 %v7594_v11  ;;  %v7678_v10 = vld [vmem:[%s10725_s1 + $0x58c] ss:$16 sps:$4 sm:$0xff]   ;;  %v7673_v11 = vld [vmem:[%s10725_s1 + $0x580] ss:$16 sps:$4 sm:$0xff]  }
  0x7b   :  { %1708 = vmatpush1.bf16.msra.mxu0 %v7589_v13  ;;  %1872 = vmatpush1.bf16.msra.mxu1 %v7592_v14  ;;  %v7676_v13 = vld [vmem:[%s10725_s1 + $0x588] ss:$16 sps:$4 sm:$0xff]   ;;  %v7681_v14 = vld [vmem:[%s10725_s1 + $0x5a4] ss:$16 sps:$4 sm:$0xff]  }
  0x7c   :  { %1709 = vmatprep.subr.bf16.mxu0 %v7597_v15  ;;  %1873 = vmatprep.subr.bf16.mxu1 %v7600_v16  ;;  %v7684_v15 = vld [vmem:[%s10725_s1 + $0x5ac] ss:$16 sps:$4 sm:$0xff]   ;;  %v7679_v16 = vld [vmem:[%s10725_s1 + $0x5a0] ss:$16 sps:$4 sm:$0xff]  }
  0x7f   :  { %1710 = vmatpush1.bf16.msra.mxu0 %v7595_v18  ;;  %1874 = vmatpush1.bf16.msra.mxu1 %v7598_v19  ;;  %v7682_v18 = vld [vmem:[%s10725_s1 + $0x5a8] ss:$16 sps:$4 sm:$0xff]   ;;  %v7687_v19 = vld [vmem:[%s10725_s1 + $0x5c4] ss:$16 sps:$4 sm:$0xff]  }
  0x80   :  { %1720 = vmatprep.subr.bf16.mxu0 %v7603_v20  ;;  %1884 = vmatprep.subr.bf16.mxu1 %v7606_v21  ;;  %v7690_v20 = vld [vmem:[%s10725_s1 + $0x5cc] ss:$16 sps:$4 sm:$0xff]   ;;  %v303_v21 = vcombine.high %v8314_v12, %v8314_v12 }
  0x81   :  { %v7696_v12 = vld [vmem:[%s10725_s1 + $0x5ec] ss:$16 sps:$4 sm:$0xff]  }
  0x82   :  { %1712 = vmatmul.mubr.bf16.vlgmr.msra.gmra.mrb[0].mxu0 %v330_v23  ;;  %1876 = vmatmul.mubr.bf16.vlgmr.msra.gmra.mrb[0].mxu1 %v330_v23  ;;  %v7688_v23 = vld [vmem:[%s10725_s1 + $0x5c8] ss:$16 sps:$4 sm:$0xff]  }
  0x83   :  { %1721 = vmatpush1.bf16.msra.mxu0 %v7601_v24  ;;  %1885 = vmatpush1.bf16.msra.mxu1 %v7604_v25  ;;  %v7693_v24 = vld [vmem:[%s10725_s1 + $0x5e4] ss:$16 sps:$4 sm:$0xff]   ;;  %v8531_v25 = vrot.slane %v303_v21, %v8066_v49  ;;  %v7772_v21 = vld [vmem:[%s10725_s1 + $0x788] ss:$16 sps:$4 sm:$0xff]  }
  0x84   :  { %1722 = vmatprep.subr.bf16.mxu0 %v7609_v26  ;;  %1886 = vmatprep.subr.bf16.mxu1 %v7612_v9  ;;  %v7691_v26 = vld [vmem:[%s10725_s1 + $0x5e0] ss:$16 sps:$4 sm:$0xff]   ;;  %v7694_v9 = vld [vmem:[%s10725_s1 + $0x5e8] ss:$16 sps:$4 sm:$0xff]  }
  0x85   :  { %1752 = vmatprep.mubr.bf16.mxu0 %v333_v27  ;;  %1916 = vmatprep.mubr.bf16.mxu1 %v333_v27  ;;  %v7699_v27 = vld [vmem:[%s10725_s1 + $0x604] ss:$16 sps:$4 sm:$0xff]  }
  0x87   :  { %1723 = vmatpush1.bf16.msra.mxu0 %v7607_v28  ;;  %1887 = vmatpush1.bf16.msra.mxu1 %v7610_v29  ;;  %v7702_v28 = vld [vmem:[%s10725_s1 + $0x60c] ss:$16 sps:$4 sm:$0xff]   ;;  %v7697_v29 = vld [vmem:[%s10725_s1 + $0x600] ss:$16 sps:$4 sm:$0xff]  }
  0x88   :  { %1724 = vmatprep.subr.bf16.mxu0 %v7615_v30  ;;  %1888 = vmatprep.subr.bf16.mxu1 %v7618_v31  ;;  %v7700_v30 = vld [vmem:[%s10725_s1 + $0x608] ss:$16 sps:$4 sm:$0xff]   ;;  %v319_v31 = vcombine.high %v8531_v25, %v8531_v25 }
  0x8b   :  { %1725 = vmatpush1.bf16.msra.mxu0 %v7613_v32  ;;  %1889 = vmatpush1.bf16.msra.mxu1 %v7616_v33  ;;  %v332_v32 = vpack.c.bf16 %v8330_v17, %v8330_v17  ;;  %v7705_v33 = vld [vmem:[%s10725_s1 + $0x624] ss:$16 sps:$4 sm:$0xff]   ;;  %v7706_v17 = vld [vmem:[%s10725_s1 + $0x628] ss:$16 sps:$4 sm:$0xff]  }
  0x8c   :  { %1726 = vmatprep.subr.bf16.mxu0 %v7621_v34  ;;  %1890 = vmatprep.subr.bf16.mxu1 %v7624_v35  ;;  %v7708_v34 = vld [vmem:[%s10725_s1 + $0x62c] ss:$16 sps:$4 sm:$0xff]   ;;  %v7703_v35 = vld [vmem:[%s10725_s1 + $0x620] ss:$16 sps:$4 sm:$0xff]  }
  0x8f   :  { %1727 = vmatpush1.bf16.msra.mxu0 %v7619_v36  ;;  %1891 = vmatpush1.bf16.msra.mxu1 %v7622_v37  ;;  %v335_v36 = vpack.c.bf16 %v319_v31, %v319_v31  ;;  %v7711_v37 = vld [vmem:[%s10725_s1 + $0x644] ss:$16 sps:$4 sm:$0xff]   ;;  %v7787_v31 = vld [vmem:[%s10725_s1 + $0x7e0] ss:$16 sps:$4 sm:$0xff]  }
  0x90   :  { %1728 = vmatprep.subr.bf16.mxu0 %v7627_v38  ;;  %1892 = vmatprep.subr.bf16.mxu1 %v7630_v39  ;;  %v7714_v38 = vld [vmem:[%s10725_s1 + $0x64c] ss:$16 sps:$4 sm:$0xff]   ;;  %v7709_v39 = vld [vmem:[%s10725_s1 + $0x640] ss:$16 sps:$4 sm:$0xff]  }
  0x93   :  { %1729 = vmatpush1.bf16.msra.mxu0 %v7625_v40  ;;  %1893 = vmatpush1.bf16.msra.mxu1 %v7628_v41  ;;  %v7712_v40 = vld [vmem:[%s10725_s1 + $0x648] ss:$16 sps:$4 sm:$0xff]   ;;  %v7717_v41 = vld [vmem:[%s10725_s1 + $0x664] ss:$16 sps:$4 sm:$0xff]  }
  0x94   :  { %1730 = vmatprep.subr.bf16.mxu0 %v7633_v42  ;;  %1894 = vmatprep.subr.bf16.mxu1 %v7636_v44  ;;  %v7720_v42 = vld [vmem:[%s10725_s1 + $0x66c] ss:$16 sps:$4 sm:$0xff]   ;;  %v7715_v44 = vld [vmem:[%s10725_s1 + $0x660] ss:$16 sps:$4 sm:$0xff]  }
  0x97   :  { %1731 = vmatpush1.bf16.msra.mxu0 %v7631_v45  ;;  %1895 = vmatpush1.bf16.msra.mxu1 %v7634_v46  ;;  %v7718_v45 = vld [vmem:[%s10725_s1 + $0x668] ss:$16 sps:$4 sm:$0xff]   ;;  %v7723_v46 = vld [vmem:[%s10725_s1 + $0x684] ss:$16 sps:$4 sm:$0xff]  }
  0x98   :  { %1732 = vmatprep.subr.bf16.mxu0 %v7639_v47  ;;  %1896 = vmatprep.subr.bf16.mxu1 %v7642_v48  ;;  %v7726_v47 = vld [vmem:[%s10725_s1 + $0x68c] ss:$16 sps:$4 sm:$0xff]   ;;  %v7721_v48 = vld [vmem:[%s10725_s1 + $0x680] ss:$16 sps:$4 sm:$0xff]  }
  0x9b   :  { %1733 = vmatpush1.bf16.msra.mxu0 %v7637_v50  ;;  %1897 = vmatpush1.bf16.msra.mxu1 %v7640_v51  ;;  %v7724_v50 = vld [vmem:[%s10725_s1 + $0x688] ss:$16 sps:$4 sm:$0xff]   ;;  %v7729_v51 = vld [vmem:[%s10725_s1 + $0x6a4] ss:$16 sps:$4 sm:$0xff]  }
  0x9c   :  { %1734 = vmatprep.subr.bf16.mxu0 %v7645_v52  ;;  %1898 = vmatprep.subr.bf16.mxu1 %v7648_v53  ;;  %v7732_v52 = vld [vmem:[%s10725_s1 + $0x6ac] ss:$16 sps:$4 sm:$0xff]   ;;  %v7727_v53 = vld [vmem:[%s10725_s1 + $0x6a0] ss:$16 sps:$4 sm:$0xff]  }
  0x9f   :  { %1735 = vmatpush1.bf16.msra.mxu0 %v7643_v54  ;;  %1899 = vmatpush1.bf16.msra.mxu1 %v7646_v55  ;;  %v7730_v54 = vld [vmem:[%s10725_s1 + $0x6a8] ss:$16 sps:$4 sm:$0xff]   ;;  %v7735_v55 = vld [vmem:[%s10725_s1 + $0x6c4] ss:$16 sps:$4 sm:$0xff]  }
  0xa0   :  { %1736 = vmatprep.subr.bf16.mxu0 %v7651_v56  ;;  %1900 = vmatprep.subr.bf16.mxu1 %v7654_v57  ;;  %v7738_v56 = vld [vmem:[%s10725_s1 + $0x6cc] ss:$16 sps:$4 sm:$0xff]   ;;  %v7733_v57 = vld [vmem:[%s10725_s1 + $0x6c0] ss:$16 sps:$4 sm:$0xff]  }
  0xa3   :  { %1737 = vmatpush1.bf16.msra.mxu0 %v7649_v58  ;;  %1901 = vmatpush1.bf16.msra.mxu1 %v7652_v59  ;;  %v7736_v58 = vld [vmem:[%s10725_s1 + $0x6c8] ss:$16 sps:$4 sm:$0xff]   ;;  %v7741_v59 = vld [vmem:[%s10725_s1 + $0x6e4] ss:$16 sps:$4 sm:$0xff]  }
  0xa4   :  { %1738 = vmatprep.subr.bf16.mxu0 %v7657_v60  ;;  %1902 = vmatprep.subr.bf16.mxu1 %v7660_v61  ;;  %v7744_v60 = vld [vmem:[%s10725_s1 + $0x6ec] ss:$16 sps:$4 sm:$0xff]   ;;  %v7739_v61 = vld [vmem:[%s10725_s1 + $0x6e0] ss:$16 sps:$4 sm:$0xff]  }
  0xa7   :  { %1739 = vmatpush1.bf16.msra.mxu0 %v7655_v62  ;;  %1903 = vmatpush1.bf16.msra.mxu1 %v7658_v63  ;;  %v7742_v62 = vld [vmem:[%s10725_s1 + $0x6e8] ss:$16 sps:$4 sm:$0xff]   ;;  %v7747_v63 = vld [vmem:[%s10725_s1 + $0x704] ss:$16 sps:$4 sm:$0xff]  }
  0xa8   :  { %1740 = vmatprep.subr.bf16.mxu0 %v7663_v0  ;;  %1904 = vmatprep.subr.bf16.mxu1 %v7666_v1  ;;  %v7750_v0 = vld [vmem:[%s10725_s1 + $0x70c] ss:$16 sps:$4 sm:$0xff]   ;;  %v7745_v1 = vld [vmem:[%s10725_s1 + $0x700] ss:$16 sps:$4 sm:$0xff]  }
  0xab   :  { %1741 = vmatpush1.bf16.msra.mxu0 %v7661_v2  ;;  %1905 = vmatpush1.bf16.msra.mxu1 %v7664_v3  ;;  %v7748_v2 = vld [vmem:[%s10725_s1 + $0x708] ss:$16 sps:$4 sm:$0xff]   ;;  %v7753_v3 = vld [vmem:[%s10725_s1 + $0x724] ss:$16 sps:$4 sm:$0xff]  }
  0xac   :  { %1742 = vmatprep.subr.bf16.mxu0 %v7669_v4  ;;  %1906 = vmatprep.subr.bf16.mxu1 %v7672_v5  ;;  %v7756_v4 = vld [vmem:[%s10725_s1 + $0x72c] ss:$16 sps:$4 sm:$0xff]   ;;  %v7751_v5 = vld [vmem:[%s10725_s1 + $0x720] ss:$16 sps:$4 sm:$0xff]  }
  0xaf   :  { %1743 = vmatpush1.bf16.msra.mxu0 %v7667_v6  ;;  %1907 = vmatpush1.bf16.msra.mxu1 %v7670_v7  ;;  %v7754_v6 = vld [vmem:[%s10725_s1 + $0x728] ss:$16 sps:$4 sm:$0xff]   ;;  %v7759_v7 = vld [vmem:[%s10725_s1 + $0x744] ss:$16 sps:$4 sm:$0xff]  }
  0xb0   :  { %1744 = vmatprep.subr.bf16.mxu0 %v7675_v8  ;;  %1908 = vmatprep.subr.bf16.mxu1 %v7678_v10  ;;  %v7762_v8 = vld [vmem:[%s10725_s1 + $0x74c] ss:$16 sps:$4 sm:$0xff]   ;;  %v7757_v10 = vld [vmem:[%s10725_s1 + $0x740] ss:$16 sps:$4 sm:$0xff]  }
  0xb3   :  { %1745 = vmatpush1.bf16.msra.mxu0 %v7673_v11  ;;  %1909 = vmatpush1.bf16.msra.mxu1 %v7676_v13  ;;  %v7760_v11 = vld [vmem:[%s10725_s1 + $0x748] ss:$16 sps:$4 sm:$0xff]   ;;  %v7765_v13 = vld [vmem:[%s10725_s1 + $0x764] ss:$16 sps:$4 sm:$0xff]  }
  0xb4   :  { %1746 = vmatprep.subr.bf16.mxu0 %v7681_v14  ;;  %1910 = vmatprep.subr.bf16.mxu1 %v7684_v15  ;;  %v7768_v14 = vld [vmem:[%s10725_s1 + $0x76c] ss:$16 sps:$4 sm:$0xff]   ;;  %v7763_v15 = vld [vmem:[%s10725_s1 + $0x760] ss:$16 sps:$4 sm:$0xff]  }
  0xb7   :  { %1747 = vmatpush1.bf16.msra.mxu0 %v7679_v16  ;;  %1911 = vmatpush1.bf16.msra.mxu1 %v7682_v18  ;;  %v7766_v16 = vld [vmem:[%s10725_s1 + $0x768] ss:$16 sps:$4 sm:$0xff]   ;;  %v7771_v18 = vld [vmem:[%s10725_s1 + $0x784] ss:$16 sps:$4 sm:$0xff]  }
  0xb8   :  { %1748 = vmatprep.subr.bf16.mxu0 %v7687_v19  ;;  %1912 = vmatprep.subr.bf16.mxu1 %v7690_v20  ;;  %v7774_v19 = vld [vmem:[%s10725_s1 + $0x78c] ss:$16 sps:$4 sm:$0xff]   ;;  %v7769_v20 = vld [vmem:[%s10725_s1 + $0x780] ss:$16 sps:$4 sm:$0xff]  }
  0xbb   :  { %1749 = vmatpush1.bf16.msra.mxu0 %v7685_v22  ;;  %1913 = vmatpush1.bf16.msra.mxu1 %v7688_v23  ;;  %v7777_v22 = vld [vmem:[%s10725_s1 + $0x7a4] ss:$16 sps:$4 sm:$0xff]   ;;  %v7780_v23 = vld [vmem:[%s10725_s1 + $0x7ac] ss:$16 sps:$4 sm:$0xff]  }
  0xbc   :  { %1750 = vmatprep.subr.bf16.mxu0 %v7693_v24  ;;  %1914 = vmatprep.subr.bf16.mxu1 %v7696_v12  ;;  %v7775_v24 = vld [vmem:[%s10725_s1 + $0x7a0] ss:$16 sps:$4 sm:$0xff]   ;;  %v7778_v12 = vld [vmem:[%s10725_s1 + $0x7a8] ss:$16 sps:$4 sm:$0xff]  }
  0xbf   :  { %1751 = vmatpush1.bf16.msra.mxu0 %v7691_v26  ;;  %1915 = vmatpush1.bf16.msra.mxu1 %v7694_v9  ;;  %v7783_v26 = vld [vmem:[%s10725_s1 + $0x7c4] ss:$16 sps:$4 sm:$0xff]   ;;  %v7786_v9 = vld [vmem:[%s10725_s1 + $0x7cc] ss:$16 sps:$4 sm:$0xff]  }
  0xc0   :  { %1761 = vmatprep.subr.bf16.mxu0 %v7699_v27  ;;  %1925 = vmatprep.subr.bf16.mxu1 %v7702_v28  ;;  %v7781_v27 = vld [vmem:[%s10725_s1 + $0x7c0] ss:$16 sps:$4 sm:$0xff]   ;;  %v7784_v28 = vld [vmem:[%s10725_s1 + $0x7c8] ss:$16 sps:$4 sm:$0xff]  }
  0xc2   :  { %1753 = vmatmul.mubr.bf16.vlgmr.msra.gmra.mrb[0].mxu0 %v332_v32  ;;  %1917 = vmatmul.mubr.bf16.vlgmr.msra.gmra.mrb[0].mxu1 %v332_v32  ;;  %v7790_v32 = vld [vmem:[%s10725_s1 + $0x7e8] ss:$16 sps:$4 sm:$0xff]  }
  0xc3   :  { %1762 = vmatpush1.bf16.msra.mxu0 %v7697_v29  ;;  %1926 = vmatpush1.bf16.msra.mxu1 %v7700_v30  ;;  %v7789_v29 = vld [vmem:[%s10725_s1 + $0x7e4] ss:$16 sps:$4 sm:$0xff]   ;;  %v7792_v30 = vld [vmem:[%s10725_s1 + $0x7ec] ss:$16 sps:$4 sm:$0xff]  }
  0xc4   :  { %1763 = vmatprep.subr.bf16.mxu0 %v7705_v33  ;;  %1927 = vmatprep.subr.bf16.mxu1 %v7708_v34  ;;  %v7795_v33 = vld [vmem:[%s10727_s3 + $0x4] ss:$8 sps:$4 sm:$0xff]   ;;  %v334_v34 = vpack.c.bf16 %v8531_v25, %v8531_v25 }
  0xc5   :  { %1793 = vmatprep.mubr.bf16.mxu0 %v335_v36  ;;  %1957 = vmatprep.mubr.bf16.mxu1 %v335_v36  ;;  %v7796_v36 = vld [vmem:[%s10727_s3 + $0x10] ss:$8 sps:$4 sm:$0xff]   ;;  %v7801_v25 = vld [vmem:[%s10727_s3 + $0x24] ss:$8 sps:$4 sm:$0xff]  }
  0xc7   :  { %1764 = vmatpush1.bf16.msra.mxu0 %v7703_v35  ;;  %1928 = vmatpush1.bf16.msra.mxu1 %v7706_v17  ;;  %v7793_v35 = vld [vmem:[%s10727_s3] ss:$8 sps:$4 sm:$0xff]   ;;  %v7798_v17 = vld [vmem:[%s10727_s3 + $0x14] ss:$8 sps:$4 sm:$0xff]  }
  0xc8   :  { %1765 = vmatprep.subr.bf16.mxu0 %v7711_v37  ;;  %1929 = vmatprep.subr.bf16.mxu1 %v7714_v38  ;;  %v7799_v37 = vld [vmem:[%s10727_s3 + $0x20] ss:$8 sps:$4 sm:$0xff]   ;;  %v7804_v38 = vld [vmem:[%s10727_s3 + $0x34] ss:$8 sps:$4 sm:$0xff]  }
  0xcb   :  { %1766 = vmatpush1.bf16.msra.mxu0 %v7709_v39  ;;  %1930 = vmatpush1.bf16.msra.mxu1 %v7712_v40  ;;  %v7802_v39 = vld [vmem:[%s10727_s3 + $0x30] ss:$8 sps:$4 sm:$0xff]   ;;  %v7807_v40 = vld [vmem:[%s10727_s3 + $0x44] ss:$8 sps:$4 sm:$0xff]  }
  0xcc   :  { %1767 = vmatprep.subr.bf16.mxu0 %v7717_v41  ;;  %1931 = vmatprep.subr.bf16.mxu1 %v7720_v42  ;;  %v7805_v41 = vld [vmem:[%s10727_s3 + $0x40] ss:$8 sps:$4 sm:$0xff]   ;;  %v7810_v42 = vld [vmem:[%s10727_s3 + $0x54] ss:$8 sps:$4 sm:$0xff]  }
  0xcf   :  { %1768 = vmatpush1.bf16.msra.mxu0 %v7715_v44  ;;  %1932 = vmatpush1.bf16.msra.mxu1 %v7718_v45  ;;  %v7808_v44 = vld [vmem:[%s10727_s3 + $0x50] ss:$8 sps:$4 sm:$0xff]   ;;  %v7813_v45 = vld [vmem:[%s10727_s3 + $0x64] ss:$8 sps:$4 sm:$0xff]  }
  0xd0   :  { %1769 = vmatprep.subr.bf16.mxu0 %v7723_v46  ;;  %1933 = vmatprep.subr.bf16.mxu1 %v7726_v47  ;;  %v7811_v46 = vld [vmem:[%s10727_s3 + $0x60] ss:$8 sps:$4 sm:$0xff]   ;;  %v7816_v47 = vld [vmem:[%s10727_s3 + $0x74] ss:$8 sps:$4 sm:$0xff]  }
  0xd3   :  { %1770 = vmatpush1.bf16.msra.mxu0 %v7721_v48  ;;  %1934 = vmatpush1.bf16.msra.mxu1 %v7724_v50  ;;  %v7814_v48 = vld [vmem:[%s10727_s3 + $0x70] ss:$8 sps:$4 sm:$0xff]   ;;  %v7819_v50 = vld [vmem:[%s10727_s3 + $0x84] ss:$8 sps:$4 sm:$0xff]  }
  0xd4   :  { %1771 = vmatprep.subr.bf16.mxu0 %v7729_v51  ;;  %1935 = vmatprep.subr.bf16.mxu1 %v7732_v52  ;;  %v7817_v51 = vld [vmem:[%s10727_s3 + $0x80] ss:$8 sps:$4 sm:$0xff]   ;;  %v7822_v52 = vld [vmem:[%s10727_s3 + $0x94] ss:$8 sps:$4 sm:$0xff]  }
  0xd7   :  { %1772 = vmatpush1.bf16.msra.mxu0 %v7727_v53  ;;  %1936 = vmatpush1.bf16.msra.mxu1 %v7730_v54  ;;  %v7820_v53 = vld [vmem:[%s10727_s3 + $0x90] ss:$8 sps:$4 sm:$0xff]   ;;  %v7825_v54 = vld [vmem:[%s10727_s3 + $0xa4] ss:$8 sps:$4 sm:$0xff]  }
  0xd8   :  { %1773 = vmatprep.subr.bf16.mxu0 %v7735_v55  ;;  %1937 = vmatprep.subr.bf16.mxu1 %v7738_v56  ;;  %v7823_v55 = vld [vmem:[%s10727_s3 + $0xa0] ss:$8 sps:$4 sm:$0xff]   ;;  %v7828_v56 = vld [vmem:[%s10727_s3 + $0xb4] ss:$8 sps:$4 sm:$0xff]  }
  0xdb   :  { %1774 = vmatpush1.bf16.msra.mxu0 %v7733_v57  ;;  %1938 = vmatpush1.bf16.msra.mxu1 %v7736_v58  ;;  %v7826_v57 = vld [vmem:[%s10727_s3 + $0xb0] ss:$8 sps:$4 sm:$0xff]   ;;  %v7831_v58 = vld [vmem:[%s10727_s3 + $0xc4] ss:$8 sps:$4 sm:$0xff]  }
  0xdc   :  { %1775 = vmatprep.subr.bf16.mxu0 %v7741_v59  ;;  %1939 = vmatprep.subr.bf16.mxu1 %v7744_v60  ;;  %v7829_v59 = vld [vmem:[%s10727_s3 + $0xc0] ss:$8 sps:$4 sm:$0xff]   ;;  %v7834_v60 = vld [vmem:[%s10727_s3 + $0xd4] ss:$8 sps:$4 sm:$0xff]  }
  0xdf   :  { %1776 = vmatpush1.bf16.msra.mxu0 %v7739_v61  ;;  %1940 = vmatpush1.bf16.msra.mxu1 %v7742_v62  ;;  %v7832_v61 = vld [vmem:[%s10727_s3 + $0xd0] ss:$8 sps:$4 sm:$0xff]   ;;  %v7837_v62 = vld [vmem:[%s10727_s3 + $0xe4] ss:$8 sps:$4 sm:$0xff]  }
  0xe0   :  { %1777 = vmatprep.subr.bf16.mxu0 %v7747_v63  ;;  %1941 = vmatprep.subr.bf16.mxu1 %v7750_v0  ;;  %v7835_v63 = vld [vmem:[%s10727_s3 + $0xe0] ss:$8 sps:$4 sm:$0xff]   ;;  %v7840_v0 = vld [vmem:[%s10727_s3 + $0xf4] ss:$8 sps:$4 sm:$0xff]  }
  0xe3   :  { %1778 = vmatpush1.bf16.msra.mxu0 %v7745_v1  ;;  %1942 = vmatpush1.bf16.msra.mxu1 %v7748_v2  ;;  %v7838_v1 = vld [vmem:[%s10727_s3 + $0xf0] ss:$8 sps:$4 sm:$0xff]   ;;  %v7843_v2 = vld [vmem:[%s10727_s3 + $0x104] ss:$8 sps:$4 sm:$0xff]  }
  0xe4   :  { %1779 = vmatprep.subr.bf16.mxu0 %v7753_v3  ;;  %1943 = vmatprep.subr.bf16.mxu1 %v7756_v4  ;;  %v2454_v3 = vld [vmem:[%s10728_s5] sm:$0xff] }
  0xe5   :  { %v2470_v4 = vld [vmem:[%s10728_s5 + $0x80] sm:$0xff] }
  0xe7   :  { %1780 = vmatpush1.bf16.msra.mxu0 %v7751_v5  ;;  %1944 = vmatpush1.bf16.msra.mxu1 %v7754_v6  ;;  %v6860_v5 = vcombine.low %v2454_v3, %v2470_v4  ;;  %v6861_v6 = vcombine.high %v2454_v3, %v2470_v4 }
  0xe8   :  { %1781 = vmatprep.subr.bf16.mxu0 %v7759_v7  ;;  %1945 = vmatprep.subr.bf16.mxu1 %v7762_v8  ;;  %v2486_v7 = vld [vmem:[%s10728_s5 + $0x100] sm:$0xff] }
  0xe9   :  { %v2502_v8 = vld [vmem:[%s10728_s5 + $0x180] sm:$0xff] }
  0xeb   :  { %1782 = vmatpush1.bf16.msra.mxu0 %v7757_v10  ;;  %1946 = vmatpush1.bf16.msra.mxu1 %v7760_v11  ;;  %v6893_v10 = vcombine.high %v2486_v7, %v2502_v8  ;;  %v6892_v11 = vcombine.low %v2486_v7, %v2502_v8 }
  0xec   :  { %1783 = vmatprep.subr.bf16.mxu0 %v7765_v13  ;;  %1947 = vmatprep.subr.bf16.mxu1 %v7768_v14  ;;  %v2518_v13 = vld [vmem:[%s10728_s5 + $0x200] sm:$0xff] }
  0xed   :  { %v2534_v14 = vld [vmem:[%s10728_s5 + $0x280] sm:$0xff] }
  0xef   :  { %1784 = vmatpush1.bf16.msra.mxu0 %v7763_v15  ;;  %1948 = vmatpush1.bf16.msra.mxu1 %v7766_v16  ;;  %v6925_v15 = vcombine.high %v2518_v13, %v2534_v14  ;;  %v6924_v16 = vcombine.low %v2518_v13, %v2534_v14 }
  0xf0   :  { %1785 = vmatprep.subr.bf16.mxu0 %v7771_v18  ;;  %1949 = vmatprep.subr.bf16.mxu1 %v7774_v19  ;;  %v2550_v18 = vld [vmem:[%s10728_s5 + $0x300] sm:$0xff] }
  0xf1   :  { %v2566_v19 = vld [vmem:[%s10728_s5 + $0x380] sm:$0xff] }
  0xf3   :  { %1786 = vmatpush1.bf16.msra.mxu0 %v7769_v20  ;;  %1950 = vmatpush1.bf16.msra.mxu1 %v7772_v21  ;;  %v6957_v20 = vcombine.high %v2550_v18, %v2566_v19  ;;  %v6956_v21 = vcombine.low %v2550_v18, %v2566_v19 }
  0xf4   :  { %1787 = vmatprep.subr.bf16.mxu0 %v7777_v22  ;;  %1951 = vmatprep.subr.bf16.mxu1 %v7780_v23  ;;  %v2582_v22 = vld [vmem:[%s10728_s5 + $0x400] sm:$0xff] }
  0xf5   :  { %v2598_v23 = vld [vmem:[%s10728_s5 + $0x480] sm:$0xff] }
  0xf7   :  { %1788 = vmatpush1.bf16.msra.mxu0 %v7775_v24  ;;  %1952 = vmatpush1.bf16.msra.mxu1 %v7778_v12  ;;  %v6989_v24 = vcombine.high %v2582_v22, %v2598_v23  ;;  %v6988_v12 = vcombine.low %v2582_v22, %v2598_v23  ;;  %v7841_v22 = vld [vmem:[%s10727_s3 + $0x100] ss:$8 sps:$4 sm:$0xff]  }
  0xf8   :  { %1789 = vmatprep.subr.bf16.mxu0 %v7783_v26  ;;  %1953 = vmatprep.subr.bf16.mxu1 %v7786_v9  ;;  %v2614_v26 = vld [vmem:[%s10728_s5 + $0x500] sm:$0xff] }
  0xf9   :  { %v2630_v9 = vld [vmem:[%s10728_s5 + $0x580] sm:$0xff] }
  0xfb   :  { %1790 = vmatpush1.bf16.msra.mxu0 %v7781_v27  ;;  %1954 = vmatpush1.bf16.msra.mxu1 %v7784_v28  ;;  %v7021_v27 = vcombine.high %v2614_v26, %v2630_v9  ;;  %v7020_v28 = vcombine.low %v2614_v26, %v2630_v9  ;;  %v7844_v26 = vld [vmem:[%s10727_s3 + $0x110] ss:$8 sps:$4 sm:$0xff]   ;;  %v7849_v9 = vld [vmem:[%s10727_s3 + $0x124] ss:$8 sps:$4 sm:$0xff]  }
  0xfc   :  { %1791 = vmatprep.subr.bf16.mxu0 %v7789_v29  ;;  %1955 = vmatprep.subr.bf16.mxu1 %v7792_v30  ;;  %v2646_v29 = vld [vmem:[%s10728_s5 + $0x600] sm:$0xff] }
  0xfd   :  { %v2662_v30 = vld [vmem:[%s10728_s5 + $0x680] sm:$0xff] }
  0xff   :  { %1792 = vmatpush1.bf16.msra.mxu0 %v7787_v31  ;;  %1956 = vmatpush1.bf16.msra.mxu1 %v7790_v32  ;;  %v7053_v31 = vcombine.high %v2646_v29, %v2662_v30  ;;  %v7052_v32 = vcombine.low %v2646_v29, %v2662_v30  ;;  %v7850_v29 = vld [vmem:[%s10727_s3 + $0x130] ss:$8 sps:$4 sm:$0xff]   ;;  %v7855_v30 = vld [vmem:[%s10727_s3 + $0x144] ss:$8 sps:$4 sm:$0xff]  }
 0x100   :  { %2370 = vmatprep.subr.bf16.mxu0 %v7795_v33  ;;  %5696 = vmatprep.subr.bf16.mxu1 %v6861_v6  ;;  %v2678_v33 = vld [vmem:[%s10728_s5 + $0x700] sm:$0xff] }
 0x102   :  { %1794 = vmatmul.mubr.bf16.vlgmr.msra.gmra.mrb[0].mxu0 %v334_v34  ;;  %1958 = vmatmul.mubr.bf16.vlgmr.msra.gmra.mrb[0].mxu1 %v334_v34  ;;  %v2694_v34 = vld [vmem:[%s10728_s5 + $0x780] sm:$0xff] }
 0x103   :  { %2371 = vmatpush1.bf16.msra.mxu0 %v7793_v35  ;;  %5697 = vmatpush1.bf16.msra.mxu1 %v6860_v5  ;;  %v7085_v35 = vcombine.high %v2678_v33, %v2694_v34 }
 0x104   :  { %2372 = vmatprep.subr.bf16.mxu0 %v7798_v17  ;;  %5698 = vmatprep.subr.bf16.mxu1 %v6893_v10  ;;  %v7084_v17 = vcombine.low %v2678_v33, %v2694_v34  ;;  %v7856_v33 = vld [vmem:[%s10727_s3 + $0x150] ss:$8 sps:$4 sm:$0xff]   ;;  %v7861_v34 = vld [vmem:[%s10727_s3 + $0x164] ss:$8 sps:$4 sm:$0xff]  }
 0x107   :  { %2373 = vmatpush1.bf16.msra.mxu0 %v7796_v36  ;;  %5699 = vmatpush1.bf16.msra.mxu1 %v6892_v11  ;;  %v2710_v36 = vld [vmem:[%s10728_s5 + $0x800] sm:$0xff] }
 0x108   :  { %2374 = vmatprep.subr.bf16.mxu0 %v7801_v25  ;;  %5700 = vmatprep.subr.bf16.mxu1 %v6925_v15  ;;  %v2726_v25 = vld [vmem:[%s10728_s5 + $0x880] sm:$0xff] }
 0x10b   :  { %2375 = vmatpush1.bf16.msra.mxu0 %v7799_v37  ;;  %5701 = vmatpush1.bf16.msra.mxu1 %v6924_v16  ;;  %v7117_v37 = vcombine.high %v2710_v36, %v2726_v25 }
 0x10c   :  { %2376 = vmatprep.subr.bf16.mxu0 %v7804_v38  ;;  %5702 = vmatprep.subr.bf16.mxu1 %v6957_v20  ;;  %v7116_v38 = vcombine.low %v2710_v36, %v2726_v25  ;;  %v7862_v36 = vld [vmem:[%s10727_s3 + $0x170] ss:$8 sps:$4 sm:$0xff]   ;;  %v7867_v25 = vld [vmem:[%s10727_s3 + $0x184] ss:$8 sps:$4 sm:$0xff]  }
 0x10f   :  { %2377 = vmatpush1.bf16.msra.mxu0 %v7802_v39  ;;  %5703 = vmatpush1.bf16.msra.mxu1 %v6956_v21  ;;  %v2742_v39 = vld [vmem:[%s10728_s5 + $0x900] sm:$0xff] }
 0x110   :  { %2378 = vmatprep.subr.bf16.mxu0 %v7807_v40  ;;  %5704 = vmatprep.subr.bf16.mxu1 %v6989_v24  ;;  %v2758_v40 = vld [vmem:[%s10728_s5 + $0x980] sm:$0xff]  ;;  %v7846_v24 = vld [vmem:[%s10727_s3 + $0x114] ss:$8 sps:$4 sm:$0xff]  }
 0x113   :  { %2379 = vmatpush1.bf16.msra.mxu0 %v7805_v41  ;;  %5705 = vmatpush1.bf16.msra.mxu1 %v6988_v12  ;;  %v7149_v41 = vcombine.high %v2742_v39, %v2758_v40 }
 0x114   :  { %2380 = vmatprep.subr.bf16.mxu0 %v7810_v42  ;;  %5706 = vmatprep.subr.bf16.mxu1 %v7021_v27  ;;  %v7148_v42 = vcombine.low %v2742_v39, %v2758_v40  ;;  %v7847_v27 = vld [vmem:[%s10727_s3 + $0x120] ss:$8 sps:$4 sm:$0xff]   ;;  %v7868_v39 = vld [vmem:[%s10727_s3 + $0x190] ss:$8 sps:$4 sm:$0xff]   ;;  %v7873_v40 = vld [vmem:[%s10727_s3 + $0x1a4] ss:$8 sps:$4 sm:$0xff]  }
 0x117   :  { %2381 = vmatpush1.bf16.msra.mxu0 %v7808_v44  ;;  %5707 = vmatpush1.bf16.msra.mxu1 %v7020_v28  ;;  %v2774_v44 = vld [vmem:[%s10728_s5 + $0xa00] sm:$0xff]  ;;  %v7852_v28 = vld [vmem:[%s10727_s3 + $0x134] ss:$8 sps:$4 sm:$0xff]  }
 0x118   :  { %2382 = vmatprep.subr.bf16.mxu0 %v7813_v45  ;;  %5708 = vmatprep.subr.bf16.mxu1 %v7053_v31  ;;  %v2790_v45 = vld [vmem:[%s10728_s5 + $0xa80] sm:$0xff] }
 0x119   :  { %v7853_v31 = vld [vmem:[%s10727_s3 + $0x140] ss:$8 sps:$4 sm:$0xff]  }
 0x11b   :  { %2383 = vmatpush1.bf16.msra.mxu0 %v7811_v46  ;;  %5709 = vmatpush1.bf16.msra.mxu1 %v7052_v32  ;;  %v7181_v46 = vcombine.high %v2774_v44, %v2790_v45  ;;  %v7858_v32 = vld [vmem:[%s10727_s3 + $0x154] ss:$8 sps:$4 sm:$0xff]  }
 0x11c   :  { %2384 = vmatprep.subr.bf16.mxu0 %v7816_v47  ;;  %5710 = vmatprep.subr.bf16.mxu1 %v7085_v35  ;;  %v7180_v47 = vcombine.low %v2774_v44, %v2790_v45  ;;  %v7859_v35 = vld [vmem:[%s10727_s3 + $0x160] ss:$8 sps:$4 sm:$0xff]   ;;  %v7874_v44 = vld [vmem:[%s10727_s3 + $0x1b0] ss:$8 sps:$4 sm:$0xff]   ;;  %v7879_v45 = vld [vmem:[%s10727_s3 + $0x1c4] ss:$8 sps:$4 sm:$0xff]  }
 0x11f   :  { %2385 = vmatpush1.bf16.msra.mxu0 %v7814_v48  ;;  %5711 = vmatpush1.bf16.msra.mxu1 %v7084_v17  ;;  %v2806_v48 = vld [vmem:[%s10728_s5 + $0xb00] sm:$0xff]  ;;  %v7864_v17 = vld [vmem:[%s10727_s3 + $0x174] ss:$8 sps:$4 sm:$0xff]  }
 0x120   :  { %2386 = vmatprep.subr.bf16.mxu0 %v7819_v50  ;;  %5712 = vmatprep.subr.bf16.mxu1 %v7117_v37  ;;  %v2822_v50 = vld [vmem:[%s10728_s5 + $0xb80] sm:$0xff] }
 0x121   :  { %v7865_v37 = vld [vmem:[%s10727_s3 + $0x180] ss:$8 sps:$4 sm:$0xff]  }
 0x123   :  { %2387 = vmatpush1.bf16.msra.mxu0 %v7817_v51  ;;  %5713 = vmatpush1.bf16.msra.mxu1 %v7116_v38  ;;  %v7213_v51 = vcombine.high %v2806_v48, %v2822_v50  ;;  %v7870_v38 = vld [vmem:[%s10727_s3 + $0x194] ss:$8 sps:$4 sm:$0xff]  }
 0x124   :  { %2388 = vmatprep.subr.bf16.mxu0 %v7822_v52  ;;  %5714 = vmatprep.subr.bf16.mxu1 %v7149_v41  ;;  %v7212_v52 = vcombine.low %v2806_v48, %v2822_v50  ;;  %v7871_v41 = vld [vmem:[%s10727_s3 + $0x1a0] ss:$8 sps:$4 sm:$0xff]   ;;  %v7882_v48 = vld [vmem:[%s10727_s3 + $0x1d4] ss:$8 sps:$4 sm:$0xff]   ;;  %v7880_v50 = vld [vmem:[%s10727_s3 + $0x1d0] ss:$8 sps:$4 sm:$0xff]  }
 0x127   :  { %2389 = vmatpush1.bf16.msra.mxu0 %v7820_v53  ;;  %5715 = vmatpush1.bf16.msra.mxu1 %v7148_v42  ;;  %v2838_v53 = vld [vmem:[%s10728_s5 + $0xc00] sm:$0xff]  ;;  %v7876_v42 = vld [vmem:[%s10727_s3 + $0x1b4] ss:$8 sps:$4 sm:$0xff]  }
 0x128   :  { %2390 = vmatprep.subr.bf16.mxu0 %v7825_v54  ;;  %5716 = vmatprep.subr.bf16.mxu1 %v7181_v46  ;;  %v2854_v54 = vld [vmem:[%s10728_s5 + $0xc80] sm:$0xff] }
 0x129   :  { %v7877_v46 = vld [vmem:[%s10727_s3 + $0x1c0] ss:$8 sps:$4 sm:$0xff]  }
 0x12b   :  { %2391 = vmatpush1.bf16.msra.mxu0 %v7823_v55  ;;  %5717 = vmatpush1.bf16.msra.mxu1 %v7180_v47  ;;  %v7245_v55 = vcombine.high %v2838_v53, %v2854_v54  ;;  %v9018_v47 = vsub.s32 2, %v8048_v43 }
 0x12c   :  { %2392 = vmatprep.subr.bf16.mxu0 %v7828_v56  ;;  %5718 = vmatprep.subr.bf16.mxu1 %v7213_v51  ;;  %v8915_v56 = vsub.s32 0, %v8048_v43 }
 0x12f   :  { %2393 = vmatpush1.bf16.msra.mxu0 %v7826_v57  ;;  %v8920_v57 = vld [vmem:[%s10729_s2] sm:$0xf]  ;;  %5719 = vmatpush1.bf16.msra.mxu1 %v7212_v52  ;;  %v7885_v52 = vld [vmem:[%s10727_s3 + $0x1e4] ss:$8 sps:$4 sm:$0xff]  }
 0x130   :  { %2394 = vmatprep.subr.bf16.mxu0 %v7831_v58  ;;  %v8923_v58 = vsub.s32 1, %v8048_v43  ;;  %5720 = vmatprep.subr.bf16.mxu1 %v7245_v55  ;;  %v349_v51 = vrot.slane %v8920_v57, %v9018_v47  ;;  %v7888_v55 = vld [vmem:[%s10727_s3 + $0x1f4] ss:$8 sps:$4 sm:$0xff]  }
 0x133   :  { %2395 = vmatpush1.bf16.msra.mxu0 %v7829_v59  ;;  %v8926_v59 = vsub.s32 3, %v8048_v43 }
 0x134   :  { %2396 = vmatprep.subr.bf16.mxu0 %v7834_v60  ;;  %v7244_v60 = vcombine.low %v2838_v53, %v2854_v54  ;;  %v7883_v53 = vld [vmem:[%s10727_s3 + $0x1e0] ss:$8 sps:$4 sm:$0xff]  }
 0x136   :  { %5721 = vmatpush1.bf16.msra.mxu1 %v7244_v60  ;;  %v2472_v60 = vld [vmem:[%s10728_s5 + $0x90] sm:$0xff] }
 0x137   :  { %2397 = vmatpush1.bf16.msra.mxu0 %v7832_v61  ;;  %v2870_v61 = vld [vmem:[%s10728_s5 + $0xd00] sm:$0xff] }
 0x138   :  { %2398 = vmatprep.subr.bf16.mxu0 %v7837_v62  ;;  %v2886_v62 = vld [vmem:[%s10728_s5 + $0xd80] sm:$0xff] }
 0x139   :  { %v7276_v3 = vcombine.low %v2870_v61, %v2886_v62 }
 0x13b   :  { %2399 = vmatpush1.bf16.msra.mxu0 %v7835_v63  ;;  %v7277_v63 = vcombine.high %v2870_v61, %v2886_v62  ;;  %v7886_v61 = vld [vmem:[%s10727_s3 + $0x1f0] ss:$8 sps:$4 sm:$0xff]  }
 0x13c   :  { %2400 = vmatprep.subr.bf16.mxu0 %v7840_v0  ;;  %v341_v0 = vrot.slane %v8920_v57, %v8915_v56 }
 0x13d   :  { %5722 = vmatprep.subr.bf16.mxu1 %v7277_v63 }
 0x13e   :  { %5723 = vmatpush1.bf16.msra.mxu1 %v7276_v3 }
 0x13f   :  { %2401 = vmatpush1.bf16.msra.mxu0 %v7838_v1  ;;  %v345_v1 = vrot.slane %v8920_v57, %v8923_v58 }
 0x140   :  { %2411 = vmatprep.subr.bf16.mxu0 %v7843_v2  ;;  %v353_v2 = vrot.slane %v8920_v57, %v8926_v59  ;;  %v2456_v57 = vld [vmem:[%s10728_s5 + $0x10] sm:$0xff] }
 0x141   :  { %v6865_v63 = vcombine.high %v2456_v57, %v2472_v60 }
 0x1d5   :  { %v1795_v4 = vpop.f32.mrb[0].mxu0  ;;  %v8940_v5 = vpop.f32.mrb[0].mxu1 }
 0x1d6   :  { %v7372_v6 = vadd.f32 %v1795_v4, %v341_v0  ;;  %v1797_v7 = vpop.f32.mrb[1].mxu0  ;;  %v1961_v8 = vpop.f32.mrb[1].mxu1  ;;  %v7374_v54 = vadd.f32 %v8940_v5, %v349_v51  ;;  %v2488_v0 = vld [vmem:[%s10728_s5 + $0x110] sm:$0xff] }
 0x1d7   :  { %v7373_v10 = vadd.f32 %v1797_v7, %v345_v1  ;;  %v7375_v11 = vadd.f32 %v1961_v8, %v353_v2  ;;  %v1799_v13 = vpop.f32.mrb[2].mxu0  ;;  %v1963_v14 = vpop.f32.mrb[2].mxu1  ;;  %v2504_v1 = vld [vmem:[%s10728_s5 + $0x190] sm:$0xff]  ;;  %v6864_v2 = vcombine.low %v2456_v57, %v2472_v60  ;;  %v2902_v60 = vld [vmem:[%s10728_s5 + $0xe00] sm:$0xff] }
 0x1d8   :  { %v1966_v15 = vmax.f32 %v7372_v6, 0.0  ;;  %v1800_v16 = vpop.f32.mrb[3].mxu0  ;;  %v1964_v18 = vpop.f32.mrb[3].mxu1  ;;  %v1968_v62 = vmax.f32 %v7374_v54, 0.0  ;;  %v6897_v4 = vcombine.high %v2488_v0, %v2504_v1  ;;  %v2520_v5 = vld [vmem:[%s10728_s5 + $0x210] sm:$0xff]  ;;  %v6896_v7 = vcombine.low %v2488_v0, %v2504_v1 }
 0x1d9   :  { %v1967_v19 = vmax.f32 %v7373_v10, 0.0  ;;  %v1969_v20 = vmax.f32 %v7375_v11, 0.0  ;;  %v2536_v6 = vld [vmem:[%s10728_s5 + $0x290] sm:$0xff] }
 0x1da   :  { %v2034_v23 = vpack.c.bf16 %v1966_v15, %v1966_v15  ;;  %v2036_v3 = vpack.c.bf16 %v1968_v62, %v1968_v62  ;;  %v6929_v8 = vcombine.high %v2520_v5, %v2536_v6  ;;  %v2552_v10 = vld [vmem:[%s10728_s5 + $0x310] sm:$0xff]  ;;  %v6928_v13 = vcombine.low %v2520_v5, %v2536_v6  ;;  %v2950_v5 = vld [vmem:[%s10728_s5 + $0xf80] sm:$0xff] }
 0x1db   :  { %v2035_v21 = vpack.c.bf16 %v1967_v19, %v1967_v19  ;;  %v2037_v12 = vpack.c.bf16 %v1969_v20, %v1969_v20  ;;  %v2568_v11 = vld [vmem:[%s10728_s5 + $0x390] sm:$0xff] }
 0x1dc   :  { %v6961_v14 = vcombine.high %v2552_v10, %v2568_v11  ;;  %v2584_v15 = vld [vmem:[%s10728_s5 + $0x410] sm:$0xff]  ;;  %v6960_v18 = vcombine.low %v2552_v10, %v2568_v11 }
 0x1dd   :  { %2402 = vmatprep.mubr.bf16.mxu0 %v2035_v21  ;;  %v2600_v16 = vld [vmem:[%s10728_s5 + $0x490] sm:$0xff] }
 0x1de   :  { %2403 = vmatmul.mubr.bf16.vlgmr.msra.gmra.mrb[4].mxu0 %v2034_v23  ;;  %v6993_v19 = vcombine.high %v2584_v15, %v2600_v16  ;;  %v2616_v20 = vld [vmem:[%s10728_s5 + $0x510] sm:$0xff] }
 0x1df   :  { %2412 = vmatpush1.bf16.msra.mxu0 %v7841_v22  ;;  %2443 = vmatprep.mubr.bf16.mxu0 %v2037_v12  ;;  %v2632_v21 = vld [vmem:[%s10728_s5 + $0x590] sm:$0xff]  ;;  %v6992_v22 = vcombine.low %v2584_v15, %v2600_v16  ;;  %v2471_v15 = vld [vmem:[%s10728_s5 + $0x88] sm:$0xff]  ;;  %v2458_v16 = vld [vmem:[%s10728_s5 + $0x20] sm:$0xff] }
 0x1e0   :  { %2413 = vmatprep.subr.bf16.mxu0 %v7846_v24  ;;  %v7025_v23 = vcombine.high %v2616_v20, %v2632_v21  ;;  %v2648_v24 = vld [vmem:[%s10728_s5 + $0x610] sm:$0xff] }
 0x1e1   :  { %v2664_v12 = vld [vmem:[%s10728_s5 + $0x690] sm:$0xff] }
 0x1e2   :  { %v2904_v62 = vld [vmem:[%s10728_s5 + $0xe10] sm:$0xff] }
 0x1e3   :  { %2414 = vmatpush1.bf16.msra.mxu0 %v7844_v26  ;;  %v7024_v26 = vcombine.low %v2616_v20, %v2632_v21  ;;  %v2920_v0 = vld [vmem:[%s10728_s5 + $0xe90] sm:$0xff] }
 0x1e4   :  { %2415 = vmatprep.subr.bf16.mxu0 %v7849_v9  ;;  %v7057_v9 = vcombine.high %v2648_v24, %v2664_v12  ;;  %v2936_v6 = vld [vmem:[%s10728_s5 + $0xf10] sm:$0xff] }
 0x1e7   :  { %2416 = vmatpush1.bf16.msra.mxu0 %v7847_v27  ;;  %v2680_v27 = vld [vmem:[%s10728_s5 + $0x710] sm:$0xff] }
 0x1e8   :  { %2417 = vmatprep.subr.bf16.mxu0 %v7852_v28  ;;  %v2696_v28 = vld [vmem:[%s10728_s5 + $0x790] sm:$0xff] }
 0x1eb   :  { %2418 = vmatpush1.bf16.msra.mxu0 %v7850_v29  ;;  %v7056_v29 = vcombine.low %v2648_v24, %v2664_v12 }
 0x1ec   :  { %2419 = vmatprep.subr.bf16.mxu0 %v7855_v30  ;;  %v7089_v30 = vcombine.high %v2680_v27, %v2696_v28 }
 0x1ef   :  { %2420 = vmatpush1.bf16.msra.mxu0 %v7853_v31  ;;  %v2712_v31 = vld [vmem:[%s10728_s5 + $0x810] sm:$0xff] }
 0x1f0   :  { %2421 = vmatprep.subr.bf16.mxu0 %v7858_v32  ;;  %v2728_v32 = vld [vmem:[%s10728_s5 + $0x890] sm:$0xff] }
 0x1f3   :  { %2422 = vmatpush1.bf16.msra.mxu0 %v7856_v33  ;;  %v7088_v33 = vcombine.low %v2680_v27, %v2696_v28 }
 0x1f4   :  { %2423 = vmatprep.subr.bf16.mxu0 %v7861_v34  ;;  %v7121_v34 = vcombine.high %v2712_v31, %v2728_v32 }
 0x1f7   :  { %2424 = vmatpush1.bf16.msra.mxu0 %v7859_v35  ;;  %v2744_v35 = vld [vmem:[%s10728_s5 + $0x910] sm:$0xff] }
 0x1f8   :  { %2425 = vmatprep.subr.bf16.mxu0 %v7864_v17  ;;  %v2760_v17 = vld [vmem:[%s10728_s5 + $0x990] sm:$0xff] }
 0x1fb   :  { %2426 = vmatpush1.bf16.msra.mxu0 %v7862_v36  ;;  %v7120_v36 = vcombine.low %v2712_v31, %v2728_v32 }
 0x1fc   :  { %2427 = vmatprep.subr.bf16.mxu0 %v7867_v25  ;;  %v7153_v25 = vcombine.high %v2744_v35, %v2760_v17 }
 0x1ff   :  { %2428 = vmatpush1.bf16.msra.mxu0 %v7865_v37  ;;  %v2776_v37 = vld [vmem:[%s10728_s5 + $0xa10] sm:$0xff] }
 0x200   :  { %2429 = vmatprep.subr.bf16.mxu0 %v7870_v38  ;;  %v2792_v38 = vld [vmem:[%s10728_s5 + $0xa90] sm:$0xff] }
 0x203   :  { %2430 = vmatpush1.bf16.msra.mxu0 %v7868_v39  ;;  %v7152_v39 = vcombine.low %v2744_v35, %v2760_v17  ;;  %v2490_v35 = vld [vmem:[%s10728_s5 + $0x120] sm:$0xff] }
 0x204   :  { %2431 = vmatprep.subr.bf16.mxu0 %v7873_v40  ;;  %v7185_v40 = vcombine.high %v2776_v37, %v2792_v38  ;;  %v2506_v17 = vld [vmem:[%s10728_s5 + $0x1a0] sm:$0xff] }
 0x207   :  { %2432 = vmatpush1.bf16.msra.mxu0 %v7871_v41  ;;  %v2808_v41 = vld [vmem:[%s10728_s5 + $0xb10] sm:$0xff] }
 0x208   :  { %2433 = vmatprep.subr.bf16.mxu0 %v7876_v42  ;;  %v2824_v42 = vld [vmem:[%s10728_s5 + $0xb90] sm:$0xff] }
 0x20b   :  { %2434 = vmatpush1.bf16.msra.mxu0 %v7874_v44  ;;  %v7184_v44 = vcombine.low %v2776_v37, %v2792_v38  ;;  %v2519_v37 = vld [vmem:[%s10728_s5 + $0x208] sm:$0xff] }
 0x20c   :  { %2435 = vmatprep.subr.bf16.mxu0 %v7879_v45  ;;  %v7217_v45 = vcombine.high %v2808_v41, %v2824_v42 }
 0x20f   :  { %2436 = vmatpush1.bf16.msra.mxu0 %v7877_v46  ;;  %v2840_v46 = vld [vmem:[%s10728_s5 + $0xc10] sm:$0xff] }
 0x210   :  { %2437 = vmatprep.subr.bf16.mxu0 %v7882_v48  ;;  %v2856_v48 = vld [vmem:[%s10728_s5 + $0xc90] sm:$0xff] }
 0x211   :  { %v7249_v51 = vcombine.high %v2840_v46, %v2856_v48  ;;  %v7248_v54 = vcombine.low %v2840_v46, %v2856_v48 }
 0x213   :  { %2438 = vmatpush1.bf16.msra.mxu0 %v7880_v50  ;;  %v7216_v50 = vcombine.low %v2808_v41, %v2824_v42  ;;  %v2522_v41 = vld [vmem:[%s10728_s5 + $0x220] sm:$0xff] }
 0x214   :  { %2439 = vmatprep.subr.bf16.mxu0 %v7885_v52  ;;  %v2872_v52 = vld [vmem:[%s10728_s5 + $0xd10] sm:$0xff]  ;;  %v2538_v42 = vld [vmem:[%s10728_s5 + $0x2a0] sm:$0xff] }
 0x215   :  { %v6933_v48 = vcombine.high %v2522_v41, %v2538_v42 }
 0x217   :  { %2440 = vmatpush1.bf16.msra.mxu0 %v7883_v53  ;;  %v2888_v53 = vld [vmem:[%s10728_s5 + $0xd90] sm:$0xff] }
 0x218   :  { %2441 = vmatprep.subr.bf16.mxu0 %v7888_v55  ;;  %v7281_v55 = vcombine.high %v2872_v52, %v2888_v53  ;;  %v7280_v57 = vcombine.low %v2872_v52, %v2888_v53  ;;  %v2554_v52 = vld [vmem:[%s10728_s5 + $0x320] sm:$0xff] }
 0x219   :  { %v2570_v53 = vld [vmem:[%s10728_s5 + $0x3a0] sm:$0xff] }
 0x21b   :  { %2442 = vmatpush1.bf16.msra.mxu0 %v7886_v61  ;;  %v2918_v61 = vld [vmem:[%s10728_s5 + $0xe80] sm:$0xff] }
 0x21c   :  { %5778 = vmatprep.subr.bf16.mxu0 %v6865_v63  ;;  %v7309_v63 = vcombine.high %v2902_v60, %v2918_v61  ;;  %v7308_v1 = vcombine.low %v2902_v60, %v2918_v61  ;;  %v6965_v60 = vcombine.high %v2554_v52, %v2570_v53  ;;  %v2583_v61 = vld [vmem:[%s10728_s5 + $0x408] sm:$0xff] }
 0x21e   :  { %2444 = vmatmul.mubr.bf16.vlgmr.msra.gmra.mrb[4].mxu0 %v2036_v3  ;;  %v7313_v3 = vcombine.high %v2904_v62, %v2920_v0  ;;  %5724 = vmatprep.subr.bf16.mxu1 %v7309_v63  ;;  %v2586_v63 = vld [vmem:[%s10728_s5 + $0x420] sm:$0xff] }
 0x21f   :  { %5779 = vmatpush1.bf16.msra.mxu0 %v6864_v2  ;;  %v7312_v2 = vcombine.low %v2904_v62, %v2920_v0  ;;  %5725 = vmatpush1.bf16.msra.mxu1 %v7308_v1  ;;  %v2599_v62 = vld [vmem:[%s10728_s5 + $0x488] sm:$0xff]  ;;  %v2602_v0 = vld [vmem:[%s10728_s5 + $0x4a0] sm:$0xff] }
 0x220   :  { %5780 = vmatprep.subr.bf16.mxu0 %v6897_v4  ;;  %v2934_v4 = vld [vmem:[%s10728_s5 + $0xf00] sm:$0xff] }
 0x221   :  { %v7340_v10 = vcombine.low %v2934_v4, %v2950_v5 }
 0x223   :  { %5781 = vmatpush1.bf16.msra.mxu0 %v6896_v7  ;;  %v7341_v7 = vcombine.high %v2934_v4, %v2950_v5  ;;  %v6997_v4 = vcombine.high %v2586_v63, %v2602_v0  ;;  %v2615_v5 = vld [vmem:[%s10728_s5 + $0x508] sm:$0xff] }
 0x224   :  { %5782 = vmatprep.subr.bf16.mxu0 %v6929_v8  ;;  %v2952_v8 = vld [vmem:[%s10728_s5 + $0xf90] sm:$0xff] }
 0x225   :  { %v7344_v11 = vcombine.low %v2936_v6, %v2952_v8  ;;  %5726 = vmatprep.subr.bf16.mxu1 %v7341_v7  ;;  %v2618_v7 = vld [vmem:[%s10728_s5 + $0x520] sm:$0xff] }
 0x226   :  { %5727 = vmatpush1.bf16.msra.mxu1 %v7340_v10  ;;  %v6990_v10 = vcombine.low %v2583_v61, %v2599_v62 }
 0x227   :  { %5783 = vmatpush1.bf16.msra.mxu0 %v6928_v13  ;;  %v7345_v13 = vcombine.high %v2936_v6, %v2952_v8  ;;  %v2631_v6 = vld [vmem:[%s10728_s5 + $0x588] sm:$0xff]  ;;  %v2634_v8 = vld [vmem:[%s10728_s5 + $0x5a0] sm:$0xff] }
 0x228   :  { %5784 = vmatprep.subr.bf16.mxu0 %v6961_v14  ;;  %v2455_v14 = vld [vmem:[%s10728_s5 + $0x8] sm:$0xff] }
 0x229   :  { %v6862_v20 = vcombine.low %v2455_v14, %v2471_v15 }
 0x22b   :  { %5785 = vmatpush1.bf16.msra.mxu0 %v6960_v18  ;;  %v6863_v18 = vcombine.high %v2455_v14, %v2471_v15  ;;  %v7029_v14 = vcombine.high %v2618_v7, %v2634_v8  ;;  %v2647_v15 = vld [vmem:[%s10728_s5 + $0x608] sm:$0xff] }
 0x22c   :  { %5786 = vmatprep.subr.bf16.mxu0 %v6993_v19  ;;  %v2474_v19 = vld [vmem:[%s10728_s5 + $0xa0] sm:$0xff] }
 0x22d   :  { %v6868_v21 = vcombine.low %v2458_v16, %v2474_v19  ;;  %5737 = vmatprep.subr.bf16.mxu1 %v6863_v18  ;;  %v2650_v18 = vld [vmem:[%s10728_s5 + $0x620] sm:$0xff] }
 0x22f   :  { %5787 = vmatpush1.bf16.msra.mxu0 %v6992_v22  ;;  %v6869_v22 = vcombine.high %v2458_v16, %v2474_v19  ;;  %v2663_v16 = vld [vmem:[%s10728_s5 + $0x688] sm:$0xff]  ;;  %v2666_v19 = vld [vmem:[%s10728_s5 + $0x6a0] sm:$0xff] }
 0x230   :  { %5788 = vmatprep.subr.bf16.mxu0 %v7025_v23  ;;  %v2038_v23 = vld [vmem:[%s10730_s4] sm:$0x3] }
 0x231   :  { %v2043_v24 = vrot.slane %v2038_v23, %v8915_v56  ;;  %v2047_v12 = vrot.slane %v2038_v23, %v8923_v58  ;;  %v7061_v23 = vcombine.high %v2650_v18, %v2666_v19 }
 0x233   :  { %5789 = vmatpush1.bf16.msra.mxu0 %v7024_v26 }
 0x234   :  { %5790 = vmatprep.subr.bf16.mxu0 %v7057_v9 }
 0x237   :  { %5791 = vmatpush1.bf16.msra.mxu0 %v7056_v29 }
 0x238   :  { %5792 = vmatprep.subr.bf16.mxu0 %v7089_v30 }
 0x23b   :  { %5793 = vmatpush1.bf16.msra.mxu0 %v7088_v33  ;;  %v2487_v33 = vld [vmem:[%s10728_s5 + $0x108] sm:$0xff] }
 0x23c   :  { %5794 = vmatprep.subr.bf16.mxu0 %v7121_v34  ;;  %v2503_v34 = vld [vmem:[%s10728_s5 + $0x188] sm:$0xff] }
 0x23d   :  { %v6895_v38 = vcombine.high %v2487_v33, %v2503_v34 }
 0x23f   :  { %5795 = vmatpush1.bf16.msra.mxu0 %v7120_v36 }
 0x240   :  { %5796 = vmatprep.subr.bf16.mxu0 %v7153_v25 }
 0x243   :  { %5797 = vmatpush1.bf16.msra.mxu0 %v7152_v39  ;;  %v6901_v39 = vcombine.high %v2490_v35, %v2506_v17 }
 0x244   :  { %5798 = vmatprep.subr.bf16.mxu0 %v7185_v40  ;;  %v2535_v40 = vld [vmem:[%s10728_s5 + $0x288] sm:$0xff] }
 0x245   :  { %v6927_v46 = vcombine.high %v2519_v37, %v2535_v40 }
 0x247   :  { %5799 = vmatpush1.bf16.msra.mxu0 %v7184_v44  ;;  %v6894_v44 = vcombine.low %v2487_v33, %v2503_v34  ;;  %v2714_v33 = vld [vmem:[%s10728_s5 + $0x820] sm:$0xff] }
 0x248   :  { %5800 = vmatprep.subr.bf16.mxu0 %v7217_v45  ;;  %v6900_v45 = vcombine.low %v2490_v35, %v2506_v17  ;;  %v2730_v34 = vld [vmem:[%s10728_s5 + $0x8a0] sm:$0xff] }
 0x24b   :  { %5801 = vmatpush1.bf16.msra.mxu0 %v7216_v50  ;;  %v2551_v50 = vld [vmem:[%s10728_s5 + $0x308] sm:$0xff] }
 0x24c   :  { %5802 = vmatprep.subr.bf16.mxu0 %v7249_v51  ;;  %v2567_v51 = vld [vmem:[%s10728_s5 + $0x388] sm:$0xff] }
 0x24d   :  { %v6958_v1 = vcombine.low %v2551_v50, %v2567_v51 }
 0x24f   :  { %5803 = vmatpush1.bf16.msra.mxu0 %v7248_v54  ;;  %v6926_v54 = vcombine.low %v2519_v37, %v2535_v40  ;;  %v2759_v40 = vld [vmem:[%s10728_s5 + $0x988] sm:$0xff] }
 0x250   :  { %5804 = vmatprep.subr.bf16.mxu0 %v7281_v55  ;;  %v6932_v55 = vcombine.low %v2522_v41, %v2538_v42  ;;  %v2746_v41 = vld [vmem:[%s10728_s5 + $0x920] sm:$0xff] }
 0x251   :  { %v2762_v42 = vld [vmem:[%s10728_s5 + $0x9a0] sm:$0xff] }
 0x253   :  { %5805 = vmatpush1.bf16.msra.mxu0 %v7280_v57  ;;  %v6959_v57 = vcombine.high %v2551_v50, %v2567_v51  ;;  %v2775_v50 = vld [vmem:[%s10728_s5 + $0xa08] sm:$0xff] }
 0x254   :  { %5806 = vmatprep.subr.bf16.mxu0 %v7313_v3  ;;  %v6991_v3 = vcombine.high %v2583_v61, %v2599_v62  ;;  %v2791_v51 = vld [vmem:[%s10728_s5 + $0xa88] sm:$0xff] }
 0x255   :  { %v2807_v61 = vld [vmem:[%s10728_s5 + $0xb08] sm:$0xff] }
 0x256   :  { %v2823_v62 = vld [vmem:[%s10728_s5 + $0xb88] sm:$0xff] }
 0x257   :  { %5807 = vmatpush1.bf16.msra.mxu0 %v7312_v2  ;;  %v6964_v2 = vcombine.low %v2554_v52, %v2570_v53  ;;  %v2778_v52 = vld [vmem:[%s10728_s5 + $0xa20] sm:$0xff] }
 0x258   :  { %5808 = vmatprep.subr.bf16.mxu0 %v7345_v13  ;;  %v7023_v13 = vcombine.high %v2615_v5, %v2631_v6  ;;  %v2794_v53 = vld [vmem:[%s10728_s5 + $0xaa0] sm:$0xff] }
 0x25b   :  { %5809 = vmatpush1.bf16.msra.mxu0 %v7344_v11  ;;  %v6996_v11 = vcombine.low %v2586_v63, %v2602_v0  ;;  %v2810_v63 = vld [vmem:[%s10728_s5 + $0xb20] sm:$0xff] }
 0x25c   :  { %5860 = vmatprep.subr.bf16.mxu0 %v6869_v22  ;;  %v7055_v22 = vcombine.high %v2647_v15, %v2663_v16  ;;  %v2826_v0 = vld [vmem:[%s10728_s5 + $0xba0] sm:$0xff] }
 0x2f1   :  { %v2445_v26 = vpop.f32.mrb[4].mxu0 }
 0x2f2   :  { %v7376_v9 = vadd.f32 %v2445_v26, %v2043_v24  ;;  %v2447_v27 = vpop.f32.mrb[5].mxu0  ;;  %v2679_v24 = vld [vmem:[%s10728_s5 + $0x708] sm:$0xff]  ;;  %v2682_v26 = vld [vmem:[%s10728_s5 + $0x720] sm:$0xff] }
 0x2f3   :  { %v7377_v28 = vadd.f32 %v2447_v27, %v2047_v12  ;;  %v2449_v29 = vpop.f32.mrb[6].mxu0  ;;  %v2695_v12 = vld [vmem:[%s10728_s5 + $0x788] sm:$0xff]  ;;  %v7054_v27 = vcombine.low %v2647_v15, %v2663_v16 }
 0x2f4   :  { %v2452_v30 = vmax.f32 %v7376_v9, 0.0  ;;  %v2450_v31 = vpop.f32.mrb[7].mxu0  ;;  %v2698_v9 = vld [vmem:[%s10728_s5 + $0x7a0] sm:$0xff]  ;;  %v7087_v29 = vcombine.high %v2679_v24, %v2695_v12  ;;  %v7086_v35 = vcombine.low %v2679_v24, %v2695_v12  ;;  %v2871_v15 = vld [vmem:[%s10728_s5 + $0xd08] sm:$0xff] }
 0x2f5   :  { %v2453_v32 = vmax.f32 %v7377_v28, 0.0  ;;  %v7060_v28 = vcombine.low %v2650_v18, %v2666_v19  ;;  %v2711_v31 = vld [vmem:[%s10728_s5 + $0x808] sm:$0xff]  ;;  %v7092_v17 = vcombine.low %v2682_v26, %v2698_v9  ;;  %v2874_v18 = vld [vmem:[%s10728_s5 + $0xd20] sm:$0xff] }
 0x2f6   :  { %v9180_v25 = vpack.c.bf16 %v2452_v30, %v2452_v30  ;;  %v7093_v30 = vcombine.high %v2682_v26, %v2698_v9  ;;  %v2887_v16 = vld [vmem:[%s10728_s5 + $0xd88] sm:$0xff]  ;;  %v2890_v19 = vld [vmem:[%s10728_s5 + $0xda0] sm:$0xff] }
 0x2f7   :  { %v9178_v36 = vpack.c.bf16 %v2453_v32, %v2453_v32  ;;  %v2727_v32 = vld [vmem:[%s10728_s5 + $0x888] sm:$0xff]  ;;  %v2906_v26 = vld [vmem:[%s10728_s5 + $0xe20] sm:$0xff] }
 0x2f8   :  { %v7119_v37 = vcombine.high %v2711_v31, %v2727_v32  ;;  %v2903_v24 = vld [vmem:[%s10728_s5 + $0xe08] sm:$0xff]  ;;  %v2922_v9 = vld [vmem:[%s10728_s5 + $0xea0] sm:$0xff] }
 0x2f9   :  { %5728 = vmatprep.mubr.bf16.mxu1 %v9178_v36  ;;  %5810 = vmatprep.mubr.bf16.mxu0 %v9178_v36  ;;  %v2919_v12 = vld [vmem:[%s10728_s5 + $0xe88] sm:$0xff] }
 0x2fa   :  { %5729 = vmatmul.mubr.bf16.vlgmr.msra.gmra.mrb[4].mxu1 %v9180_v25  ;;  %5811 = vmatmul.mubr.bf16.vlgmr.msra.gmra.mrb[8].mxu0 %v9180_v25 }
 0x2fb   :  { %5738 = vmatpush1.bf16.msra.mxu1 %v6862_v20  ;;  %5861 = vmatpush1.bf16.msra.mxu0 %v6868_v21  ;;  %v7022_v20 = vcombine.low %v2615_v5, %v2631_v6  ;;  %v7028_v21 = vcombine.low %v2618_v7, %v2634_v8  ;;  %v2839_v5 = vld [vmem:[%s10728_s5 + $0xc08] sm:$0xff]  ;;  %v2842_v7 = vld [vmem:[%s10728_s5 + $0xc20] sm:$0xff] }
 0x2fc   :  { %5769 = vmatprep.mubr.bf16.mxu1 %v9178_v36  ;;  %5892 = vmatprep.mubr.bf16.mxu0 %v9178_v36  ;;  %v2855_v6 = vld [vmem:[%s10728_s5 + $0xc88] sm:$0xff]  ;;  %v2858_v8 = vld [vmem:[%s10728_s5 + $0xca0] sm:$0xff] }
 0x2fd   :  { %5739 = vmatprep.subr.bf16.mxu1 %v6895_v38  ;;  %5862 = vmatprep.subr.bf16.mxu0 %v6901_v39  ;;  %v7125_v38 = vcombine.high %v2714_v33, %v2730_v34  ;;  %v2743_v39 = vld [vmem:[%s10728_s5 + $0x908] sm:$0xff] }
 0x2ff   :  { %5740 = vmatpush1.bf16.msra.mxu1 %v6894_v44  ;;  %5863 = vmatpush1.bf16.msra.mxu0 %v6900_v45  ;;  %v7118_v44 = vcombine.low %v2711_v31, %v2727_v32  ;;  %v7124_v45 = vcombine.low %v2714_v33, %v2730_v34  ;;  %v2935_v31 = vld [vmem:[%s10728_s5 + $0xf08] sm:$0xff]  ;;  %v2938_v33 = vld [vmem:[%s10728_s5 + $0xf20] sm:$0xff] }
 0x300   :  { %5741 = vmatprep.subr.bf16.mxu1 %v6927_v46  ;;  %5864 = vmatprep.subr.bf16.mxu0 %v6933_v48  ;;  %v7151_v46 = vcombine.high %v2743_v39, %v2759_v40  ;;  %v7157_v48 = vcombine.high %v2746_v41, %v2762_v42  ;;  %v2951_v32 = vld [vmem:[%s10728_s5 + $0xf88] sm:$0xff]  ;;  %v2954_v34 = vld [vmem:[%s10728_s5 + $0xfa0] sm:$0xff] }
 0x303   :  { %5742 = vmatpush1.bf16.msra.mxu1 %v6926_v54  ;;  %5865 = vmatpush1.bf16.msra.mxu0 %v6932_v55  ;;  %v7150_v54 = vcombine.low %v2743_v39, %v2759_v40  ;;  %v7156_v55 = vcombine.low %v2746_v41, %v2762_v42  ;;  %v2457_v39 = vld [vmem:[%s10728_s5 + $0x18] sm:$0xff]  ;;  %v2460_v41 = vld [vmem:[%s10728_s5 + $0x30] sm:$0xff] }
 0x304   :  { %5743 = vmatprep.subr.bf16.mxu1 %v6959_v57  ;;  %5866 = vmatprep.subr.bf16.mxu0 %v6965_v60  ;;  %v7183_v57 = vcombine.high %v2775_v50, %v2791_v51  ;;  %v7189_v60 = vcombine.high %v2778_v52, %v2794_v53  ;;  %v2473_v40 = vld [vmem:[%s10728_s5 + $0x98] sm:$0xff]  ;;  %v2476_v42 = vld [vmem:[%s10728_s5 + $0xb0] sm:$0xff] }
 0x307   :  { %5744 = vmatpush1.bf16.msra.mxu1 %v6958_v1  ;;  %5867 = vmatpush1.bf16.msra.mxu0 %v6964_v2  ;;  %v7182_v1 = vcombine.low %v2775_v50, %v2791_v51  ;;  %v7188_v2 = vcombine.low %v2778_v52, %v2794_v53  ;;  %v2489_v50 = vld [vmem:[%s10728_s5 + $0x118] sm:$0xff]  ;;  %v2492_v52 = vld [vmem:[%s10728_s5 + $0x130] sm:$0xff] }
 0x308   :  { %5745 = vmatprep.subr.bf16.mxu1 %v6991_v3  ;;  %5868 = vmatprep.subr.bf16.mxu0 %v6997_v4  ;;  %v7215_v3 = vcombine.high %v2807_v61, %v2823_v62  ;;  %v7221_v4 = vcombine.high %v2810_v63, %v2826_v0  ;;  %v2505_v51 = vld [vmem:[%s10728_s5 + $0x198] sm:$0xff]  ;;  %v2508_v53 = vld [vmem:[%s10728_s5 + $0x1b0] sm:$0xff] }
 0x30b   :  { %5746 = vmatpush1.bf16.msra.mxu1 %v6990_v10  ;;  %5869 = vmatpush1.bf16.msra.mxu0 %v6996_v11  ;;  %v7214_v10 = vcombine.low %v2807_v61, %v2823_v62  ;;  %v7220_v11 = vcombine.low %v2810_v63, %v2826_v0  ;;  %v2521_v61 = vld [vmem:[%s10728_s5 + $0x218] sm:$0xff]  ;;  %v2524_v63 = vld [vmem:[%s10728_s5 + $0x230] sm:$0xff] }
 0x30c   :  { %5747 = vmatprep.subr.bf16.mxu1 %v7023_v13  ;;  %5870 = vmatprep.subr.bf16.mxu0 %v7029_v14  ;;  %v7247_v13 = vcombine.high %v2839_v5, %v2855_v6  ;;  %v7253_v14 = vcombine.high %v2842_v7, %v2858_v8  ;;  %v2537_v62 = vld [vmem:[%s10728_s5 + $0x298] sm:$0xff]  ;;  %v2540_v0 = vld [vmem:[%s10728_s5 + $0x2b0] sm:$0xff] }
 0x30f   :  { %5748 = vmatpush1.bf16.msra.mxu1 %v7022_v20  ;;  %5871 = vmatpush1.bf16.msra.mxu0 %v7028_v21  ;;  %v7246_v20 = vcombine.low %v2839_v5, %v2855_v6  ;;  %v7252_v21 = vcombine.low %v2842_v7, %v2858_v8  ;;  %v2553_v5 = vld [vmem:[%s10728_s5 + $0x318] sm:$0xff]  ;;  %v2556_v7 = vld [vmem:[%s10728_s5 + $0x330] sm:$0xff] }
 0x310   :  { %5749 = vmatprep.subr.bf16.mxu1 %v7055_v22  ;;  %5872 = vmatprep.subr.bf16.mxu0 %v7061_v23  ;;  %v7279_v22 = vcombine.high %v2871_v15, %v2887_v16  ;;  %v7285_v23 = vcombine.high %v2874_v18, %v2890_v19  ;;  %v2569_v6 = vld [vmem:[%s10728_s5 + $0x398] sm:$0xff]  ;;  %v2572_v8 = vld [vmem:[%s10728_s5 + $0x3b0] sm:$0xff] }
 0x313   :  { %5750 = vmatpush1.bf16.msra.mxu1 %v7054_v27  ;;  %5873 = vmatpush1.bf16.msra.mxu0 %v7060_v28  ;;  %v7278_v27 = vcombine.low %v2871_v15, %v2887_v16  ;;  %v7284_v28 = vcombine.low %v2874_v18, %v2890_v19  ;;  %v2585_v15 = vld [vmem:[%s10728_s5 + $0x418] sm:$0xff]  ;;  %v2588_v18 = vld [vmem:[%s10728_s5 + $0x430] sm:$0xff] }
 0x314   :  { %5751 = vmatprep.subr.bf16.mxu1 %v7087_v29  ;;  %5874 = vmatprep.subr.bf16.mxu0 %v7093_v30  ;;  %v7311_v29 = vcombine.high %v2903_v24, %v2919_v12  ;;  %v7317_v30 = vcombine.high %v2906_v26, %v2922_v9  ;;  %v2601_v16 = vld [vmem:[%s10728_s5 + $0x498] sm:$0xff]  ;;  %v2604_v19 = vld [vmem:[%s10728_s5 + $0x4b0] sm:$0xff] }
 0x317   :  { %5752 = vmatpush1.bf16.msra.mxu1 %v7086_v35  ;;  %5875 = vmatpush1.bf16.msra.mxu0 %v7092_v17  ;;  %v7310_v35 = vcombine.low %v2903_v24, %v2919_v12  ;;  %v7316_v17 = vcombine.low %v2906_v26, %v2922_v9  ;;  %v2617_v24 = vld [vmem:[%s10728_s5 + $0x518] sm:$0xff]  ;;  %v2620_v26 = vld [vmem:[%s10728_s5 + $0x530] sm:$0xff] }
 0x318   :  { %5753 = vmatprep.subr.bf16.mxu1 %v7119_v37  ;;  %5876 = vmatprep.subr.bf16.mxu0 %v7125_v38  ;;  %v7343_v37 = vcombine.high %v2935_v31, %v2951_v32  ;;  %v7349_v38 = vcombine.high %v2938_v33, %v2954_v34  ;;  %v2633_v12 = vld [vmem:[%s10728_s5 + $0x598] sm:$0xff]  ;;  %v2636_v9 = vld [vmem:[%s10728_s5 + $0x5b0] sm:$0xff] }
 0x31b   :  { %5754 = vmatpush1.bf16.msra.mxu1 %v7118_v44  ;;  %5877 = vmatpush1.bf16.msra.mxu0 %v7124_v45  ;;  %v7342_v44 = vcombine.low %v2935_v31, %v2951_v32  ;;  %v7348_v45 = vcombine.low %v2938_v33, %v2954_v34  ;;  %v2649_v31 = vld [vmem:[%s10728_s5 + $0x618] sm:$0xff]  ;;  %v2652_v33 = vld [vmem:[%s10728_s5 + $0x630] sm:$0xff] }
 0x31c   :  { %5755 = vmatprep.subr.bf16.mxu1 %v7151_v46  ;;  %5878 = vmatprep.subr.bf16.mxu0 %v7157_v48  ;;  %v6867_v46 = vcombine.high %v2457_v39, %v2473_v40  ;;  %v6873_v48 = vcombine.high %v2460_v41, %v2476_v42  ;;  %v2665_v32 = vld [vmem:[%s10728_s5 + $0x698] sm:$0xff]  ;;  %v2668_v34 = vld [vmem:[%s10728_s5 + $0x6b0] sm:$0xff] }
 0x31f   :  { %5756 = vmatpush1.bf16.msra.mxu1 %v7150_v54  ;;  %5879 = vmatpush1.bf16.msra.mxu0 %v7156_v55  ;;  %v6866_v54 = vcombine.low %v2457_v39, %v2473_v40  ;;  %v6872_v55 = vcombine.low %v2460_v41, %v2476_v42  ;;  %v2681_v39 = vld [vmem:[%s10728_s5 + $0x718] sm:$0xff]  ;;  %v2684_v41 = vld [vmem:[%s10728_s5 + $0x730] sm:$0xff] }
 0x320   :  { %5757 = vmatprep.subr.bf16.mxu1 %v7183_v57  ;;  %5880 = vmatprep.subr.bf16.mxu0 %v7189_v60  ;;  %v6899_v57 = vcombine.high %v2489_v50, %v2505_v51  ;;  %v6905_v60 = vcombine.high %v2492_v52, %v2508_v53  ;;  %v2697_v40 = vld [vmem:[%s10728_s5 + $0x798] sm:$0xff]  ;;  %v2700_v42 = vld [vmem:[%s10728_s5 + $0x7b0] sm:$0xff] }
 0x323   :  { %5758 = vmatpush1.bf16.msra.mxu1 %v7182_v1  ;;  %5881 = vmatpush1.bf16.msra.mxu0 %v7188_v2  ;;  %v6898_v1 = vcombine.low %v2489_v50, %v2505_v51  ;;  %v6904_v2 = vcombine.low %v2492_v52, %v2508_v53  ;;  %v2713_v50 = vld [vmem:[%s10728_s5 + $0x818] sm:$0xff]  ;;  %v2716_v52 = vld [vmem:[%s10728_s5 + $0x830] sm:$0xff] }
 0x324   :  { %5759 = vmatprep.subr.bf16.mxu1 %v7215_v3  ;;  %5882 = vmatprep.subr.bf16.mxu0 %v7221_v4  ;;  %v6931_v3 = vcombine.high %v2521_v61, %v2537_v62  ;;  %v6937_v4 = vcombine.high %v2524_v63, %v2540_v0  ;;  %v2729_v51 = vld [vmem:[%s10728_s5 + $0x898] sm:$0xff]  ;;  %v2732_v53 = vld [vmem:[%s10728_s5 + $0x8b0] sm:$0xff] }
 0x327   :  { %5760 = vmatpush1.bf16.msra.mxu1 %v7214_v10  ;;  %5883 = vmatpush1.bf16.msra.mxu0 %v7220_v11  ;;  %v6930_v10 = vcombine.low %v2521_v61, %v2537_v62  ;;  %v6936_v11 = vcombine.low %v2524_v63, %v2540_v0  ;;  %v2745_v61 = vld [vmem:[%s10728_s5 + $0x918] sm:$0xff]  ;;  %v2748_v63 = vld [vmem:[%s10728_s5 + $0x930] sm:$0xff] }
 0x328   :  { %5761 = vmatprep.subr.bf16.mxu1 %v7247_v13  ;;  %5884 = vmatprep.subr.bf16.mxu0 %v7253_v14  ;;  %v6963_v13 = vcombine.high %v2553_v5, %v2569_v6  ;;  %v6969_v14 = vcombine.high %v2556_v7, %v2572_v8  ;;  %v2761_v62 = vld [vmem:[%s10728_s5 + $0x998] sm:$0xff]  ;;  %v2764_v0 = vld [vmem:[%s10728_s5 + $0x9b0] sm:$0xff] }
 0x32b   :  { %5762 = vmatpush1.bf16.msra.mxu1 %v7246_v20  ;;  %5885 = vmatpush1.bf16.msra.mxu0 %v7252_v21  ;;  %v6962_v20 = vcombine.low %v2553_v5, %v2569_v6  ;;  %v6968_v21 = vcombine.low %v2556_v7, %v2572_v8  ;;  %v2777_v5 = vld [vmem:[%s10728_s5 + $0xa18] sm:$0xff]  ;;  %v2780_v7 = vld [vmem:[%s10728_s5 + $0xa30] sm:$0xff] }
 0x32c   :  { %5763 = vmatprep.subr.bf16.mxu1 %v7279_v22  ;;  %5886 = vmatprep.subr.bf16.mxu0 %v7285_v23  ;;  %v6995_v22 = vcombine.high %v2585_v15, %v2601_v16  ;;  %v7001_v23 = vcombine.high %v2588_v18, %v2604_v19  ;;  %v2793_v6 = vld [vmem:[%s10728_s5 + $0xa98] sm:$0xff]  ;;  %v2796_v8 = vld [vmem:[%s10728_s5 + $0xab0] sm:$0xff] }
 0x32f   :  { %5764 = vmatpush1.bf16.msra.mxu1 %v7278_v27  ;;  %5887 = vmatpush1.bf16.msra.mxu0 %v7284_v28  ;;  %v6994_v27 = vcombine.low %v2585_v15, %v2601_v16  ;;  %v7000_v28 = vcombine.low %v2588_v18, %v2604_v19  ;;  %v2809_v15 = vld [vmem:[%s10728_s5 + $0xb18] sm:$0xff]  ;;  %v2812_v18 = vld [vmem:[%s10728_s5 + $0xb30] sm:$0xff] }
 0x330   :  { %5765 = vmatprep.subr.bf16.mxu1 %v7311_v29  ;;  %5888 = vmatprep.subr.bf16.mxu0 %v7317_v30  ;;  %v7027_v29 = vcombine.high %v2617_v24, %v2633_v12  ;;  %v7033_v30 = vcombine.high %v2620_v26, %v2636_v9  ;;  %v2825_v16 = vld [vmem:[%s10728_s5 + $0xb98] sm:$0xff]  ;;  %v2828_v19 = vld [vmem:[%s10728_s5 + $0xbb0] sm:$0xff] }
 0x333   :  { %5766 = vmatpush1.bf16.msra.mxu1 %v7310_v35  ;;  %5889 = vmatpush1.bf16.msra.mxu0 %v7316_v17  ;;  %v7026_v35 = vcombine.low %v2617_v24, %v2633_v12  ;;  %v7032_v17 = vcombine.low %v2620_v26, %v2636_v9  ;;  %v2841_v24 = vld [vmem:[%s10728_s5 + $0xc18] sm:$0xff]  ;;  %v2844_v26 = vld [vmem:[%s10728_s5 + $0xc30] sm:$0xff] }
 0x334   :  { %5767 = vmatprep.subr.bf16.mxu1 %v7343_v37  ;;  %5890 = vmatprep.subr.bf16.mxu0 %v7349_v38  ;;  %v7059_v37 = vcombine.high %v2649_v31, %v2665_v32  ;;  %v7065_v38 = vcombine.high %v2652_v33, %v2668_v34  ;;  %v2857_v12 = vld [vmem:[%s10728_s5 + $0xc98] sm:$0xff]  ;;  %v2860_v9 = vld [vmem:[%s10728_s5 + $0xcb0] sm:$0xff] }
 0x337   :  { %5768 = vmatpush1.bf16.msra.mxu1 %v7342_v44  ;;  %5891 = vmatpush1.bf16.msra.mxu0 %v7348_v45  ;;  %v7058_v44 = vcombine.low %v2649_v31, %v2665_v32  ;;  %v7064_v45 = vcombine.low %v2652_v33, %v2668_v34  ;;  %v2873_v31 = vld [vmem:[%s10728_s5 + $0xd18] sm:$0xff]  ;;  %v2876_v33 = vld [vmem:[%s10728_s5 + $0xd30] sm:$0xff] }
 0x338   :  { %5819 = vmatprep.subr.bf16.mxu1 %v6867_v46  ;;  %5942 = vmatprep.subr.bf16.mxu0 %v6873_v48  ;;  %v7091_v46 = vcombine.high %v2681_v39, %v2697_v40  ;;  %v7097_v48 = vcombine.high %v2684_v41, %v2700_v42  ;;  %v2889_v32 = vld [vmem:[%s10728_s5 + $0xd98] sm:$0xff]  ;;  %v2892_v34 = vld [vmem:[%s10728_s5 + $0xdb0] sm:$0xff] }
 0x33a   :  { %5770 = vmatmul.mubr.bf16.vlgmr.msra.gmra.mrb[8].mxu1 %v9180_v25  ;;  %5893 = vmatmul.mubr.bf16.vlgmr.msra.gmra.mrb[12].mxu0 %v9180_v25 }
 0x33b   :  { %5820 = vmatpush1.bf16.msra.mxu1 %v6866_v54  ;;  %5851 = vmatprep.mubr.bf16.mxu1 %v9178_v36  ;;  %v7090_v54 = vcombine.low %v2681_v39, %v2697_v40  ;;  %v2905_v39 = vld [vmem:[%s10728_s5 + $0xe18] sm:$0xff] }
 0x33c   :  { %5943 = vmatpush1.bf16.msra.mxu0 %v6872_v55  ;;  %5974 = vmatprep.mubr.bf16.mxu0 %v9178_v36  ;;  %v7096_v55 = vcombine.low %v2684_v41, %v2700_v42  ;;  %v2921_v40 = vld [vmem:[%s10728_s5 + $0xe98] sm:$0xff]  ;;  %v2908_v41 = vld [vmem:[%s10728_s5 + $0xe30] sm:$0xff] }
 0x33d   :  { %5821 = vmatprep.subr.bf16.mxu1 %v6899_v57  ;;  %5944 = vmatprep.subr.bf16.mxu0 %v6905_v60  ;;  %v7123_v57 = vcombine.high %v2713_v50, %v2729_v51  ;;  %v7129_v60 = vcombine.high %v2716_v52, %v2732_v53  ;;  %v2924_v42 = vld [vmem:[%s10728_s5 + $0xeb0] sm:$0xff] }
 0x33f   :  { %5822 = vmatpush1.bf16.msra.mxu1 %v6898_v1  ;;  %v7122_v1 = vcombine.low %v2713_v50, %v2729_v51  ;;  %v2937_v50 = vld [vmem:[%s10728_s5 + $0xf18] sm:$0xff] }
 0x340   :  { %5945 = vmatpush1.bf16.msra.mxu0 %v6904_v2  ;;  %5823 = vmatprep.subr.bf16.mxu1 %v6931_v3  ;;  %v7128_v2 = vcombine.low %v2716_v52, %v2732_v53  ;;  %v7155_v3 = vcombine.high %v2745_v61, %v2761_v62  ;;  %v2953_v51 = vld [vmem:[%s10728_s5 + $0xf98] sm:$0xff]  ;;  %v2940_v52 = vld [vmem:[%s10728_s5 + $0xf30] sm:$0xff] }
 0x341   :  { %5946 = vmatprep.subr.bf16.mxu0 %v6937_v4  ;;  %v7161_v4 = vcombine.high %v2748_v63, %v2764_v0  ;;  %v2956_v53 = vld [vmem:[%s10728_s5 + $0xfb0] sm:$0xff] }
 0x343   :  { %5824 = vmatpush1.bf16.msra.mxu1 %v6930_v10  ;;  %v7154_v10 = vcombine.low %v2745_v61, %v2761_v62  ;;  %v2459_v61 = vld [vmem:[%s10728_s5 + $0x28] sm:$0xff] }
 0x344   :  { %5947 = vmatpush1.bf16.msra.mxu0 %v6936_v11  ;;  %5825 = vmatprep.subr.bf16.mxu1 %v6963_v13  ;;  %v7160_v11 = vcombine.low %v2748_v63, %v2764_v0  ;;  %v7187_v13 = vcombine.high %v2777_v5, %v2793_v6  ;;  %v2475_v62 = vld [vmem:[%s10728_s5 + $0xa8] sm:$0xff]  ;;  %v2462_v63 = vld [vmem:[%s10728_s5 + $0x40] sm:$0xff] }
 0x345   :  { %5948 = vmatprep.subr.bf16.mxu0 %v6969_v14  ;;  %v7193_v14 = vcombine.high %v2780_v7, %v2796_v8  ;;  %v2478_v0 = vld [vmem:[%s10728_s5 + $0xc0] sm:$0xff] }
 0x347   :  { %5826 = vmatpush1.bf16.msra.mxu1 %v6962_v20  ;;  %v7186_v20 = vcombine.low %v2777_v5, %v2793_v6  ;;  %v2491_v5 = vld [vmem:[%s10728_s5 + $0x128] sm:$0xff] }
 0x348   :  { %5949 = vmatpush1.bf16.msra.mxu0 %v6968_v21  ;;  %5827 = vmatprep.subr.bf16.mxu1 %v6995_v22  ;;  %v7192_v21 = vcombine.low %v2780_v7, %v2796_v8  ;;  %v7219_v22 = vcombine.high %v2809_v15, %v2825_v16  ;;  %v2507_v6 = vld [vmem:[%s10728_s5 + $0x1a8] sm:$0xff]  ;;  %v6870_v7 = vcombine.low %v2459_v61, %v2475_v62  ;;  %v2494_v8 = vld [vmem:[%s10728_s5 + $0x140] sm:$0xff] }
 0x349   :  { %5950 = vmatprep.subr.bf16.mxu0 %v7001_v23  ;;  %v7225_v23 = vcombine.high %v2812_v18, %v2828_v19 }
 0x34b   :  { %5828 = vmatpush1.bf16.msra.mxu1 %v6994_v27  ;;  %v7218_v27 = vcombine.low %v2809_v15, %v2825_v16  ;;  %v2539_v15 = vld [vmem:[%s10728_s5 + $0x2a8] sm:$0xff] }
 0x34c   :  { %5951 = vmatpush1.bf16.msra.mxu0 %v7000_v28  ;;  %5829 = vmatprep.subr.bf16.mxu1 %v7027_v29  ;;  %v7224_v28 = vcombine.low %v2812_v18, %v2828_v19  ;;  %v7251_v29 = vcombine.high %v2841_v24, %v2857_v12  ;;  %v2526_v18 = vld [vmem:[%s10728_s5 + $0x240] sm:$0xff] }
 0x34d   :  { %5952 = vmatprep.subr.bf16.mxu0 %v7033_v30  ;;  %v7257_v30 = vcombine.high %v2844_v26, %v2860_v9  ;;  %v2542_v19 = vld [vmem:[%s10728_s5 + $0x2c0] sm:$0xff] }
 0x34f   :  { %5830 = vmatpush1.bf16.msra.mxu1 %v7026_v35  ;;  %v7250_v35 = vcombine.low %v2841_v24, %v2857_v12  ;;  %v2555_v24 = vld [vmem:[%s10728_s5 + $0x328] sm:$0xff] }
 0x350   :  { %5953 = vmatpush1.bf16.msra.mxu0 %v7032_v17  ;;  %5831 = vmatprep.subr.bf16.mxu1 %v7059_v37  ;;  %v7256_v17 = vcombine.low %v2844_v26, %v2860_v9  ;;  %v7283_v37 = vcombine.high %v2873_v31, %v2889_v32  ;;  %v2571_v12 = vld [vmem:[%s10728_s5 + $0x3a8] sm:$0xff]  ;;  %v2558_v26 = vld [vmem:[%s10728_s5 + $0x340] sm:$0xff] }
 0x351   :  { %5954 = vmatprep.subr.bf16.mxu0 %v7065_v38  ;;  %v7289_v38 = vcombine.high %v2876_v33, %v2892_v34  ;;  %v2574_v9 = vld [vmem:[%s10728_s5 + $0x3c0] sm:$0xff] }
 0x353   :  { %5832 = vmatpush1.bf16.msra.mxu1 %v7058_v44  ;;  %v7282_v44 = vcombine.low %v2873_v31, %v2889_v32  ;;  %v2587_v31 = vld [vmem:[%s10728_s5 + $0x428] sm:$0xff] }
 0x354   :  { %5955 = vmatpush1.bf16.msra.mxu0 %v7064_v45  ;;  %5833 = vmatprep.subr.bf16.mxu1 %v7091_v46  ;;  %v7288_v45 = vcombine.low %v2876_v33, %v2892_v34  ;;  %v7315_v46 = vcombine.high %v2905_v39, %v2921_v40  ;;  %v2603_v32 = vld [vmem:[%s10728_s5 + $0x4a8] sm:$0xff]  ;;  %v2590_v33 = vld [vmem:[%s10728_s5 + $0x440] sm:$0xff] }
 0x355   :  { %5956 = vmatprep.subr.bf16.mxu0 %v7097_v48  ;;  %v7321_v48 = vcombine.high %v2908_v41, %v2924_v42  ;;  %v2606_v34 = vld [vmem:[%s10728_s5 + $0x4c0] sm:$0xff] }
 0x357   :  { %5834 = vmatpush1.bf16.msra.mxu1 %v7090_v54  ;;  %v7314_v54 = vcombine.low %v2905_v39, %v2921_v40  ;;  %v2619_v39 = vld [vmem:[%s10728_s5 + $0x528] sm:$0xff] }
 0x358   :  { %5957 = vmatpush1.bf16.msra.mxu0 %v7096_v55  ;;  %5835 = vmatprep.subr.bf16.mxu1 %v7123_v57  ;;  %v7320_v55 = vcombine.low %v2908_v41, %v2924_v42  ;;  %v7347_v57 = vcombine.high %v2937_v50, %v2953_v51  ;;  %v2635_v40 = vld [vmem:[%s10728_s5 + $0x5a8] sm:$0xff]  ;;  %v2622_v41 = vld [vmem:[%s10728_s5 + $0x540] sm:$0xff] }
 0x359   :  { %5958 = vmatprep.subr.bf16.mxu0 %v7129_v60  ;;  %v7353_v60 = vcombine.high %v2940_v52, %v2956_v53  ;;  %v2638_v42 = vld [vmem:[%s10728_s5 + $0x5c0] sm:$0xff] }
 0x35b   :  { %5836 = vmatpush1.bf16.msra.mxu1 %v7122_v1  ;;  %v7346_v1 = vcombine.low %v2937_v50, %v2953_v51  ;;  %v2651_v50 = vld [vmem:[%s10728_s5 + $0x628] sm:$0xff] }
 0x35c   :  { %5959 = vmatpush1.bf16.msra.mxu0 %v7128_v2  ;;  %5837 = vmatprep.subr.bf16.mxu1 %v7155_v3  ;;  %v7352_v2 = vcombine.low %v2940_v52, %v2956_v53  ;;  %v6871_v3 = vcombine.high %v2459_v61, %v2475_v62  ;;  %v2667_v51 = vld [vmem:[%s10728_s5 + $0x6a8] sm:$0xff]  ;;  %v2654_v52 = vld [vmem:[%s10728_s5 + $0x640] sm:$0xff] }
 0x35d   :  { %5960 = vmatprep.subr.bf16.mxu0 %v7161_v4  ;;  %v6877_v4 = vcombine.high %v2462_v63, %v2478_v0  ;;  %v2670_v53 = vld [vmem:[%s10728_s5 + $0x6c0] sm:$0xff]  ;;  %v2683_v61 = vld [vmem:[%s10728_s5 + $0x728] sm:$0xff] }
 0x35e   :  { %v2699_v62 = vld [vmem:[%s10728_s5 + $0x7a8] sm:$0xff] }
 0x35f   :  { %5838 = vmatpush1.bf16.msra.mxu1 %v7154_v10  ;;  %v2510_v10 = vld [vmem:[%s10728_s5 + $0x1c0] sm:$0xff] }
 0x360   :  { %5961 = vmatpush1.bf16.msra.mxu0 %v7160_v11  ;;  %5839 = vmatprep.subr.bf16.mxu1 %v7187_v13  ;;  %v6876_v11 = vcombine.low %v2462_v63, %v2478_v0  ;;  %v6903_v13 = vcombine.high %v2491_v5, %v2507_v6  ;;  %v6909_v16 = vcombine.high %v2494_v8, %v2510_v10  ;;  %v2686_v63 = vld [vmem:[%s10728_s5 + $0x740] sm:$0xff] }
 0x361   :  { %5962 = vmatprep.subr.bf16.mxu0 %v7193_v14  ;;  %v2523_v14 = vld [vmem:[%s10728_s5 + $0x228] sm:$0xff]  ;;  %v2702_v0 = vld [vmem:[%s10728_s5 + $0x7c0] sm:$0xff] }
 0x363   :  { %5840 = vmatpush1.bf16.msra.mxu1 %v7186_v20  ;;  %v6902_v20 = vcombine.low %v2491_v5, %v2507_v6  ;;  %v2715_v5 = vld [vmem:[%s10728_s5 + $0x828] sm:$0xff] }
 0x364   :  { %5963 = vmatpush1.bf16.msra.mxu0 %v7192_v21  ;;  %5841 = vmatprep.subr.bf16.mxu1 %v7219_v22  ;;  %v6908_v21 = vcombine.low %v2494_v8, %v2510_v10  ;;  %v6935_v22 = vcombine.high %v2523_v14, %v2539_v15  ;;  %v2731_v6 = vld [vmem:[%s10728_s5 + $0x8a8] sm:$0xff]  ;;  %v2734_v8 = vld [vmem:[%s10728_s5 + $0x8c0] sm:$0xff]  ;;  %v7094_v10 = vcombine.low %v2683_v61, %v2699_v62 }
 0x365   :  { %5964 = vmatprep.subr.bf16.mxu0 %v7225_v23  ;;  %v6941_v23 = vcombine.high %v2526_v18, %v2542_v19 }
 0x367   :  { %5842 = vmatpush1.bf16.msra.mxu1 %v7218_v27  ;;  %v6934_v27 = vcombine.low %v2523_v14, %v2539_v15  ;;  %v2747_v15 = vld [vmem:[%s10728_s5 + $0x928] sm:$0xff] }
 0x368   :  { %5965 = vmatpush1.bf16.msra.mxu0 %v7224_v28  ;;  %5843 = vmatprep.subr.bf16.mxu1 %v7251_v29  ;;  %v6940_v28 = vcombine.low %v2526_v18, %v2542_v19  ;;  %v6967_v29 = vcombine.high %v2555_v24, %v2571_v12  ;;  %v2750_v18 = vld [vmem:[%s10728_s5 + $0x940] sm:$0xff] }
 0x369   :  { %5966 = vmatprep.subr.bf16.mxu0 %v7257_v30  ;;  %v6973_v30 = vcombine.high %v2558_v26, %v2574_v9  ;;  %v2766_v19 = vld [vmem:[%s10728_s5 + $0x9c0] sm:$0xff] }
 0x36b   :  { %5844 = vmatpush1.bf16.msra.mxu1 %v7250_v35  ;;  %v6966_v35 = vcombine.low %v2555_v24, %v2571_v12  ;;  %v2779_v24 = vld [vmem:[%s10728_s5 + $0xa28] sm:$0xff] }
 0x36c   :  { %5967 = vmatpush1.bf16.msra.mxu0 %v7256_v17  ;;  %5845 = vmatprep.subr.bf16.mxu1 %v7283_v37  ;;  %v6972_v17 = vcombine.low %v2558_v26, %v2574_v9  ;;  %v6999_v37 = vcombine.high %v2587_v31, %v2603_v32  ;;  %v2795_v12 = vld [vmem:[%s10728_s5 + $0xaa8] sm:$0xff]  ;;  %v2782_v26 = vld [vmem:[%s10728_s5 + $0xa40] sm:$0xff] }
 0x36d   :  { %5968 = vmatprep.subr.bf16.mxu0 %v7289_v38  ;;  %v7005_v38 = vcombine.high %v2590_v33, %v2606_v34  ;;  %v2798_v9 = vld [vmem:[%s10728_s5 + $0xac0] sm:$0xff] }
 0x36f   :  { %5846 = vmatpush1.bf16.msra.mxu1 %v7282_v44  ;;  %v6998_v44 = vcombine.low %v2587_v31, %v2603_v32  ;;  %v2811_v31 = vld [vmem:[%s10728_s5 + $0xb28] sm:$0xff] }
 0x370   :  { %5969 = vmatpush1.bf16.msra.mxu0 %v7288_v45  ;;  %5847 = vmatprep.subr.bf16.mxu1 %v7315_v46  ;;  %v7004_v45 = vcombine.low %v2590_v33, %v2606_v34  ;;  %v7031_v46 = vcombine.high %v2619_v39, %v2635_v40  ;;  %v2827_v32 = vld [vmem:[%s10728_s5 + $0xba8] sm:$0xff]  ;;  %v2814_v33 = vld [vmem:[%s10728_s5 + $0xb40] sm:$0xff] }
 0x371   :  { %5970 = vmatprep.subr.bf16.mxu0 %v7321_v48  ;;  %v7037_v48 = vcombine.high %v2622_v41, %v2638_v42  ;;  %v2830_v34 = vld [vmem:[%s10728_s5 + $0xbc0] sm:$0xff] }
 0x373   :  { %5848 = vmatpush1.bf16.msra.mxu1 %v7314_v54  ;;  %v7030_v54 = vcombine.low %v2619_v39, %v2635_v40  ;;  %v2843_v39 = vld [vmem:[%s10728_s5 + $0xc28] sm:$0xff] }
 0x374   :  { %5971 = vmatpush1.bf16.msra.mxu0 %v7320_v55  ;;  %5849 = vmatprep.subr.bf16.mxu1 %v7347_v57  ;;  %v7036_v55 = vcombine.low %v2622_v41, %v2638_v42  ;;  %v7063_v57 = vcombine.high %v2651_v50, %v2667_v51  ;;  %v2859_v40 = vld [vmem:[%s10728_s5 + $0xca8] sm:$0xff]  ;;  %v2846_v41 = vld [vmem:[%s10728_s5 + $0xc40] sm:$0xff] }
 0x375   :  { %5972 = vmatprep.subr.bf16.mxu0 %v7353_v60  ;;  %v7069_v60 = vcombine.high %v2654_v52, %v2670_v53  ;;  %v2862_v42 = vld [vmem:[%s10728_s5 + $0xcc0] sm:$0xff] }
 0x377   :  { %5850 = vmatpush1.bf16.msra.mxu1 %v7346_v1  ;;  %v7062_v1 = vcombine.low %v2651_v50, %v2667_v51  ;;  %v2875_v50 = vld [vmem:[%s10728_s5 + $0xd28] sm:$0xff] }
 0x378   :  { %5973 = vmatpush1.bf16.msra.mxu0 %v7352_v2  ;;  %5901 = vmatprep.subr.bf16.mxu1 %v6871_v3  ;;  %v7068_v2 = vcombine.low %v2654_v52, %v2670_v53  ;;  %v7095_v3 = vcombine.high %v2683_v61, %v2699_v62  ;;  %v2891_v51 = vld [vmem:[%s10728_s5 + $0xda8] sm:$0xff]  ;;  %v2878_v52 = vld [vmem:[%s10728_s5 + $0xd40] sm:$0xff] }
 0x379   :  { %6024 = vmatprep.subr.bf16.mxu0 %v6877_v4  ;;  %v7101_v4 = vcombine.high %v2686_v63, %v2702_v0  ;;  %v2894_v53 = vld [vmem:[%s10728_s5 + $0xdc0] sm:$0xff]  ;;  %v2907_v61 = vld [vmem:[%s10728_s5 + $0xe28] sm:$0xff] }
 0x37a   :  { %5852 = vmatmul.mubr.bf16.vlgmr.msra.gmra.mrb[12].mxu1 %v9180_v25  ;;  %v2923_v62 = vld [vmem:[%s10728_s5 + $0xea8] sm:$0xff] }
 0x37b   :  { %5975 = vmatmul.mubr.bf16.vlgmr.msra.gmra.mrb[16].mxu0 %v9180_v25  ;;  %5902 = vmatpush1.bf16.msra.mxu1 %v6870_v7  ;;  %v2718_v7 = vld [vmem:[%s10728_s5 + $0x840] sm:$0xff] }
 0x37c   :  { %5933 = vmatprep.mubr.bf16.mxu1 %v9178_v36  ;;  %6025 = vmatpush1.bf16.msra.mxu0 %v6876_v11  ;;  %v7100_v11 = vcombine.low %v2686_v63, %v2702_v0  ;;  %v7133_v14 = vcombine.high %v2718_v7, %v2734_v8  ;;  %v2910_v63 = vld [vmem:[%s10728_s5 + $0xe40] sm:$0xff] }
 0x37d   :  { %6056 = vmatprep.mubr.bf16.mxu0 %v9178_v36  ;;  %5903 = vmatprep.subr.bf16.mxu1 %v6903_v13  ;;  %v7127_v13 = vcombine.high %v2715_v5, %v2731_v6  ;;  %v2926_v0 = vld [vmem:[%s10728_s5 + $0xec0] sm:$0xff] }
 0x37e   :  { %6026 = vmatprep.subr.bf16.mxu0 %v6909_v16  ;;  %v2763_v16 = vld [vmem:[%s10728_s5 + $0x9a8] sm:$0xff] }
 0x37f   :  { %5904 = vmatpush1.bf16.msra.mxu1 %v6902_v20  ;;  %v7126_v20 = vcombine.low %v2715_v5, %v2731_v6  ;;  %v2939_v5 = vld [vmem:[%s10728_s5 + $0xf28] sm:$0xff] }
 0x380   :  { %6027 = vmatpush1.bf16.msra.mxu0 %v6908_v21  ;;  %5905 = vmatprep.subr.bf16.mxu1 %v6935_v22  ;;  %v7132_v21 = vcombine.low %v2718_v7, %v2734_v8  ;;  %v7159_v22 = vcombine.high %v2747_v15, %v2763_v16  ;;  %v2955_v6 = vld [vmem:[%s10728_s5 + $0xfa8] sm:$0xff]  ;;  %v2942_v7 = vld [vmem:[%s10728_s5 + $0xf40] sm:$0xff] }
 0x381   :  { %6028 = vmatprep.subr.bf16.mxu0 %v6941_v23  ;;  %v7165_v23 = vcombine.high %v2750_v18, %v2766_v19  ;;  %v2958_v8 = vld [vmem:[%s10728_s5 + $0xfc0] sm:$0xff] }
 0x383   :  { %5906 = vmatpush1.bf16.msra.mxu1 %v6934_v27  ;;  %v7158_v27 = vcombine.low %v2747_v15, %v2763_v16  ;;  %v2461_v15 = vld [vmem:[%s10728_s5 + $0x38] sm:$0xff] }
 0x384   :  { %6029 = vmatpush1.bf16.msra.mxu0 %v6940_v28  ;;  %5907 = vmatprep.subr.bf16.mxu1 %v6967_v29  ;;  %v7164_v28 = vcombine.low %v2750_v18, %v2766_v19  ;;  %v7191_v29 = vcombine.high %v2779_v24, %v2795_v12  ;;  %v2477_v16 = vld [vmem:[%s10728_s5 + $0xb8] sm:$0xff]  ;;  %v2464_v18 = vld [vmem:[%s10728_s5 + $0x50] sm:$0xff] }
 0x385   :  { %6030 = vmatprep.subr.bf16.mxu0 %v6973_v30  ;;  %v7197_v30 = vcombine.high %v2782_v26, %v2798_v9  ;;  %v2480_v19 = vld [vmem:[%s10728_s5 + $0xd0] sm:$0xff] }
 0x387   :  { %5908 = vmatpush1.bf16.msra.mxu1 %v6966_v35  ;;  %v7190_v35 = vcombine.low %v2779_v24, %v2795_v12  ;;  %v2493_v24 = vld [vmem:[%s10728_s5 + $0x138] sm:$0xff] }
 0x388   :  { %6031 = vmatpush1.bf16.msra.mxu0 %v6972_v17  ;;  %5909 = vmatprep.subr.bf16.mxu1 %v6999_v37  ;;  %v7196_v17 = vcombine.low %v2782_v26, %v2798_v9  ;;  %v7223_v37 = vcombine.high %v2811_v31, %v2827_v32  ;;  %v2509_v12 = vld [vmem:[%s10728_s5 + $0x1b8] sm:$0xff]  ;;  %v6874_v26 = vcombine.low %v2461_v15, %v2477_v16  ;;  %v2496_v9 = vld [vmem:[%s10728_s5 + $0x150] sm:$0xff] }
 0x389   :  { %6032 = vmatprep.subr.bf16.mxu0 %v7005_v38  ;;  %v7229_v38 = vcombine.high %v2814_v33, %v2830_v34 }
 0x38b   :  { %5910 = vmatpush1.bf16.msra.mxu1 %v6998_v44  ;;  %v7222_v44 = vcombine.low %v2811_v31, %v2827_v32  ;;  %v2541_v31 = vld [vmem:[%s10728_s5 + $0x2b8] sm:$0xff] }
 0x38c   :  { %6033 = vmatpush1.bf16.msra.mxu0 %v7004_v45  ;;  %5911 = vmatprep.subr.bf16.mxu1 %v7031_v46  ;;  %v7228_v45 = vcombine.low %v2814_v33, %v2830_v34  ;;  %v7255_v46 = vcombine.high %v2843_v39, %v2859_v40  ;;  %v2528_v33 = vld [vmem:[%s10728_s5 + $0x250] sm:$0xff] }
 0x38d   :  { %6034 = vmatprep.subr.bf16.mxu0 %v7037_v48  ;;  %v7261_v48 = vcombine.high %v2846_v41, %v2862_v42  ;;  %v2544_v34 = vld [vmem:[%s10728_s5 + $0x2d0] sm:$0xff] }
 0x38f   :  { %5912 = vmatpush1.bf16.msra.mxu1 %v7030_v54  ;;  %v7254_v54 = vcombine.low %v2843_v39, %v2859_v40  ;;  %v2557_v39 = vld [vmem:[%s10728_s5 + $0x338] sm:$0xff] }
 0x390   :  { %6035 = vmatpush1.bf16.msra.mxu0 %v7036_v55  ;;  %5913 = vmatprep.subr.bf16.mxu1 %v7063_v57  ;;  %v7260_v55 = vcombine.low %v2846_v41, %v2862_v42  ;;  %v7287_v57 = vcombine.high %v2875_v50, %v2891_v51  ;;  %v2573_v40 = vld [vmem:[%s10728_s5 + $0x3b8] sm:$0xff]  ;;  %v2560_v41 = vld [vmem:[%s10728_s5 + $0x350] sm:$0xff] }
 0x391   :  { %6036 = vmatprep.subr.bf16.mxu0 %v7069_v60  ;;  %v7293_v60 = vcombine.high %v2878_v52, %v2894_v53  ;;  %v2576_v42 = vld [vmem:[%s10728_s5 + $0x3d0] sm:$0xff] }
 0x393   :  { %5914 = vmatpush1.bf16.msra.mxu1 %v7062_v1  ;;  %v7286_v1 = vcombine.low %v2875_v50, %v2891_v51  ;;  %v2589_v50 = vld [vmem:[%s10728_s5 + $0x438] sm:$0xff] }
 0x394   :  { %6037 = vmatpush1.bf16.msra.mxu0 %v7068_v2  ;;  %5915 = vmatprep.subr.bf16.mxu1 %v7095_v3  ;;  %v7292_v2 = vcombine.low %v2878_v52, %v2894_v53  ;;  %v7319_v3 = vcombine.high %v2907_v61, %v2923_v62  ;;  %v2605_v51 = vld [vmem:[%s10728_s5 + $0x4b8] sm:$0xff]  ;;  %v2592_v52 = vld [vmem:[%s10728_s5 + $0x450] sm:$0xff] }
 0x395   :  { %6038 = vmatprep.subr.bf16.mxu0 %v7101_v4  ;;  %v7325_v4 = vcombine.high %v2910_v63, %v2926_v0  ;;  %v2608_v53 = vld [vmem:[%s10728_s5 + $0x4d0] sm:$0xff] }
 0x397   :  { %5916 = vmatpush1.bf16.msra.mxu1 %v7094_v10  ;;  %v7318_v10 = vcombine.low %v2907_v61, %v2923_v62  ;;  %v2621_v61 = vld [vmem:[%s10728_s5 + $0x538] sm:$0xff] }
 0x398   :  { %6039 = vmatpush1.bf16.msra.mxu0 %v7100_v11  ;;  %5917 = vmatprep.subr.bf16.mxu1 %v7127_v13  ;;  %v7324_v11 = vcombine.low %v2910_v63, %v2926_v0  ;;  %v7351_v13 = vcombine.high %v2939_v5, %v2955_v6  ;;  %v2637_v62 = vld [vmem:[%s10728_s5 + $0x5b8] sm:$0xff]  ;;  %v9819_v63 = vsub.s32 4, %v8048_v43  ;;  %v2624_v0 = vld [vmem:[%s10728_s5 + $0x550] sm:$0xff] }
 0x399   :  { %6040 = vmatprep.subr.bf16.mxu0 %v7133_v14  ;;  %v7357_v14 = vcombine.high %v2942_v7, %v2958_v8 }
 0x39b   :  { %5918 = vmatpush1.bf16.msra.mxu1 %v7126_v20  ;;  %v7350_v20 = vcombine.low %v2939_v5, %v2955_v6  ;;  %v7008_v5 = vcombine.low %v2592_v52, %v2608_v53  ;;  %v7035_v6 = vcombine.high %v2621_v61, %v2637_v62 }
 0x39c   :  { %6041 = vmatpush1.bf16.msra.mxu0 %v7132_v21  ;;  %5919 = vmatprep.subr.bf16.mxu1 %v7159_v22  ;;  %v7356_v21 = vcombine.low %v2942_v7, %v2958_v8  ;;  %v6875_v22 = vcombine.high %v2461_v15, %v2477_v16  ;;  %v2653_v8 = vld [vmem:[%s10728_s5 + $0x638] sm:$0xff]  ;;  %v2672_v15 = vld [vmem:[%s10728_s5 + $0x6d0] sm:$0xff]  ;;  %v7034_v16 = vcombine.low %v2621_v61, %v2637_v62 }
 0x39d   :  { %6042 = vmatprep.subr.bf16.mxu0 %v7165_v23  ;;  %v6881_v23 = vcombine.high %v2464_v18, %v2480_v19  ;;  %v2768_v61 = vld [vmem:[%s10728_s5 + $0x9d0] sm:$0xff] }
 0x39f   :  { %5920 = vmatpush1.bf16.msra.mxu1 %v7158_v27  ;;  %v2512_v27 = vld [vmem:[%s10728_s5 + $0x1d0] sm:$0xff] }
 0x3a0   :  { %6043 = vmatpush1.bf16.msra.mxu0 %v7164_v28  ;;  %5921 = vmatprep.subr.bf16.mxu1 %v7191_v29  ;;  %v6880_v28 = vcombine.low %v2464_v18, %v2480_v19  ;;  %v6907_v29 = vcombine.high %v2493_v24, %v2509_v12  ;;  %v6913_v32 = vcombine.high %v2496_v9, %v2512_v27 }
 0x3a1   :  { %6044 = vmatprep.subr.bf16.mxu0 %v7197_v30  ;;  %v2525_v30 = vld [vmem:[%s10728_s5 + $0x238] sm:$0xff] }
 0x3a3   :  { %5922 = vmatpush1.bf16.msra.mxu1 %v7190_v35  ;;  %v6906_v35 = vcombine.low %v2493_v24, %v2509_v12  ;;  %v2685_v12 = vld [vmem:[%s10728_s5 + $0x738] sm:$0xff] }
 0x3a4   :  { %6045 = vmatpush1.bf16.msra.mxu0 %v7196_v17  ;;  %5923 = vmatprep.subr.bf16.mxu1 %v7223_v37  ;;  %v6912_v17 = vcombine.low %v2496_v9, %v2512_v27  ;;  %v6939_v37 = vcombine.high %v2525_v30, %v2541_v31 }
 0x3a5   :  { %6046 = vmatprep.subr.bf16.mxu0 %v7229_v38  ;;  %v6945_v38 = vcombine.high %v2528_v33, %v2544_v34 }
 0x3a7   :  { %5924 = vmatpush1.bf16.msra.mxu1 %v7222_v44  ;;  %v6938_v44 = vcombine.low %v2525_v30, %v2541_v31  ;;  %v2688_v30 = vld [vmem:[%s10728_s5 + $0x750] sm:$0xff] }
 0x3a8   :  { %6047 = vmatpush1.bf16.msra.mxu0 %v7228_v45  ;;  %5925 = vmatprep.subr.bf16.mxu1 %v7255_v46  ;;  %v6944_v45 = vcombine.low %v2528_v33, %v2544_v34  ;;  %v6971_v46 = vcombine.high %v2557_v39, %v2573_v40  ;;  %v2704_v31 = vld [vmem:[%s10728_s5 + $0x7d0] sm:$0xff] }
 0x3a9   :  { %6048 = vmatprep.subr.bf16.mxu0 %v7261_v48  ;;  %v6977_v48 = vcombine.high %v2560_v41, %v2576_v42 }
 0x3ab   :  { %5926 = vmatpush1.bf16.msra.mxu1 %v7254_v54  ;;  %v6970_v54 = vcombine.low %v2557_v39, %v2573_v40 }
 0x3ac   :  { %6049 = vmatpush1.bf16.msra.mxu0 %v7260_v55  ;;  %5927 = vmatprep.subr.bf16.mxu1 %v7287_v57  ;;  %v6976_v55 = vcombine.low %v2560_v41, %v2576_v42  ;;  %v7003_v57 = vcombine.high %v2589_v50, %v2605_v51 }
 0x3ad   :  { %6050 = vmatprep.subr.bf16.mxu0 %v7293_v60  ;;  %v7009_v60 = vcombine.high %v2592_v52, %v2608_v53  ;;  %v7104_v52 = vcombine.low %v2688_v30, %v2704_v31 }
 0x3af   :  { %5928 = vmatpush1.bf16.msra.mxu1 %v7286_v1  ;;  %v2640_v1 = vld [vmem:[%s10728_s5 + $0x5d0] sm:$0xff] }
 0x3b0   :  { %6051 = vmatpush1.bf16.msra.mxu0 %v7292_v2  ;;  %5929 = vmatprep.subr.bf16.mxu1 %v7319_v3  ;;  %v7002_v2 = vcombine.low %v2589_v50, %v2605_v51  ;;  %v9830_v3 = vld [vmem:[%s10731_s6] sm:$0xff]  ;;  %v7041_v7 = vcombine.high %v2624_v0, %v2640_v1  ;;  %v2736_v50 = vld [vmem:[%s10728_s5 + $0x8d0] sm:$0xff] }
 0x3b1   :  { %6052 = vmatprep.subr.bf16.mxu0 %v7325_v4  ;;  %v9833_v4 = vsub.s32 5, %v8048_v43  ;;  %v2983_v18 = vrot.slane %v9830_v3, %v8923_v58 }
 0x3b3   :  { %5930 = vmatpush1.bf16.msra.mxu1 %v7318_v10  ;;  %v2669_v10 = vld [vmem:[%s10728_s5 + $0x6b8] sm:$0xff]  ;;  %v2999_v19 = vrot.slane %v9830_v3, %v9833_v4 }
 0x3b4   :  { %6053 = vmatpush1.bf16.msra.mxu0 %v7324_v11  ;;  %5931 = vmatprep.subr.bf16.mxu1 %v7351_v13  ;;  %v2979_v11 = vrot.slane %v9830_v3, %v8915_v56  ;;  %v2995_v13 = vrot.slane %v9830_v3, %v9819_v63 }
 0x3b5   :  { %6054 = vmatprep.subr.bf16.mxu0 %v7357_v14  ;;  %v2656_v14 = vld [vmem:[%s10728_s5 + $0x650] sm:$0xff] }
 0x3b6   :  { %v7073_v24 = vcombine.high %v2656_v14, %v2672_v15  ;;  %v7072_v39 = vcombine.low %v2656_v14, %v2672_v15  ;;  %v2813_v15 = vld [vmem:[%s10728_s5 + $0xb38] sm:$0xff] }
 0x3b7   :  { %5932 = vmatpush1.bf16.msra.mxu1 %v7350_v20  ;;  %v7040_v20 = vcombine.low %v2624_v0, %v2640_v1 }
 0x3b8   :  { %6055 = vmatpush1.bf16.msra.mxu0 %v7356_v21  ;;  %5983 = vmatprep.subr.bf16.mxu1 %v6875_v22  ;;  %v7067_v21 = vcombine.high %v2653_v8, %v2669_v10 }
 0x3b9   :  { %6106 = vmatprep.subr.bf16.mxu0 %v6881_v23 }
 0x3ba   :  { %5934 = vmatmul.mubr.bf16.vlgmr.msra.gmra.mrb[16].mxu1 %v9180_v25 }
 0x3bb   :  { %6057 = vmatmul.mubr.bf16.vlgmr.msra.gmra.mrb[20].mxu0 %v9180_v25  ;;  %5984 = vmatpush1.bf16.msra.mxu1 %v6874_v26  ;;  %v2701_v26 = vld [vmem:[%s10728_s5 + $0x7b8] sm:$0xff] }
 0x3bc   :  { %6015 = vmatprep.mubr.bf16.mxu1 %v9178_v36  ;;  %6107 = vmatpush1.bf16.msra.mxu0 %v6880_v28  ;;  %v7099_v40 = vcombine.high %v2685_v12, %v2701_v26  ;;  %v7098_v51 = vcombine.low %v2685_v12, %v2701_v26  ;;  %v2861_v12 = vld [vmem:[%s10728_s5 + $0xcb8] sm:$0xff]  ;;  %v2848_v26 = vld [vmem:[%s10728_s5 + $0xc50] sm:$0xff] }
 0x3bd   :  { %6138 = vmatprep.mubr.bf16.mxu0 %v9178_v36  ;;  %5985 = vmatprep.subr.bf16.mxu1 %v6907_v29 }
 0x3be   :  { %6108 = vmatprep.subr.bf16.mxu0 %v6913_v32 }
 0x3bf   :  { %5986 = vmatpush1.bf16.msra.mxu1 %v6906_v35 }
 0x3c0   :  { %6109 = vmatpush1.bf16.msra.mxu0 %v6912_v17  ;;  %5987 = vmatprep.subr.bf16.mxu1 %v6939_v37  ;;  %v7066_v17 = vcombine.low %v2653_v8, %v2669_v10  ;;  %v2800_v8 = vld [vmem:[%s10728_s5 + $0xad0] sm:$0xff] }
 0x3c1   :  { %6110 = vmatprep.subr.bf16.mxu0 %v6945_v38 }
 0x3c3   :  { %5988 = vmatpush1.bf16.msra.mxu1 %v6938_v44  ;;  %v7105_v44 = vcombine.high %v2688_v30, %v2704_v31 }
 0x3c4   :  { %6111 = vmatpush1.bf16.msra.mxu0 %v6944_v45  ;;  %5989 = vmatprep.subr.bf16.mxu1 %v6971_v46  ;;  %v2717_v45 = vld [vmem:[%s10728_s5 + $0x838] sm:$0xff] }
 0x3c5   :  { %6112 = vmatprep.subr.bf16.mxu0 %v6977_v48  ;;  %v2733_v46 = vld [vmem:[%s10728_s5 + $0x8b8] sm:$0xff]  ;;  %v2720_v48 = vld [vmem:[%s10728_s5 + $0x850] sm:$0xff] }
 0x3c6   :  { %v7131_v53 = vcombine.high %v2717_v45, %v2733_v46  ;;  %v7130_v62 = vcombine.low %v2717_v45, %v2733_v46  ;;  %v7136_v0 = vcombine.low %v2720_v48, %v2736_v50  ;;  %v2909_v46 = vld [vmem:[%s10728_s5 + $0xe38] sm:$0xff] }
 0x3c7   :  { %5990 = vmatpush1.bf16.msra.mxu1 %v6970_v54  ;;  %v7137_v54 = vcombine.high %v2720_v48, %v2736_v50  ;;  %v2925_v48 = vld [vmem:[%s10728_s5 + $0xeb8] sm:$0xff]  ;;  %v2912_v50 = vld [vmem:[%s10728_s5 + $0xe50] sm:$0xff] }
 0x3c8   :  { %6113 = vmatpush1.bf16.msra.mxu0 %v6976_v55  ;;  %5991 = vmatprep.subr.bf16.mxu1 %v7003_v57  ;;  %v2749_v55 = vld [vmem:[%s10728_s5 + $0x938] sm:$0xff] }
 0x3c9   :  { %6114 = vmatprep.subr.bf16.mxu0 %v7009_v60  ;;  %v2765_v57 = vld [vmem:[%s10728_s5 + $0x9b8] sm:$0xff]  ;;  %v2752_v60 = vld [vmem:[%s10728_s5 + $0x950] sm:$0xff] }
 0x3ca   :  { %v7163_v1 = vcombine.high %v2749_v55, %v2765_v57  ;;  %v7162_v10 = vcombine.low %v2749_v55, %v2765_v57  ;;  %v2941_v57 = vld [vmem:[%s10728_s5 + $0xf38] sm:$0xff] }
 0x3cb   :  { %5992 = vmatpush1.bf16.msra.mxu1 %v7002_v2  ;;  %v7169_v2 = vcombine.high %v2752_v60, %v2768_v61 }
 0x3cc   :  { %6115 = vmatpush1.bf16.msra.mxu0 %v7008_v5  ;;  %5993 = vmatprep.subr.bf16.mxu1 %v7035_v6  ;;  %v2781_v5 = vld [vmem:[%s10728_s5 + $0xa38] sm:$0xff] }
 0x3cd   :  { %v5730_v22 = vpop.f32.mrb[4].mxu1  ;;  %v5812_v23 = vpop.f32.mrb[8].mxu0  ;;  %6116 = vmatprep.subr.bf16.mxu0 %v7041_v7  ;;  %v2797_v6 = vld [vmem:[%s10728_s5 + $0xab8] sm:$0xff]  ;;  %v2784_v7 = vld [vmem:[%s10728_s5 + $0xa50] sm:$0xff] }
 0x3ce   :  { %v9861_v9 = vadd.f32 %v5730_v22, %v2979_v11  ;;  %v9863_v27 = vadd.f32 %v5812_v23, %v2995_v13  ;;  %v5732_v28 = vpop.f32.mrb[5].mxu1  ;;  %v5814_v29 = vpop.f32.mrb[9].mxu0  ;;  %v7168_v11 = vcombine.low %v2752_v60, %v2768_v61  ;;  %v7195_v13 = vcombine.high %v2781_v5, %v2797_v6  ;;  %v2957_v60 = vld [vmem:[%s10728_s5 + $0xfb8] sm:$0xff]  ;;  %v2944_v61 = vld [vmem:[%s10728_s5 + $0xf50] sm:$0xff] }
 0x3cf   :  { %v9871_v32 = vadd.f32 %v5732_v28, %v2983_v18  ;;  %v9873_v33 = vadd.f32 %v5814_v29, %v2999_v19  ;;  %5994 = vmatpush1.bf16.msra.mxu1 %v7034_v16  ;;  %v5734_v34 = vpop.f32.mrb[6].mxu1  ;;  %v5816_v35 = vpop.f32.mrb[10].mxu0  ;;  %v7201_v14 = vcombine.high %v2784_v7, %v2800_v8  ;;  %v2829_v16 = vld [vmem:[%s10728_s5 + $0xbb8] sm:$0xff]  ;;  %v2816_v18 = vld [vmem:[%s10728_s5 + $0xb50] sm:$0xff] }
 0x3d0   :  { %6117 = vmatpush1.bf16.msra.mxu0 %v7040_v20  ;;  %v5735_v37 = vpop.f32.mrb[7].mxu1  ;;  %v5817_v38 = vpop.f32.mrb[11].mxu0  ;;  %5995 = vmatprep.subr.bf16.mxu1 %v7067_v21  ;;  %v2832_v19 = vld [vmem:[%s10728_s5 + $0xbd0] sm:$0xff]  ;;  %v7194_v20 = vcombine.low %v2781_v5, %v2797_v6  ;;  %v7200_v21 = vcombine.low %v2784_v7, %v2800_v8  ;;  %v7227_v22 = vcombine.high %v2813_v15, %v2829_v16  ;;  %v2877_v35 = vld [vmem:[%s10728_s5 + $0xd38] sm:$0xff]  ;;  %v2463_v6 = vld [vmem:[%s10728_s5 + $0x48] sm:$0xff] }
 0x3d1   :  { %v6384_v41 = vcombine.low %v9861_v9, %v9871_v32  ;;  %v6401_v42 = vcombine.low %v9863_v27, %v9873_v33  ;;  %6118 = vmatprep.subr.bf16.mxu0 %v7073_v24  ;;  %v7233_v23 = vcombine.high %v2816_v18, %v2832_v19  ;;  %v2845_v24 = vld [vmem:[%s10728_s5 + $0xc38] sm:$0xff]  ;;  %v2864_v28 = vld [vmem:[%s10728_s5 + $0xcd0] sm:$0xff]  ;;  %v7226_v29 = vcombine.low %v2813_v15, %v2829_v16  ;;  %v2479_v7 = vld [vmem:[%s10728_s5 + $0xc8] sm:$0xff] }
 0x3d2   :  { %v7232_v30 = vcombine.low %v2816_v18, %v2832_v19  ;;  %v7259_v31 = vcombine.high %v2845_v24, %v2861_v12  ;;  %v7265_v34 = vcombine.high %v2848_v26, %v2864_v28  ;;  %v2880_v37 = vld [vmem:[%s10728_s5 + $0xd50] sm:$0xff]  ;;  %v2466_v8 = vld [vmem:[%s10728_s5 + $0x60] sm:$0xff]  ;;  %v2495_v16 = vld [vmem:[%s10728_s5 + $0x148] sm:$0xff]  ;;  %v6878_v19 = vcombine.low %v2463_v6, %v2479_v7 }
 0x3d3   :  { %5996 = vmatpush1.bf16.msra.mxu1 %v7066_v17  ;;  %v2893_v17 = vld [vmem:[%s10728_s5 + $0xdb8] sm:$0xff]  ;;  %v2896_v38 = vld [vmem:[%s10728_s5 + $0xdd0] sm:$0xff]  ;;  %v2511_v18 = vld [vmem:[%s10728_s5 + $0x1c8] sm:$0xff] }
 0x3d4   :  { %6119 = vmatpush1.bf16.msra.mxu0 %v7072_v39  ;;  %5997 = vmatprep.subr.bf16.mxu1 %v7099_v40  ;;  %v7258_v39 = vcombine.low %v2845_v24, %v2861_v12  ;;  %v7264_v40 = vcombine.low %v2848_v26, %v2864_v28  ;;  %v7297_v45 = vcombine.high %v2880_v37, %v2896_v38  ;;  %v2527_v24 = vld [vmem:[%s10728_s5 + $0x248] sm:$0xff]  ;;  %v2530_v28 = vld [vmem:[%s10728_s5 + $0x260] sm:$0xff]  ;;  %v2769_v27 = vld [vmem:[%s10728_s5 + $0x9d8] sm:$0xff] }
 0x3d5   :  { %6120 = vmatprep.subr.bf16.mxu0 %v7105_v44  ;;  %v7291_v44 = vcombine.high %v2877_v35, %v2893_v17  ;;  %v2543_v12 = vld [vmem:[%s10728_s5 + $0x2c8] sm:$0xff]  ;;  %v2754_v32 = vld [vmem:[%s10728_s5 + $0x960] sm:$0xff]  ;;  %v2756_v33 = vld [vmem:[%s10728_s5 + $0x970] sm:$0xff] }
 0x3d6   :  { %v2767_v9 = vld [vmem:[%s10728_s5 + $0x9c8] sm:$0xff] }
 0x3d7   :  { %5998 = vmatpush1.bf16.msra.mxu1 %v7098_v51  ;;  %v2928_v51 = vld [vmem:[%s10728_s5 + $0xed0] sm:$0xff] }
 0x3d8   :  { %6121 = vmatpush1.bf16.msra.mxu0 %v7104_v52  ;;  %5999 = vmatprep.subr.bf16.mxu1 %v7131_v53  ;;  %v7290_v52 = vcombine.low %v2877_v35, %v2893_v17  ;;  %v7296_v53 = vcombine.low %v2880_v37, %v2896_v38  ;;  %v7329_v55 = vcombine.high %v2912_v50, %v2928_v51  ;;  %v2559_v17 = vld [vmem:[%s10728_s5 + $0x348] sm:$0xff]  ;;  %v2562_v38 = vld [vmem:[%s10728_s5 + $0x360] sm:$0xff] }
 0x3d9   :  { %6122 = vmatprep.subr.bf16.mxu0 %v7137_v54  ;;  %v7323_v54 = vcombine.high %v2909_v46, %v2925_v48  ;;  %v2575_v37 = vld [vmem:[%s10728_s5 + $0x3c8] sm:$0xff] }
 0x3db   :  { %6000 = vmatpush1.bf16.msra.mxu1 %v7130_v62  ;;  %v2960_v62 = vld [vmem:[%s10728_s5 + $0xfd0] sm:$0xff] }
 0x3dc   :  { %6123 = vmatpush1.bf16.msra.mxu0 %v7136_v0  ;;  %6001 = vmatprep.subr.bf16.mxu1 %v7163_v1  ;;  %v7322_v0 = vcombine.low %v2909_v46, %v2925_v48  ;;  %v7328_v1 = vcombine.low %v2912_v50, %v2928_v51  ;;  %v7361_v5 = vcombine.high %v2944_v61, %v2960_v62  ;;  %v2591_v48 = vld [vmem:[%s10728_s5 + $0x448] sm:$0xff]  ;;  %v2594_v51 = vld [vmem:[%s10728_s5 + $0x460] sm:$0xff] }
 0x3dd   :  { %6124 = vmatprep.subr.bf16.mxu0 %v7169_v2  ;;  %v7355_v2 = vcombine.high %v2941_v57, %v2957_v60  ;;  %v2607_v50 = vld [vmem:[%s10728_s5 + $0x4c8] sm:$0xff] }
 0x3df   :  { %6002 = vmatpush1.bf16.msra.mxu1 %v7162_v10  ;;  %v2482_v10 = vld [vmem:[%s10728_s5 + $0xe0] sm:$0xff] }
 0x3e0   :  { %6125 = vmatpush1.bf16.msra.mxu0 %v7168_v11  ;;  %6003 = vmatprep.subr.bf16.mxu1 %v7195_v13  ;;  %v7354_v11 = vcombine.low %v2941_v57, %v2957_v60  ;;  %v7360_v13 = vcombine.low %v2944_v61, %v2960_v62  ;;  %v6885_v15 = vcombine.high %v2466_v8, %v2482_v10  ;;  %v2623_v60 = vld [vmem:[%s10728_s5 + $0x548] sm:$0xff]  ;;  %v2626_v62 = vld [vmem:[%s10728_s5 + $0x560] sm:$0xff] }
 0x3e1   :  { %6126 = vmatprep.subr.bf16.mxu0 %v7201_v14  ;;  %v6879_v14 = vcombine.high %v2463_v6, %v2479_v7  ;;  %v2639_v61 = vld [vmem:[%s10728_s5 + $0x5c8] sm:$0xff] }
 0x3e2   :  { %v7039_v6 = vcombine.high %v2623_v60, %v2639_v61 }
 0x3e3   :  { %6004 = vmatpush1.bf16.msra.mxu1 %v7194_v20  ;;  %v2498_v20 = vld [vmem:[%s10728_s5 + $0x160] sm:$0xff] }
 0x3e4   :  { %6127 = vmatpush1.bf16.msra.mxu0 %v7200_v21  ;;  %6005 = vmatprep.subr.bf16.mxu1 %v7227_v22  ;;  %v2514_v21 = vld [vmem:[%s10728_s5 + $0x1e0] sm:$0xff]  ;;  %v6884_v22 = vcombine.low %v2466_v8, %v2482_v10  ;;  %v2655_v8 = vld [vmem:[%s10728_s5 + $0x648] sm:$0xff] }
 0x3e5   :  { %6128 = vmatprep.subr.bf16.mxu0 %v7233_v23  ;;  %v6911_v23 = vcombine.high %v2495_v16, %v2511_v18  ;;  %v6917_v26 = vcombine.high %v2498_v20, %v2514_v21  ;;  %v2671_v10 = vld [vmem:[%s10728_s5 + $0x6c8] sm:$0xff] }
 0x3e7   :  { %6006 = vmatpush1.bf16.msra.mxu1 %v7226_v29  ;;  %v2546_v29 = vld [vmem:[%s10728_s5 + $0x2e0] sm:$0xff] }
 0x3e8   :  { %6129 = vmatpush1.bf16.msra.mxu0 %v7232_v30  ;;  %6007 = vmatprep.subr.bf16.mxu1 %v7259_v31  ;;  %v6910_v30 = vcombine.low %v2495_v16, %v2511_v18  ;;  %v6916_v31 = vcombine.low %v2498_v20, %v2514_v21  ;;  %v6949_v35 = vcombine.high %v2530_v28, %v2546_v29 }
 0x3e9   :  { %6130 = vmatprep.subr.bf16.mxu0 %v7265_v34  ;;  %v6943_v34 = vcombine.high %v2527_v24, %v2543_v12  ;;  %v2991_v16 = vrot.slane %v9830_v3, %v8926_v59  ;;  %v7071_v21 = vcombine.high %v2655_v8, %v2671_v10 }
 0x3eb   :  { %6008 = vmatpush1.bf16.msra.mxu1 %v7258_v39  ;;  %v2578_v39 = vld [vmem:[%s10728_s5 + $0x3e0] sm:$0xff] }
 0x3ec   :  { %6131 = vmatpush1.bf16.msra.mxu0 %v7264_v40  ;;  %6009 = vmatprep.subr.bf16.mxu1 %v7291_v44  ;;  %v6942_v40 = vcombine.low %v2527_v24, %v2543_v12  ;;  %v6948_v44 = vcombine.low %v2530_v28, %v2546_v29  ;;  %v6981_v46 = vcombine.high %v2562_v38, %v2578_v39  ;;  %v2687_v12 = vld [vmem:[%s10728_s5 + $0x748] sm:$0xff] }
 0x3ed   :  { %6132 = vmatprep.subr.bf16.mxu0 %v7297_v45  ;;  %v6975_v45 = vcombine.high %v2559_v17, %v2575_v37 }
 0x3ef   :  { %6010 = vmatpush1.bf16.msra.mxu1 %v7290_v52  ;;  %v2610_v52 = vld [vmem:[%s10728_s5 + $0x4e0] sm:$0xff] }
 0x3f0   :  { %6133 = vmatpush1.bf16.msra.mxu0 %v7296_v53  ;;  %6011 = vmatprep.subr.bf16.mxu1 %v7323_v54  ;;  %v6974_v53 = vcombine.low %v2559_v17, %v2575_v37  ;;  %v6980_v54 = vcombine.low %v2562_v38, %v2578_v39  ;;  %v7013_v57 = vcombine.high %v2594_v51, %v2610_v52 }
 0x3f1   :  { %6134 = vmatprep.subr.bf16.mxu0 %v7329_v55  ;;  %v7007_v55 = vcombine.high %v2591_v48, %v2607_v50 }
 0x3f3   :  { %6012 = vmatpush1.bf16.msra.mxu1 %v7322_v0  ;;  %v2642_v0 = vld [vmem:[%s10728_s5 + $0x5e0] sm:$0xff] }
 0x3f4   :  { %6135 = vmatpush1.bf16.msra.mxu0 %v7328_v1  ;;  %6013 = vmatprep.subr.bf16.mxu1 %v7355_v2  ;;  %v7006_v1 = vcombine.low %v2591_v48, %v2607_v50  ;;  %v10054_v2 = vld [vmem:[%s10731_s6 + $0x8] sm:$0xff]  ;;  %v7045_v7 = vcombine.high %v2626_v62, %v2642_v0  ;;  %v7044_v20 = vcombine.low %v2626_v62, %v2642_v0 }
 0x3f5   :  { %6136 = vmatprep.subr.bf16.mxu0 %v7361_v5  ;;  %v7012_v5 = vcombine.low %v2594_v51, %v2610_v52  ;;  %v3015_v18 = vrot.slane %v10054_v2, %v8923_v58 }
 0x3f7   :  { %6014 = vmatpush1.bf16.msra.mxu1 %v7354_v11  ;;  %v2987_v11 = vrot.slane %v9830_v3, %v9018_v47 }
 0x3f8   :  { %6137 = vmatpush1.bf16.msra.mxu0 %v7360_v13  ;;  %6065 = vmatprep.subr.bf16.mxu1 %v6879_v14  ;;  %v3011_v13 = vrot.slane %v10054_v2, %v8915_v56  ;;  %v2658_v14 = vld [vmem:[%s10728_s5 + $0x660] sm:$0xff] }
 0x3f9   :  { %6188 = vmatprep.subr.bf16.mxu0 %v6885_v15  ;;  %v2674_v15 = vld [vmem:[%s10728_s5 + $0x6e0] sm:$0xff] }
 0x3fa   :  { %6016 = vmatmul.mubr.bf16.vlgmr.msra.gmra.mrb[20].mxu1 %v9180_v25  ;;  %v7077_v24 = vcombine.high %v2658_v14, %v2674_v15 }
 0x3fb   :  { %6139 = vmatmul.mubr.bf16.vlgmr.msra.gmra.mrb[24].mxu0 %v9180_v25  ;;  %6066 = vmatpush1.bf16.msra.mxu1 %v6878_v19  ;;  %v7038_v19 = vcombine.low %v2623_v60, %v2639_v61  ;;  %v6392_v60 = vrot.slane %v6384_v41, %v8066_v49  ;;  %v2770_v41 = vld [vmem:[%s10728_s5 + $0x9e0] sm:$0xff] }
 0x3fc   :  { %6097 = vmatprep.mubr.bf16.mxu1 %v9178_v36  ;;  %6189 = vmatpush1.bf16.msra.mxu0 %v6884_v22 }
 0x3fd   :  { %6220 = vmatprep.mubr.bf16.mxu0 %v9178_v36  ;;  %6067 = vmatprep.subr.bf16.mxu1 %v6911_v23 }
 0x3fe   :  { %6190 = vmatprep.subr.bf16.mxu0 %v6917_v26  ;;  %v2703_v26 = vld [vmem:[%s10728_s5 + $0x7c8] sm:$0xff] }
 0x3ff   :  { %6068 = vmatpush1.bf16.msra.mxu1 %v6910_v30  ;;  %v7103_v48 = vcombine.high %v2687_v12, %v2703_v26  ;;  %v7102_v62 = vcombine.low %v2687_v12, %v2703_v26  ;;  %v2818_v12 = vld [vmem:[%s10728_s5 + $0xb60] sm:$0xff] }
 0x400   :  { %6191 = vmatpush1.bf16.msra.mxu0 %v6916_v31  ;;  %6069 = vmatprep.subr.bf16.mxu1 %v6943_v34  ;;  %v2690_v34 = vld [vmem:[%s10728_s5 + $0x760] sm:$0xff] }
 0x401   :  { %6192 = vmatprep.subr.bf16.mxu0 %v6949_v35  ;;  %v2706_v35 = vld [vmem:[%s10728_s5 + $0x7e0] sm:$0xff] }
 0x402   :  { %v7109_v52 = vcombine.high %v2690_v34, %v2706_v35  ;;  %v7108_v0 = vcombine.low %v2690_v34, %v2706_v35  ;;  %v2834_v26 = vld [vmem:[%s10728_s5 + $0xbe0] sm:$0xff]  ;;  %v2847_v35 = vld [vmem:[%s10728_s5 + $0xc48] sm:$0xff] }
 0x403   :  { %6070 = vmatpush1.bf16.msra.mxu1 %v6942_v40  ;;  %v7070_v40 = vcombine.low %v2655_v8, %v2671_v10  ;;  %v7237_v34 = vcombine.high %v2818_v12, %v2834_v26 }
 0x404   :  { %6193 = vmatpush1.bf16.msra.mxu0 %v6948_v44  ;;  %6071 = vmatprep.subr.bf16.mxu1 %v6975_v45 }
 0x405   :  { %6194 = vmatprep.subr.bf16.mxu0 %v6981_v46  ;;  %v7076_v46 = vcombine.low %v2658_v14, %v2674_v15  ;;  %v2783_v14 = vld [vmem:[%s10728_s5 + $0xa48] sm:$0xff] }
 0x406   :  { %v2799_v15 = vld [vmem:[%s10728_s5 + $0xac8] sm:$0xff] }
 0x407   :  { %6072 = vmatpush1.bf16.msra.mxu1 %v6974_v53  ;;  %v2719_v53 = vld [vmem:[%s10728_s5 + $0x848] sm:$0xff] }
 0x408   :  { %6195 = vmatpush1.bf16.msra.mxu0 %v6980_v54  ;;  %6073 = vmatprep.subr.bf16.mxu1 %v7007_v55  ;;  %v2735_v54 = vld [vmem:[%s10728_s5 + $0x8c8] sm:$0xff]  ;;  %v2722_v55 = vld [vmem:[%s10728_s5 + $0x860] sm:$0xff] }
 0x409   :  { %6196 = vmatprep.subr.bf16.mxu0 %v7013_v57  ;;  %v2738_v57 = vld [vmem:[%s10728_s5 + $0x8e0] sm:$0xff]  ;;  %v7134_v8 = vcombine.low %v2719_v53, %v2735_v54 }
 0x40a   :  { %v7140_v10 = vcombine.low %v2722_v55, %v2738_v57 }
 0x40b   :  { %6074 = vmatpush1.bf16.msra.mxu1 %v7006_v1  ;;  %v7135_v1 = vcombine.high %v2719_v53, %v2735_v54  ;;  %v2898_v53 = vld [vmem:[%s10728_s5 + $0xde0] sm:$0xff] }
 0x40c   :  { %6197 = vmatpush1.bf16.msra.mxu0 %v7012_v5  ;;  %6075 = vmatprep.subr.bf16.mxu1 %v7039_v6  ;;  %v7141_v6 = vcombine.high %v2722_v55, %v2738_v57 }
 0x40d   :  { %v5771_v22 = vpop.f32.mrb[8].mxu1  ;;  %v5894_v23 = vpop.f32.mrb[12].mxu0  ;;  %6198 = vmatprep.subr.bf16.mxu0 %v7045_v7  ;;  %v2751_v7 = vld [vmem:[%s10728_s5 + $0x948] sm:$0xff] }
 0x40e   :  { %v5772_v28 = vadd.f32 %v5771_v22, %v2987_v11  ;;  %v10082_v29 = vadd.f32 %v5894_v23, %v3011_v13  ;;  %v5773_v30 = vpop.f32.mrb[9].mxu1  ;;  %v5896_v31 = vpop.f32.mrb[13].mxu0  ;;  %v7167_v11 = vcombine.high %v2751_v7, %v2767_v9  ;;  %v7173_v13 = vcombine.high %v2754_v32, %v2770_v41  ;;  %v2815_v23 = vld [vmem:[%s10728_s5 + $0xb48] sm:$0xff] }
 0x40f   :  { %v5774_v17 = vadd.f32 %v5773_v30, %v2991_v16  ;;  %v10090_v37 = vadd.f32 %v5896_v31, %v3015_v18  ;;  %v5775_v38 = vpop.f32.mrb[10].mxu1  ;;  %v5898_v39 = vpop.f32.mrb[14].mxu0  ;;  %6076 = vmatpush1.bf16.msra.mxu1 %v7038_v19  ;;  %v2786_v16 = vld [vmem:[%s10728_s5 + $0xa60] sm:$0xff]  ;;  %v7166_v19 = vcombine.low %v2751_v7, %v2767_v9 }
 0x410   :  { %6199 = vmatpush1.bf16.msra.mxu0 %v7044_v20  ;;  %v5776_v44 = vpop.f32.mrb[11].mxu1  ;;  %v5899_v45 = vpop.f32.mrb[15].mxu0  ;;  %6077 = vmatprep.subr.bf16.mxu1 %v7071_v21  ;;  %v2802_v18 = vld [vmem:[%s10728_s5 + $0xae0] sm:$0xff]  ;;  %v7172_v20 = vcombine.low %v2754_v32, %v2770_v41  ;;  %v7199_v21 = vcombine.high %v2783_v14, %v2799_v15  ;;  %v2943_v32 = vld [vmem:[%s10728_s5 + $0xf48] sm:$0xff] }
 0x411   :  { %v6385_v50 = vcombine.low %v5772_v28, %v5774_v17  ;;  %v6418_v51 = vcombine.low %v10082_v29, %v10090_v37  ;;  %6200 = vmatprep.subr.bf16.mxu0 %v7077_v24  ;;  %v7205_v22 = vcombine.high %v2786_v16, %v2802_v18  ;;  %v2831_v24 = vld [vmem:[%s10728_s5 + $0xbc8] sm:$0xff]  ;;  %v7198_v28 = vcombine.low %v2783_v14, %v2799_v15  ;;  %v2850_v38 = vld [vmem:[%s10728_s5 + $0xc60] sm:$0xff] }
 0x412   :  { %v7204_v30 = vcombine.low %v2786_v16, %v2802_v18  ;;  %v7231_v31 = vcombine.high %v2815_v23, %v2831_v24  ;;  %v2863_v17 = vld [vmem:[%s10728_s5 + $0xcc8] sm:$0xff]  ;;  %v2866_v39 = vld [vmem:[%s10728_s5 + $0xce0] sm:$0xff]  ;;  %v7236_v44 = vcombine.low %v2818_v12, %v2834_v26  ;;  %v2465_v16 = vld [vmem:[%s10728_s5 + $0x58] sm:$0xff] }
 0x413   :  { %v6399_v61 = vrot.slane %v6385_v50, %v8066_v49  ;;  %6078 = vmatpush1.bf16.msra.mxu1 %v7070_v40  ;;  %v7230_v40 = vcombine.low %v2815_v23, %v2831_v24  ;;  %v7263_v45 = vcombine.high %v2847_v35, %v2863_v17  ;;  %v2895_v50 = vld [vmem:[%s10728_s5 + $0xdc8] sm:$0xff]  ;;  %v7262_v54 = vcombine.low %v2847_v35, %v2863_v17  ;;  %v2481_v18 = vld [vmem:[%s10728_s5 + $0xd8] sm:$0xff] }
 0x414   :  { %6201 = vmatpush1.bf16.msra.mxu0 %v7076_v46  ;;  %6079 = vmatprep.subr.bf16.mxu1 %v7103_v48  ;;  %v7269_v46 = vcombine.high %v2850_v38, %v2866_v39  ;;  %v2879_v48 = vld [vmem:[%s10728_s5 + $0xd48] sm:$0xff]  ;;  %v7268_v55 = vcombine.low %v2850_v38, %v2866_v39  ;;  %v6883_v23 = vcombine.high %v2465_v16, %v2481_v18  ;;  %v2497_v12 = vld [vmem:[%s10728_s5 + $0x158] sm:$0xff] }
 0x415   :  { %v6400_v5 = vcombine.low %v6392_v60, %v6399_v61  ;;  %6202 = vmatprep.subr.bf16.mxu0 %v7109_v52  ;;  %v2882_v52 = vld [vmem:[%s10728_s5 + $0xd60] sm:$0xff]  ;;  %v7295_v57 = vcombine.high %v2879_v48, %v2895_v50  ;;  %v2911_v61 = vld [vmem:[%s10728_s5 + $0xe48] sm:$0xff]  ;;  %v2513_v26 = vld [vmem:[%s10728_s5 + $0x1d8] sm:$0xff] }
 0x416   :  { %v7301_v60 = vcombine.high %v2882_v52, %v2898_v53  ;;  %v2959_v41 = vld [vmem:[%s10728_s5 + $0xfc8] sm:$0xff]  ;;  %v6915_v35 = vcombine.high %v2497_v12, %v2513_v26  ;;  %v2529_v17 = vld [vmem:[%s10728_s5 + $0x258] sm:$0xff] }
 0x417   :  { %6528 = vst [vmem:[%s10732_s7] sm:$0xff] %v6400_v5  ;;  %6080 = vmatpush1.bf16.msra.mxu1 %v7102_v62  ;;  %v2927_v62 = vld [vmem:[%s10728_s5 + $0xec8] sm:$0xff]  ;;  %v7294_v5 = vcombine.low %v2879_v48, %v2895_v50  ;;  %v7359_v14 = vcombine.high %v2943_v32, %v2959_v41  ;;  %v2545_v38 = vld [vmem:[%s10728_s5 + $0x2d8] sm:$0xff] }
 0x418   :  { %6203 = vmatpush1.bf16.msra.mxu0 %v7108_v0  ;;  %6081 = vmatprep.subr.bf16.mxu1 %v7135_v1  ;;  %v2914_v0 = vld [vmem:[%s10728_s5 + $0xe60] sm:$0xff]  ;;  %v7327_v7 = vcombine.high %v2911_v61, %v2927_v62  ;;  %v6947_v48 = vcombine.high %v2529_v17, %v2545_v38 }
 0x419   :  { %6204 = vmatprep.subr.bf16.mxu0 %v7141_v6  ;;  %v2930_v1 = vld [vmem:[%s10728_s5 + $0xee0] sm:$0xff]  ;;  %v7300_v6 = vcombine.low %v2882_v52, %v2898_v53  ;;  %v2561_v52 = vld [vmem:[%s10728_s5 + $0x358] sm:$0xff] }
 0x41a   :  { %v7333_v9 = vcombine.high %v2914_v0, %v2930_v1  ;;  %v2577_v53 = vld [vmem:[%s10728_s5 + $0x3d8] sm:$0xff] }
 0x41b   :  { %6082 = vmatpush1.bf16.msra.mxu1 %v7134_v8  ;;  %v2946_v8 = vld [vmem:[%s10728_s5 + $0xf60] sm:$0xff] }
 0x41c   :  { %6205 = vmatpush1.bf16.msra.mxu0 %v7140_v10  ;;  %6083 = vmatprep.subr.bf16.mxu1 %v7167_v11  ;;  %v2962_v10 = vld [vmem:[%s10728_s5 + $0xfe0] sm:$0xff]  ;;  %v7326_v11 = vcombine.low %v2911_v61, %v2927_v62  ;;  %v6979_v61 = vcombine.high %v2561_v52, %v2577_v53 }
 0x41d   :  { %6206 = vmatprep.subr.bf16.mxu0 %v7173_v13  ;;  %v7332_v13 = vcombine.low %v2914_v0, %v2930_v1  ;;  %v7365_v15 = vcombine.high %v2946_v8, %v2962_v10  ;;  %v2593_v0 = vld [vmem:[%s10728_s5 + $0x458] sm:$0xff] }
 0x41e   :  { %v2609_v1 = vld [vmem:[%s10728_s5 + $0x4d8] sm:$0xff] }
 0x41f   :  { %6084 = vmatpush1.bf16.msra.mxu1 %v7166_v19  ;;  %v2468_v19 = vld [vmem:[%s10728_s5 + $0x70] sm:$0xff] }
 0x420   :  { %6207 = vmatpush1.bf16.msra.mxu0 %v7172_v20  ;;  %6085 = vmatprep.subr.bf16.mxu1 %v7199_v21  ;;  %v2484_v20 = vld [vmem:[%s10728_s5 + $0xf0] sm:$0xff]  ;;  %v7358_v21 = vcombine.low %v2943_v32, %v2959_v41  ;;  %v7011_v32 = vcombine.high %v2593_v0, %v2609_v1 }
 0x421   :  { %6208 = vmatprep.subr.bf16.mxu0 %v7205_v22  ;;  %v7364_v22 = vcombine.low %v2946_v8, %v2962_v10  ;;  %v6889_v24 = vcombine.high %v2468_v19, %v2484_v20  ;;  %v2625_v8 = vld [vmem:[%s10728_s5 + $0x558] sm:$0xff] }
 0x422   :  { %v2641_v10 = vld [vmem:[%s10728_s5 + $0x5d8] sm:$0xff] }
 0x423   :  { %6086 = vmatpush1.bf16.msra.mxu1 %v7198_v28  ;;  %v6882_v28 = vcombine.low %v2465_v16, %v2481_v18  ;;  %v10278_v16 = vsub.s32 7, %v8048_v43 }
 0x424   :  { %6209 = vmatpush1.bf16.msra.mxu0 %v7204_v30  ;;  %6087 = vmatprep.subr.bf16.mxu1 %v7231_v31  ;;  %v2500_v30 = vld [vmem:[%s10728_s5 + $0x170] sm:$0xff] }
 0x425   :  { %6210 = vmatprep.subr.bf16.mxu0 %v7237_v34  ;;  %v2516_v31 = vld [vmem:[%s10728_s5 + $0x1f0] sm:$0xff]  ;;  %v6888_v34 = vcombine.low %v2468_v19, %v2484_v20  ;;  %v7043_v19 = vcombine.high %v2625_v8, %v2641_v10 }
 0x426   :  { %v6921_v39 = vcombine.high %v2500_v30, %v2516_v31 }
 0x427   :  { %6088 = vmatpush1.bf16.msra.mxu1 %v7230_v40  ;;  %v2532_v40 = vld [vmem:[%s10728_s5 + $0x270] sm:$0xff] }
 0x428   :  { %6211 = vmatpush1.bf16.msra.mxu0 %v7236_v44  ;;  %6089 = vmatprep.subr.bf16.mxu1 %v7263_v45  ;;  %v2548_v44 = vld [vmem:[%s10728_s5 + $0x2f0] sm:$0xff]  ;;  %v6914_v45 = vcombine.low %v2497_v12, %v2513_v26  ;;  %v3027_v12 = vrot.slane %v10054_v2, %v9819_v63  ;;  %v3007_v26 = vrot.slane %v9830_v3, %v10278_v16 }
 0x429   :  { %6212 = vmatprep.subr.bf16.mxu0 %v7269_v46  ;;  %v6920_v46 = vcombine.low %v2500_v30, %v2516_v31  ;;  %v6953_v50 = vcombine.high %v2532_v40, %v2548_v44  ;;  %v3031_v30 = vrot.slane %v10054_v2, %v9833_v4 }
 0x42b   :  { %6090 = vmatpush1.bf16.msra.mxu1 %v7262_v54  ;;  %v2564_v54 = vld [vmem:[%s10728_s5 + $0x370] sm:$0xff] }
 0x42c   :  { %6213 = vmatpush1.bf16.msra.mxu0 %v7268_v55  ;;  %6091 = vmatprep.subr.bf16.mxu1 %v7295_v57  ;;  %v2580_v55 = vld [vmem:[%s10728_s5 + $0x3f0] sm:$0xff]  ;;  %v6946_v57 = vcombine.low %v2529_v17, %v2545_v38  ;;  %v2689_v38 = vld [vmem:[%s10728_s5 + $0x758] sm:$0xff] }
 0x42d   :  { %6214 = vmatprep.subr.bf16.mxu0 %v7301_v60  ;;  %v6952_v60 = vcombine.low %v2532_v40, %v2548_v44  ;;  %v6985_v62 = vcombine.high %v2564_v54, %v2580_v55 }
 0x42f   :  { %6092 = vmatpush1.bf16.msra.mxu1 %v7294_v5  ;;  %v2596_v5 = vld [vmem:[%s10728_s5 + $0x470] sm:$0xff] }
 0x430   :  { %6215 = vmatpush1.bf16.msra.mxu0 %v7300_v6  ;;  %6093 = vmatprep.subr.bf16.mxu1 %v7327_v7  ;;  %v2612_v6 = vld [vmem:[%s10728_s5 + $0x4f0] sm:$0xff]  ;;  %v6978_v7 = vcombine.low %v2561_v52, %v2577_v53 }
 0x431   :  { %6216 = vmatprep.subr.bf16.mxu0 %v7333_v9  ;;  %v6984_v9 = vcombine.low %v2564_v54, %v2580_v55  ;;  %v7017_v41 = vcombine.high %v2596_v5, %v2612_v6  ;;  %v7016_v18 = vcombine.low %v2596_v5, %v2612_v6  ;;  %v2721_v6 = vld [vmem:[%s10728_s5 + $0x858] sm:$0xff] }
 0x433   :  { %6094 = vmatpush1.bf16.msra.mxu1 %v7326_v11  ;;  %v10269_v11 = vsub.s32 6, %v8048_v43  ;;  %v2660_v43 = vld [vmem:[%s10728_s5 + $0x670] sm:$0xff] }
 0x434   :  { %6217 = vmatpush1.bf16.msra.mxu0 %v7332_v13  ;;  %6095 = vmatprep.subr.bf16.mxu1 %v7359_v14  ;;  %v2628_v13 = vld [vmem:[%s10728_s5 + $0x570] sm:$0xff] }
 0x435   :  { %6218 = vmatprep.subr.bf16.mxu0 %v7365_v15  ;;  %v2644_v14 = vld [vmem:[%s10728_s5 + $0x5f0] sm:$0xff]  ;;  %v7010_v15 = vcombine.low %v2593_v0, %v2609_v1 }
 0x436   :  { %v7049_v20 = vcombine.high %v2628_v13, %v2644_v14  ;;  %v7048_v31 = vcombine.low %v2628_v13, %v2644_v14 }
 0x437   :  { %6096 = vmatpush1.bf16.msra.mxu1 %v7358_v21  ;;  %v2657_v21 = vld [vmem:[%s10728_s5 + $0x658] sm:$0xff] }
 0x438   :  { %6219 = vmatpush1.bf16.msra.mxu0 %v7364_v22  ;;  %6147 = vmatprep.subr.bf16.mxu1 %v6883_v23  ;;  %v2673_v22 = vld [vmem:[%s10728_s5 + $0x6d8] sm:$0xff]  ;;  %v3003_v23 = vrot.slane %v9830_v3, %v10269_v11 }
 0x439   :  { %6270 = vmatprep.subr.bf16.mxu0 %v6889_v24  ;;  %v2676_v24 = vld [vmem:[%s10728_s5 + $0x6f0] sm:$0xff]  ;;  %v7074_v54 = vcombine.low %v2657_v21, %v2673_v22 }
 0x43a   :  { %6098 = vmatmul.mubr.bf16.vlgmr.msra.gmra.mrb[24].mxu1 %v9180_v25  ;;  %v7081_v17 = vcombine.high %v2660_v43, %v2676_v24 }
 0x43b   :  { %6221 = vmatmul.mubr.bf16.vlgmr.msra.gmra.mrb[28].mxu0 %v9180_v25  ;;  %6148 = vmatpush1.bf16.msra.mxu1 %v6882_v28  ;;  %v7042_v28 = vcombine.low %v2625_v8, %v2641_v10  ;;  %v6409_v8 = vrot.slane %v6401_v42, %v8066_v49  ;;  %v2772_v42 = vld [vmem:[%s10728_s5 + $0x9f0] sm:$0xff] }
 0x43c   :  { %6179 = vmatprep.mubr.bf16.mxu1 %v9178_v36  ;;  %6271 = vmatpush1.bf16.msra.mxu0 %v6888_v34  ;;  %v7075_v34 = vcombine.high %v2657_v21, %v2673_v22 }
 0x43d   :  { %6302 = vmatprep.mubr.bf16.mxu0 %v9178_v36  ;;  %6149 = vmatprep.subr.bf16.mxu1 %v6915_v35 }
 0x43e   :  { %6272 = vmatprep.subr.bf16.mxu0 %v6921_v39  ;;  %v2705_v39 = vld [vmem:[%s10728_s5 + $0x7d8] sm:$0xff] }
 0x43f   :  { %6150 = vmatpush1.bf16.msra.mxu1 %v6914_v45  ;;  %v2692_v45 = vld [vmem:[%s10728_s5 + $0x770] sm:$0xff]  ;;  %v7106_v13 = vcombine.low %v2689_v38, %v2705_v39 }
 0x440   :  { %6273 = vmatpush1.bf16.msra.mxu0 %v6920_v46  ;;  %6151 = vmatprep.subr.bf16.mxu1 %v6947_v48  ;;  %v2708_v46 = vld [vmem:[%s10728_s5 + $0x7f0] sm:$0xff] }
 0x441   :  { %6274 = vmatprep.subr.bf16.mxu0 %v6953_v50  ;;  %v7113_v5 = vcombine.high %v2692_v45, %v2708_v46  ;;  %v7112_v14 = vcombine.low %v2692_v45, %v2708_v46 }
 0x443   :  { %6152 = vmatpush1.bf16.msra.mxu1 %v6946_v57 }
 0x444   :  { %6275 = vmatpush1.bf16.msra.mxu0 %v6952_v60  ;;  %6153 = vmatprep.subr.bf16.mxu1 %v6979_v61  ;;  %v7080_v61 = vcombine.low %v2660_v43, %v2676_v24  ;;  %v7177_v43 = vcombine.high %v2756_v33, %v2772_v42  ;;  %v2785_v24 = vld [vmem:[%s10728_s5 + $0xa58] sm:$0xff] }
 0x445   :  { %6276 = vmatprep.subr.bf16.mxu0 %v6985_v62  ;;  %v7107_v62 = vcombine.high %v2689_v38, %v2705_v39  ;;  %v2833_v38 = vld [vmem:[%s10728_s5 + $0xbd8] sm:$0xff]  ;;  %v2820_v39 = vld [vmem:[%s10728_s5 + $0xb70] sm:$0xff] }
 0x447   :  { %6154 = vmatpush1.bf16.msra.mxu1 %v6978_v7  ;;  %v2737_v7 = vld [vmem:[%s10728_s5 + $0x8d8] sm:$0xff] }
 0x448   :  { %6277 = vmatpush1.bf16.msra.mxu0 %v6984_v9  ;;  %6155 = vmatprep.subr.bf16.mxu1 %v7011_v32  ;;  %v2724_v32 = vld [vmem:[%s10728_s5 + $0x870] sm:$0xff]  ;;  %v7138_v21 = vcombine.low %v2721_v6, %v2737_v7 }
 0x449   :  { %6278 = vmatprep.subr.bf16.mxu0 %v7017_v41  ;;  %v2740_v41 = vld [vmem:[%s10728_s5 + $0x8f0] sm:$0xff] }
 0x44a   :  { %v7144_v22 = vcombine.low %v2724_v32, %v2740_v41 }
 0x44b   :  { %6156 = vmatpush1.bf16.msra.mxu1 %v7010_v15  ;;  %v7139_v15 = vcombine.high %v2721_v6, %v2737_v7  ;;  %v2900_v6 = vld [vmem:[%s10728_s5 + $0xdf0] sm:$0xff] }
 0x44c   :  { %6279 = vmatpush1.bf16.msra.mxu0 %v7016_v18  ;;  %6157 = vmatprep.subr.bf16.mxu1 %v7043_v19  ;;  %v7145_v19 = vcombine.high %v2724_v32, %v2740_v41 }
 0x44d   :  { %v5853_v35 = vpop.f32.mrb[12].mxu1  ;;  %6280 = vmatprep.subr.bf16.mxu0 %v7049_v20  ;;  %v2753_v20 = vld [vmem:[%s10728_s5 + $0x958] sm:$0xff] }
 0x44e   :  { %v5854_v3 = vadd.f32 %v5853_v35, %v3003_v23  ;;  %v5976_v40 = vpop.f32.mrb[16].mxu0  ;;  %v5855_v44 = vpop.f32.mrb[13].mxu1  ;;  %v7171_v23 = vcombine.high %v2753_v20, %v2769_v27 }
 0x44f   :  { %v10312_v48 = vadd.f32 %v5976_v40, %v3027_v12  ;;  %v5856_v50 = vadd.f32 %v5855_v44, %v3007_v26  ;;  %v5978_v52 = vpop.f32.mrb[17].mxu0  ;;  %v5857_v53 = vpop.f32.mrb[14].mxu1  ;;  %6158 = vmatpush1.bf16.msra.mxu1 %v7042_v28  ;;  %v2801_v12 = vld [vmem:[%s10728_s5 + $0xad8] sm:$0xff]  ;;  %v2788_v26 = vld [vmem:[%s10728_s5 + $0xa70] sm:$0xff] }
 0x450   :  { %v10314_v55 = vadd.f32 %v5978_v52, %v3031_v30  ;;  %v5980_v57 = vpop.f32.mrb[18].mxu0  ;;  %6281 = vmatpush1.bf16.msra.mxu0 %v7048_v31  ;;  %v5858_v60 = vpop.f32.mrb[15].mxu1  ;;  %6159 = vmatprep.subr.bf16.mxu1 %v7075_v34  ;;  %v2804_v28 = vld [vmem:[%s10728_s5 + $0xaf0] sm:$0xff]  ;;  %v7170_v30 = vcombine.low %v2753_v20, %v2769_v27  ;;  %v7176_v31 = vcombine.low %v2756_v33, %v2772_v42  ;;  %v2865_v52 = vld [vmem:[%s10728_s5 + $0xcd8] sm:$0xff] }
 0x451   :  { %v6402_v0 = vcombine.low %v5854_v3, %v5856_v50  ;;  %v5981_v1 = vpop.f32.mrb[19].mxu0  ;;  %6282 = vmatprep.subr.bf16.mxu0 %v7081_v17  ;;  %v7203_v34 = vcombine.high %v2785_v24, %v2801_v12  ;;  %v7209_v35 = vcombine.high %v2788_v26, %v2804_v28  ;;  %v2817_v17 = vld [vmem:[%s10728_s5 + $0xb58] sm:$0xff]  ;;  %v2836_v3 = vld [vmem:[%s10728_s5 + $0xbf0] sm:$0xff]  ;;  %v7202_v40 = vcombine.low %v2785_v24, %v2801_v12 }
 0x452   :  { %v6435_v9 = vcombine.low %v10312_v48, %v10314_v55  ;;  %v7208_v44 = vcombine.low %v2788_v26, %v2804_v28  ;;  %v7235_v45 = vcombine.high %v2817_v17, %v2833_v38  ;;  %v7241_v46 = vcombine.high %v2820_v39, %v2836_v3  ;;  %v2849_v50 = vld [vmem:[%s10728_s5 + $0xc58] sm:$0xff]  ;;  %v2852_v53 = vld [vmem:[%s10728_s5 + $0xc70] sm:$0xff]  ;;  %v2467_v26 = vld [vmem:[%s10728_s5 + $0x68] sm:$0xff] }
 0x453   :  { %v6416_v10 = vrot.slane %v6402_v0, %v8066_v49  ;;  %6160 = vmatpush1.bf16.msra.mxu1 %v7074_v54  ;;  %v2868_v54 = vld [vmem:[%s10728_s5 + $0xcf0] sm:$0xff]  ;;  %v7234_v57 = vcombine.low %v2817_v17, %v2833_v38  ;;  %v7240_v60 = vcombine.low %v2820_v39, %v2836_v3  ;;  %v2881_v0 = vld [vmem:[%s10728_s5 + $0xd58] sm:$0xff]  ;;  %v7266_v7 = vcombine.low %v2849_v50, %v2865_v52  ;;  %v2483_v28 = vld [vmem:[%s10728_s5 + $0xe8] sm:$0xff] }
 0x454   :  { %6283 = vmatpush1.bf16.msra.mxu0 %v7080_v61  ;;  %6161 = vmatprep.subr.bf16.mxu1 %v7107_v62  ;;  %v7267_v61 = vcombine.high %v2849_v50, %v2865_v52  ;;  %v7273_v62 = vcombine.high %v2852_v53, %v2868_v54  ;;  %v2897_v1 = vld [vmem:[%s10728_s5 + $0xdd8] sm:$0xff]  ;;  %v7272_v32 = vcombine.low %v2852_v53, %v2868_v54  ;;  %v2515_v17 = vld [vmem:[%s10728_s5 + $0x1e8] sm:$0xff] }
 0x455   :  { %v6417_v18 = vcombine.low %v6409_v8, %v6416_v10  ;;  %6284 = vmatprep.subr.bf16.mxu0 %v7113_v5  ;;  %v2884_v5 = vld [vmem:[%s10728_s5 + $0xd70] sm:$0xff]  ;;  %v7299_v41 = vcombine.high %v2881_v0, %v2897_v1  ;;  %v2913_v10 = vld [vmem:[%s10728_s5 + $0xe58] sm:$0xff]  ;;  %v6886_v38 = vcombine.low %v2467_v26, %v2483_v28  ;;  %v2531_v3 = vld [vmem:[%s10728_s5 + $0x268] sm:$0xff] }
 0x456   :  { %v7305_v8 = vcombine.high %v2884_v5, %v2900_v6  ;;  %v2945_v33 = vld [vmem:[%s10728_s5 + $0xf58] sm:$0xff]  ;;  %v2579_v50 = vld [vmem:[%s10728_s5 + $0x3e8] sm:$0xff] }
 0x457   :  { %6529 = vst [vmem:[%s10732_s7 + $0x8] sm:$0xff] %v6417_v18  ;;  %6162 = vmatpush1.bf16.msra.mxu1 %v7106_v13  ;;  %v2929_v13 = vld [vmem:[%s10728_s5 + $0xed8] sm:$0xff]  ;;  %v7298_v18 = vcombine.low %v2881_v0, %v2897_v1  ;;  %v2595_v54 = vld [vmem:[%s10728_s5 + $0x468] sm:$0xff] }
 0x458   :  { %6285 = vmatpush1.bf16.msra.mxu0 %v7112_v14  ;;  %6163 = vmatprep.subr.bf16.mxu1 %v7139_v15  ;;  %v2916_v14 = vld [vmem:[%s10728_s5 + $0xe70] sm:$0xff]  ;;  %v7331_v20 = vcombine.high %v2913_v10, %v2929_v13  ;;  %v2961_v42 = vld [vmem:[%s10728_s5 + $0xfd8] sm:$0xff]  ;;  %v2643_v0 = vld [vmem:[%s10728_s5 + $0x5e8] sm:$0xff] }
 0x459   :  { %6286 = vmatprep.subr.bf16.mxu0 %v7145_v19  ;;  %v2932_v15 = vld [vmem:[%s10728_s5 + $0xef0] sm:$0xff]  ;;  %v7304_v19 = vcombine.low %v2884_v5, %v2900_v6  ;;  %v7363_v24 = vcombine.high %v2945_v33, %v2961_v42 }
 0x45a   :  { %v7337_v27 = vcombine.high %v2916_v14, %v2932_v15  ;;  %v10464_v5 = vld [vmem:[%s10731_s6 + $0x10] sm:$0xff] }
 0x45b   :  { %6164 = vmatpush1.bf16.msra.mxu1 %v7138_v21  ;;  %v2948_v21 = vld [vmem:[%s10728_s5 + $0xf70] sm:$0xff] }
 0x45c   :  { %6287 = vmatpush1.bf16.msra.mxu0 %v7144_v22  ;;  %6165 = vmatprep.subr.bf16.mxu1 %v7171_v23  ;;  %v2964_v22 = vld [vmem:[%s10728_s5 + $0xff0] sm:$0xff]  ;;  %v7330_v23 = vcombine.low %v2913_v10, %v2929_v13  ;;  %v3023_v10 = vrot.slane %v10054_v2, %v8926_v59 }
 0x45d   :  { %6288 = vmatprep.subr.bf16.mxu0 %v7177_v43  ;;  %v7336_v43 = vcombine.low %v2916_v14, %v2932_v15  ;;  %v7369_v12 = vcombine.high %v2948_v21, %v2964_v22  ;;  %v3047_v14 = vrot.slane %v10464_v5, %v8923_v58 }
 0x45f   :  { %6166 = vmatpush1.bf16.msra.mxu1 %v7170_v30  ;;  %v7362_v30 = vcombine.low %v2945_v33, %v2961_v42 }
 0x460   :  { %6289 = vmatpush1.bf16.msra.mxu0 %v7176_v31  ;;  %6167 = vmatprep.subr.bf16.mxu1 %v7203_v34  ;;  %v7368_v31 = vcombine.low %v2948_v21, %v2964_v22  ;;  %v6887_v34 = vcombine.high %v2467_v26, %v2483_v28 }
 0x461   :  { %6290 = vmatprep.subr.bf16.mxu0 %v7209_v35  ;;  %v2499_v35 = vld [vmem:[%s10728_s5 + $0x168] sm:$0xff] }
 0x462   :  { %v6919_v39 = vcombine.high %v2499_v35, %v2515_v17 }
 0x463   :  { %6168 = vmatpush1.bf16.msra.mxu1 %v7202_v40  ;;  %v2547_v40 = vld [vmem:[%s10728_s5 + $0x2e8] sm:$0xff] }
 0x464   :  { %6291 = vmatpush1.bf16.msra.mxu0 %v7208_v44  ;;  %6169 = vmatprep.subr.bf16.mxu1 %v7235_v45  ;;  %v6918_v44 = vcombine.low %v2499_v35, %v2515_v17  ;;  %v6951_v45 = vcombine.high %v2531_v3, %v2547_v40  ;;  %v6950_v52 = vcombine.low %v2531_v3, %v2547_v40  ;;  %v2739_v35 = vld [vmem:[%s10728_s5 + $0x8e8] sm:$0xff] }
 0x465   :  { %6292 = vmatprep.subr.bf16.mxu0 %v7241_v46  ;;  %v2563_v46 = vld [vmem:[%s10728_s5 + $0x368] sm:$0xff] }
 0x466   :  { %v6983_v53 = vcombine.high %v2563_v46, %v2579_v50 }
 0x467   :  { %6170 = vmatpush1.bf16.msra.mxu1 %v7234_v57  ;;  %v2611_v57 = vld [vmem:[%s10728_s5 + $0x4e8] sm:$0xff] }
 0x468   :  { %6293 = vmatpush1.bf16.msra.mxu0 %v7240_v60  ;;  %6171 = vmatprep.subr.bf16.mxu1 %v7267_v61  ;;  %v6982_v60 = vcombine.low %v2563_v46, %v2579_v50  ;;  %v7015_v61 = vcombine.high %v2595_v54, %v2611_v57  ;;  %v7014_v1 = vcombine.low %v2595_v54, %v2611_v57  ;;  %v2771_v46 = vld [vmem:[%s10728_s5 + $0x9e8] sm:$0xff] }
 0x469   :  { %6294 = vmatprep.subr.bf16.mxu0 %v7273_v62  ;;  %v2627_v62 = vld [vmem:[%s10728_s5 + $0x568] sm:$0xff] }
 0x46a   :  { %v7047_v6 = vcombine.high %v2627_v62, %v2643_v0  ;;  %v7046_v13 = vcombine.low %v2627_v62, %v2643_v0  ;;  %v2803_v50 = vld [vmem:[%s10728_s5 + $0xae8] sm:$0xff] }
 0x46b   :  { %6172 = vmatpush1.bf16.msra.mxu1 %v7266_v7  ;;  %v2659_v7 = vld [vmem:[%s10728_s5 + $0x668] sm:$0xff] }
 0x46c   :  { %6295 = vmatpush1.bf16.msra.mxu0 %v7272_v32  ;;  %6173 = vmatprep.subr.bf16.mxu1 %v7299_v41  ;;  %v2675_v32 = vld [vmem:[%s10728_s5 + $0x6e8] sm:$0xff]  ;;  %v3019_v41 = vrot.slane %v10054_v2, %v9018_v47 }
 0x46d   :  { %6296 = vmatprep.subr.bf16.mxu0 %v7305_v8  ;;  %v3043_v8 = vrot.slane %v10464_v5, %v8915_v56  ;;  %v7079_v15 = vcombine.high %v2659_v7, %v2675_v32  ;;  %v2819_v54 = vld [vmem:[%s10728_s5 + $0xb68] sm:$0xff] }
 0x46e   :  { %v2835_v57 = vld [vmem:[%s10728_s5 + $0xbe8] sm:$0xff] }
 0x46f   :  { %6174 = vmatpush1.bf16.msra.mxu1 %v7298_v18  ;;  %v2851_v62 = vld [vmem:[%s10728_s5 + $0xc68] sm:$0xff] }
 0x470   :  { %6297 = vmatpush1.bf16.msra.mxu0 %v7304_v19  ;;  %6175 = vmatprep.subr.bf16.mxu1 %v7331_v20  ;;  %v2691_v19 = vld [vmem:[%s10728_s5 + $0x768] sm:$0xff] }
 0x471   :  { %6298 = vmatprep.subr.bf16.mxu0 %v7337_v27  ;;  %v2707_v20 = vld [vmem:[%s10728_s5 + $0x7e8] sm:$0xff] }
 0x472   :  { %v7111_v28 = vcombine.high %v2691_v19, %v2707_v20  ;;  %v7110_v3 = vcombine.low %v2691_v19, %v2707_v20  ;;  %v2867_v0 = vld [vmem:[%s10728_s5 + $0xce8] sm:$0xff] }
 0x473   :  { %6176 = vmatpush1.bf16.msra.mxu1 %v7330_v23  ;;  %v2963_v19 = vld [vmem:[%s10728_s5 + $0xfe8] sm:$0xff] }
 0x474   :  { %6299 = vmatpush1.bf16.msra.mxu0 %v7336_v43  ;;  %6177 = vmatprep.subr.bf16.mxu1 %v7363_v24  ;;  %v7078_v43 = vcombine.low %v2659_v7, %v2675_v32  ;;  %v2883_v7 = vld [vmem:[%s10728_s5 + $0xd68] sm:$0xff] }
 0x475   :  { %6300 = vmatprep.subr.bf16.mxu0 %v7369_v12  ;;  %v2899_v32 = vld [vmem:[%s10728_s5 + $0xde8] sm:$0xff] }
 0x477   :  { %6178 = vmatpush1.bf16.msra.mxu1 %v7362_v30 }
 0x478   :  { %6301 = vmatpush1.bf16.msra.mxu0 %v7368_v31  ;;  %6229 = vmatprep.subr.bf16.mxu1 %v6887_v34  ;;  %v2723_v34 = vld [vmem:[%s10728_s5 + $0x868] sm:$0xff] }
 0x479   :  { %v7143_v40 = vcombine.high %v2723_v34, %v2739_v35  ;;  %v7142_v29 = vcombine.low %v2723_v34, %v2739_v35  ;;  %v2565_v35 = vld [vmem:[%s10728_s5 + $0x378] sm:$0xff] }
 0x47a   :  { %6180 = vmatmul.mubr.bf16.vlgmr.msra.gmra.mrb[28].mxu1 %v9180_v25 }
 0x47b   :  { %6303 = vmatmul.mubr.bf16.vlgmr.msra.gmra.mrb[32].mxu0 %v9180_v25  ;;  %6230 = vmatpush1.bf16.msra.mxu1 %v6886_v38  ;;  %v6426_v38 = vrot.slane %v6418_v51, %v8066_v49  ;;  %v2787_v51 = vld [vmem:[%s10728_s5 + $0xa68] sm:$0xff] }
 0x47c   :  { %6261 = vmatprep.mubr.bf16.mxu1 %v9178_v36  ;;  %6231 = vmatprep.subr.bf16.mxu1 %v6919_v39 }
 0x47f   :  { %6232 = vmatpush1.bf16.msra.mxu1 %v6918_v44 }
 0x480   :  { %6233 = vmatprep.subr.bf16.mxu1 %v6951_v45  ;;  %v2755_v45 = vld [vmem:[%s10728_s5 + $0x968] sm:$0xff] }
 0x481   :  { %v7175_v37 = vcombine.high %v2755_v45, %v2771_v46 }
 0x483   :  { %6234 = vmatpush1.bf16.msra.mxu1 %v6950_v52  ;;  %v7174_v52 = vcombine.low %v2755_v45, %v2771_v46  ;;  %v2629_v46 = vld [vmem:[%s10728_s5 + $0x578] sm:$0xff] }
 0x484   :  { %6235 = vmatprep.subr.bf16.mxu1 %v6983_v53  ;;  %v7207_v53 = vcombine.high %v2787_v51, %v2803_v50 }
 0x487   :  { %6236 = vmatpush1.bf16.msra.mxu1 %v6982_v60  ;;  %v7206_v60 = vcombine.low %v2787_v51, %v2803_v50  ;;  %v2661_v50 = vld [vmem:[%s10728_s5 + $0x678] sm:$0xff] }
 0x488   :  { %6237 = vmatprep.subr.bf16.mxu1 %v7015_v61  ;;  %v7239_v61 = vcombine.high %v2819_v54, %v2835_v57 }
 0x48b   :  { %6238 = vmatpush1.bf16.msra.mxu1 %v7014_v1  ;;  %v7238_v1 = vcombine.low %v2819_v54, %v2835_v57  ;;  %v3059_v57 = vrot.slane %v10464_v5, %v9819_v63 }
 0x48c   :  { %6239 = vmatprep.subr.bf16.mxu1 %v7047_v6  ;;  %v7271_v6 = vcombine.high %v2851_v62, %v2867_v0 }
 0x48d   :  { %v5935_v18 = vpop.f32.mrb[16].mxu1 }
 0x48e   :  { %v5936_v27 = vadd.f32 %v5935_v18, %v3019_v41  ;;  %v6058_v33 = vpop.f32.mrb[20].mxu0  ;;  %v5937_v42 = vpop.f32.mrb[17].mxu1  ;;  %v7270_v41 = vcombine.low %v2851_v62, %v2867_v0  ;;  %v2947_v18 = vld [vmem:[%s10728_s5 + $0xf68] sm:$0xff]  ;;  %v3063_v62 = vrot.slane %v10464_v5, %v9833_v4 }
 0x48f   :  { %v10486_v21 = vadd.f32 %v6058_v33, %v3043_v8  ;;  %v5938_v2 = vadd.f32 %v5937_v42, %v3023_v10  ;;  %v6060_v22 = vpop.f32.mrb[21].mxu0  ;;  %v5939_v23 = vpop.f32.mrb[18].mxu1  ;;  %6240 = vmatpush1.bf16.msra.mxu1 %v7046_v13  ;;  %v7303_v8 = vcombine.high %v2883_v7, %v2899_v32  ;;  %v2915_v10 = vld [vmem:[%s10728_s5 + $0xe68] sm:$0xff]  ;;  %v2469_v33 = vld [vmem:[%s10728_s5 + $0x78] sm:$0xff] }
 0x490   :  { %v10488_v24 = vadd.f32 %v6060_v22, %v3047_v14  ;;  %v6062_v12 = vpop.f32.mrb[22].mxu0  ;;  %v5940_v26 = vpop.f32.mrb[19].mxu1  ;;  %6241 = vmatprep.subr.bf16.mxu1 %v7079_v15  ;;  %v2931_v13 = vld [vmem:[%s10728_s5 + $0xee8] sm:$0xff]  ;;  %v7302_v14 = vcombine.low %v2883_v7, %v2899_v32  ;;  %v2485_v42 = vld [vmem:[%s10728_s5 + $0xf8] sm:$0xff] }
 0x491   :  { %v6419_v30 = vcombine.low %v5936_v27, %v5938_v2  ;;  %v6063_v31 = vpop.f32.mrb[23].mxu0  ;;  %v7335_v15 = vcombine.high %v2915_v10, %v2931_v13  ;;  %v7334_v20 = vcombine.low %v2915_v10, %v2931_v13  ;;  %v7367_v27 = vcombine.high %v2947_v18, %v2963_v19  ;;  %v2501_v23 = vld [vmem:[%s10728_s5 + $0x178] sm:$0xff] }
 0x492   :  { %v6452_v17 = vcombine.low %v10486_v21, %v10488_v24  ;;  %v7366_v2 = vcombine.low %v2947_v18, %v2963_v19  ;;  %v6891_v22 = vcombine.high %v2469_v33, %v2485_v42  ;;  %v6890_v12 = vcombine.low %v2469_v33, %v2485_v42  ;;  %v2709_v7 = vld [vmem:[%s10728_s5 + $0x7f8] sm:$0xff] }
 0x493   :  { %v6433_v39 = vrot.slane %v6419_v30, %v8066_v49  ;;  %6242 = vmatpush1.bf16.msra.mxu1 %v7078_v43  ;;  %v2517_v43 = vld [vmem:[%s10728_s5 + $0x1f8] sm:$0xff] }
 0x494   :  { %6243 = vmatprep.subr.bf16.mxu1 %v7111_v28  ;;  %v6923_v26 = vcombine.high %v2501_v23, %v2517_v43  ;;  %v2533_v28 = vld [vmem:[%s10728_s5 + $0x278] sm:$0xff]  ;;  %v6922_v31 = vcombine.low %v2501_v23, %v2517_v43 }
 0x495   :  { %v6434_v44 = vcombine.low %v6426_v38, %v6433_v39  ;;  %v2549_v30 = vld [vmem:[%s10728_s5 + $0x2f8] sm:$0xff] }
 0x496   :  { %v6955_v34 = vcombine.high %v2533_v28, %v2549_v30  ;;  %v2581_v38 = vld [vmem:[%s10728_s5 + $0x3f8] sm:$0xff]  ;;  %v6954_v39 = vcombine.low %v2533_v28, %v2549_v30 }
 0x497   :  { %6530 = vst [vmem:[%s10732_s7 + $0x10] sm:$0xff] %v6434_v44  ;;  %6244 = vmatpush1.bf16.msra.mxu1 %v7110_v3  ;;  %v6987_v3 = vcombine.high %v2565_v35, %v2581_v38  ;;  %v6986_v44 = vcombine.low %v2565_v35, %v2581_v38  ;;  %v2741_v23 = vld [vmem:[%s10728_s5 + $0x8f8] sm:$0xff] }
 0x498   :  { %6245 = vmatprep.subr.bf16.mxu1 %v7143_v40  ;;  %v2597_v40 = vld [vmem:[%s10728_s5 + $0x478] sm:$0xff] }
 0x499   :  { %v2773_v35 = vld [vmem:[%s10728_s5 + $0x9f8] sm:$0xff] }
 0x49a   :  { %v2805_v38 = vld [vmem:[%s10728_s5 + $0xaf8] sm:$0xff] }
 0x49b   :  { %6246 = vmatpush1.bf16.msra.mxu1 %v7142_v29  ;;  %v2645_v29 = vld [vmem:[%s10728_s5 + $0x5f8] sm:$0xff] }
 0x49c   :  { %6247 = vmatprep.subr.bf16.mxu1 %v7175_v37  ;;  %v7051_v51 = vcombine.high %v2629_v46, %v2645_v29 }
 0x49f   :  { %6248 = vmatpush1.bf16.msra.mxu1 %v7174_v52  ;;  %v2677_v52 = vld [vmem:[%s10728_s5 + $0x6f8] sm:$0xff] }
 0x4a0   :  { %6249 = vmatprep.subr.bf16.mxu1 %v7207_v53  ;;  %v7889_v53 = vld [vmem:[%s10731_s6 + $0x8] sm:$0xff]  ;;  %v7083_v0 = vcombine.high %v2661_v50, %v2677_v52  ;;  %v7082_v18 = vcombine.low %v2661_v50, %v2677_v52  ;;  %v2885_v50 = vld [vmem:[%s10728_s5 + $0xd78] sm:$0xff] }
 0x4a1   :  { %v3035_v54 = vrot.slane %v7889_v53, %v10269_v11  ;;  %v2901_v52 = vld [vmem:[%s10728_s5 + $0xdf8] sm:$0xff] }
 0x4a3   :  { %6250 = vmatpush1.bf16.msra.mxu1 %v7206_v60  ;;  %v3039_v60 = vrot.slane %v7889_v53, %v10278_v16 }
 0x4a4   :  { %6251 = vmatprep.subr.bf16.mxu1 %v7239_v61  ;;  %v7050_v61 = vcombine.low %v2629_v46, %v2645_v29  ;;  %v2853_v46 = vld [vmem:[%s10728_s5 + $0xc78] sm:$0xff] }
 0x4a5   :  { %v2869_v29 = vld [vmem:[%s10728_s5 + $0xcf8] sm:$0xff] }
 0x4a6   :  { %v7274_v53 = vcombine.low %v2853_v46, %v2869_v29 }
 0x4a7   :  { %6252 = vmatpush1.bf16.msra.mxu1 %v7238_v1 }
 0x4a8   :  { %6253 = vmatprep.subr.bf16.mxu1 %v7271_v6  ;;  %v2693_v6 = vld [vmem:[%s10728_s5 + $0x778] sm:$0xff] }
 0x4a9   :  { %v7115_v33 = vcombine.high %v2693_v6, %v2709_v7  ;;  %v7114_v28 = vcombine.low %v2693_v6, %v2709_v7 }
 0x4ab   :  { %6254 = vmatpush1.bf16.msra.mxu1 %v7270_v41 }
 0x4ac   :  { %6255 = vmatprep.subr.bf16.mxu1 %v7303_v8 }
 0x4af   :  { %6256 = vmatpush1.bf16.msra.mxu1 %v7302_v14 }
 0x4b0   :  { %6257 = vmatprep.subr.bf16.mxu1 %v7335_v15 }
 0x4b3   :  { %6258 = vmatpush1.bf16.msra.mxu1 %v7334_v20 }
 0x4b4   :  { %6259 = vmatprep.subr.bf16.mxu1 %v7367_v27 }
 0x4b7   :  { %6260 = vmatpush1.bf16.msra.mxu1 %v7366_v2 }
 0x4b8   :  { %6311 = vmatprep.subr.bf16.mxu1 %v6891_v22  ;;  %v2725_v22 = vld [vmem:[%s10728_s5 + $0x878] sm:$0xff] }
 0x4b9   :  { %v7147_v30 = vcombine.high %v2725_v22, %v2741_v23  ;;  %v7146_v48 = vcombine.low %v2725_v22, %v2741_v23 }
 0x4ba   :  { %6262 = vmatmul.mubr.bf16.vlgmr.msra.gmra.mrb[32].mxu1 %v9180_v25 }
 0x4bb   :  { %6312 = vmatpush1.bf16.msra.mxu1 %v6890_v12  ;;  %6343 = vmatprep.mubr.bf16.mxu1 %v9178_v36  ;;  %v2613_v36 = vld [vmem:[%s10728_s5 + $0x4f8] sm:$0xff]  ;;  %v6443_v12 = vrot.slane %v6435_v9, %v8066_v49 }
 0x4bc   :  { %6313 = vmatprep.subr.bf16.mxu1 %v6923_v26  ;;  %v7019_v45 = vcombine.high %v2597_v40, %v2613_v36  ;;  %v7018_v37 = vcombine.low %v2597_v40, %v2613_v36  ;;  %v2789_v9 = vld [vmem:[%s10728_s5 + $0xa78] sm:$0xff] }
 0x4bd   :  { %v2821_v40 = vld [vmem:[%s10728_s5 + $0xb78] sm:$0xff] }
 0x4be   :  { %v2837_v36 = vld [vmem:[%s10728_s5 + $0xbf8] sm:$0xff] }
 0x4bf   :  { %6314 = vmatpush1.bf16.msra.mxu1 %v6922_v31 }
 0x4c0   :  { %6315 = vmatprep.subr.bf16.mxu1 %v6955_v34  ;;  %v2757_v34 = vld [vmem:[%s10728_s5 + $0x978] sm:$0xff] }
 0x4c1   :  { %v7179_v55 = vcombine.high %v2757_v34, %v2773_v35 }
 0x4c3   :  { %6316 = vmatpush1.bf16.msra.mxu1 %v6954_v39  ;;  %v7178_v39 = vcombine.low %v2757_v34, %v2773_v35  ;;  %v3067_v35 = vrot.slane %v10464_v5, %v10269_v11 }
 0x4c4   :  { %6317 = vmatprep.subr.bf16.mxu1 %v6987_v3  ;;  %v7211_v3 = vcombine.high %v2789_v9, %v2805_v38 }
 0x4c7   :  { %6318 = vmatpush1.bf16.msra.mxu1 %v6986_v44  ;;  %v7210_v44 = vcombine.low %v2789_v9, %v2805_v38 }
 0x4c8   :  { %6319 = vmatprep.subr.bf16.mxu1 %v7019_v45  ;;  %v7243_v45 = vcombine.high %v2821_v40, %v2837_v36 }
 0x4cb   :  { %6320 = vmatpush1.bf16.msra.mxu1 %v7018_v37  ;;  %v7242_v37 = vcombine.low %v2821_v40, %v2837_v36 }
 0x4cc   :  { %6321 = vmatprep.subr.bf16.mxu1 %v7051_v51  ;;  %v7275_v51 = vcombine.high %v2853_v46, %v2869_v29 }
 0x4cd   :  { %v6017_v1 = vpop.f32.mrb[20].mxu1 }
 0x4ce   :  { %v6018_v32 = vadd.f32 %v6017_v1, %v3035_v54  ;;  %v6140_v41 = vpop.f32.mrb[24].mxu0  ;;  %v6019_v8 = vpop.f32.mrb[21].mxu1  ;;  %v7307_v54 = vcombine.high %v2885_v50, %v2901_v52  ;;  %v2965_v1 = vld [vmem:[%s10728_s5 + $0xff8] sm:$0xff] }
 0x4cf   :  { %v10607_v10 = vadd.f32 %v6140_v41, %v3059_v57  ;;  %v6020_v13 = vadd.f32 %v6019_v8, %v3039_v60  ;;  %v6142_v14 = vpop.f32.mrb[25].mxu0  ;;  %v6021_v15 = vpop.f32.mrb[22].mxu1  ;;  %6322 = vmatpush1.bf16.msra.mxu1 %v7050_v61  ;;  %v2917_v57 = vld [vmem:[%s10728_s5 + $0xe78] sm:$0xff]  ;;  %v7306_v61 = vcombine.low %v2885_v50, %v2901_v52  ;;  %v3051_v8 = vrot.slane %v10464_v5, %v9018_v47 }
 0x4d0   :  { %v10609_v19 = vadd.f32 %v6142_v14, %v3063_v62  ;;  %v6144_v20 = vpop.f32.mrb[26].mxu0  ;;  %v6022_v27 = vpop.f32.mrb[23].mxu1  ;;  %6323 = vmatprep.subr.bf16.mxu1 %v7083_v0  ;;  %v2933_v60 = vld [vmem:[%s10728_s5 + $0xef8] sm:$0xff]  ;;  %v3055_v14 = vrot.slane %v10464_v5, %v8926_v59 }
 0x4d1   :  { %v6436_v42 = vcombine.low %v6018_v32, %v6020_v13  ;;  %v6145_v2 = vpop.f32.mrb[27].mxu0  ;;  %v7339_v62 = vcombine.high %v2917_v57, %v2933_v60  ;;  %v2949_v0 = vld [vmem:[%s10728_s5 + $0xf78] sm:$0xff]  ;;  %v7338_v6 = vcombine.low %v2917_v57, %v2933_v60 }
 0x4d2   :  { %v6469_v43 = vcombine.low %v10607_v10, %v10609_v19  ;;  %v7371_v7 = vcombine.high %v2949_v0, %v2965_v1  ;;  %v7370_v32 = vcombine.low %v2949_v0, %v2965_v1  ;;  %v10673_v41 = vld [vmem:[%s10731_s6 + $0x18] sm:$0xff] }
 0x4d3   :  { %v6450_v26 = vrot.slane %v6436_v42, %v8066_v49  ;;  %6324 = vmatpush1.bf16.msra.mxu1 %v7082_v18  ;;  %v3075_v13 = vrot.slane %v10673_v41, %v8915_v56  ;;  %v3079_v15 = vrot.slane %v10673_v41, %v8923_v58  ;;  %v3095_v21 = vrot.slane %v10673_v41, %v9833_v4 }
 0x4d4   :  { %6325 = vmatprep.subr.bf16.mxu1 %v7115_v33  ;;  %v3083_v50 = vrot.slane %v10673_v41, %v9018_v47  ;;  %v3087_v52 = vrot.slane %v10673_v41, %v8926_v59  ;;  %v3099_v47 = vrot.slane %v10673_v41, %v10269_v11  ;;  %v3103_v59 = vrot.slane %v10673_v41, %v10278_v16 }
 0x4d5   :  { %v6451_v31 = vcombine.low %v6443_v12, %v6450_v26 }
 0x4d7   :  { %6531 = vst [vmem:[%s10732_s7 + $0x18] sm:$0xff] %v6451_v31  ;;  %6326 = vmatpush1.bf16.msra.mxu1 %v7114_v28  ;;  %v6460_v31 = vrot.slane %v6452_v17, %v8066_v49 }
 0x4d8   :  { %6327 = vmatprep.subr.bf16.mxu1 %v7147_v30 }
 0x4db   :  { %6328 = vmatpush1.bf16.msra.mxu1 %v7146_v48  ;;  %v3091_v48 = vrot.slane %v10673_v41, %v9819_v63 }
 0x4dc   :  { %6329 = vmatprep.subr.bf16.mxu1 %v7179_v55  ;;  %v3071_v55 = vrot.slane %v10464_v5, %v10278_v16  ;;  %v6477_v5 = vrot.slane %v6469_v43, %v8066_v49 }
 0x4df   :  { %6330 = vmatpush1.bf16.msra.mxu1 %v7178_v39 }
 0x4e0   :  { %6331 = vmatprep.subr.bf16.mxu1 %v7211_v3 }
 0x4e3   :  { %6332 = vmatpush1.bf16.msra.mxu1 %v7210_v44 }
 0x4e4   :  { %6333 = vmatprep.subr.bf16.mxu1 %v7243_v45 }
 0x4e7   :  { %6334 = vmatpush1.bf16.msra.mxu1 %v7242_v37 }
 0x4e8   :  { %6335 = vmatprep.subr.bf16.mxu1 %v7275_v51 }
 0x4eb   :  { %6336 = vmatpush1.bf16.msra.mxu1 %v7274_v53 }
 0x4ec   :  { %6337 = vmatprep.subr.bf16.mxu1 %v7307_v54 }
 0x4ef   :  { %6338 = vmatpush1.bf16.msra.mxu1 %v7306_v61 }
 0x4f0   :  { %6339 = vmatprep.subr.bf16.mxu1 %v7339_v62 }
 0x4f3   :  { %6340 = vmatpush1.bf16.msra.mxu1 %v7338_v6 }
 0x4f4   :  { %6341 = vmatprep.subr.bf16.mxu1 %v7371_v7 }
 0x4f7   :  { %6342 = vmatpush1.bf16.msra.mxu1 %v7370_v32 }
 0x4fa   :  { %6344 = vmatmul.mubr.bf16.vlgmr.msra.gmra.mrb[36].mxu1 %v9180_v25 }
 0x50d   :  { %v6099_v18 = vpop.f32.mrb[24].mxu1 }
 0x50e   :  { %v6100_v20 = vadd.f32 %v6099_v18, %v3051_v8  ;;  %v6222_v25 = vpop.f32.mrb[28].mxu0  ;;  %v6101_v27 = vpop.f32.mrb[25].mxu1 }
 0x50f   :  { %v6223_v33 = vadd.f32 %v6222_v25, %v3075_v13  ;;  %v6102_v42 = vadd.f32 %v6101_v27, %v3055_v14  ;;  %v6224_v2 = vpop.f32.mrb[29].mxu0  ;;  %v6103_v22 = vpop.f32.mrb[26].mxu1 }
 0x510   :  { %v6225_v23 = vadd.f32 %v6224_v2, %v3079_v15  ;;  %v6226_v12 = vpop.f32.mrb[30].mxu0  ;;  %v6104_v26 = vpop.f32.mrb[27].mxu1 }
 0x511   :  { %v6453_v28 = vcombine.low %v6100_v20, %v6102_v42  ;;  %v6227_v30 = vpop.f32.mrb[31].mxu0 }
 0x512   :  { %v6486_v56 = vcombine.low %v6223_v33, %v6225_v23 }
 0x513   :  { %v6467_v58 = vrot.slane %v6453_v28, %v8066_v49 }
 0x514   :  { %v6494_v43 = vrot.slane %v6486_v56, %v8066_v49 }
 0x515   :  { %v6468_v34 = vcombine.low %v6460_v31, %v6467_v58 }
 0x517   :  { %6532 = vst [vmem:[%s10732_s7 + $0x20] sm:$0xff] %v6468_v34 }
 0x54d   :  { %v6181_v24 = vpop.f32.mrb[28].mxu1 }
 0x54e   :  { %v6182_v17 = vadd.f32 %v6181_v24, %v3067_v35  ;;  %v6304_v9 = vpop.f32.mrb[32].mxu0  ;;  %v6183_v38 = vpop.f32.mrb[29].mxu1 }
 0x54f   :  { %v6305_v39 = vadd.f32 %v6304_v9, %v3091_v48  ;;  %v6184_v3 = vadd.f32 %v6183_v38, %v3071_v55  ;;  %v6306_v40 = vpop.f32.mrb[33].mxu0  ;;  %v6185_v36 = vpop.f32.mrb[30].mxu1 }
 0x550   :  { %v6307_v44 = vadd.f32 %v6306_v40, %v3095_v21  ;;  %v6308_v45 = vpop.f32.mrb[34].mxu0  ;;  %v6186_v46 = vpop.f32.mrb[31].mxu1 }
 0x551   :  { %v6470_v29 = vcombine.low %v6182_v17, %v6184_v3  ;;  %v6309_v37 = vpop.f32.mrb[35].mxu0 }
 0x552   :  { %v6503_v63 = vcombine.low %v6305_v39, %v6307_v44 }
 0x553   :  { %v6484_v4 = vrot.slane %v6470_v29, %v8066_v49 }
 0x554   :  { %v6511_v15 = vrot.slane %v6503_v63, %v8066_v49 }
 0x555   :  { %v6485_v51 = vcombine.low %v6477_v5, %v6484_v4 }
 0x557   :  { %6533 = vst [vmem:[%s10732_s7 + $0x28] sm:$0xff] %v6485_v51 }
 0x58d   :  { %v6263_v53 = vpop.f32.mrb[32].mxu1 }
 0x58e   :  { %v6264_v54 = vadd.f32 %v6263_v53, %v3083_v50  ;;  %v6265_v57 = vpop.f32.mrb[33].mxu1 }
 0x58f   :  { %v6266_v60 = vadd.f32 %v6265_v57, %v3087_v52  ;;  %v6267_v61 = vpop.f32.mrb[34].mxu1 }
 0x590   :  { %v6268_v10 = vpop.f32.mrb[35].mxu1 }
 0x591   :  { %v6487_v19 = vcombine.low %v6264_v54, %v6266_v60 }
 0x593   :  { %v6501_v62 = vrot.slane %v6487_v19, %v8066_v49 }
 0x595   :  { %v6502_v0 = vcombine.low %v6494_v43, %v6501_v62 }
 0x597   :  { %6534 = vst [vmem:[%s10732_s7 + $0x30] sm:$0xff] %v6502_v0 }
 0x5cd   :  { %v6345_v1 = vpop.f32.mrb[36].mxu1 }
 0x5ce   :  { %v6346_v6 = vadd.f32 %v6345_v1, %v3099_v47  ;;  %v6347_v7 = vpop.f32.mrb[37].mxu1 }
 0x5cf   :  { %v6348_v32 = vadd.f32 %v6347_v7, %v3103_v59  ;;  %v6349_v8 = vpop.f32.mrb[38].mxu1 }
 0x5d0   :  { %v6350_v13 = vpop.f32.mrb[39].mxu1 }
 0x5d1   :  { %v6504_v14 = vcombine.low %v6346_v6, %v6348_v32 }
 0x5d3   :  { %v6518_v18 = vrot.slane %v6504_v14, %v8066_v49 }
 0x5d5   :  { %v6519_v20 = vcombine.low %v6511_v15, %v6518_v18 }
 0x5d7   :  { %6535 = vst [vmem:[%s10732_s7 + $0x38] sm:$0xff] %v6519_v20 }

// kernel: pointnet_forward.11
= control target key start
LH: loop header
LB: loop body
LE: loop exit
PB: predicated region body
PF: predicated region fallthrough
CT: control target
= control target key end

     0   :  { %v3563_v36 = vmov 1983009808   ;;  %v292_v38 = vlaneseq  ;;  %s4712_s0 = inlined_call_operand.vmem [shape: f32[2,1024], index: 0, kind: input, shape index: {}]   ;;  %s4713_s1 = inlined_call_operand.vmem [shape: bf16[1024,512], index: 1, kind: input, shape index: {}]   ;;  %s4714_s2 = inlined_call_operand.vmem [shape: f32[1,512], index: 2, kind: input, shape index: {}]   ;;  %s4715_s3 = inlined_call_operand.vmem [shape: bf16[512,256], index: 3, kind: input, shape index: {}]   ;;  %s4716_s4 = inlined_call_operand.vmem [shape: f32[1,256], index: 4, kind: input, shape index: {}]   ;;  %s4717_s5 = inlined_call_operand.vmem [shape: bf16[256,128], index: 5, kind: input, shape index: {}]   ;;  %s4718_s6 = inlined_call_operand.vmem [shape: f32[1,128], index: 6, kind: input, shape index: {}]   ;;  %s4719_s7 = inlined_call_operand.hbm [shape: f32[2,128], index: 7, kind: output, shape index: {}]  }
   0x1   :  { %v3041_v0 = vld [vmem:[%s4713_s1 + $0x4] ss:$16 sps:$4 sm:$0xff]   ;;  %v3045_v2 = vld [vmem:[%s4713_s1] ss:$16 sps:$4 sm:$0xff]   ;;  %v290_v37 = vunpack.c.l.s4 %v3563_v36 }
   0x2   :  { %v3043_v1 = vld [vmem:[%s4713_s1 + $0x204] ss:$16 sps:$4 sm:$0xff]   ;;  %1640 = vmatprep.subr.bf16.mxu1 %v3041_v0  ;;  %v3046_v3 = vld [vmem:[%s4713_s1 + $0x200] ss:$16 sps:$4 sm:$0xff]   ;;  %v3722_v43 = vshrl.u32 %v292_v38, 7 }
   0x3   :  { %1681 = vmatprep.subr.bf16.mxu0 %v3043_v1  ;;  %v3047_v4 = vld [vmem:[%s4713_s1 + $0x24] ss:$16 sps:$4 sm:$0xff]   ;;  %1641 = vmatpush1.bf16.msra.mxu1 %v3045_v2  ;;  %v3051_v6 = vld [vmem:[%s4713_s1 + $0x20] ss:$16 sps:$4 sm:$0xff]   ;;  %v291_v42 = vunpack.c.0.s8 %v290_v37  ;;  %v3173_v37 = vld [vmem:[%s4713_s1 + $0xac] ss:$16 sps:$4 sm:$0xff]  }
   0x4   :  { %1682 = vmatpush1.bf16.msra.mxu0 %v3046_v3  ;;  %v3049_v5 = vld [vmem:[%s4713_s1 + $0x224] ss:$16 sps:$4 sm:$0xff]   ;;  %1642 = vmatprep.subr.bf16.mxu1 %v3047_v4  ;;  %v3052_v7 = vld [vmem:[%s4713_s1 + $0x220] ss:$16 sps:$4 sm:$0xff]  }
   0x5   :  { %1683 = vmatprep.subr.bf16.mxu0 %v3049_v5  ;;  %v3053_v8 = vld [vmem:[%s4713_s1 + $0x44] ss:$16 sps:$4 sm:$0xff]   ;;  %v3057_v10 = vld [vmem:[%s4713_s1 + $0x40] ss:$16 sps:$4 sm:$0xff]   ;;  %v3740_v49 = vsub.s32 %v291_v42, %v3722_v43  ;;  %v3897_v42 = vld [vmem:[%s4712_s0 + $0x8] sm:$0xff] }
   0x6   :  { %v3055_v9 = vld [vmem:[%s4713_s1 + $0x244] ss:$16 sps:$4 sm:$0xff]   ;;  %v3058_v11 = vld [vmem:[%s4713_s1 + $0x240] ss:$16 sps:$4 sm:$0xff]  }
   0x7   :  { %1643 = vmatpush1.bf16.msra.mxu1 %v3051_v6  ;;  %v3059_v12 = vld [vmem:[%s4713_s1 + $0x64] ss:$16 sps:$4 sm:$0xff]   ;;  %v3063_v14 = vld [vmem:[%s4713_s1 + $0x60] ss:$16 sps:$4 sm:$0xff]  }
   0x8   :  { %1684 = vmatpush1.bf16.msra.mxu0 %v3052_v7  ;;  %1644 = vmatprep.subr.bf16.mxu1 %v3053_v8  ;;  %v3061_v13 = vld [vmem:[%s4713_s1 + $0x264] ss:$16 sps:$4 sm:$0xff]   ;;  %v3064_v15 = vld [vmem:[%s4713_s1 + $0x260] ss:$16 sps:$4 sm:$0xff]  }
   0x9   :  { %1685 = vmatprep.subr.bf16.mxu0 %v3055_v9  ;;  %v3065_v16 = vld [vmem:[%s4713_s1 + $0x84] ss:$16 sps:$4 sm:$0xff]   ;;  %v3069_v18 = vld [vmem:[%s4713_s1 + $0x80] ss:$16 sps:$4 sm:$0xff]  }
   0xa   :  { %v3067_v17 = vld [vmem:[%s4713_s1 + $0x284] ss:$16 sps:$4 sm:$0xff]   ;;  %v3070_v19 = vld [vmem:[%s4713_s1 + $0x280] ss:$16 sps:$4 sm:$0xff]  }
   0xb   :  { %1645 = vmatpush1.bf16.msra.mxu1 %v3057_v10  ;;  %v3071_v20 = vld [vmem:[%s4713_s1 + $0xa4] ss:$16 sps:$4 sm:$0xff]   ;;  %v3075_v22 = vld [vmem:[%s4713_s1 + $0xa0] ss:$16 sps:$4 sm:$0xff]  }
   0xc   :  { %1686 = vmatpush1.bf16.msra.mxu0 %v3058_v11  ;;  %1646 = vmatprep.subr.bf16.mxu1 %v3059_v12  ;;  %v3073_v21 = vld [vmem:[%s4713_s1 + $0x2a4] ss:$16 sps:$4 sm:$0xff]   ;;  %v3076_v23 = vld [vmem:[%s4713_s1 + $0x2a0] ss:$16 sps:$4 sm:$0xff]  }
   0xd   :  { %1687 = vmatprep.subr.bf16.mxu0 %v3061_v13  ;;  %v3077_v24 = vld [vmem:[%s4713_s1 + $0xc4] ss:$16 sps:$4 sm:$0xff]   ;;  %v3081_v26 = vld [vmem:[%s4713_s1 + $0xc0] ss:$16 sps:$4 sm:$0xff]  }
   0xe   :  { %v3079_v25 = vld [vmem:[%s4713_s1 + $0x2c4] ss:$16 sps:$4 sm:$0xff]   ;;  %v3082_v27 = vld [vmem:[%s4713_s1 + $0x2c0] ss:$16 sps:$4 sm:$0xff]  }
   0xf   :  { %1647 = vmatpush1.bf16.msra.mxu1 %v3063_v14  ;;  %v3083_v28 = vld [vmem:[%s4713_s1 + $0xe4] ss:$16 sps:$4 sm:$0xff]   ;;  %v3087_v30 = vld [vmem:[%s4713_s1 + $0xe0] ss:$16 sps:$4 sm:$0xff]  }
  0x10   :  { %1688 = vmatpush1.bf16.msra.mxu0 %v3064_v15  ;;  %1648 = vmatprep.subr.bf16.mxu1 %v3065_v16  ;;  %v3085_v29 = vld [vmem:[%s4713_s1 + $0x2e4] ss:$16 sps:$4 sm:$0xff]   ;;  %v3088_v31 = vld [vmem:[%s4713_s1 + $0x2e0] ss:$16 sps:$4 sm:$0xff]   ;;  %v3143_v15 = vld [vmem:[%s4713_s1 + $0xc] ss:$16 sps:$4 sm:$0xff]  }
  0x11   :  { %1689 = vmatprep.subr.bf16.mxu0 %v3067_v17  ;;  %v3089_v32 = vld [vmem:[%s4713_s1 + $0x104] ss:$16 sps:$4 sm:$0xff]   ;;  %v3093_v34 = vld [vmem:[%s4713_s1 + $0x100] ss:$16 sps:$4 sm:$0xff]  }
  0x12   :  { %v3091_v33 = vld [vmem:[%s4713_s1 + $0x304] ss:$16 sps:$4 sm:$0xff]   ;;  %v3094_v35 = vld [vmem:[%s4713_s1 + $0x300] ss:$16 sps:$4 sm:$0xff]  }
  0x13   :  { %1649 = vmatpush1.bf16.msra.mxu1 %v3069_v18  ;;  %v3095_v39 = vld [vmem:[%s4713_s1 + $0x124] ss:$16 sps:$4 sm:$0xff]   ;;  %v3099_v41 = vld [vmem:[%s4713_s1 + $0x120] ss:$16 sps:$4 sm:$0xff]  }
  0x14   :  { %1690 = vmatpush1.bf16.msra.mxu0 %v3070_v19  ;;  %1650 = vmatprep.subr.bf16.mxu1 %v3071_v20  ;;  %v3097_v40 = vld [vmem:[%s4713_s1 + $0x324] ss:$16 sps:$4 sm:$0xff]   ;;  %v3100_v44 = vld [vmem:[%s4713_s1 + $0x320] ss:$16 sps:$4 sm:$0xff]   ;;  %v3141_v19 = vld [vmem:[%s4713_s1 + $0x8] ss:$16 sps:$4 sm:$0xff]  }
  0x15   :  { %1691 = vmatprep.subr.bf16.mxu0 %v3073_v21  ;;  %v3101_v45 = vld [vmem:[%s4713_s1 + $0x144] ss:$16 sps:$4 sm:$0xff]   ;;  %v3105_v47 = vld [vmem:[%s4713_s1 + $0x140] ss:$16 sps:$4 sm:$0xff]   ;;  %v3149_v21 = vld [vmem:[%s4713_s1 + $0x2c] ss:$16 sps:$4 sm:$0xff]  }
  0x16   :  { %v3103_v46 = vld [vmem:[%s4713_s1 + $0x344] ss:$16 sps:$4 sm:$0xff]   ;;  %v3106_v48 = vld [vmem:[%s4713_s1 + $0x340] ss:$16 sps:$4 sm:$0xff]  }
  0x17   :  { %1651 = vmatpush1.bf16.msra.mxu1 %v3075_v22  ;;  %v3107_v50 = vld [vmem:[%s4713_s1 + $0x164] ss:$16 sps:$4 sm:$0xff]   ;;  %v3111_v53 = vld [vmem:[%s4713_s1 + $0x160] ss:$16 sps:$4 sm:$0xff]  }
  0x18   :  { %1692 = vmatpush1.bf16.msra.mxu0 %v3076_v23  ;;  %1652 = vmatprep.subr.bf16.mxu1 %v3077_v24  ;;  %v3109_v51 = vld [vmem:[%s4713_s1 + $0x364] ss:$16 sps:$4 sm:$0xff]   ;;  %v3112_v56 = vld [vmem:[%s4713_s1 + $0x360] ss:$16 sps:$4 sm:$0xff]   ;;  %v3147_v23 = vld [vmem:[%s4713_s1 + $0x28] ss:$16 sps:$4 sm:$0xff]  }
  0x19   :  { %1693 = vmatprep.subr.bf16.mxu0 %v3079_v25  ;;  %v284_v52 = vld [vmem:[%s4712_s0] sm:$0xff]  ;;  %v3155_v25 = vld [vmem:[%s4713_s1 + $0x4c] ss:$16 sps:$4 sm:$0xff]  }
  0x1a   :  { %v295_v54 = vrot.slane %v284_v52, %v3740_v49  ;;  %v288_v55 = vcombine.high %v284_v52, %v284_v52  ;;  %v3113_v57 = vld [vmem:[%s4713_s1 + $0x184] ss:$16 sps:$4 sm:$0xff]   ;;  %v3117_v61 = vld [vmem:[%s4713_s1 + $0x180] ss:$16 sps:$4 sm:$0xff]  }
  0x1b   :  { %1653 = vmatpush1.bf16.msra.mxu1 %v3081_v26  ;;  %v3115_v58 = vld [vmem:[%s4713_s1 + $0x384] ss:$16 sps:$4 sm:$0xff]   ;;  %v3118_v0 = vld [vmem:[%s4713_s1 + $0x380] ss:$16 sps:$4 sm:$0xff]  }
  0x1c   :  { %1694 = vmatpush1.bf16.msra.mxu0 %v3082_v27  ;;  %1654 = vmatprep.subr.bf16.mxu1 %v3083_v28  ;;  %v303_v59 = vcombine.high %v295_v54, %v295_v54  ;;  %v302_v60 = vrot.slane %v288_v55, %v3740_v49  ;;  %v3119_v1 = vld [vmem:[%s4713_s1 + $0x1a4] ss:$16 sps:$4 sm:$0xff]   ;;  %v3123_v4 = vld [vmem:[%s4713_s1 + $0x1a0] ss:$16 sps:$4 sm:$0xff]   ;;  %v3816_v16 = vpack.c.bf16 %v295_v54, %v295_v54  ;;  %v3153_v27 = vld [vmem:[%s4713_s1 + $0x48] ss:$16 sps:$4 sm:$0xff]  }
  0x1d   :  { %1695 = vmatprep.subr.bf16.mxu0 %v3085_v29  ;;  %v3121_v2 = vld [vmem:[%s4713_s1 + $0x3a4] ss:$16 sps:$4 sm:$0xff]   ;;  %v3124_v5 = vld [vmem:[%s4713_s1 + $0x3a0] ss:$16 sps:$4 sm:$0xff]   ;;  %v3161_v29 = vld [vmem:[%s4713_s1 + $0x6c] ss:$16 sps:$4 sm:$0xff]  }
  0x1e   :  { %v331_v62 = vpack.c.bf16 %v303_v59, %v303_v59  ;;  %v304_v63 = vcombine.high %v302_v60, %v302_v60  ;;  %v3125_v6 = vld [vmem:[%s4713_s1 + $0x1c4] ss:$16 sps:$4 sm:$0xff]   ;;  %v3129_v8 = vld [vmem:[%s4713_s1 + $0x1c0] ss:$16 sps:$4 sm:$0xff]   ;;  %v3821_v18 = vpack.c.bf16 %v302_v60, %v302_v60  ;;  %v3191_v55 = vld [vmem:[%s4713_s1 + $0x10c] ss:$16 sps:$4 sm:$0xff]  }
  0x1f   :  { %1655 = vmatpush1.bf16.msra.mxu1 %v3087_v30  ;;  %v3127_v7 = vld [vmem:[%s4713_s1 + $0x3c4] ss:$16 sps:$4 sm:$0xff]   ;;  %v3130_v9 = vld [vmem:[%s4713_s1 + $0x3c0] ss:$16 sps:$4 sm:$0xff]   ;;  %v3197_v59 = vld [vmem:[%s4713_s1 + $0x12c] ss:$16 sps:$4 sm:$0xff]  }
  0x20   :  { %1696 = vmatpush1.bf16.msra.mxu0 %v3088_v31  ;;  %1656 = vmatprep.subr.bf16.mxu1 %v3089_v32  ;;  %v3777_v3 = vpack.c.bf16 %v304_v63, %v304_v63  ;;  %v3131_v10 = vld [vmem:[%s4713_s1 + $0x1e4] ss:$16 sps:$4 sm:$0xff]   ;;  %v3135_v12 = vld [vmem:[%s4713_s1 + $0x1e0] ss:$16 sps:$4 sm:$0xff]   ;;  %v3159_v31 = vld [vmem:[%s4713_s1 + $0x68] ss:$16 sps:$4 sm:$0xff]  }
  0x21   :  { %1697 = vmatprep.subr.bf16.mxu0 %v3091_v33  ;;  %1672 = vmatprep.mubr.bf16.mxu1 %v331_v62  ;;  %v3133_v11 = vld [vmem:[%s4713_s1 + $0x3e4] ss:$16 sps:$4 sm:$0xff]   ;;  %v3136_v13 = vld [vmem:[%s4713_s1 + $0x3e0] ss:$16 sps:$4 sm:$0xff]   ;;  %v3167_v33 = vld [vmem:[%s4713_s1 + $0x8c] ss:$16 sps:$4 sm:$0xff]  }
  0x22   :  { %1713 = vmatprep.mubr.bf16.mxu0 %v3777_v3  ;;  %v3140_v14 = vld [vmem:[%s4713_s1 + $0x404] ss:$16 sps:$4 sm:$0xff]   ;;  %v3138_v17 = vld [vmem:[%s4713_s1 + $0x400] ss:$16 sps:$4 sm:$0xff]   ;;  %v3203_v63 = vld [vmem:[%s4713_s1 + $0x14c] ss:$16 sps:$4 sm:$0xff]  }
  0x23   :  { %1657 = vmatpush1.bf16.msra.mxu1 %v3093_v34  ;;  %v3146_v20 = vld [vmem:[%s4713_s1 + $0x424] ss:$16 sps:$4 sm:$0xff]   ;;  %v3144_v22 = vld [vmem:[%s4713_s1 + $0x420] ss:$16 sps:$4 sm:$0xff]  }
  0x24   :  { %1698 = vmatpush1.bf16.msra.mxu0 %v3094_v35  ;;  %1658 = vmatprep.subr.bf16.mxu1 %v3095_v39  ;;  %v3152_v24 = vld [vmem:[%s4713_s1 + $0x444] ss:$16 sps:$4 sm:$0xff]   ;;  %v3150_v26 = vld [vmem:[%s4713_s1 + $0x440] ss:$16 sps:$4 sm:$0xff]   ;;  %v3165_v35 = vld [vmem:[%s4713_s1 + $0x88] ss:$16 sps:$4 sm:$0xff]  }
  0x25   :  { %1699 = vmatprep.subr.bf16.mxu0 %v3097_v40  ;;  %v3158_v28 = vld [vmem:[%s4713_s1 + $0x464] ss:$16 sps:$4 sm:$0xff]   ;;  %v3156_v30 = vld [vmem:[%s4713_s1 + $0x460] ss:$16 sps:$4 sm:$0xff]   ;;  %v3171_v39 = vld [vmem:[%s4713_s1 + $0xa8] ss:$16 sps:$4 sm:$0xff]  }
  0x26   :  { %v3164_v32 = vld [vmem:[%s4713_s1 + $0x484] ss:$16 sps:$4 sm:$0xff]   ;;  %v3162_v34 = vld [vmem:[%s4713_s1 + $0x480] ss:$16 sps:$4 sm:$0xff]  }
  0x27   :  { %1659 = vmatpush1.bf16.msra.mxu1 %v3099_v41  ;;  %v3170_v36 = vld [vmem:[%s4713_s1 + $0x4a4] ss:$16 sps:$4 sm:$0xff]   ;;  %v3168_v38 = vld [vmem:[%s4713_s1 + $0x4a0] ss:$16 sps:$4 sm:$0xff]   ;;  %v3179_v41 = vld [vmem:[%s4713_s1 + $0xcc] ss:$16 sps:$4 sm:$0xff]  }
  0x28   :  { %1700 = vmatpush1.bf16.msra.mxu0 %v3100_v44  ;;  %1660 = vmatprep.subr.bf16.mxu1 %v3101_v45  ;;  %v3176_v40 = vld [vmem:[%s4713_s1 + $0x4c4] ss:$16 sps:$4 sm:$0xff]   ;;  %v3901_v44 = vrot.slane %v3897_v42, %v3740_v49  ;;  %v3174_v45 = vld [vmem:[%s4713_s1 + $0x4c0] ss:$16 sps:$4 sm:$0xff]  }
  0x29   :  { %1701 = vmatprep.subr.bf16.mxu0 %v3103_v46  ;;  %v3177_v46 = vld [vmem:[%s4713_s1 + $0xc8] ss:$16 sps:$4 sm:$0xff]   ;;  %v3180_v52 = vld [vmem:[%s4713_s1 + $0x4e0] ss:$16 sps:$4 sm:$0xff]   ;;  %v3188_v54 = vld [vmem:[%s4713_s1 + $0x504] ss:$16 sps:$4 sm:$0xff]  }
  0x2a   :  { %v3192_v60 = vld [vmem:[%s4713_s1 + $0x520] ss:$16 sps:$4 sm:$0xff]  }
  0x2b   :  { %1661 = vmatpush1.bf16.msra.mxu1 %v3105_v47  ;;  %v320_v47 = vcombine.high %v3901_v44, %v3901_v44 }
  0x2c   :  { %1702 = vmatpush1.bf16.msra.mxu0 %v3106_v48  ;;  %1662 = vmatprep.subr.bf16.mxu1 %v3107_v50  ;;  %v3182_v48 = vld [vmem:[%s4713_s1 + $0x4e4] ss:$16 sps:$4 sm:$0xff]   ;;  %v3185_v50 = vld [vmem:[%s4713_s1 + $0xec] ss:$16 sps:$4 sm:$0xff]  }
  0x2d   :  { %1703 = vmatprep.subr.bf16.mxu0 %v3109_v51  ;;  %v3917_v51 = vpack.c.bf16 %v320_v47, %v320_v47  ;;  %v3261_v47 = vld [vmem:[%s4713_s1 + $0x288] ss:$16 sps:$4 sm:$0xff]  }
  0x2f   :  { %1663 = vmatpush1.bf16.msra.mxu1 %v3111_v53  ;;  %v3183_v53 = vld [vmem:[%s4713_s1 + $0xe8] ss:$16 sps:$4 sm:$0xff]  }
  0x30   :  { %1704 = vmatpush1.bf16.msra.mxu0 %v3112_v56  ;;  %1664 = vmatprep.subr.bf16.mxu1 %v3113_v57  ;;  %v3186_v56 = vld [vmem:[%s4713_s1 + $0x500] ss:$16 sps:$4 sm:$0xff]   ;;  %v3189_v57 = vld [vmem:[%s4713_s1 + $0x108] ss:$16 sps:$4 sm:$0xff]  }
  0x31   :  { %1705 = vmatprep.subr.bf16.mxu0 %v3115_v58  ;;  %v3194_v58 = vld [vmem:[%s4713_s1 + $0x524] ss:$16 sps:$4 sm:$0xff]  }
  0x33   :  { %1665 = vmatpush1.bf16.msra.mxu1 %v3117_v61  ;;  %v3195_v61 = vld [vmem:[%s4713_s1 + $0x128] ss:$16 sps:$4 sm:$0xff]  }
  0x34   :  { %1706 = vmatpush1.bf16.msra.mxu0 %v3118_v0  ;;  %1666 = vmatprep.subr.bf16.mxu1 %v3119_v1  ;;  %v3198_v0 = vld [vmem:[%s4713_s1 + $0x540] ss:$16 sps:$4 sm:$0xff]   ;;  %v3201_v1 = vld [vmem:[%s4713_s1 + $0x148] ss:$16 sps:$4 sm:$0xff]  }
  0x35   :  { %1707 = vmatprep.subr.bf16.mxu0 %v3121_v2  ;;  %v3206_v2 = vld [vmem:[%s4713_s1 + $0x564] ss:$16 sps:$4 sm:$0xff]  }
  0x37   :  { %1667 = vmatpush1.bf16.msra.mxu1 %v3123_v4  ;;  %v3209_v4 = vld [vmem:[%s4713_s1 + $0x16c] ss:$16 sps:$4 sm:$0xff]  }
  0x38   :  { %1708 = vmatpush1.bf16.msra.mxu0 %v3124_v5  ;;  %1668 = vmatprep.subr.bf16.mxu1 %v3125_v6  ;;  %v3204_v5 = vld [vmem:[%s4713_s1 + $0x560] ss:$16 sps:$4 sm:$0xff]   ;;  %v3207_v6 = vld [vmem:[%s4713_s1 + $0x168] ss:$16 sps:$4 sm:$0xff]  }
  0x39   :  { %1709 = vmatprep.subr.bf16.mxu0 %v3127_v7  ;;  %v3212_v7 = vld [vmem:[%s4713_s1 + $0x584] ss:$16 sps:$4 sm:$0xff]  }
  0x3b   :  { %1669 = vmatpush1.bf16.msra.mxu1 %v3129_v8  ;;  %v3215_v8 = vld [vmem:[%s4713_s1 + $0x18c] ss:$16 sps:$4 sm:$0xff]  }
  0x3c   :  { %1710 = vmatpush1.bf16.msra.mxu0 %v3130_v9  ;;  %1670 = vmatprep.subr.bf16.mxu1 %v3131_v10  ;;  %v3210_v9 = vld [vmem:[%s4713_s1 + $0x580] ss:$16 sps:$4 sm:$0xff]   ;;  %v3213_v10 = vld [vmem:[%s4713_s1 + $0x188] ss:$16 sps:$4 sm:$0xff]  }
  0x3d   :  { %1711 = vmatprep.subr.bf16.mxu0 %v3133_v11  ;;  %v3218_v11 = vld [vmem:[%s4713_s1 + $0x5a4] ss:$16 sps:$4 sm:$0xff]  }
  0x3f   :  { %1671 = vmatpush1.bf16.msra.mxu1 %v3135_v12  ;;  %v3221_v12 = vld [vmem:[%s4713_s1 + $0x1ac] ss:$16 sps:$4 sm:$0xff]  }
  0x40   :  { %1712 = vmatpush1.bf16.msra.mxu0 %v3136_v13  ;;  %1804 = vmatprep.subr.bf16.mxu1 %v3143_v15  ;;  %v3216_v13 = vld [vmem:[%s4713_s1 + $0x5a0] ss:$16 sps:$4 sm:$0xff]   ;;  %v3224_v15 = vld [vmem:[%s4713_s1 + $0x5c4] ss:$16 sps:$4 sm:$0xff]  }
  0x41   :  { %1722 = vmatprep.subr.bf16.mxu0 %v3140_v14  ;;  %v3219_v14 = vld [vmem:[%s4713_s1 + $0x1a8] ss:$16 sps:$4 sm:$0xff]  }
  0x42   :  { %1673 = vmatmul.mubr.bf16.vlgmr.msra.gmra.mrb[0].mxu1 %v3816_v16 }
  0x43   :  { %1714 = vmatmul.mubr.bf16.vlgmr.msra.gmra.mrb[0].mxu0 %v3821_v18  ;;  %1805 = vmatpush1.bf16.msra.mxu1 %v3141_v19  ;;  %v305_v19 = vcombine.high %v3897_v42, %v3897_v42  ;;  %v3255_v42 = vld [vmem:[%s4713_s1 + $0x268] ss:$16 sps:$4 sm:$0xff]  }
  0x44   :  { %1723 = vmatpush1.bf16.msra.mxu0 %v3138_v17  ;;  %1806 = vmatprep.subr.bf16.mxu1 %v3149_v21  ;;  %v3227_v17 = vld [vmem:[%s4713_s1 + $0x1cc] ss:$16 sps:$4 sm:$0xff]   ;;  %v3225_v21 = vld [vmem:[%s4713_s1 + $0x1c8] ss:$16 sps:$4 sm:$0xff]  }
  0x45   :  { %1724 = vmatprep.subr.bf16.mxu0 %v3146_v20  ;;  %1836 = vmatprep.mubr.bf16.mxu1 %v331_v62  ;;  %v3200_v62 = vld [vmem:[%s4713_s1 + $0x544] ss:$16 sps:$4 sm:$0xff]   ;;  %v3222_v20 = vld [vmem:[%s4713_s1 + $0x5c0] ss:$16 sps:$4 sm:$0xff]  }
  0x46   :  { %1754 = vmatprep.mubr.bf16.mxu0 %v3917_v51 }
  0x47   :  { %1807 = vmatpush1.bf16.msra.mxu1 %v3147_v23  ;;  %v3233_v23 = vld [vmem:[%s4713_s1 + $0x1ec] ss:$16 sps:$4 sm:$0xff]  }
  0x48   :  { %1725 = vmatpush1.bf16.msra.mxu0 %v3144_v22  ;;  %1808 = vmatprep.subr.bf16.mxu1 %v3155_v25  ;;  %v3230_v22 = vld [vmem:[%s4713_s1 + $0x5e4] ss:$16 sps:$4 sm:$0xff]   ;;  %v3228_v25 = vld [vmem:[%s4713_s1 + $0x5e0] ss:$16 sps:$4 sm:$0xff]  }
  0x49   :  { %1726 = vmatprep.subr.bf16.mxu0 %v3152_v24  ;;  %v4019_v24 = vrot.slane %v305_v19, %v3740_v49  ;;  %v3239_v49 = vld [vmem:[%s4713_s1 + $0x20c] ss:$16 sps:$4 sm:$0xff]   ;;  %v3306_v19 = vld [vmem:[%s4713_s1 + $0x780] ss:$16 sps:$4 sm:$0xff]  }
  0x4b   :  { %1809 = vmatpush1.bf16.msra.mxu1 %v3153_v27  ;;  %v3236_v27 = vld [vmem:[%s4713_s1 + $0x604] ss:$16 sps:$4 sm:$0xff]  }
  0x4c   :  { %1727 = vmatpush1.bf16.msra.mxu0 %v3150_v26  ;;  %1810 = vmatprep.subr.bf16.mxu1 %v3161_v29  ;;  %v3231_v26 = vld [vmem:[%s4713_s1 + $0x1e8] ss:$16 sps:$4 sm:$0xff]   ;;  %v4037_v29 = vpack.c.bf16 %v3901_v44, %v3901_v44  ;;  %v3260_v44 = vld [vmem:[%s4713_s1 + $0x684] ss:$16 sps:$4 sm:$0xff]  }
  0x4d   :  { %1728 = vmatprep.subr.bf16.mxu0 %v3158_v28  ;;  %v321_v28 = vcombine.high %v4019_v24, %v4019_v24 }
  0x4f   :  { %1811 = vmatpush1.bf16.msra.mxu1 %v3159_v31  ;;  %v3237_v31 = vld [vmem:[%s4713_s1 + $0x208] ss:$16 sps:$4 sm:$0xff]  }
  0x50   :  { %1729 = vmatpush1.bf16.msra.mxu0 %v3156_v30  ;;  %1812 = vmatprep.subr.bf16.mxu1 %v3167_v33  ;;  %v3234_v30 = vld [vmem:[%s4713_s1 + $0x600] ss:$16 sps:$4 sm:$0xff]   ;;  %v3245_v33 = vld [vmem:[%s4713_s1 + $0x22c] ss:$16 sps:$4 sm:$0xff]  }
  0x51   :  { %1730 = vmatprep.subr.bf16.mxu0 %v3164_v32  ;;  %v3242_v32 = vld [vmem:[%s4713_s1 + $0x624] ss:$16 sps:$4 sm:$0xff]  }
  0x53   :  { %1813 = vmatpush1.bf16.msra.mxu1 %v3165_v35  ;;  %v3240_v35 = vld [vmem:[%s4713_s1 + $0x620] ss:$16 sps:$4 sm:$0xff]  }
  0x54   :  { %1731 = vmatpush1.bf16.msra.mxu0 %v3162_v34  ;;  %1814 = vmatprep.subr.bf16.mxu1 %v3173_v37  ;;  %v4051_v34 = vpack.c.bf16 %v321_v28, %v321_v28  ;;  %v3248_v37 = vld [vmem:[%s4713_s1 + $0x644] ss:$16 sps:$4 sm:$0xff]   ;;  %v3321_v28 = vld [vmem:[%s4713_s1 + $0x3c8] ss:$16 sps:$4 sm:$0xff]  }
  0x55   :  { %1732 = vmatprep.subr.bf16.mxu0 %v3170_v36  ;;  %v3243_v36 = vld [vmem:[%s4713_s1 + $0x228] ss:$16 sps:$4 sm:$0xff]  }
  0x57   :  { %1815 = vmatpush1.bf16.msra.mxu1 %v3171_v39  ;;  %v3249_v39 = vld [vmem:[%s4713_s1 + $0x248] ss:$16 sps:$4 sm:$0xff]  }
  0x58   :  { %1733 = vmatpush1.bf16.msra.mxu0 %v3168_v38  ;;  %1816 = vmatprep.subr.bf16.mxu1 %v3179_v41  ;;  %v3246_v38 = vld [vmem:[%s4713_s1 + $0x640] ss:$16 sps:$4 sm:$0xff]  }
  0x59   :  { %1734 = vmatprep.subr.bf16.mxu0 %v3176_v40  ;;  %v3254_v40 = vld [vmem:[%s4713_s1 + $0x664] ss:$16 sps:$4 sm:$0xff]   ;;  %v3252_v41 = vld [vmem:[%s4713_s1 + $0x660] ss:$16 sps:$4 sm:$0xff]  }
  0x5b   :  { %1817 = vmatpush1.bf16.msra.mxu1 %v3177_v46  ;;  %v3258_v46 = vld [vmem:[%s4713_s1 + $0x680] ss:$16 sps:$4 sm:$0xff]  }
  0x5c   :  { %1735 = vmatpush1.bf16.msra.mxu0 %v3174_v45  ;;  %1818 = vmatprep.subr.bf16.mxu1 %v3185_v50  ;;  %v3263_v45 = vld [vmem:[%s4713_s1 + $0x28c] ss:$16 sps:$4 sm:$0xff]  }
  0x5d   :  { %1736 = vmatprep.subr.bf16.mxu0 %v3182_v48  ;;  %v3266_v48 = vld [vmem:[%s4713_s1 + $0x6a4] ss:$16 sps:$4 sm:$0xff]   ;;  %v3269_v50 = vld [vmem:[%s4713_s1 + $0x2ac] ss:$16 sps:$4 sm:$0xff]  }
  0x5f   :  { %1819 = vmatpush1.bf16.msra.mxu1 %v3183_v53  ;;  %v3267_v53 = vld [vmem:[%s4713_s1 + $0x2a8] ss:$16 sps:$4 sm:$0xff]  }
  0x60   :  { %1737 = vmatpush1.bf16.msra.mxu0 %v3180_v52  ;;  %1820 = vmatprep.subr.bf16.mxu1 %v3191_v55  ;;  %v3264_v52 = vld [vmem:[%s4713_s1 + $0x6a0] ss:$16 sps:$4 sm:$0xff]   ;;  %v3275_v55 = vld [vmem:[%s4713_s1 + $0x2cc] ss:$16 sps:$4 sm:$0xff]  }
  0x61   :  { %1738 = vmatprep.subr.bf16.mxu0 %v3188_v54  ;;  %v3272_v54 = vld [vmem:[%s4713_s1 + $0x6c4] ss:$16 sps:$4 sm:$0xff]  }
  0x63   :  { %1821 = vmatpush1.bf16.msra.mxu1 %v3189_v57  ;;  %v3273_v57 = vld [vmem:[%s4713_s1 + $0x2c8] ss:$16 sps:$4 sm:$0xff]  }
  0x64   :  { %1739 = vmatpush1.bf16.msra.mxu0 %v3186_v56  ;;  %1822 = vmatprep.subr.bf16.mxu1 %v3197_v59  ;;  %v3270_v56 = vld [vmem:[%s4713_s1 + $0x6c0] ss:$16 sps:$4 sm:$0xff]   ;;  %v3281_v59 = vld [vmem:[%s4713_s1 + $0x2ec] ss:$16 sps:$4 sm:$0xff]  }
  0x65   :  { %1740 = vmatprep.subr.bf16.mxu0 %v3194_v58  ;;  %v3278_v58 = vld [vmem:[%s4713_s1 + $0x6e4] ss:$16 sps:$4 sm:$0xff]  }
  0x67   :  { %1823 = vmatpush1.bf16.msra.mxu1 %v3195_v61  ;;  %v3279_v61 = vld [vmem:[%s4713_s1 + $0x2e8] ss:$16 sps:$4 sm:$0xff]  }
  0x68   :  { %1741 = vmatpush1.bf16.msra.mxu0 %v3192_v60  ;;  %1824 = vmatprep.subr.bf16.mxu1 %v3203_v63  ;;  %v3276_v60 = vld [vmem:[%s4713_s1 + $0x6e0] ss:$16 sps:$4 sm:$0xff]   ;;  %v3287_v63 = vld [vmem:[%s4713_s1 + $0x30c] ss:$16 sps:$4 sm:$0xff]  }
  0x69   :  { %1742 = vmatprep.subr.bf16.mxu0 %v3200_v62  ;;  %v3284_v62 = vld [vmem:[%s4713_s1 + $0x704] ss:$16 sps:$4 sm:$0xff]  }
  0x6b   :  { %1825 = vmatpush1.bf16.msra.mxu1 %v3201_v1  ;;  %v3285_v1 = vld [vmem:[%s4713_s1 + $0x308] ss:$16 sps:$4 sm:$0xff]  }
  0x6c   :  { %1743 = vmatpush1.bf16.msra.mxu0 %v3198_v0  ;;  %1826 = vmatprep.subr.bf16.mxu1 %v3209_v4  ;;  %v3282_v0 = vld [vmem:[%s4713_s1 + $0x700] ss:$16 sps:$4 sm:$0xff]   ;;  %v3293_v4 = vld [vmem:[%s4713_s1 + $0x32c] ss:$16 sps:$4 sm:$0xff]  }
  0x6d   :  { %1744 = vmatprep.subr.bf16.mxu0 %v3206_v2  ;;  %v3290_v2 = vld [vmem:[%s4713_s1 + $0x724] ss:$16 sps:$4 sm:$0xff]  }
  0x6f   :  { %1827 = vmatpush1.bf16.msra.mxu1 %v3207_v6  ;;  %v3291_v6 = vld [vmem:[%s4713_s1 + $0x328] ss:$16 sps:$4 sm:$0xff]  }
  0x70   :  { %1745 = vmatpush1.bf16.msra.mxu0 %v3204_v5  ;;  %1828 = vmatprep.subr.bf16.mxu1 %v3215_v8  ;;  %v3288_v5 = vld [vmem:[%s4713_s1 + $0x720] ss:$16 sps:$4 sm:$0xff]   ;;  %v3299_v8 = vld [vmem:[%s4713_s1 + $0x34c] ss:$16 sps:$4 sm:$0xff]  }
  0x71   :  { %1746 = vmatprep.subr.bf16.mxu0 %v3212_v7  ;;  %v3296_v7 = vld [vmem:[%s4713_s1 + $0x744] ss:$16 sps:$4 sm:$0xff]  }
  0x73   :  { %1829 = vmatpush1.bf16.msra.mxu1 %v3213_v10  ;;  %v3297_v10 = vld [vmem:[%s4713_s1 + $0x348] ss:$16 sps:$4 sm:$0xff]  }
  0x74   :  { %1747 = vmatpush1.bf16.msra.mxu0 %v3210_v9  ;;  %1830 = vmatprep.subr.bf16.mxu1 %v3221_v12  ;;  %v3294_v9 = vld [vmem:[%s4713_s1 + $0x740] ss:$16 sps:$4 sm:$0xff]   ;;  %v3305_v12 = vld [vmem:[%s4713_s1 + $0x36c] ss:$16 sps:$4 sm:$0xff]  }
  0x75   :  { %1748 = vmatprep.subr.bf16.mxu0 %v3218_v11  ;;  %v3302_v11 = vld [vmem:[%s4713_s1 + $0x764] ss:$16 sps:$4 sm:$0xff]  }
  0x77   :  { %1831 = vmatpush1.bf16.msra.mxu1 %v3219_v14  ;;  %v3303_v14 = vld [vmem:[%s4713_s1 + $0x368] ss:$16 sps:$4 sm:$0xff]  }
  0x78   :  { %1749 = vmatpush1.bf16.msra.mxu0 %v3216_v13  ;;  %1832 = vmatprep.subr.bf16.mxu1 %v3227_v17  ;;  %v3300_v13 = vld [vmem:[%s4713_s1 + $0x760] ss:$16 sps:$4 sm:$0xff]   ;;  %v3311_v17 = vld [vmem:[%s4713_s1 + $0x38c] ss:$16 sps:$4 sm:$0xff]  }
  0x79   :  { %1750 = vmatprep.subr.bf16.mxu0 %v3224_v15  ;;  %v3308_v15 = vld [vmem:[%s4713_s1 + $0x784] ss:$16 sps:$4 sm:$0xff]  }
  0x7b   :  { %1833 = vmatpush1.bf16.msra.mxu1 %v3225_v21  ;;  %v3314_v21 = vld [vmem:[%s4713_s1 + $0x7a4] ss:$16 sps:$4 sm:$0xff]  }
  0x7c   :  { %1751 = vmatpush1.bf16.msra.mxu0 %v3222_v20  ;;  %1834 = vmatprep.subr.bf16.mxu1 %v3233_v23  ;;  %v3309_v20 = vld [vmem:[%s4713_s1 + $0x388] ss:$16 sps:$4 sm:$0xff]   ;;  %v3312_v23 = vld [vmem:[%s4713_s1 + $0x7a0] ss:$16 sps:$4 sm:$0xff]  }
  0x7d   :  { %1752 = vmatprep.subr.bf16.mxu0 %v3230_v22  ;;  %v3317_v22 = vld [vmem:[%s4713_s1 + $0x3ac] ss:$16 sps:$4 sm:$0xff]  }
  0x7f   :  { %1835 = vmatpush1.bf16.msra.mxu1 %v3231_v26  ;;  %v3320_v26 = vld [vmem:[%s4713_s1 + $0x7c4] ss:$16 sps:$4 sm:$0xff]  }
  0x80   :  { %1753 = vmatpush1.bf16.msra.mxu0 %v3228_v25  ;;  %1845 = vmatprep.subr.bf16.mxu1 %v3239_v49  ;;  %v3315_v25 = vld [vmem:[%s4713_s1 + $0x3a8] ss:$16 sps:$4 sm:$0xff]   ;;  %v3318_v49 = vld [vmem:[%s4713_s1 + $0x7c0] ss:$16 sps:$4 sm:$0xff]  }
  0x81   :  { %1763 = vmatprep.subr.bf16.mxu0 %v3236_v27  ;;  %v3323_v27 = vld [vmem:[%s4713_s1 + $0x3cc] ss:$16 sps:$4 sm:$0xff]  }
  0x82   :  { %1837 = vmatmul.mubr.bf16.vlgmr.msra.gmra.mrb[4].mxu1 %v3816_v16  ;;  %v3251_v16 = vld [vmem:[%s4713_s1 + $0x24c] ss:$16 sps:$4 sm:$0xff]  }
  0x83   :  { %1755 = vmatmul.mubr.bf16.vlgmr.msra.gmra.mrb[0].mxu0 %v4037_v29  ;;  %1846 = vmatpush1.bf16.msra.mxu1 %v3237_v31  ;;  %v3329_v31 = vld [vmem:[%s4713_s1 + $0x3ec] ss:$16 sps:$4 sm:$0xff]  }
  0x84   :  { %1764 = vmatpush1.bf16.msra.mxu0 %v3234_v30  ;;  %1847 = vmatprep.subr.bf16.mxu1 %v3245_v33  ;;  %v3326_v30 = vld [vmem:[%s4713_s1 + $0x7e4] ss:$16 sps:$4 sm:$0xff]   ;;  %v3327_v33 = vld [vmem:[%s4713_s1 + $0x3e8] ss:$16 sps:$4 sm:$0xff]  }
  0x85   :  { %1765 = vmatprep.subr.bf16.mxu0 %v3242_v32  ;;  %1795 = vmatprep.mubr.bf16.mxu0 %v4051_v34  ;;  %v3324_v32 = vld [vmem:[%s4713_s1 + $0x7e0] ss:$16 sps:$4 sm:$0xff]  }
  0x86   :  { %1877 = vmatprep.mubr.bf16.mxu1 %v3777_v3  ;;  %v3257_v3 = vld [vmem:[%s4713_s1 + $0x26c] ss:$16 sps:$4 sm:$0xff]  }
  0x87   :  { %1848 = vmatpush1.bf16.msra.mxu1 %v3243_v36  ;;  %v3331_v36 = vld [vmem:[%s4713_s1 + $0x408] ss:$16 sps:$4 sm:$0xff]  }
  0x88   :  { %1766 = vmatpush1.bf16.msra.mxu0 %v3240_v35  ;;  %1849 = vmatprep.subr.bf16.mxu1 %v3251_v16  ;;  %v3333_v35 = vld [vmem:[%s4713_s1 + $0x40c] ss:$16 sps:$4 sm:$0xff]  }
  0x89   :  { %1767 = vmatprep.subr.bf16.mxu0 %v3248_v37  ;;  %v4239_v37 = vpack.c.bf16 %v4019_v24, %v4019_v24  ;;  %v3336_v16 = vld [vmem:[%s4713_s1 + $0x42c] ss:$16 sps:$4 sm:$0xff]  }
  0x8a   :  { %v3429_v24 = vld [vmem:[%s4715_s3 + $0x4] ss:$8 sps:$4 sm:$0xff]  }
  0x8b   :  { %1850 = vmatpush1.bf16.msra.mxu1 %v3249_v39  ;;  %v3334_v39 = vld [vmem:[%s4713_s1 + $0x428] ss:$16 sps:$4 sm:$0xff]  }
  0x8c   :  { %1768 = vmatpush1.bf16.msra.mxu0 %v3246_v38  ;;  %1851 = vmatprep.subr.bf16.mxu1 %v3257_v3  ;;  %v3427_v38 = vld [vmem:[%s4715_s3] ss:$8 sps:$4 sm:$0xff]   ;;  %v3430_v3 = vld [vmem:[%s4715_s3 + $0x10] ss:$8 sps:$4 sm:$0xff]  }
  0x8d   :  { %1769 = vmatprep.subr.bf16.mxu0 %v3254_v40  ;;  %v3432_v40 = vld [vmem:[%s4715_s3 + $0x14] ss:$8 sps:$4 sm:$0xff]  }
  0x8f   :  { %1852 = vmatpush1.bf16.msra.mxu1 %v3255_v42  ;;  %v3342_v42 = vld [vmem:[%s4713_s1 + $0x46c] ss:$16 sps:$4 sm:$0xff]  }
  0x90   :  { %1770 = vmatpush1.bf16.msra.mxu0 %v3252_v41  ;;  %1853 = vmatprep.subr.bf16.mxu1 %v3263_v45  ;;  %v3337_v41 = vld [vmem:[%s4713_s1 + $0x448] ss:$16 sps:$4 sm:$0xff]  }
  0x91   :  { %1771 = vmatprep.subr.bf16.mxu0 %v3260_v44  ;;  %v3433_v44 = vld [vmem:[%s4715_s3 + $0x20] ss:$8 sps:$4 sm:$0xff]  }
  0x92   :  { %v3340_v45 = vld [vmem:[%s4713_s1 + $0x468] ss:$16 sps:$4 sm:$0xff]  }
  0x93   :  { %1854 = vmatpush1.bf16.msra.mxu1 %v3261_v47  ;;  %v3438_v47 = vld [vmem:[%s4715_s3 + $0x34] ss:$8 sps:$4 sm:$0xff]  }
  0x94   :  { %1772 = vmatpush1.bf16.msra.mxu0 %v3258_v46  ;;  %1855 = vmatprep.subr.bf16.mxu1 %v3269_v50  ;;  %v3345_v46 = vld [vmem:[%s4713_s1 + $0x48c] ss:$16 sps:$4 sm:$0xff]  }
  0x95   :  { %1773 = vmatprep.subr.bf16.mxu0 %v3266_v48  ;;  %v3436_v48 = vld [vmem:[%s4715_s3 + $0x30] ss:$8 sps:$4 sm:$0xff]   ;;  %v3441_v50 = vld [vmem:[%s4715_s3 + $0x44] ss:$8 sps:$4 sm:$0xff]  }
  0x97   :  { %1856 = vmatpush1.bf16.msra.mxu1 %v3267_v53  ;;  %v3348_v53 = vld [vmem:[%s4713_s1 + $0x4ac] ss:$16 sps:$4 sm:$0xff]  }
  0x98   :  { %1774 = vmatpush1.bf16.msra.mxu0 %v3264_v52  ;;  %1857 = vmatprep.subr.bf16.mxu1 %v3275_v55  ;;  %v3343_v52 = vld [vmem:[%s4713_s1 + $0x488] ss:$16 sps:$4 sm:$0xff]   ;;  %v3444_v55 = vld [vmem:[%s4715_s3 + $0x54] ss:$8 sps:$4 sm:$0xff]  }
  0x99   :  { %1775 = vmatprep.subr.bf16.mxu0 %v3272_v54  ;;  %v3439_v54 = vld [vmem:[%s4715_s3 + $0x40] ss:$8 sps:$4 sm:$0xff]  }
  0x9b   :  { %1858 = vmatpush1.bf16.msra.mxu1 %v3273_v57  ;;  %v3351_v57 = vld [vmem:[%s4713_s1 + $0x4cc] ss:$16 sps:$4 sm:$0xff]  }
  0x9c   :  { %1776 = vmatpush1.bf16.msra.mxu0 %v3270_v56  ;;  %1859 = vmatprep.subr.bf16.mxu1 %v3281_v59  ;;  %v3346_v56 = vld [vmem:[%s4713_s1 + $0x4a8] ss:$16 sps:$4 sm:$0xff]  }
  0x9d   :  { %1777 = vmatprep.subr.bf16.mxu0 %v3278_v58 }
  0x9f   :  { %1860 = vmatpush1.bf16.msra.mxu1 %v3279_v61 }
  0xa0   :  { %1778 = vmatpush1.bf16.msra.mxu0 %v3276_v60  ;;  %1861 = vmatprep.subr.bf16.mxu1 %v3287_v63 }
  0xa1   :  { %1779 = vmatprep.subr.bf16.mxu0 %v3284_v62 }
  0xa3   :  { %1862 = vmatpush1.bf16.msra.mxu1 %v3285_v1 }
  0xa4   :  { %1780 = vmatpush1.bf16.msra.mxu0 %v3282_v0  ;;  %1863 = vmatprep.subr.bf16.mxu1 %v3293_v4 }
  0xa5   :  { %1781 = vmatprep.subr.bf16.mxu0 %v3290_v2 }
  0xa7   :  { %1864 = vmatpush1.bf16.msra.mxu1 %v3291_v6 }
  0xa8   :  { %1782 = vmatpush1.bf16.msra.mxu0 %v3288_v5  ;;  %1865 = vmatprep.subr.bf16.mxu1 %v3299_v8 }
  0xa9   :  { %1783 = vmatprep.subr.bf16.mxu0 %v3296_v7 }
  0xab   :  { %1866 = vmatpush1.bf16.msra.mxu1 %v3297_v10 }
  0xac   :  { %1784 = vmatpush1.bf16.msra.mxu0 %v3294_v9  ;;  %1867 = vmatprep.subr.bf16.mxu1 %v3305_v12 }
  0xad   :  { %1785 = vmatprep.subr.bf16.mxu0 %v3302_v11 }
  0xaf   :  { %1868 = vmatpush1.bf16.msra.mxu1 %v3303_v14 }
  0xb0   :  { %1786 = vmatpush1.bf16.msra.mxu0 %v3300_v13  ;;  %1869 = vmatprep.subr.bf16.mxu1 %v3311_v17 }
  0xb1   :  { %1787 = vmatprep.subr.bf16.mxu0 %v3308_v15 }
  0xb3   :  { %1870 = vmatpush1.bf16.msra.mxu1 %v3309_v20 }
  0xb4   :  { %1788 = vmatpush1.bf16.msra.mxu0 %v3306_v19  ;;  %1871 = vmatprep.subr.bf16.mxu1 %v3317_v22 }
  0xb5   :  { %1789 = vmatprep.subr.bf16.mxu0 %v3314_v21 }
  0xb7   :  { %1872 = vmatpush1.bf16.msra.mxu1 %v3315_v25 }
  0xb8   :  { %1790 = vmatpush1.bf16.msra.mxu0 %v3312_v23  ;;  %1873 = vmatprep.subr.bf16.mxu1 %v3323_v27 }
  0xb9   :  { %1791 = vmatprep.subr.bf16.mxu0 %v3320_v26 }
  0xbb   :  { %1874 = vmatpush1.bf16.msra.mxu1 %v3321_v28 }
  0xbc   :  { %1792 = vmatpush1.bf16.msra.mxu0 %v3318_v49  ;;  %1875 = vmatprep.subr.bf16.mxu1 %v3329_v31 }
  0xbd   :  { %1793 = vmatprep.subr.bf16.mxu0 %v3326_v30 }
  0xbf   :  { %1876 = vmatpush1.bf16.msra.mxu1 %v3327_v33 }
  0xc0   :  { %1794 = vmatpush1.bf16.msra.mxu0 %v3324_v32  ;;  %1886 = vmatprep.subr.bf16.mxu1 %v3333_v35 }
  0xc1   :  { %2372 = vmatprep.subr.bf16.mxu0 %v3429_v24 }
  0xc2   :  { %1878 = vmatmul.mubr.bf16.vlgmr.msra.gmra.mrb[4].mxu1 %v3821_v18  ;;  %v3339_v18 = vld [vmem:[%s4713_s1 + $0x44c] ss:$16 sps:$4 sm:$0xff]  }
  0xc3   :  { %1796 = vmatmul.mubr.bf16.vlgmr.msra.gmra.mrb[0].mxu0 %v4239_v37  ;;  %1887 = vmatpush1.bf16.msra.mxu1 %v3331_v36 }
  0xc4   :  { %1918 = vmatprep.mubr.bf16.mxu1 %v3917_v51  ;;  %1888 = vmatprep.subr.bf16.mxu1 %v3336_v16  ;;  %v3435_v51 = vld [vmem:[%s4715_s3 + $0x24] ss:$8 sps:$4 sm:$0xff]  }
  0xc5   :  { %2373 = vmatpush1.bf16.msra.mxu0 %v3427_v38 }
  0xc6   :  { %2374 = vmatprep.subr.bf16.mxu0 %v3432_v40 }
  0xc7   :  { %1889 = vmatpush1.bf16.msra.mxu1 %v3334_v39 }
  0xc8   :  { %1890 = vmatprep.subr.bf16.mxu1 %v3339_v18 }
  0xc9   :  { %2375 = vmatpush1.bf16.msra.mxu0 %v3430_v3 }
  0xca   :  { %2376 = vmatprep.subr.bf16.mxu0 %v3435_v51 }
  0xcb   :  { %1891 = vmatpush1.bf16.msra.mxu1 %v3337_v41 }
  0xcc   :  { %1892 = vmatprep.subr.bf16.mxu1 %v3342_v42 }
  0xcd   :  { %2377 = vmatpush1.bf16.msra.mxu0 %v3433_v44 }
  0xce   :  { %2378 = vmatprep.subr.bf16.mxu0 %v3438_v47 }
  0xcf   :  { %1893 = vmatpush1.bf16.msra.mxu1 %v3340_v45 }
  0xd0   :  { %1894 = vmatprep.subr.bf16.mxu1 %v3345_v46 }
  0xd1   :  { %2379 = vmatpush1.bf16.msra.mxu0 %v3436_v48 }
  0xd2   :  { %2380 = vmatprep.subr.bf16.mxu0 %v3441_v50 }
  0xd3   :  { %1895 = vmatpush1.bf16.msra.mxu1 %v3343_v52 }
  0xd4   :  { %1896 = vmatprep.subr.bf16.mxu1 %v3348_v53 }
  0xd5   :  { %12 = vsyncpa [#allocation3], 0  ;;  %2381 = vmatpush1.bf16.msra.mxu0 %v3439_v54  ;;  %v3442_v58 = vld [vmem:[%s4715_s3 + $0x50] ss:$8 sps:$4 sm:$0xff]   ;;  %v3447_v59 = vld [vmem:[%s4715_s3 + $0x64] ss:$8 sps:$4 sm:$0xff]  }
  0xd6   :  { %2382 = vmatprep.subr.bf16.mxu0 %v3444_v55  ;;  %v3349_v60 = vld [vmem:[%s4713_s1 + $0x4c8] ss:$16 sps:$4 sm:$0xff]   ;;  %v3354_v61 = vld [vmem:[%s4713_s1 + $0x4ec] ss:$16 sps:$4 sm:$0xff]   ;;  %s3564_s30 = smov [#allocation2]  }
  0xd7   :  { %1897 = vmatpush1.bf16.msra.mxu1 %v3346_v56  ;;  %v3445_v62 = vld [vmem:[%s4715_s3 + $0x60] ss:$8 sps:$4 sm:$0xff]   ;;  %v3450_v63 = vld [vmem:[%s4715_s3 + $0x74] ss:$8 sps:$4 sm:$0xff]   ;;  %v3448_v2 = vld [vmem:[%s4715_s3 + $0x70] ss:$8 sps:$4 sm:$0xff]  }
  0xd8   :  { %1898 = vmatprep.subr.bf16.mxu1 %v3351_v57  ;;  %v3352_v0 = vld [vmem:[%s4713_s1 + $0x4e8] ss:$16 sps:$4 sm:$0xff]   ;;  %v3357_v1 = vld [vmem:[%s4713_s1 + $0x50c] ss:$16 sps:$4 sm:$0xff]   ;;  %s2640_s8 = sshll.u32 %s3564_s30, 4  ;;  %s2641_s8 = int_to_ptr.vmem [resolvable:$true] %s2640_s8 }
  0xd9   :  { %2383 = vmatpush1.bf16.msra.mxu0 %v3442_v58  ;;  %v3453_v4 = vld [vmem:[%s4715_s3 + $0x84] ss:$8 sps:$4 sm:$0xff]   ;;  %v3355_v5 = vld [vmem:[%s4713_s1 + $0x508] ss:$16 sps:$4 sm:$0xff]   ;;  %v3456_v8 = vld [vmem:[%s4715_s3 + $0x94] ss:$8 sps:$4 sm:$0xff]   ;;  %p3544_p1 = scmp.lt.s32.totalorder %s2641_s8, %s2641_s8 }
  0xda   :  { %2384 = vmatprep.subr.bf16.mxu0 %v3447_v59  ;;  %v3360_v6 = vld [vmem:[%s4713_s1 + $0x52c] ss:$16 sps:$4 sm:$0xff]   ;;  %v3451_v7 = vld [vmem:[%s4715_s3 + $0x80] ss:$8 sps:$4 sm:$0xff]   ;;  %v3454_v11 = vld [vmem:[%s4715_s3 + $0x90] ss:$8 sps:$4 sm:$0xff]  }
  0xdb   :  { %1899 = vmatpush1.bf16.msra.mxu1 %v3349_v60  ;;  %v3358_v9 = vld [vmem:[%s4713_s1 + $0x528] ss:$16 sps:$4 sm:$0xff]   ;;  %v3363_v10 = vld [vmem:[%s4713_s1 + $0x54c] ss:$16 sps:$4 sm:$0xff]   ;;  %s3539_s9 = scalar_lea.vmem %s2641_s8, 32 }
  0xdc   :  { %1900 = vmatprep.subr.bf16.mxu1 %v3354_v61  ;;  %v3459_v12 = vld [vmem:[%s4715_s3 + $0xa4] ss:$8 sps:$4 sm:$0xff]   ;;  %v3361_v13 = vld [vmem:[%s4713_s1 + $0x548] ss:$16 sps:$4 sm:$0xff]   ;;  %v3462_v17 = vld [vmem:[%s4715_s3 + $0xb4] ss:$8 sps:$4 sm:$0xff]   ;;  %p3540_p0 = scmp.ne.s32.totalorder %s2641_s8, %s3539_s9  ;;  %p3545_p2 = scmp.lt.s32.totalorder %s3539_s9, %s3539_s9 }
  0xdd   :  { %2385 = vmatpush1.bf16.msra.mxu0 %v3445_v62  ;;  %v3366_v14 = vld [vmem:[%s4713_s1 + $0x56c] ss:$16 sps:$4 sm:$0xff]   ;;  %v3457_v15 = vld [vmem:[%s4715_s3 + $0xa0] ss:$8 sps:$4 sm:$0xff]   ;;  %v3460_v21 = vld [vmem:[%s4715_s3 + $0xb0] ss:$8 sps:$4 sm:$0xff]  }
  0xde   :  { %2386 = vmatprep.subr.bf16.mxu0 %v3450_v63  ;;  %v3364_v19 = vld [vmem:[%s4713_s1 + $0x568] ss:$16 sps:$4 sm:$0xff]   ;;  %v3369_v20 = vld [vmem:[%s4713_s1 + $0x58c] ss:$16 sps:$4 sm:$0xff]   ;;  %p3546_p3 = por %p3545_p2, %p3544_p1 }
  0xdf   :  { %1901 = vmatpush1.bf16.msra.mxu1 %v3352_v0  ;;  %v3465_v22 = vld [vmem:[%s4715_s3 + $0xc4] ss:$8 sps:$4 sm:$0xff]   ;;  %v3367_v23 = vld [vmem:[%s4713_s1 + $0x588] ss:$16 sps:$4 sm:$0xff]   ;;  %v3468_v27 = vld [vmem:[%s4715_s3 + $0xd4] ss:$8 sps:$4 sm:$0xff]  }
  0xe0   :  { %1902 = vmatprep.subr.bf16.mxu1 %v3357_v1  ;;  %v3372_v25 = vld [vmem:[%s4713_s1 + $0x5ac] ss:$16 sps:$4 sm:$0xff]   ;;  %v3463_v26 = vld [vmem:[%s4715_s3 + $0xc0] ss:$8 sps:$4 sm:$0xff]   ;;  %v3466_v30 = vld [vmem:[%s4715_s3 + $0xd0] ss:$8 sps:$4 sm:$0xff]   ;;  %p3547_p4 = pnand %p3546_p3, %p3540_p0 }
  0xe1   :  { %2387 = vmatpush1.bf16.msra.mxu0 %v3448_v2  ;;  %v3370_v49 = vld [vmem:[%s4713_s1 + $0x5a8] ss:$16 sps:$4 sm:$0xff]   ;;  %v3375_v28 = vld [vmem:[%s4713_s1 + $0x5cc] ss:$16 sps:$4 sm:$0xff]  }
  0xe2   :  { %2388 = vmatprep.subr.bf16.mxu0 %v3453_v4  ;;  %v3373_v31 = vld [vmem:[%s4713_s1 + $0x5c8] ss:$16 sps:$4 sm:$0xff]   ;;  %v3378_v32 = vld [vmem:[%s4713_s1 + $0x5ec] ss:$16 sps:$4 sm:$0xff]  }
  0xe3   :  { %1903 = vmatpush1.bf16.msra.mxu1 %v3355_v5  ;;  %v3376_v33 = vld [vmem:[%s4713_s1 + $0x5e8] ss:$16 sps:$4 sm:$0xff]   ;;  %v3381_v35 = vld [vmem:[%s4713_s1 + $0x60c] ss:$16 sps:$4 sm:$0xff]  }
  0xe4   :  { %1904 = vmatprep.subr.bf16.mxu1 %v3360_v6  ;;  %v3379_v36 = vld [vmem:[%s4713_s1 + $0x608] ss:$16 sps:$4 sm:$0xff]   ;;  %v3384_v16 = vld [vmem:[%s4713_s1 + $0x62c] ss:$16 sps:$4 sm:$0xff]  }
  0xe5   :  { %2389 = vmatpush1.bf16.msra.mxu0 %v3451_v7  ;;  %v3382_v38 = vld [vmem:[%s4713_s1 + $0x628] ss:$16 sps:$4 sm:$0xff]   ;;  %v3387_v24 = vld [vmem:[%s4713_s1 + $0x64c] ss:$16 sps:$4 sm:$0xff]  }
  0xe6   :  { %2390 = vmatprep.subr.bf16.mxu0 %v3456_v8  ;;  %v3385_v39 = vld [vmem:[%s4713_s1 + $0x648] ss:$16 sps:$4 sm:$0xff]   ;;  %v3393_v40 = vld [vmem:[%s4713_s1 + $0x68c] ss:$16 sps:$4 sm:$0xff]  }
  0xe7   :  { %1905 = vmatpush1.bf16.msra.mxu1 %v3358_v9  ;;  %v3391_v18 = vld [vmem:[%s4713_s1 + $0x688] ss:$16 sps:$4 sm:$0xff]   ;;  %v3396_v3 = vld [vmem:[%s4713_s1 + $0x6ac] ss:$16 sps:$4 sm:$0xff]  }
  0xe8   :  { %1906 = vmatprep.subr.bf16.mxu1 %v3363_v10  ;;  %v3394_v51 = vld [vmem:[%s4713_s1 + $0x6a8] ss:$16 sps:$4 sm:$0xff]   ;;  %v3399_v41 = vld [vmem:[%s4713_s1 + $0x6cc] ss:$16 sps:$4 sm:$0xff]   ;;  %v342_v10 = vsub.s32 0, %v3722_v43 }
  0xe9   :  { %2391 = vmatpush1.bf16.msra.mxu0 %v3454_v11  ;;  %v3471_v42 = vld [vmem:[%s4715_s3 + $0xe4] ss:$8 sps:$4 sm:$0xff]   ;;  %v3469_v45 = vld [vmem:[%s4715_s3 + $0xe0] ss:$8 sps:$4 sm:$0xff]   ;;  %v3474_v53 = vld [vmem:[%s4715_s3 + $0xf4] ss:$8 sps:$4 sm:$0xff]  }
  0xea   :  { %2392 = vmatprep.subr.bf16.mxu0 %v3459_v12  ;;  %v3397_v48 = vld [vmem:[%s4713_s1 + $0x6c8] ss:$16 sps:$4 sm:$0xff]   ;;  %v3402_v52 = vld [vmem:[%s4713_s1 + $0x6ec] ss:$16 sps:$4 sm:$0xff]   ;;  %v4536_v11 = vld [vmem:[%s4714_s2] sm:$0xf] }
  0xeb   :  { %1907 = vmatpush1.bf16.msra.mxu1 %v3361_v13  ;;  %v3472_v54 = vld [vmem:[%s4715_s3 + $0xf0] ss:$8 sps:$4 sm:$0xff]   ;;  %v3405_v56 = vld [vmem:[%s4713_s1 + $0x70c] ss:$16 sps:$4 sm:$0xff]   ;;  %v346_v12 = vsub.s32 1, %v3722_v43  ;;  %v343_v13 = vrot.slane %v4536_v11, %v342_v10 }
  0xec   :  { %1908 = vmatprep.subr.bf16.mxu1 %v3366_v14  ;;  %v3400_v55 = vld [vmem:[%s4713_s1 + $0x6e8] ss:$16 sps:$4 sm:$0xff]   ;;  %v3477_v57 = vld [vmem:[%s4715_s3 + $0x104] ss:$8 sps:$4 sm:$0xff]  }
  0xed   :  { %2393 = vmatpush1.bf16.msra.mxu0 %v3457_v15  ;;  %v3403_v58 = vld [vmem:[%s4713_s1 + $0x708] ss:$16 sps:$4 sm:$0xff]   ;;  %v3408_v59 = vld [vmem:[%s4713_s1 + $0x72c] ss:$16 sps:$4 sm:$0xff]   ;;  %v347_v14 = vrot.slane %v4536_v11, %v346_v12 }
  0xee   :  { %2394 = vmatprep.subr.bf16.mxu0 %v3462_v17  ;;  %v3406_v60 = vld [vmem:[%s4713_s1 + $0x728] ss:$16 sps:$4 sm:$0xff]   ;;  %v3411_v61 = vld [vmem:[%s4713_s1 + $0x74c] ss:$16 sps:$4 sm:$0xff]  }
  0xef   :  { %1909 = vmatpush1.bf16.msra.mxu1 %v3364_v19  ;;  %v3409_v62 = vld [vmem:[%s4713_s1 + $0x748] ss:$16 sps:$4 sm:$0xff]   ;;  %v3414_v63 = vld [vmem:[%s4713_s1 + $0x76c] ss:$16 sps:$4 sm:$0xff]  }
  0xf0   :  { %1910 = vmatprep.subr.bf16.mxu1 %v3369_v20  ;;  %v3412_v0 = vld [vmem:[%s4713_s1 + $0x768] ss:$16 sps:$4 sm:$0xff]   ;;  %v3417_v1 = vld [vmem:[%s4713_s1 + $0x78c] ss:$16 sps:$4 sm:$0xff]  }
  0xf1   :  { %2395 = vmatpush1.bf16.msra.mxu0 %v3460_v21  ;;  %v3415_v2 = vld [vmem:[%s4713_s1 + $0x788] ss:$16 sps:$4 sm:$0xff]   ;;  %v3420_v4 = vld [vmem:[%s4713_s1 + $0x7ac] ss:$16 sps:$4 sm:$0xff]  }
  0xf2   :  { %2396 = vmatprep.subr.bf16.mxu0 %v3465_v22  ;;  %v3418_v5 = vld [vmem:[%s4713_s1 + $0x7a8] ss:$16 sps:$4 sm:$0xff]   ;;  %v3423_v6 = vld [vmem:[%s4713_s1 + $0x7cc] ss:$16 sps:$4 sm:$0xff]  }
  0xf3   :  { %1911 = vmatpush1.bf16.msra.mxu1 %v3367_v23  ;;  %v3421_v7 = vld [vmem:[%s4713_s1 + $0x7c8] ss:$16 sps:$4 sm:$0xff]   ;;  %v3426_v8 = vld [vmem:[%s4713_s1 + $0x7ec] ss:$16 sps:$4 sm:$0xff]  }
  0xf4   :  { %1912 = vmatprep.subr.bf16.mxu1 %v3372_v25  ;;  %v3424_v9 = vld [vmem:[%s4713_s1 + $0x7e8] ss:$16 sps:$4 sm:$0xff]  }
  0xf5   :  { %2397 = vmatpush1.bf16.msra.mxu0 %v3463_v26 }
  0xf6   :  { %2398 = vmatprep.subr.bf16.mxu0 %v3468_v27 }
  0xf7   :  { %1913 = vmatpush1.bf16.msra.mxu1 %v3370_v49  ;;  %v3475_v49 = vld [vmem:[%s4715_s3 + $0x100] ss:$8 sps:$4 sm:$0xff]  }
  0xf8   :  { %1914 = vmatprep.subr.bf16.mxu1 %v3375_v28 }
  0xf9   :  { %2399 = vmatpush1.bf16.msra.mxu0 %v3466_v30  ;;  %v3480_v30 = vld [vmem:[%s4715_s3 + $0x114] ss:$8 sps:$4 sm:$0xff]  }
  0xfa   :  { %2400 = vmatprep.subr.bf16.mxu0 %v3471_v42  ;;  %v3492_v42 = vld [vmem:[%s4715_s3 + $0x154] ss:$8 sps:$4 sm:$0xff]  }
  0xfb   :  { %1915 = vmatpush1.bf16.msra.mxu1 %v3373_v31  ;;  %v3523_v31 = vld [vmem:[%s4717_s5 + $0x40] sm:$0xff]  }
  0xfc   :  { %1916 = vmatprep.subr.bf16.mxu1 %v3378_v32  ;;  %v3524_v32 = vld [vmem:[%s4717_s5] sm:$0xff]  }
  0xfd   :  { %2401 = vmatpush1.bf16.msra.mxu0 %v3469_v45  ;;  %v3533_v45 = vld [vmem:[%s4717_s5 + $0x68] sm:$0xff]  }
  0xfe   :  { %2402 = vmatprep.subr.bf16.mxu0 %v3474_v53  ;;  %v3496_v53 = vld [vmem:[%s4715_s3 + $0x170] ss:$8 sps:$4 sm:$0xff]  }
  0xff   :  { %1917 = vmatpush1.bf16.msra.mxu1 %v3376_v33  ;;  %v3525_v33 = vld [vmem:[%s4717_s5 + $0x48] sm:$0xff]  }
 0x100   :  { %1927 = vmatprep.subr.bf16.mxu1 %v3381_v35  ;;  %v3478_v35 = vld [vmem:[%s4715_s3 + $0x110] ss:$8 sps:$4 sm:$0xff]  }
 0x101   :  { %2403 = vmatpush1.bf16.msra.mxu0 %v3472_v54  ;;  %v3501_v54 = vld [vmem:[%s4715_s3 + $0x184] ss:$8 sps:$4 sm:$0xff]  }
 0x102   :  { %1919 = vmatmul.mubr.bf16.vlgmr.msra.gmra.mrb[4].mxu1 %v4037_v29  ;;  %v3390_v29 = vld [vmem:[%s4713_s1 + $0x66c] ss:$16 sps:$4 sm:$0xff]   ;;  %2413 = vmatprep.subr.bf16.mxu0 %v3477_v57  ;;  %v3502_v57 = vld [vmem:[%s4715_s3 + $0x190] ss:$8 sps:$4 sm:$0xff]  }
 0x103   :  { %1928 = vmatpush1.bf16.msra.mxu1 %v3379_v36  ;;  %1959 = vmatprep.mubr.bf16.mxu1 %v4051_v34  ;;  %v3388_v34 = vld [vmem:[%s4713_s1 + $0x668] ss:$16 sps:$4 sm:$0xff]   ;;  %v3483_v36 = vld [vmem:[%s4715_s3 + $0x124] ss:$8 sps:$4 sm:$0xff]  }
 0x104   :  { %1929 = vmatprep.subr.bf16.mxu1 %v3384_v16  ;;  %v3526_v16 = vld [vmem:[%s4717_s5 + $0x8] sm:$0xff]  }
 0x107   :  { %1930 = vmatpush1.bf16.msra.mxu1 %v3382_v38  ;;  %v3527_v38 = vld [vmem:[%s4717_s5 + $0x50] sm:$0xff]  }
 0x108   :  { %1931 = vmatprep.subr.bf16.mxu1 %v3387_v24  ;;  %v3481_v24 = vld [vmem:[%s4715_s3 + $0x120] ss:$8 sps:$4 sm:$0xff]  }
 0x10b   :  { %1932 = vmatpush1.bf16.msra.mxu1 %v3385_v39  ;;  %v3486_v39 = vld [vmem:[%s4715_s3 + $0x134] ss:$8 sps:$4 sm:$0xff]  }
 0x10c   :  { %1933 = vmatprep.subr.bf16.mxu1 %v3390_v29  ;;  %v3528_v29 = vld [vmem:[%s4717_s5 + $0x10] sm:$0xff]  }
 0x10f   :  { %1934 = vmatpush1.bf16.msra.mxu1 %v3388_v34  ;;  %v3529_v34 = vld [vmem:[%s4717_s5 + $0x58] sm:$0xff]  }
 0x110   :  { %1935 = vmatprep.subr.bf16.mxu1 %v3393_v40  ;;  %v3484_v40 = vld [vmem:[%s4715_s3 + $0x130] ss:$8 sps:$4 sm:$0xff]  }
 0x113   :  { %1936 = vmatpush1.bf16.msra.mxu1 %v3391_v18  ;;  %v3489_v18 = vld [vmem:[%s4715_s3 + $0x144] ss:$8 sps:$4 sm:$0xff]  }
 0x114   :  { %1937 = vmatprep.subr.bf16.mxu1 %v3396_v3  ;;  %v3530_v3 = vld [vmem:[%s4717_s5 + $0x18] sm:$0xff]  }
 0x115   :  { %v1674_v44 = vpop.f32.mrb[0].mxu1 }
 0x116   :  { %v1676_v46 = vpop.f32.mrb[1].mxu1  ;;  %v1675_v15 = vadd.f32 %v1674_v44, %v343_v13  ;;  %v3532_v44 = vld [vmem:[%s4717_s5 + $0x20] sm:$0xff]  }
 0x117   :  { %v1678_v47 = vpop.f32.mrb[2].mxu1  ;;  %1938 = vmatpush1.bf16.msra.mxu1 %v3394_v51  ;;  %v1677_v17 = vadd.f32 %v1676_v46, %v347_v14  ;;  %v3531_v51 = vld [vmem:[%s4717_s5 + $0x60] sm:$0xff]   ;;  %v3490_v46 = vld [vmem:[%s4715_s3 + $0x150] ss:$8 sps:$4 sm:$0xff]  }
 0x118   :  { %v1679_v50 = vpop.f32.mrb[3].mxu1  ;;  %1939 = vmatprep.subr.bf16.mxu1 %v3399_v41  ;;  %v3487_v41 = vld [vmem:[%s4715_s3 + $0x140] ss:$8 sps:$4 sm:$0xff]   ;;  %v3495_v47 = vld [vmem:[%s4715_s3 + $0x164] ss:$8 sps:$4 sm:$0xff]  }
 0x119   :  { %v3493_v50 = vld [vmem:[%s4715_s3 + $0x160] ss:$8 sps:$4 sm:$0xff]  }
 0x11b   :  { %1940 = vmatpush1.bf16.msra.mxu1 %v3397_v48  ;;  %v3534_v48 = vld [vmem:[%s4717_s5 + $0x28] sm:$0xff]  }
 0x11c   :  { %1941 = vmatprep.subr.bf16.mxu1 %v3402_v52  ;;  %v3498_v52 = vld [vmem:[%s4715_s3 + $0x174] ss:$8 sps:$4 sm:$0xff]  }
 0x11f   :  { %1942 = vmatpush1.bf16.msra.mxu1 %v3400_v55  ;;  %v3499_v55 = vld [vmem:[%s4715_s3 + $0x180] ss:$8 sps:$4 sm:$0xff]  }
 0x120   :  { %1943 = vmatprep.subr.bf16.mxu1 %v3405_v56  ;;  %v3504_v56 = vld [vmem:[%s4715_s3 + $0x194] ss:$8 sps:$4 sm:$0xff]  }
 0x123   :  { %1944 = vmatpush1.bf16.msra.mxu1 %v3403_v58  ;;  %v3507_v58 = vld [vmem:[%s4715_s3 + $0x1a4] ss:$8 sps:$4 sm:$0xff]  }
 0x124   :  { %1945 = vmatprep.subr.bf16.mxu1 %v3408_v59  ;;  %v3505_v59 = vld [vmem:[%s4715_s3 + $0x1a0] ss:$8 sps:$4 sm:$0xff]  }
 0x127   :  { %1946 = vmatpush1.bf16.msra.mxu1 %v3406_v60  ;;  %v3510_v60 = vld [vmem:[%s4715_s3 + $0x1b4] ss:$8 sps:$4 sm:$0xff]  }
 0x128   :  { %1947 = vmatprep.subr.bf16.mxu1 %v3411_v61  ;;  %v3508_v61 = vld [vmem:[%s4715_s3 + $0x1b0] ss:$8 sps:$4 sm:$0xff]  }
 0x12b   :  { %1948 = vmatpush1.bf16.msra.mxu1 %v3409_v62  ;;  %v3513_v62 = vld [vmem:[%s4715_s3 + $0x1c4] ss:$8 sps:$4 sm:$0xff]  }
 0x12c   :  { %1949 = vmatprep.subr.bf16.mxu1 %v3414_v63  ;;  %v3511_v63 = vld [vmem:[%s4715_s3 + $0x1c0] ss:$8 sps:$4 sm:$0xff]  }
 0x12f   :  { %1950 = vmatpush1.bf16.msra.mxu1 %v3412_v0  ;;  %v3516_v0 = vld [vmem:[%s4715_s3 + $0x1d4] ss:$8 sps:$4 sm:$0xff]  }
 0x130   :  { %1951 = vmatprep.subr.bf16.mxu1 %v3417_v1  ;;  %v3514_v1 = vld [vmem:[%s4715_s3 + $0x1d0] ss:$8 sps:$4 sm:$0xff]  }
 0x133   :  { %1952 = vmatpush1.bf16.msra.mxu1 %v3415_v2  ;;  %v3519_v2 = vld [vmem:[%s4715_s3 + $0x1e4] ss:$8 sps:$4 sm:$0xff]  }
 0x134   :  { %1953 = vmatprep.subr.bf16.mxu1 %v3420_v4  ;;  %v3517_v4 = vld [vmem:[%s4715_s3 + $0x1e0] ss:$8 sps:$4 sm:$0xff]  }
 0x137   :  { %1954 = vmatpush1.bf16.msra.mxu1 %v3418_v5  ;;  %v3522_v5 = vld [vmem:[%s4715_s3 + $0x1f4] ss:$8 sps:$4 sm:$0xff]  }
 0x138   :  { %1955 = vmatprep.subr.bf16.mxu1 %v3423_v6  ;;  %v3520_v6 = vld [vmem:[%s4715_s3 + $0x1f0] ss:$8 sps:$4 sm:$0xff]  }
 0x13b   :  { %1956 = vmatpush1.bf16.msra.mxu1 %v3421_v7  ;;  %v350_v7 = vsub.s32 2, %v3722_v43 }
 0x13c   :  { %1957 = vmatprep.subr.bf16.mxu1 %v3426_v8  ;;  %v354_v8 = vsub.s32 3, %v3722_v43 }
 0x13e   :  { %v355_v13 = vrot.slane %v4536_v11, %v354_v8 }
 0x13f   :  { %1958 = vmatpush1.bf16.msra.mxu1 %v3424_v9  ;;  %v351_v9 = vrot.slane %v4536_v11, %v350_v7  ;;  %v3536_v11 = vld [vmem:[%s4717_s5 + $0x30] sm:$0xff]  }
 0x140   :  { %2985 = vmatprep.subr.bf16.mxu1 %v3523_v31 }
 0x142   :  { %1960 = vmatmul.mubr.bf16.vlgmr.msra.gmra.mrb[4].mxu1 %v4239_v37 }
 0x143   :  { %2986 = vmatpush3.bf16.msra.mxu1 %v3524_v32 }
 0x144   :  { %2987 = vmatprep.subr.bf16.mxu1 %v3525_v33 }
 0x147   :  { %2988 = vmatpush3.bf16.msra.mxu1 %v3526_v16 }
 0x148   :  { %2989 = vmatprep.subr.bf16.mxu1 %v3527_v38 }
 0x14b   :  { %2990 = vmatpush3.bf16.msra.mxu1 %v3528_v29 }
 0x14c   :  { %2991 = vmatprep.subr.bf16.mxu1 %v3529_v34 }
 0x14f   :  { %2992 = vmatpush3.bf16.msra.mxu1 %v3530_v3 }
 0x150   :  { %2993 = vmatprep.subr.bf16.mxu1 %v3531_v51 }
 0x153   :  { %2994 = vmatpush3.bf16.msra.mxu1 %v3532_v44 }
 0x154   :  { %2995 = vmatprep.subr.bf16.mxu1 %v3533_v45 }
 0x157   :  { %2996 = vmatpush3.bf16.msra.mxu1 %v3534_v48 }
 0x196   :  { %v1797_v37 = vpop.f32.mrb[0].mxu0 }
 0x197   :  { %v3008_v19 = vadd.f32 %v1797_v37, %v1675_v15  ;;  %v1799_v20 = vpop.f32.mrb[1].mxu0 }
 0x198   :  { %v3010_v21 = vadd.f32 %v1799_v20, %v1677_v17  ;;  %v1801_v22 = vpop.f32.mrb[2].mxu0 }
 0x199   :  { %v1968_v23 = vmax.f32 %v3008_v19, 0.0  ;;  %v1802_v25 = vpop.f32.mrb[3].mxu0 }
 0x19a   :  { %v1969_v26 = vmax.f32 %v3010_v21, 0.0 }
 0x19b   :  { %v2036_v28 = vpack.c.bf16 %v1968_v23, %v1968_v23 }
 0x19c   :  { %v2037_v27 = vpack.c.bf16 %v1969_v26, %v1969_v26  ;;  %v3535_v26 = vld [vmem:[%s4717_s5 + $0x70] sm:$0xff]  }
 0x19d   :  { %2997 = vmatprep.subr.bf16.mxu1 %v3535_v26 }
 0x19e   :  { %2404 = vmatprep.mubr.bf16.mxu0 %v2037_v27  ;;  %2998 = vmatpush3.bf16.msra.mxu1 %v3536_v11  ;;  %v3537_v27 = vld [vmem:[%s4717_s5 + $0x78] sm:$0xff]  }
 0x19f   :  { %2405 = vmatmul.mubr.bf16.vlgmr.msra.gmra.mrb[4].mxu0 %v2036_v28  ;;  %2999 = vmatprep.subr.bf16.mxu1 %v3537_v27  ;;  %v2040_v28 = vld [vmem:[%s4716_s4] sm:$0x3] }
 0x1a0   :  { %2414 = vmatpush1.bf16.msra.mxu0 %v3475_v49  ;;  %v3538_v49 = vld [vmem:[%s4717_s5 + $0x38] sm:$0xff]   ;;  %v2049_v31 = vrot.slane %v2040_v28, %v346_v12 }
 0x1a1   :  { %2415 = vmatprep.subr.bf16.mxu0 %v3480_v30  ;;  %v2045_v30 = vrot.slane %v2040_v28, %v342_v10  ;;  %v2968_v10 = vld [vmem:[%s4718_s6] ss:$0 sm:$0xff] }
 0x1a2   :  { %3000 = vmatpush3.bf16.msra.mxu1 %v3538_v49 }
 0x1a4   :  { %2416 = vmatpush1.bf16.msra.mxu0 %v3478_v35 }
 0x1a5   :  { %2417 = vmatprep.subr.bf16.mxu0 %v3483_v36 }
 0x1a8   :  { %2418 = vmatpush1.bf16.msra.mxu0 %v3481_v24 }
 0x1a9   :  { %2419 = vmatprep.subr.bf16.mxu0 %v3486_v39 }
 0x1ac   :  { %2420 = vmatpush1.bf16.msra.mxu0 %v3484_v40 }
 0x1ad   :  { %2421 = vmatprep.subr.bf16.mxu0 %v3489_v18 }
 0x1b0   :  { %2422 = vmatpush1.bf16.msra.mxu0 %v3487_v41 }
 0x1b1   :  { %2423 = vmatprep.subr.bf16.mxu0 %v3492_v42 }
 0x1b4   :  { %2424 = vmatpush1.bf16.msra.mxu0 %v3490_v46 }
 0x1b5   :  { %2425 = vmatprep.subr.bf16.mxu0 %v3495_v47 }
 0x1b8   :  { %2426 = vmatpush1.bf16.msra.mxu0 %v3493_v50 }
 0x1b9   :  { %2427 = vmatprep.subr.bf16.mxu0 %v3498_v52 }
 0x1bc   :  { %2428 = vmatpush1.bf16.msra.mxu0 %v3496_v53 }
 0x1bd   :  { %2429 = vmatprep.subr.bf16.mxu0 %v3501_v54 }
 0x1c0   :  { %2430 = vmatpush1.bf16.msra.mxu0 %v3499_v55 }
 0x1c1   :  { %2431 = vmatprep.subr.bf16.mxu0 %v3504_v56 }
 0x1c4   :  { %2432 = vmatpush1.bf16.msra.mxu0 %v3502_v57 }
 0x1c5   :  { %2433 = vmatprep.subr.bf16.mxu0 %v3507_v58 }
 0x1c8   :  { %2434 = vmatpush1.bf16.msra.mxu0 %v3505_v59 }
 0x1c9   :  { %2435 = vmatprep.subr.bf16.mxu0 %v3510_v60 }
 0x1cc   :  { %2436 = vmatpush1.bf16.msra.mxu0 %v3508_v61 }
 0x1cd   :  { %2437 = vmatprep.subr.bf16.mxu0 %v3513_v62 }
 0x1d0   :  { %2438 = vmatpush1.bf16.msra.mxu0 %v3511_v63 }
 0x1d1   :  { %2439 = vmatprep.subr.bf16.mxu0 %v3516_v0 }
 0x1d4   :  { %2440 = vmatpush1.bf16.msra.mxu0 %v3514_v1 }
 0x1d5   :  { %2441 = vmatprep.subr.bf16.mxu0 %v3519_v2 }
 0x1d8   :  { %2442 = vmatpush1.bf16.msra.mxu0 %v3517_v4 }
 0x1d9   :  { %2443 = vmatprep.subr.bf16.mxu0 %v3522_v5 }
 0x1dc   :  { %2444 = vmatpush1.bf16.msra.mxu0 %v3520_v6 }
 0x215   :  { %v1961_v14 = vpop.f32.mrb[4].mxu1 }
 0x216   :  { %v3011_v15 = vadd.f32 %v1961_v14, %v351_v9  ;;  %v1963_v17 = vpop.f32.mrb[5].mxu1 }
 0x217   :  { %v3012_v37 = vadd.f32 %v1963_v17, %v355_v13  ;;  %v1965_v19 = vpop.f32.mrb[6].mxu1 }
 0x218   :  { %v1970_v20 = vmax.f32 %v3011_v15, 0.0  ;;  %v1966_v21 = vpop.f32.mrb[7].mxu1 }
 0x219   :  { %v1971_v22 = vmax.f32 %v3012_v37, 0.0 }
 0x21a   :  { %v2038_v25 = vpack.c.bf16 %v1970_v20, %v1970_v20 }
 0x21b   :  { %v2039_v23 = vpack.c.bf16 %v1971_v22, %v1971_v22 }
 0x21d   :  { %2445 = vmatprep.mubr.bf16.mxu0 %v2039_v23 }
 0x21e   :  { %2446 = vmatmul.mubr.bf16.vlgmr.msra.gmra.mrb[4].mxu0 %v2038_v25 }
 0x2f1   :  { %v2447_v32 = vpop.f32.mrb[4].mxu0 }
 0x2f2   :  { %v3013_v33 = vadd.f32 %v2447_v32, %v2045_v30  ;;  %v2449_v35 = vpop.f32.mrb[5].mxu0 }
 0x2f3   :  { %v3014_v36 = vadd.f32 %v2449_v35, %v2049_v31  ;;  %v2451_v16 = vpop.f32.mrb[6].mxu0 }
 0x2f4   :  { %v2454_v38 = vmax.f32 %v3013_v33, 0.0  ;;  %v2452_v24 = vpop.f32.mrb[7].mxu0 }
 0x2f5   :  { %v2455_v39 = vmax.f32 %v3014_v36, 0.0 }
 0x2f6   :  { %v2488_v34 = vpack.c.bf16 %v2454_v38, %v2454_v38 }
 0x2f7   :  { %v2489_v29 = vpack.c.bf16 %v2455_v39, %v2455_v39 }
 0x2f9   :  { %2625 = vmatprep.mubr.bf16.mxu1 %v2489_v29 }
 0x2fa   :  { %2626 = vmatmul.mubr.bf16.vlgmr.msra.gmra.mrb[8].mxu1 %v2488_v34 }
 0x3cd   :  { %v3001_v40 = vpop.f32.mrb[8].mxu1 }
 0x3ce   :  { %v3002_v18 = vpop.f32.mrb[9].mxu1 }
 0x3cf   :  { %v3003_v43 = vadd.f32 %v3002_v18, %v3001_v40  ;;  %v3004_v12 = vpop.f32.mrb[10].mxu1 }
 0x3d0   :  { %v3005_v3 = vpop.f32.mrb[11].mxu1 }
 0x3d1   :  { %v2628_v51 = vadd.f32 %v3003_v43, %v2968_v10 }
 0x3d3   :  { %2633 = vst [vmem:[#allocation2] sm:$0x3] %v2628_v51 }
 0x3d4   :  { %3550 = shalt.err (!%p3547_p4)
}
 0x3d5   :  { %s3551_s12 = scalar_lea.hbm %s4719_s7, 32 }
 0x3d6   :  { %p3552_p5 = scmp.ne.s32.totalorder %s4719_s7, %s3551_s12  ;;  %p3555_p6 = scmp.lt.u32.totalorder %s3551_s12, %s4719_s7 }
 0x3d8   :  { %p3557_p7 = pnand %p3555_p6, %p3552_p5 }
 0x3da   :  { %3560 = shalt.err (!%p3557_p7)
}
 0x3db   :  { %2643 = dma.vmem_to_hbm [thread:$0]  %s2641_s8, 32, %s4719_s7, [#allocation3]  }
 0x3dc   :  { %3561 = dma.done.wait [#allocation3], 32  }
 0x3dd   :  { %3562 = vsyncadd [#allocation3], 4294967264 }
 0x3de   :  { %2647 = vsyncpa [#allocation3], 1 }

</bundles_post_ra>
